<compile_context>
chip_gen: v5e
topology: v5e:2x2
jax: 0.10.0
libtpu: 0.0.40
codegen_flags: <defaults>
</compile_context>

<pallas_src>
import jax
import jax.numpy as jnp
from jax.experimental import pallas as pl
from jax.experimental.pallas import tpu as pltpu

NUM_TIMESTEPS = 1000
TEMB_DIM = 32
HIDDEN = 32
CP = 8            # channel count padded to one sublane group (requires C <= CP)


# ----------------------------------------------------------------------------
# Plain-JAX glue: schedule, params, time embedding
# ----------------------------------------------------------------------------

def make_schedule(num_timesteps=NUM_TIMESTEPS, beta_start=1e-4, beta_end=0.02):
    betas = jnp.linspace(beta_start, beta_end, num_timesteps, dtype=jnp.float32)
    alphas = 1.0 - betas
    alpha_cumprod = jnp.cumprod(alphas)
    alpha_cumprod_prev = jnp.pad(alpha_cumprod[:-1], (1, 0), constant_values=1.0)
    return dict(
        betas=betas,
        alphas=alphas,
        alpha_cumprod=alpha_cumprod,
        alpha_cumprod_prev=alpha_cumprod_prev,
        sqrt_alpha_cumprod=jnp.sqrt(alpha_cumprod),
        sqrt_one_minus_alpha_cumprod=jnp.sqrt(1.0 - alpha_cumprod),
        sqrt_recip_alpha=jnp.sqrt(1.0 / alphas),
        sqrt_recip_alpha_cumprod=jnp.sqrt(1.0 / alpha_cumprod),
        sqrt_recipm1_alpha_cumprod=jnp.sqrt(1.0 / alpha_cumprod - 1.0),
    )


def init_params(key, c_in):
    ks = jax.random.split(key, 4)
    s = 0.1
    return {
        "t_w1": s * jax.random.normal(ks[0], (TEMB_DIM, HIDDEN), jnp.float32),
        "t_b1": jnp.zeros((HIDDEN,), jnp.float32),
        "t_w2": s * jax.random.normal(ks[1], (HIDDEN, HIDDEN), jnp.float32),
        "t_b2": jnp.zeros((HIDDEN,), jnp.float32),
        "conv1_w": s * jax.random.normal(ks[2], (9 * c_in, HIDDEN), jnp.float32),
        "conv1_b": jnp.zeros((HIDDEN,), jnp.float32),
        "conv2_w": s * jax.random.normal(ks[3], (9 * HIDDEN, c_in), jnp.float32),
        "conv2_b": jnp.zeros((c_in,), jnp.float32),
    }


def sinusoidal_embedding(t, dim):
    half = dim // 2
    freqs = jnp.exp(-jnp.log(10000.0) * jnp.arange(half, dtype=jnp.float32) / half)
    args = t.astype(jnp.float32)[:, None] * freqs[None, :]
    return jnp.concatenate([jnp.sin(args), jnp.cos(args)], axis=-1)   # (B, dim)


# ----------------------------------------------------------------------------
# Fused Pallas kernel (one grid step = one image of the batch)
# ----------------------------------------------------------------------------

def _build_kernel(R, GUARD, WROW, K1, inj_row):
    # conv tap offsets in flattened (padded-grid rows x channels) coordinates;
    # ordering k = di*3 + dj must match both weight slabs built in the wrapper.
    offsets = [(di - 1) * WROW + (dj - 1) for di in range(3) for dj in range(3)]

    def kernel(temb_ref, w1_ref, b1_ref, w2_ref, b2_ref,
               patches_ref, c1w_ref, c2w_ref, nm_ref,
               out_ref, hext_ref, slab_ref):
        # ---- time-embedding MLP (tiny, f32); conv1 bias is folded into b2.
        t = jnp.dot(temb_ref[...], w1_ref[...],
                    preferred_element_type=jnp.float32) + b1_ref[...]
        t = t * jax.nn.sigmoid(t)
        t = jnp.dot(t, w2_ref[...],
                    preferred_element_type=jnp.float32) + b2_ref[...]

        # ---- conv1 weight slab: tap rows from HBM + the injection row (temb +
        #      conv1 bias), assembled with a single full-tile select (no partial
        #      stores; rows > inj_row are zero both here and in the patches).
        rows = jax.lax.broadcasted_iota(jnp.int32, (K1, HIDDEN), 0)
        t_bc = jnp.broadcast_to(t[0:1, :], (K1, HIDDEN)).astype(jnp.bfloat16)
        w_slab = jnp.where(rows == inj_row, t_bc, c1w_ref[...])   # (K1, HIDDEN) bf16

        # ---- conv1 + temb injection + bias: ONE (R, K1)@(K1, HIDDEN) bf16 matmul.
        #      Ring / dead-pad rows have all-zero patches and selector column, so
        #      their pre-activation is exactly 0 and SiLU keeps them 0.
        h = jnp.dot(patches_ref[...], w_slab, preferred_element_type=jnp.float32)
        h = h * jax.nn.sigmoid(h)                                  # SiLU, f32

        # ---- conv2 im2col: zero ONLY the guard strips, store h once, then 9
        #      sublane-aligned column-block copies (the +/-1 misalignment is paid
        #      on the reads only).
        hext_ref[0:GUARD, :] = jnp.zeros((GUARD, HIDDEN), jnp.float32)
        hext_ref[GUARD + R:GUARD + R + GUARD, :] = jnp.zeros((GUARD, HIDDEN),
                                                             jnp.float32)
        hext_ref[GUARD:GUARD + R, :] = h
        for k, off in enumerate(offsets):
            src = hext_ref[GUARD + off:GUARD + off + R, :]
            slab_ref[:, k * HIDDEN:(k + 1) * HIDDEN] = src.astype(jnp.bfloat16)

        # ---- conv2: ONE (R, 9*HIDDEN)@(9*HIDDEN, CP) bf16 matmul (conv2 bias is
        #      folded into the noise target by the wrapper).
        pred = jnp.dot(slab_ref[...], c2w_ref[...],
                       preferred_element_type=jnp.float32)

        # ---- fused masked SSE against the q-sample noise (f32 elementwise).
        nm = nm_ref[...]
        diff = (pred - nm[:, 0:CP]) * nm[:, CP:2 * CP]
        out_ref[...] = jnp.broadcast_to(jnp.sum(diff * diff), (8, 128))

    return kernel


# ----------------------------------------------------------------------------
# DDPM forward (training loss)
# ----------------------------------------------------------------------------

@jax.jit
def ddpm_forward(params, sched, x0_nchw, key):
    B, C, H, W = x0_nchw.shape
    assert C <= CP
    Hp, Wp = H + 2, W + 2
    WROW = -(-Wp // 8) * 8                       # sublane-aligned row stride
    if (Hp * WROW) % 16 != 0:                    # keep bf16 block rows 16-aligned
        WROW = -(-Wp // 16) * 16
    R = Hp * WROW                                # rows per image (padded grid)
    GUARD = -(-(WROW + 1) // 16) * 16            # guard rows above/below h
    K1 = -(-(9 * CP + 1) // 16) * 16             # conv1 K: 72 taps + injector + pad
    inj_row = 9 * CP

    # ---- randomness + q-sample (wrapper side, per review)
    x0 = jnp.transpose(x0_nchw, (0, 2, 3, 1)).astype(jnp.float32)        # NHWC
    kt, kn = jax.random.split(key)
    t = jax.random.randint(kt, (B,), 0, NUM_TIMESTEPS, dtype=jnp.int32)
    noise = jax.random.normal(kn, x0.shape, dtype=jnp.float32)
    sa = sched["sqrt_alpha_cumprod"][t][:, None, None, None]
    soma = sched["sqrt_one_minus_alpha_cumprod"][t][:, None, None, None]
    xt = sa * x0 + soma * noise

    # ---- conv1 im2col patches over the FULL 1-padded grid (+interior selector)
    xt_cp = jnp.pad(xt, ((0, 0), (0, 0), (0, 0), (0, CP - C)))
    xt_p2 = jnp.pad(xt_cp, ((0, 0), (2, 2), (2, 2), (0, 0)))
    taps = [xt_p2[:, di:di + Hp, dj:dj + Wp, :]
            for di in range(3) for dj in range(3)]
    patches = jnp.concatenate(taps, axis=-1)                             # (B,Hp,Wp,72)
    ii = jnp.arange(Hp)[:, None]
    jj = jnp.arange(Wp)[None, :]
    interior = ((ii >= 1) & (ii <= H) & (jj >= 1) & (jj <= W)).astype(jnp.float32)
    patches = patches * interior[None, :, :, None]
    inj_col = jnp.broadcast_to(interior[None, :, :, None], (B, Hp, Wp, 1))
    kpad = jnp.zeros((B, Hp, Wp, K1 - 9 * CP - 1), jnp.float32)
    patches = jnp.concatenate([patches, inj_col, kpad], axis=-1)         # (B,Hp,Wp,K1)
    patches = jnp.pad(patches, ((0, 0), (0, 0), (0, WROW - Wp), (0, 0)))
    patches = patches.reshape(B * R, K1).astype(jnp.bfloat16)

    # ---- [noise - conv2_bias | interior mask] target, full-lane layout
    c2b_pad = jnp.pad(params["conv2_b"], (0, CP - C))
    noise_cp = jnp.pad(noise, ((0, 0), (0, 0), (0, 0), (0, CP - C)))
    noise_grid = jnp.pad(noise_cp,
                         ((0, 0), (1, 1), (1, WROW - W - 1), (0, 0))) - c2b_pad
    mask_w = jnp.pad(interior, ((0, 0), (0, WROW - Wp)))
    mask_grid = jnp.broadcast_to(mask_w[None, :, :, None], (B, Hp, WROW, CP))
    nm = jnp.concatenate([noise_grid, mask_grid], axis=-1).reshape(B * R, 2 * CP)

    # ---- time embedding (rows replicated to one sublane group per batch)
    temb = sinusoidal_embedding(t, TEMB_DIM)                             # (B, 32)
    temb = jnp.broadcast_to(temb[:, None, :], (B, 8, TEMB_DIM)).reshape(B * 8,
                                                                        TEMB_DIM)

    # ---- weights: bf16 matmul operands with MXU/lane-friendly padding
    c1w = params["conv1_w"].reshape(9, C, HIDDEN)
    c1w = jnp.pad(c1w, ((0, 0), (0, CP - C), (0, 0))).reshape(9 * CP, HIDDEN)
    c1w = jnp.pad(c1w, ((0, K1 - 9 * CP), (0, 0))).astype(jnp.bfloat16)  # (K1, HIDDEN)
    c2w = jnp.pad(params["conv2_w"], ((0, 0), (0, CP - C))).astype(jnp.bfloat16)
    t_w1 = params["t_w1"]
    t_b1 = params["t_b1"].reshape(1, HIDDEN)
    t_w2 = params["t_w2"]
    t_b2 = (params["t_b2"] + params["conv1_b"]).reshape(1, HIDDEN)       # fold conv1_b

    kernel = _build_kernel(R, GUARD, WROW, K1, inj_row)

    flops = B * (2 * R * K1 * HIDDEN + 2 * R * 9 * HIDDEN * CP
                 + 2 * 8 * TEMB_DIM * HIDDEN + 2 * 8 * HIDDEN * HIDDEN)
    transcendentals = B * (R * HIDDEN + 8 * HIDDEN)
    bytes_accessed = (patches.size * 2 + nm.size * 4 + temb.size * 4
                      + c1w.size * 2 + c2w.size * 2
                      + (t_w1.size + t_b1.size + t_w2.size + t_b2.size) * 4
                      + B * 8 * 128 * 4)
    cost = pl.CostEstimate(flops=flops, transcendentals=transcendentals,
                           bytes_accessed=bytes_accessed)

    out = pl.pallas_call(
        kernel,
        out_shape=jax.ShapeDtypeStruct((B * 8, 128), jnp.float32),
        grid=(B,),
        in_specs=[
            pl.BlockSpec((8, TEMB_DIM), lambda b: (b, 0)),        # temb rows
            pl.BlockSpec((TEMB_DIM, HIDDEN), lambda b: (0, 0)),   # t_w1
            pl.BlockSpec((1, HIDDEN), lambda b: (0, 0)),          # t_b1
            pl.BlockSpec((HIDDEN, HIDDEN), lambda b: (0, 0)),     # t_w2
            pl.BlockSpec((1, HIDDEN), lambda b: (0, 0)),          # t_b2 + conv1_b
            pl.BlockSpec((R, K1), lambda b: (b, 0)),              # conv1 patches (bf16)
            pl.BlockSpec((K1, HIDDEN), lambda b: (0, 0)),         # conv1 weights (bf16)
            pl.BlockSpec((9 * HIDDEN, CP), lambda b: (0, 0)),     # conv2 weights (bf16)
            pl.BlockSpec((R, 2 * CP), lambda b: (b, 0)),          # [noise-b2 | mask]
        ],
        out_specs=pl.BlockSpec((8, 128), lambda b: (b, 0)),       # per-batch SSE
        scratch_shapes=[
            pltpu.VMEM((R + 2 * GUARD, HIDDEN), jnp.float32),     # h + guard strips
            pltpu.VMEM((R, 9 * HIDDEN), jnp.bfloat16),            # conv2 im2col slab
        ],
        compiler_params=pltpu.CompilerParams(
            dimension_semantics=("parallel",),
            vmem_limit_bytes=32 * 1024 * 1024,
        ),
        cost_estimate=cost,
    )(temb, t_w1, t_b1, t_w2, t_b2, patches, c1w, c2w, nm)

    sse = out.reshape(B, 8, 128)[:, 0, 0]
    return jnp.sum(sse) / (B * C * H * W)


if __name__ == "__main__":
    key = jax.random.PRNGKey(0)
    k_x, k_p, k_fwd = jax.random.split(key, 3)

    B, C, H, W = 2, 4, 16, 16                    # NCHW, like the PyTorch module
    x0 = jax.random.normal(k_x, (B, C, H, W), dtype=jnp.float32)

    params = init_params(k_p, C)
    sched = make_schedule()

    loss = ddpm_forward(params, sched, x0, k_fwd)
    jax.block_until_ready(loss)
    assert bool(jnp.isfinite(loss))
    print("KERNEL_OK")
</pallas_src>

<mosaic_0001>
module attributes {stable_mosaic.version = 11 : i64} {
  func.func @kernel(%arg0: i32, %arg1: memref<8x32xf32, #tpu.memory_space<vmem>>, %arg2: memref<32x32xf32, #tpu.memory_space<vmem>>, %arg3: memref<1x32xf32, #tpu.memory_space<vmem>>, %arg4: memref<32x32xf32, #tpu.memory_space<vmem>>, %arg5: memref<1x32xf32, #tpu.memory_space<vmem>>, %arg6: memref<432x80xbf16, #tpu.memory_space<vmem>>, %arg7: memref<80x32xbf16, #tpu.memory_space<vmem>>, %arg8: memref<288x8xbf16, #tpu.memory_space<vmem>>, %arg9: memref<432x16xf32, #tpu.memory_space<vmem>>, %arg10: memref<8x128xf32, #tpu.memory_space<vmem>>, %arg11: memref<496x32xf32, #tpu.memory_space<vmem>>, %arg12: memref<432x288xbf16, #tpu.memory_space<vmem>>) attributes {dimension_semantics = [#tpu.dimension_semantics<parallel>], iteration_bounds = array<i64: 2>, scalar_prefetch = 0 : i64, scratch_operands = 2 : i64, tpu.core_type = #tpu.core_type<tc>, window_params = [{transform_indices = @transform_0, window_bounds = array<i64: 8, 32>}, {pipeline_mode = #tpu.pipeline_mode<synchronous>, transform_indices = @transform_1, window_bounds = array<i64: 32, 32>}, {pipeline_mode = #tpu.pipeline_mode<synchronous>, transform_indices = @transform_2, window_bounds = array<i64: 1, 32>}, {pipeline_mode = #tpu.pipeline_mode<synchronous>, transform_indices = @transform_3, window_bounds = array<i64: 32, 32>}, {pipeline_mode = #tpu.pipeline_mode<synchronous>, transform_indices = @transform_4, window_bounds = array<i64: 1, 32>}, {transform_indices = @transform_5, window_bounds = array<i64: 432, 80>}, {pipeline_mode = #tpu.pipeline_mode<synchronous>, transform_indices = @transform_6, window_bounds = array<i64: 80, 32>}, {pipeline_mode = #tpu.pipeline_mode<synchronous>, transform_indices = @transform_7, window_bounds = array<i64: 288, 8>}, {transform_indices = @transform_8, window_bounds = array<i64: 432, 16>}, {transform_indices = @transform_9, window_bounds = array<i64: 8, 128>}]} {
    %c0 = arith.constant 0 : index
    %c0_0 = arith.constant 0 : index
    %0 = vector.load %arg1[%c0, %c0_0] : memref<8x32xf32, #tpu.memory_space<vmem>>, vector<8x32xf32>
    %c0_1 = arith.constant 0 : index
    %c0_2 = arith.constant 0 : index
    %1 = vector.load %arg2[%c0_1, %c0_2] : memref<32x32xf32, #tpu.memory_space<vmem>>, vector<32x32xf32>
    %cst = arith.constant dense<0.000000e+00> : vector<8x32xf32>
    %2 = tpu.matmul %0, %1, %cst {dimension_numbers = #tpu.dot_dimension_numbers<[1], [0], [0], [1], [0, 0, 1, 1], [], []>} : vector<8x32xf32>, vector<32x32xf32>, vector<8x32xf32> -> vector<8x32xf32>
    %c0_3 = arith.constant 0 : index
    %c0_4 = arith.constant 0 : index
    %3 = vector.load %arg3[%c0_3, %c0_4] : memref<1x32xf32, #tpu.memory_space<vmem>>, vector<1x32xf32>
    %4 = vector.broadcast %3 : vector<1x32xf32> to vector<8x32xf32>
    %5 = arith.addf %2, %4 : vector<8x32xf32>
    %6 = arith.negf %5 : vector<8x32xf32>
    %7 = math.exp %6 : vector<8x32xf32>
    %cst_5 = arith.constant 1.000000e+00 : f32
    %8 = vector.broadcast %cst_5 : f32 to vector<8x32xf32>
    %9 = arith.addf %8, %7 : vector<8x32xf32>
    %10 = arith.divf %8, %9 : vector<8x32xf32>
    %11 = arith.mulf %5, %10 : vector<8x32xf32>
    %c0_6 = arith.constant 0 : index
    %c0_7 = arith.constant 0 : index
    %12 = vector.load %arg4[%c0_6, %c0_7] : memref<32x32xf32, #tpu.memory_space<vmem>>, vector<32x32xf32>
    %cst_8 = arith.constant dense<0.000000e+00> : vector<8x32xf32>
    %13 = tpu.matmul %11, %12, %cst_8 {dimension_numbers = #tpu.dot_dimension_numbers<[1], [0], [0], [1], [0, 0, 1, 1], [], []>} : vector<8x32xf32>, vector<32x32xf32>, vector<8x32xf32> -> vector<8x32xf32>
    %c0_9 = arith.constant 0 : index
    %c0_10 = arith.constant 0 : index
    %14 = vector.load %arg5[%c0_9, %c0_10] : memref<1x32xf32, #tpu.memory_space<vmem>>, vector<1x32xf32>
    %15 = vector.broadcast %14 : vector<1x32xf32> to vector<8x32xf32>
    %16 = arith.addf %13, %15 : vector<8x32xf32>
    %17 = tpu.iota {dimensions = array<i32: 0>} : vector<80x32xi32>
    %18 = vector.extract_strided_slice %16 {offsets = [0, 0], sizes = [1, 32], strides = [1, 1]} : vector<8x32xf32> to vector<1x32xf32>
    %19 = vector.shape_cast %18 : vector<1x32xf32> to vector<1x32xf32>
    %20 = vector.broadcast %19 : vector<1x32xf32> to vector<80x32xf32>
    %21 = arith.truncf %20 : vector<80x32xf32> to vector<80x32xbf16>
    %c72_i32 = arith.constant 72 : i32
    %22 = vector.broadcast %c72_i32 : i32 to vector<80x32xi32>
    %23 = arith.cmpi eq, %17, %22 : vector<80x32xi32>
    %c0_11 = arith.constant 0 : index
    %c0_12 = arith.constant 0 : index
    %24 = vector.load %arg7[%c0_11, %c0_12] : memref<80x32xbf16, #tpu.memory_space<vmem>>, vector<80x32xbf16>
    %25 = arith.select %23, %21, %24 : vector<80x32xi1>, vector<80x32xbf16>
    %c0_13 = arith.constant 0 : index
    %c0_14 = arith.constant 0 : index
    %26 = vector.load %arg6[%c0_13, %c0_14] : memref<432x80xbf16, #tpu.memory_space<vmem>>, vector<432x80xbf16>
    %cst_15 = arith.constant dense<0.000000e+00> : vector<432x32xf32>
    %27 = tpu.matmul %26, %25, %cst_15 {dimension_numbers = #tpu.dot_dimension_numbers<[1], [0], [0], [1], [0, 0, 1, 1], [], []>} : vector<432x80xbf16>, vector<80x32xbf16>, vector<432x32xf32> -> vector<432x32xf32>
    %28 = arith.negf %27 : vector<432x32xf32>
    %29 = math.exp %28 : vector<432x32xf32>
    %cst_16 = arith.constant 1.000000e+00 : f32
    %30 = vector.broadcast %cst_16 : f32 to vector<432x32xf32>
    %31 = arith.addf %30, %29 : vector<432x32xf32>
    %32 = arith.divf %30, %31 : vector<432x32xf32>
    %33 = arith.mulf %27, %32 : vector<432x32xf32>
    %cst_17 = arith.constant 0.000000e+00 : f32
    %34 = vector.broadcast %cst_17 : f32 to vector<32x32xf32>
    %c0_18 = arith.constant 0 : index
    %c0_19 = arith.constant 0 : index
    %35 = vector.load %arg11[%c0_18, %c0_19] : memref<496x32xf32, #tpu.memory_space<vmem>>, vector<32x32xf32>
    tpu.vector_store %arg11[%c0_18, %c0_19], %34 {strides = array<i32>} : memref<496x32xf32, #tpu.memory_space<vmem>>, vector<32x32xf32>,
    %cst_20 = arith.constant 0.000000e+00 : f32
    %36 = vector.broadcast %cst_20 : f32 to vector<32x32xf32>
    %c464 = arith.constant 464 : index
    %c0_21 = arith.constant 0 : index
    %37 = vector.load %arg11[%c464, %c0_21] : memref<496x32xf32, #tpu.memory_space<vmem>>, vector<32x32xf32>
    tpu.vector_store %arg11[%c464, %c0_21], %36 {strides = array<i32>} : memref<496x32xf32, #tpu.memory_space<vmem>>, vector<32x32xf32>,
    %c32 = arith.constant 32 : index
    %c0_22 = arith.constant 0 : index
    %38 = vector.load %arg11[%c32, %c0_22] : memref<496x32xf32, #tpu.memory_space<vmem>>, vector<432x32xf32>
    tpu.vector_store %arg11[%c32, %c0_22], %33 {strides = array<i32>} : memref<496x32xf32, #tpu.memory_space<vmem>>, vector<432x32xf32>,
    %c7 = arith.constant 7 : index
    %c0_23 = arith.constant 0 : index
    %39 = vector.load %arg11[%c7, %c0_23] : memref<496x32xf32, #tpu.memory_space<vmem>>, vector<432x32xf32>
    %40 = arith.truncf %39 : vector<432x32xf32> to vector<432x32xbf16>
    %c0_24 = arith.constant 0 : index
    %c0_25 = arith.constant 0 : index
    %41 = vector.load %arg12[%c0_24, %c0_25] : memref<432x288xbf16, #tpu.memory_space<vmem>>, vector<432x32xbf16>
    tpu.vector_store %arg12[%c0_24, %c0_25], %40 {strides = array<i32>} : memref<432x288xbf16, #tpu.memory_space<vmem>>, vector<432x32xbf16>,
    %c8 = arith.constant 8 : index
    %c0_26 = arith.constant 0 : index
    %42 = vector.load %arg11[%c8, %c0_26] : memref<496x32xf32, #tpu.memory_space<vmem>>, vector<432x32xf32>
    %43 = arith.truncf %42 : vector<432x32xf32> to vector<432x32xbf16>
    %c0_27 = arith.constant 0 : index
    %c32_28 = arith.constant 32 : index
    %44 = vector.load %arg12[%c0_27, %c32_28] : memref<432x288xbf16, #tpu.memory_space<vmem>>, vector<432x32xbf16>
    tpu.vector_store %arg12[%c0_27, %c32_28], %43 {strides = array<i32>} : memref<432x288xbf16, #tpu.memory_space<vmem>>, vector<432x32xbf16>,
    %c9 = arith.constant 9 : index
    %c0_29 = arith.constant 0 : index
    %45 = vector.load %arg11[%c9, %c0_29] : memref<496x32xf32, #tpu.memory_space<vmem>>, vector<432x32xf32>
    %46 = arith.truncf %45 : vector<432x32xf32> to vector<432x32xbf16>
    %c0_30 = arith.constant 0 : index
    %c64 = arith.constant 64 : index
    %47 = vector.load %arg12[%c0_30, %c64] : memref<432x288xbf16, #tpu.memory_space<vmem>>, vector<432x32xbf16>
    tpu.vector_store %arg12[%c0_30, %c64], %46 {strides = array<i32>} : memref<432x288xbf16, #tpu.memory_space<vmem>>, vector<432x32xbf16>,
    %c31 = arith.constant 31 : index
    %c0_31 = arith.constant 0 : index
    %48 = vector.load %arg11[%c31, %c0_31] : memref<496x32xf32, #tpu.memory_space<vmem>>, vector<432x32xf32>
    %49 = arith.truncf %48 : vector<432x32xf32> to vector<432x32xbf16>
    %c0_32 = arith.constant 0 : index
    %c96 = arith.constant 96 : index
    %50 = vector.load %arg12[%c0_32, %c96] : memref<432x288xbf16, #tpu.memory_space<vmem>>, vector<432x32xbf16>
    tpu.vector_store %arg12[%c0_32, %c96], %49 {strides = array<i32>} : memref<432x288xbf16, #tpu.memory_space<vmem>>, vector<432x32xbf16>,
    %c32_33 = arith.constant 32 : index
    %c0_34 = arith.constant 0 : index
    %51 = vector.load %arg11[%c32_33, %c0_34] : memref<496x32xf32, #tpu.memory_space<vmem>>, vector<432x32xf32>
    %52 = arith.truncf %51 : vector<432x32xf32> to vector<432x32xbf16>
    %c0_35 = arith.constant 0 : index
    %c128 = arith.constant 128 : index
    %53 = vector.load %arg12[%c0_35, %c128] : memref<432x288xbf16, #tpu.memory_space<vmem>>, vector<432x32xbf16>
    tpu.vector_store %arg12[%c0_35, %c128], %52 {strides = array<i32>} : memref<432x288xbf16, #tpu.memory_space<vmem>>, vector<432x32xbf16>,
    %c33 = arith.constant 33 : index
    %c0_36 = arith.constant 0 : index
    %54 = vector.load %arg11[%c33, %c0_36] : memref<496x32xf32, #tpu.memory_space<vmem>>, vector<432x32xf32>
    %55 = arith.truncf %54 : vector<432x32xf32> to vector<432x32xbf16>
    %c0_37 = arith.constant 0 : index
    %c160 = arith.constant 160 : index
    %56 = vector.load %arg12[%c0_37, %c160] : memref<432x288xbf16, #tpu.memory_space<vmem>>, vector<432x32xbf16>
    tpu.vector_store %arg12[%c0_37, %c160], %55 {strides = array<i32>} : memref<432x288xbf16, #tpu.memory_space<vmem>>, vector<432x32xbf16>,
    %c55 = arith.constant 55 : index
    %c0_38 = arith.constant 0 : index
    %57 = vector.load %arg11[%c55, %c0_38] : memref<496x32xf32, #tpu.memory_space<vmem>>, vector<432x32xf32>
    %58 = arith.truncf %57 : vector<432x32xf32> to vector<432x32xbf16>
    %c0_39 = arith.constant 0 : index
    %c192 = arith.constant 192 : index
    %59 = vector.load %arg12[%c0_39, %c192] : memref<432x288xbf16, #tpu.memory_space<vmem>>, vector<432x32xbf16>
    tpu.vector_store %arg12[%c0_39, %c192], %58 {strides = array<i32>} : memref<432x288xbf16, #tpu.memory_space<vmem>>, vector<432x32xbf16>,
    %c56 = arith.constant 56 : index
    %c0_40 = arith.constant 0 : index
    %60 = vector.load %arg11[%c56, %c0_40] : memref<496x32xf32, #tpu.memory_space<vmem>>, vector<432x32xf32>
    %61 = arith.truncf %60 : vector<432x32xf32> to vector<432x32xbf16>
    %c0_41 = arith.constant 0 : index
    %c224 = arith.constant 224 : index
    %62 = vector.load %arg12[%c0_41, %c224] : memref<432x288xbf16, #tpu.memory_space<vmem>>, vector<432x32xbf16>
    tpu.vector_store %arg12[%c0_41, %c224], %61 {strides = array<i32>} : memref<432x288xbf16, #tpu.memory_space<vmem>>, vector<432x32xbf16>,
    %c57 = arith.constant 57 : index
    %c0_42 = arith.constant 0 : index
    %63 = vector.load %arg11[%c57, %c0_42] : memref<496x32xf32, #tpu.memory_space<vmem>>, vector<432x32xf32>
    %64 = arith.truncf %63 : vector<432x32xf32> to vector<432x32xbf16>
    %c0_43 = arith.constant 0 : index
    %c256 = arith.constant 256 : index
    %65 = vector.load %arg12[%c0_43, %c256] : memref<432x288xbf16, #tpu.memory_space<vmem>>, vector<432x32xbf16>
    tpu.vector_store %arg12[%c0_43, %c256], %64 {strides = array<i32>} : memref<432x288xbf16, #tpu.memory_space<vmem>>, vector<432x32xbf16>,
    %c0_44 = arith.constant 0 : index
    %c0_45 = arith.constant 0 : index
    %66 = vector.load %arg12[%c0_44, %c0_45] : memref<432x288xbf16, #tpu.memory_space<vmem>>, vector<432x288xbf16>
    %c0_46 = arith.constant 0 : index
    %c0_47 = arith.constant 0 : index
    %67 = vector.load %arg8[%c0_46, %c0_47] : memref<288x8xbf16, #tpu.memory_space<vmem>>, vector<288x8xbf16>
    %cst_48 = arith.constant dense<0.000000e+00> : vector<432x8xf32>
    %68 = tpu.matmul %66, %67, %cst_48 {dimension_numbers = #tpu.dot_dimension_numbers<[1], [0], [0], [1], [0, 0, 1, 1], [], []>} : vector<432x288xbf16>, vector<288x8xbf16>, vector<432x8xf32> -> vector<432x8xf32>
    %c0_49 = arith.constant 0 : index
    %c0_50 = arith.constant 0 : index
    %69 = vector.load %arg9[%c0_49, %c0_50] : memref<432x16xf32, #tpu.memory_space<vmem>>, vector<432x16xf32>
    %70 = vector.extract_strided_slice %69 {offsets = [0, 0], sizes = [432, 8], strides = [1, 1]} : vector<432x16xf32> to vector<432x8xf32>
    %71 = arith.subf %68, %70 : vector<432x8xf32>
    %72 = vector.extract_strided_slice %69 {offsets = [0, 8], sizes = [432, 8], strides = [1, 1]} : vector<432x16xf32> to vector<432x8xf32>
    %73 = arith.mulf %71, %72 : vector<432x8xf32>
    %74 = arith.mulf %73, %73 : vector<432x8xf32>
    %75 = vector.shape_cast %74 : vector<432x8xf32> to vector<1x432x8xf32>
    %cst_51 = arith.constant dense<0.000000e+00> : vector<1xf32>
    %76 = vector.multi_reduction <add>, %75, %cst_51 [1, 2] : vector<1x432x8xf32> to vector<1xf32>
    %77 = vector.shape_cast %76 : vector<1xf32> to vector<1x1x1xf32>
    %78 = vector.extract %77[0, 0, 0] : f32 from vector<1x1x1xf32>
    %79 = vector.broadcast %78 : f32 to vector<8x128xf32>
    %c0_52 = arith.constant 0 : index
    %c0_53 = arith.constant 0 : index
    %80 = vector.load %arg10[%c0_52, %c0_53] : memref<8x128xf32, #tpu.memory_space<vmem>>, vector<8x128xf32>
    tpu.vector_store %arg10[%c0_52, %c0_53], %79 {strides = array<i32>} : memref<8x128xf32, #tpu.memory_space<vmem>>, vector<8x128xf32>,
    return
  }
  func.func @transform_0(%arg0: i32) -> (i32, i32) {
    %c0_i32 = arith.constant 0 : i32
    %c0_i32_0 = arith.constant 0 : i32
    return %arg0, %c0_i32 : i32, i32
  }
  func.func @transform_1(%arg0: i32) -> (i32, i32) {
    %c0_i32 = arith.constant 0 : i32
    %c0_i32_0 = arith.constant 0 : i32
    %c0_i32_1 = arith.constant 0 : i32
    return %c0_i32, %c0_i32_0 : i32, i32
  }
  func.func @transform_2(%arg0: i32) -> (i32, i32) {
    %c0_i32 = arith.constant 0 : i32
    %c0_i32_0 = arith.constant 0 : i32
    %c0_i32_1 = arith.constant 0 : i32
    return %c0_i32, %c0_i32_0 : i32, i32
  }
  func.func @transform_3(%arg0: i32) -> (i32, i32) {
    %c0_i32 = arith.constant 0 : i32
    %c0_i32_0 = arith.constant 0 : i32
    %c0_i32_1 = arith.constant 0 : i32
    return %c0_i32, %c0_i32_0 : i32, i32
  }
  func.func @transform_4(%arg0: i32) -> (i32, i32) {
    %c0_i32 = arith.constant 0 : i32
    %c0_i32_0 = arith.constant 0 : i32
    %c0_i32_1 = arith.constant 0 : i32
    return %c0_i32, %c0_i32_0 : i32, i32
  }
  func.func @transform_5(%arg0: i32) -> (i32, i32) {
    %c0_i32 = arith.constant 0 : i32
    %c0_i32_0 = arith.constant 0 : i32
    return %arg0, %c0_i32 : i32, i32
  }
  func.func @transform_6(%arg0: i32) -> (i32, i32) {
    %c0_i32 = arith.constant 0 : i32
    %c0_i32_0 = arith.constant 0 : i32
    %c0_i32_1 = arith.constant 0 : i32
    return %c0_i32, %c0_i32_0 : i32, i32
  }
  func.func @transform_7(%arg0: i32) -> (i32, i32) {
    %c0_i32 = arith.constant 0 : i32
    %c0_i32_0 = arith.constant 0 : i32
    %c0_i32_1 = arith.constant 0 : i32
    return %c0_i32, %c0_i32_0 : i32, i32
  }
  func.func @transform_8(%arg0: i32) -> (i32, i32) {
    %c0_i32 = arith.constant 0 : i32
    %c0_i32_0 = arith.constant 0 : i32
    return %arg0, %c0_i32 : i32, i32
  }
  func.func @transform_9(%arg0: i32) -> (i32, i32) {
    %c0_i32 = arith.constant 0 : i32
    %c0_i32_0 = arith.constant 0 : i32
    return %arg0, %c0_i32 : i32, i32
  }
}

</mosaic_0001>

<bundles_post_ra>
// kernel: ddpm_forward.21
= control target key start
LH: loop header
LB: loop body
LE: loop exit
PB: predicated region body
PF: predicated region fallthrough
CT: control target
= control target key end

     0   :  { %s7707_s30 = smov 0   ;;  %s10861_s0 = inlined_call_operand.vmem [shape: f32[16,32], index: 0, kind: input, shape index: {}]   ;;  %s10862_s1 = inlined_call_operand.vmem [shape: f32[32,32], index: 1, kind: input, shape index: {}]   ;;  %s10863_s2 = inlined_call_operand.vmem [shape: f32[1,32], index: 2, kind: input, shape index: {}]   ;;  %s10864_s3 = inlined_call_operand.vmem [shape: f32[32,32], index: 3, kind: input, shape index: {}]   ;;  %s10865_s4 = inlined_call_operand.vmem [shape: f32[1,32], index: 4, kind: input, shape index: {}]   ;;  %s10866_s5 = inlined_call_operand.vmem [shape: bf16[864,80], index: 5, kind: input, shape index: {}]   ;;  %s10867_s6 = inlined_call_operand.vmem [shape: bf16[80,32], index: 6, kind: input, shape index: {}]   ;;  %s10868_s7 = inlined_call_operand.vmem [shape: bf16[288,8], index: 7, kind: input, shape index: {}]   ;;  %s10869_s8 = inlined_call_operand.vmem [shape: f32[864,16], index: 8, kind: input, shape index: {}]   ;;  %s10870_s9 = inlined_call_operand.vmem [shape: f32[16,128], index: 9, kind: output, shape index: {}]  }
   0x1 LB: > { %s7713_s10 = sadd.s32 4294967295, %s7649_s30   ;;  %p6657_p0 = scmp.ge.s32.totalorder %s7649_s30, 1  ;;  %s7649_s30 = sphi %s7707_s30, %s19_s30  }
   0x2   : > { %p308_p1 = scmp.lt.s32.totalorder %s7649_s30, 3 }
   0x4   : > { %p309_p2 = pnand %p6657_p0, %p308_p1 }
   0x6   : > { %312 = sbr.rel (%p309_p2) target bundleno = 1799 (0x707), region = 56 }
   0xb   : > { %v377_v0 = vld [vmem:[%s10862_s1 + $0x18] sm:$0xff]  ;;  %v376_v1 = vld [vmem:[%s10862_s1 + $0x10] sm:$0xff]  ;;  %p352_p3 = scmp.lt.s32.totalorder %s7713_s10, 1  ;;  %v375_v2 = vld [vmem:[%s10862_s1 + $0x8] sm:$0xff]  ;;  %vm382_vm0 = vcmask 261120   ;;  %v457_v26 = vlaneseq  ;;  %vm7651_vm6 = vmmov 0  }
   0xc   : > { %398 = vmatpush.msra.mxu1 %v377_v0  ;;  %v374_v3 = vld [vmem:[%s10862_s1] sm:$0xff]  ;;  %v429_v5 = vld [vmem:[%s10864_s3 + $0x18] sm:$0xff]  ;;  %v428_v6 = vld [vmem:[%s10864_s3 + $0x10] sm:$0xff]  ;;  %s356_s12 = smul.u32 54, %s7713_s10  ;;  %vm729_vm9 = vcmask 654336   ;;  %s7653_s26 = smov 32  }
   0xd   : > { %s7728_s17 = scalar_select %p352_p3, %s7713_s10, 1  ;;  %v7421_v7 = vld [vmem:[%s10863_s2] ss:$0 sm:$0xff]  ;;  %v427_v8 = vld [vmem:[%s10864_s3 + $0x8] sm:$0xff]  ;;  %v458_v27 = vshrl.u32 %v457_v26, 7  ;;  %vm7765_vm7 = vmpackc.low %vm7651_vm6, %vm7651_vm6 }
   0xe   : > { %399 = vmatpush.msra.mxu1 %v376_v1  ;;  %v426_v9 = vld [vmem:[%s10864_s3] sm:$0xff]  ;;  %v486_v36 = vld [vmem:[%s10867_s6 + $0x18] sm:$0xf]  ;;  %v487_v37 = vld [vmem:[%s10867_s6 + $0x1c] sm:$0xf]  ;;  %p357_p4 = scmp.lt.s32.totalorder %s356_s12, 107 }
   0xf   : > { %s6658_s20 = sshll.u32 %s7728_s17, 3  ;;  %v7422_v28 = vld [vmem:[%s10865_s4] ss:$0 sm:$0xff]  ;;  %v467_v29 = vadd.s32 72, %v458_v27  ;;  %v489_v34 = vld [vmem:[%s10867_s6 + $0x24] sm:$0xf] }
  0x10   : > { %400 = vmatpush.msra.mxu1 %v375_v2  ;;  %s355_s23 = scalar_lea.vmem %s10861_s0, %s6658_s20  ;;  %v488_v33 = vld [vmem:[%s10867_s6 + $0x20] sm:$0xf]  ;;  %v484_v45 = vld [vmem:[%s10867_s6 + $0x10] sm:$0xf]  ;;  %v485_v46 = vld [vmem:[%s10867_s6 + $0x14] sm:$0xf] }
  0x11   : > { %v373_v4 = vld [vmem:[%s355_s23] sm:$0xff]  ;;  %vm479_vm5 = vcmp.eq.s32.totalorder %v467_v29, 72  ;;  %v482_v52 = vld [vmem:[%s10867_s6 + $0x8] sm:$0xf]  ;;  %v483_v53 = vld [vmem:[%s10867_s6 + $0xc] sm:$0xf] }
  0x12   : > { %401 = vmatpush.msra.mxu1 %v374_v3  ;;  %vm499_vm8 = vmpackc.low %vm479_vm5, %vm479_vm5  ;;  %v480_v59 = vld [vmem:[%s10867_s6] sm:$0xf]  ;;  %v481_v60 = vld [vmem:[%s10867_s6 + $0x4] sm:$0xf]  ;;  %s11168_s12 = smov (!%p357_p4, %s356_s12), 107  ;;  %s7654_s27 = smov 64  }
  0x13   : > { %6662 = vmatmul.msk.f32.vlgmr.msra.gmra.mxu1 %vm382_vm0, %v373_v4  ;;  %s6659_s22 = sshll.u32 %s11168_s12, 2  ;;  %s7655_s28 = smov 96  }
  0x14   : > { %449 = vmatpush.msrb.mxu1 %v429_v5  ;;  %s7818_s25 = scalar_lea.vmem %s10866_s5, %s6659_s22 }
  0x15   : > { %v7287_v29 = vld [vmem:[%s7818_s25 + $0x40] sm:$0xff] }
  0x16   : > { %450 = vmatpush.msrb.mxu1 %v428_v6  ;;  %v7279_v6 = vld [vmem:[%s7818_s25] sm:$0xff] }
  0x18   : > { %451 = vmatpush.msrb.mxu1 %v427_v8  ;;  %v7281_v8 = vld [vmem:[%s7818_s25 + $0x10] sm:$0xff] }
  0x1a   : > { %452 = vmatpush.msrb.mxu1 %v426_v9  ;;  %v7282_v9 = vld [vmem:[%s7818_s25 + $0x18] sm:$0xff] }
  0x90   : > { %v403_v10 = vpop.f32.mrf.mxu1 }
  0x91   : > { %v404_v11 = vadd.f32 %v7421_v7, %v403_v10  ;;  %v7280_v7 = vld [vmem:[%s7818_s25 + $0x8] sm:$0xff]  ;;  %v7283_v10 = vld [vmem:[%s7818_s25 + $0x20] sm:$0xff] }
  0x93   : > { %v6663_v12 = vmul.f32 -1.442695, %v404_v11 }
  0x95   : > { %7423 = vpow2.f32 %v6663_v12  ;;  %v7285_v12 = vld [vmem:[%s7818_s25 + $0x30] sm:$0xff] }
  0x9b   : > { %v7424_v13 = vpop.eup %7423 }
  0x9c   : > { %v409_v14 = vadd.f32 1.0, %v7424_v13  ;;  %v7652_v13 = vmov 0.0  }
  0x9d   : > { %2036 = vst.msk [vmem:[#allocation2 + $0x8] sm:$0xff] %vm382_vm0, %v7652_v13 }
  0x9e   : > { %7425 = vrcp.f32 %v409_v14  ;;  %v421_v18 = vand.u32 2147483648, %v409_v14  ;;  %v419_v20 = vand.u32 2147483647, %v409_v14  ;;  %vm415_vm2 = vweird.f32 %v409_v14  ;;  %2040 = vst.msk [vmem:[#allocation2 + $0x1d8] sm:$0xff] %vm382_vm0, %v7652_v13 }
  0x9f   : > { %2042 = vst.msk [vmem:[#allocation2 + $0x1e8] sm:$0xff] %vm382_vm0, %v7652_v13 }
  0xa0   : > { %v422_v22 = vor.u32 1.1754944e-38, %v421_v18  ;;  %vm420_vm4 = vcmp.eq.f32.partialorder %v419_v20, 8.507059e+37  ;;  %2035 = vst.msk [vmem:[#allocation2] sm:$0xff] %vm382_vm0, %v7652_v13 }
  0xa1   : > { %2037 = vst.msk [vmem:[#allocation2 + $0x10] sm:$0xff] %vm382_vm0, %v7652_v13 }
  0xa2   : > { %2038 = vst.msk [vmem:[#allocation2 + $0x18] sm:$0xff] %vm382_vm0, %v7652_v13 }
  0xa3   : > { %2039 = vst.msk [vmem:[#allocation2 + $0x1d0] sm:$0xff] %vm382_vm0, %v7652_v13 }
  0xa4   : > { %v7426_v15 = vpop.eup %7425  ;;  %2041 = vst.msk [vmem:[#allocation2 + $0x1e0] sm:$0xff] %vm382_vm0, %v7652_v13 }
  0xa5   : > { %v411_v16 = vmul.f32 %v7426_v15, %v409_v14  ;;  %vm416_vm1 = vweird.f32 %v7426_v15  ;;  %v7286_v14 = vld [vmem:[%s7818_s25 + $0x38] sm:$0xff] }
  0xa6   : > { %vm417_vm3 = vmor %vm415_vm2, %vm416_vm1 }
  0xa7   : > { %v412_v17 = vsub.f32 1.0, %v411_v16 }
  0xa9   : > { %v413_v19 = vmul.f32 %v7426_v15, %v412_v17  ;;  %v2262_v17 = vld [vmem:[#allocation2 + $0x18] sm:$0xff] }
  0xaa   : > { %v2316_v18 = vpack.c.bf16 %v2262_v17, %v2262_v17  ;;  %v4366_v26 = vld [vmem:[#allocation2 + $0x1d0] sm:$0xff] }
  0xab   : > { %v414_v21 = vadd.f32 %v7426_v15, %v413_v19  ;;  %v2261_v19 = vld [vmem:[#allocation2 + $0x10] sm:$0xff] }
  0xac   : > { %v2315_v20 = vpack.c.bf16 %v2261_v19, %v2261_v19  ;;  %2426 = vrot.lane.b32.xlu1 %v2316_v18, %s7653_s26 }
  0xad   : > { %v418_v23 = vsel %vm417_vm3, %v7426_v15, %v414_v21  ;;  %v2260_v15 = vld [vmem:[#allocation2 + $0x8] sm:$0xff]  ;;  %vm2205_vm3 = vcmask 257024  }
  0xae   : > { %v423_v24 = vsel %vm420_vm4, %v422_v22, %v418_v23  ;;  %v2314_v16 = vpack.c.bf16 %v2260_v15, %v2260_v15  ;;  %v2639_v21 = vld [vmem:[#allocation2 + $0x9] sm:$0xff] }
  0xaf   : > { %v425_v25 = vmul.f32 %v423_v24, %v404_v11  ;;  %v7284_v11 = vld [vmem:[%s7818_s25 + $0x28] sm:$0xff]  ;;  %v2693_v22 = vpack.c.bf16 %v2639_v21, %v2639_v21 }
  0xb0   : > { %2422 = vrot.lane.b32.xlu0 %v2314_v16, %s7653_s26 }
  0xb1   : > { %6664 = vmatmul.msk.f32.vlgmr.msrb.gmra.mxu1 %vm382_vm0, %v425_v25  ;;  %v2640_v25 = vld [vmem:[#allocation2 + $0x11] sm:$0xff] }
  0xb2   : > { %v2694_v27 = vpack.c.bf16 %v2640_v25, %v2640_v25 }
  0xb4   : > { %2803 = vrot.lane.b32.xlu1 %v2694_v27, %s7654_s27 }
  0xb8   : > { %2424 = vrot.lane.b32.xlu0 %v2315_v20, %s7653_s26 }
  0xc0   : > { %2801 = vrot.lane.b32.xlu0 %v2693_v22, %s7654_s27 }
 0x12e   : > { %v454_v30 = vpop.f32.mrf.mxu1 }
 0x12f   : > { %v455_v31 = vadd.f32 %v7422_v28, %v454_v30  ;;  %v4420_v28 = vpack.c.bf16 %v4366_v26, %v4366_v26 }
 0x131   : > { %v468_v32 = vperm.slane %v455_v31, 0  ;;  %4579 = vrot.lane.b32.xlu0 %v4420_v28, %s7655_s28 }
 0x133   : > { %v469_v38 = vpack.c.bf16 %v468_v32, %v468_v32 }
 0x135   : > { %v508_v39 = vsel %vm7765_vm7, %v469_v38, %v488_v33  ;;  %v509_v40 = vsel %vm499_vm8, %v469_v38, %v489_v34  ;;  %v506_v41 = vsel %vm7765_vm7, %v469_v38, %v486_v36  ;;  %v507_v42 = vsel %vm7765_vm7, %v469_v38, %v487_v37 }
 0x136   : > { %v717_v43 = vunpack.c.l.b16 %v508_v39  ;;  %v718_v44 = vunpack.c.l.b16 %v509_v40  ;;  %v715_v48 = vunpack.c.l.b16 %v506_v41  ;;  %v716_v49 = vunpack.c.l.b16 %v507_v42 }
 0x137   : > { %v504_v50 = vsel %vm7765_vm7, %v469_v38, %v484_v45  ;;  %v505_v51 = vsel %vm7765_vm7, %v469_v38, %v485_v46  ;;  %v502_v57 = vsel %vm7765_vm7, %v469_v38, %v482_v52  ;;  %v503_v58 = vsel %vm7765_vm7, %v469_v38, %v483_v53  ;;  %v7288_v53 = vld [vmem:[%s7818_s25 + $0x48] sm:$0xff] }
 0x138   : > { %v723_v47 = vpack.c.b16 %v718_v44, %v717_v43  ;;  %v722_v54 = vpack.c.b16 %v716_v49, %v715_v48  ;;  %v713_v55 = vunpack.c.l.b16 %v504_v50  ;;  %v714_v56 = vunpack.c.l.b16 %v505_v51 }
 0x139   : > { %v711_v62 = vunpack.c.l.b16 %v502_v57  ;;  %v712_v63 = vunpack.c.l.b16 %v503_v58  ;;  %v500_v0 = vsel %vm7765_vm7, %v469_v38, %v480_v59  ;;  %v501_v1 = vsel %vm7765_vm7, %v469_v38, %v481_v60 }
 0x13a   : > { %814 = vmatpush.bf16.msra.mxu2 %v723_v47  ;;  %v721_v61 = vpack.c.b16 %v714_v56, %v713_v55  ;;  %v709_v3 = vunpack.c.l.b16 %v500_v0  ;;  %v710_v4 = vunpack.c.l.b16 %v501_v1 }
 0x13b   : > { %v720_v2 = vpack.c.b16 %v712_v63, %v711_v62 }
 0x13c   : > { %v719_v5 = vpack.c.b16 %v710_v4, %v709_v3 }
 0x13e   : > { %815 = vmatpush.bf16.msra.mxu2 %v722_v54 }
 0x142   : > { %816 = vmatpush.bf16.msra.mxu2 %v721_v61 }
 0x146   : > { %817 = vmatpush.bf16.msra.mxu2 %v720_v2 }
 0x14a   : > { %818 = vmatpush.bf16.msra.mxu2 %v719_v5 }
 0x14d   : > { %6773 = vmatmul.msk.bf16.vlgmr.msra.gmra.mxu2 %vm729_vm9, %v7279_v6 }
 0x15d   : > { %6774 = vmatmul.msk.bf16.gmra.mxu2 %vm729_vm9, %v7280_v7 }
 0x16d   : > { %6775 = vmatmul.msk.bf16.gmra.mxu2 %vm729_vm9, %v7281_v8 }
 0x17d   : > { %6776 = vmatmul.msk.bf16.gmra.mxu2 %vm729_vm9, %v7282_v9 }
 0x18d   : > { %6777 = vmatmul.msk.bf16.gmra.mxu2 %vm729_vm9, %v7283_v10 }
 0x19d   : > { %6778 = vmatmul.msk.bf16.gmra.mxu2 %vm729_vm9, %v7284_v11 }
 0x1ad   : > { %6779 = vmatmul.msk.bf16.gmra.mxu2 %vm729_vm9, %v7285_v12 }
 0x1bd   : > { %6780 = vmatmul.msk.bf16.gmra.mxu2 %vm729_vm9, %v7286_v14 }
 0x1cd   : > { %6781 = vmatmul.msk.bf16.gmra.mxu2 %vm729_vm9, %v7287_v29 }
 0x1d0   : > { %v820_v23 = vpop.f32.mrf.mxu2 }
 0x1d1   : > { %v6800_v24 = vmul.f32 -1.442695, %v820_v23 }
 0x1d3   : > { %7427 = vpow2.f32 %v6800_v24 }
 0x1d8   : > { %v822_v30 = vpop.f32.mrf.mxu2 }
 0x1d9   : > { %v7428_v31 = vpop.eup %7427  ;;  %v6801_v32 = vmul.f32 -1.442695, %v822_v30 }
 0x1da   : > { %v1117_v33 = vadd.f32 1.0, %v7428_v31 }
 0x1db   : > { %7429 = vpow2.f32 %v6801_v32 }
 0x1dc   : > { %7431 = vrcp.f32 %v1117_v33  ;;  %v1182_v41 = vand.u32 2147483648, %v1117_v33  ;;  %v1180_v43 = vand.u32 2147483647, %v1117_v33  ;;  %vm1176_vm11 = vweird.f32 %v1117_v33 }
 0x1dd   : > { %6782 = vmatmul.msk.bf16.gmra.mxu2 %vm729_vm9, %v7288_v53 }
 0x1de   : > { %v1183_v49 = vor.u32 1.1754944e-38, %v1182_v41  ;;  %vm1181_vm13 = vcmp.eq.f32.partialorder %v1180_v43, 8.507059e+37 }
 0x1e0   : > { %v7852_v34 = vpop.f32.mrf.mxu2 }
 0x1e1   : > { %v7430_v35 = vpop.eup %7429  ;;  %v6802_v36 = vmul.f32 -1.442695, %v7852_v34 }
 0x1e2   : > { %v7432_v37 = vpop.eup %7431  ;;  %v1118_v38 = vadd.f32 1.0, %v7430_v35 }
 0x1e3   : > { %v1172_v39 = vmul.f32 %v7432_v37, %v1117_v33  ;;  %7433 = vpow2.f32 %v6802_v36  ;;  %vm1177_vm10 = vweird.f32 %v7432_v37 }
 0x1e4   : > { %7435 = vrcp.f32 %v1118_v38  ;;  %vm1178_vm12 = vmor %vm1176_vm11, %vm1177_vm10  ;;  %v1197_v57 = vand.u32 2147483648, %v1118_v38  ;;  %v1195_v59 = vand.u32 2147483647, %v1118_v38  ;;  %vm1191_vm15 = vweird.f32 %v1118_v38 }
 0x1e5   : > { %v1173_v40 = vsub.f32 1.0, %v1172_v39 }
 0x1e6   : > { %v1198_v1 = vor.u32 1.1754944e-38, %v1197_v57  ;;  %vm1196_vm2 = vcmp.eq.f32.partialorder %v1195_v59, 8.507059e+37 }
 0x1e7   : > { %v1174_v42 = vmul.f32 %v7432_v37, %v1173_v40 }
 0x1e8   : > { %v7855_v44 = vpop.f32.mrf.mxu2 }
 0x1e9   : > { %v7434_v45 = vpop.eup %7433  ;;  %v1175_v46 = vadd.f32 %v7432_v37, %v1174_v42  ;;  %v6803_v47 = vmul.f32 -1.442695, %v7855_v44 }
 0x1ea   : > { %v7436_v48 = vpop.eup %7435  ;;  %v7858_v50 = vadd.f32 1.0, %v7434_v45 }
 0x1eb   : > { %v1179_v51 = vsel %vm1178_vm12, %v7432_v37, %v1175_v46  ;;  %v1187_v52 = vmul.f32 %v7436_v48, %v1118_v38  ;;  %7437 = vpow2.f32 %v6803_v47  ;;  %vm1192_vm14 = vweird.f32 %v7436_v48 }
 0x1ec   : > { %v1184_v54 = vsel %vm1181_vm13, %v1183_v49, %v1179_v51  ;;  %7439 = vrcp.f32 %v7858_v50  ;;  %vm1193_vm1 = vmor %vm1191_vm15, %vm1192_vm14  ;;  %v1210_v8 = vand.u32 2147483647, %v7858_v50  ;;  %v1212_v9 = vand.u32 2147483648, %v7858_v50 }
 0x1ed   : > { %v1981_v55 = vmul.f32 %v1184_v54, %v820_v23  ;;  %v1188_v56 = vsub.f32 1.0, %v1187_v52  ;;  %vm1206_vm5 = vweird.f32 %v7858_v50 }
 0x1ee   : > { %v1213_v24 = vor.u32 1.1754944e-38, %v1212_v9  ;;  %vm1211_vm7 = vcmp.eq.f32.partialorder %v1210_v8, 8.507059e+37 }
 0x1ef   : > { %2043 = vst.msk [vmem:[#allocation2 + $0x20] sm:$0xff] %vm382_vm0, %v1981_v55  ;;  %v1189_v58 = vmul.f32 %v7436_v48, %v1188_v56 }
 0x1f0   : > { %v7864_v60 = vpop.f32.mrf.mxu2 }
 0x1f1   : > { %v7438_v61 = vpop.eup %7437  ;;  %v1190_v62 = vadd.f32 %v7436_v48, %v1189_v58  ;;  %v6804_v63 = vmul.f32 -1.442695, %v7864_v60 }
 0x1f2   : > { %v7440_v0 = vpop.eup %7439  ;;  %v7867_v2 = vadd.f32 1.0, %v7438_v61 }
 0x1f3   : > { %v1194_v3 = vsel %vm1193_vm1, %v7436_v48, %v1190_v62  ;;  %v1202_v4 = vmul.f32 %v7440_v0, %v7858_v50  ;;  %7441 = vpow2.f32 %v6804_v63  ;;  %vm1207_vm4 = vweird.f32 %v7440_v0 }
 0x1f4   : > { %v1199_v5 = vsel %vm1196_vm2, %v1198_v1, %v1194_v3  ;;  %7443 = vrcp.f32 %v7867_v2  ;;  %vm1208_vm6 = vmor %vm1206_vm5, %vm1207_vm4  ;;  %v1225_v31 = vand.u32 2147483647, %v7867_v2  ;;  %v1227_v32 = vand.u32 2147483648, %v7867_v2 }
 0x1f5   : > { %v1982_v6 = vmul.f32 %v1199_v5, %v822_v30  ;;  %v1203_v7 = vsub.f32 1.0, %v1202_v4  ;;  %vm1221_vm10 = vweird.f32 %v7867_v2 }
 0x1f6   : > { %v3018_v10 = vld [vmem:[#allocation2 + $0x1f] sm:$0xff]  ;;  %v1228_v48 = vor.u32 1.1754944e-38, %v1227_v32  ;;  %vm1226_vm12 = vcmp.eq.f32.partialorder %v1225_v31, 8.507059e+37 }
 0x1f7   : > { %v2641_v11 = vld [vmem:[#allocation2 + $0x19] sm:$0xff]  ;;  %2044 = vst.msk [vmem:[#allocation2 + $0x28] sm:$0xff] %vm382_vm0, %v1982_v6  ;;  %v1204_v13 = vmul.f32 %v7440_v0, %v1203_v7  ;;  %v3072_v14 = vpack.c.bf16 %v3018_v10, %v3018_v10 }
 0x1f8   : > { %v2263_v12 = vld [vmem:[#allocation2 + $0x20] sm:$0xff]  ;;  %v2695_v15 = vpack.c.bf16 %v2641_v11, %v2641_v11  ;;  %v7874_v17 = vpop.f32.mrf.mxu2 }
 0x1f9   : > { %v3397_v16 = vld [vmem:[#allocation2 + $0x20] sm:$0xff]  ;;  %v2317_v18 = vpack.c.bf16 %v2263_v12, %v2263_v12  ;;  %v7442_v20 = vpop.eup %7441  ;;  %v1205_v21 = vadd.f32 %v7440_v0, %v1204_v13  ;;  %v6805_v22 = vmul.f32 -1.442695, %v7874_v17  ;;  %3180 = vrot.lane.b32.xlu0 %v3072_v14, %s7655_s28  ;;  %2209 = vst.msk [vmem:[#allocation3 + $0x24] sm:$0xf] %vm2205_vm3, %v3072_v14 }
 0x1fa   : > { %v3451_v19 = vpack.c.bf16 %v3397_v16, %v3397_v16  ;;  %2805 = vrot.lane.b32.xlu2 %v2695_v15, %s7654_s27  ;;  %v7444_v23 = vpop.eup %7443  ;;  %v7882_v25 = vadd.f32 1.0, %v7442_v20  ;;  %v7403_v10 = vld [vmem:[%s10868_s7 + $0x80] sm:$0xff] }
 0x1fb   : > { %2428 = vrot.lane.b32.xlu1 %v2317_v18, %s7653_s26  ;;  %v1209_v26 = vsel %vm1208_vm6, %v7440_v0, %v1205_v21  ;;  %v1217_v27 = vmul.f32 %v7444_v23, %v7867_v2  ;;  %7445 = vpow2.f32 %v6805_v22  ;;  %vm1222_vm8 = vweird.f32 %v7444_v23 }
 0x1fc   : > { %3505 = vst.msk [vmem:[#allocation3 + $0x4] sm:$0xf] %vm2205_vm3, %v3451_v19  ;;  %v1214_v28 = vsel %vm1211_vm7, %v1213_v24, %v1209_v26  ;;  %7447 = vrcp.f32 %v7882_v25  ;;  %vm1223_vm11 = vmor %vm1221_vm10, %vm1222_vm8  ;;  %vm1236_vm13 = vweird.f32 %v7882_v25  ;;  %v1240_v55 = vand.u32 2147483647, %v7882_v25 }
 0x1fd   : > { %v1983_v29 = vmul.f32 %v1214_v28, %v7852_v34  ;;  %v1218_v30 = vsub.f32 1.0, %v1217_v27  ;;  %v1242_v56 = vand.u32 2147483648, %v7882_v25 }
 0x1fe   : > { %v3019_v33 = vld [vmem:[#allocation2 + $0x27] sm:$0xff]  ;;  %vm1241_vm1 = vcmp.eq.f32.partialorder %v1240_v55, 8.507059e+37 }
 0x1ff   : > { %v2642_v35 = vld [vmem:[#allocation2 + $0x21] sm:$0xff]  ;;  %2045 = vst.msk [vmem:[#allocation2 + $0x30] sm:$0xff] %vm382_vm0, %v1983_v29  ;;  %v1219_v37 = vmul.f32 %v7444_v23, %v1218_v30  ;;  %v3073_v38 = vpack.c.bf16 %v3019_v33, %v3019_v33  ;;  %v1243_v8 = vor.u32 1.1754944e-38, %v1242_v56 }
 0x200   : > { %v2264_v36 = vld [vmem:[#allocation2 + $0x28] sm:$0xff]  ;;  %v2696_v39 = vpack.c.bf16 %v2642_v35, %v2642_v35  ;;  %v7892_v41 = vpop.f32.mrf.mxu2  ;;  %v7289_v35 = vld [vmem:[%s7818_s25 + $0x50] sm:$0xff] }
 0x201   : > { %v3398_v40 = vld [vmem:[#allocation2 + $0x28] sm:$0xff]  ;;  %v2318_v42 = vpack.c.bf16 %v2264_v36, %v2264_v36  ;;  %v7446_v34 = vpop.eup %7445  ;;  %v1220_v45 = vadd.f32 %v7444_v23, %v1219_v37  ;;  %v6806_v46 = vmul.f32 -1.442695, %v7892_v41  ;;  %2210 = vst.msk [vmem:[#allocation3 + $0x30] sm:$0xf] %vm2205_vm3, %v3073_v38  ;;  %6783 = vmatmul.msk.bf16.gmra.mxu2 %vm729_vm9, %v7289_v35 }
 0x202   : > { %v3452_v43 = vpack.c.bf16 %v3398_v40, %v3398_v40  ;;  %2807 = vrot.lane.b32.xlu0 %v2696_v39, %s7654_s27  ;;  %v7448_v47 = vpop.eup %7447  ;;  %v7898_v49 = vadd.f32 1.0, %v7446_v34 }
 0x203   : > { %3182 = vrot.lane.b32.xlu1 %v3073_v38, %s7655_s28  ;;  %2430 = vrot.lane.b32.xlu2 %v2318_v42, %s7653_s26  ;;  %v1224_v50 = vsel %vm1223_vm11, %v7444_v23, %v1220_v45  ;;  %v1232_v51 = vmul.f32 %v7448_v47, %v7882_v25  ;;  %7449 = vpow2.f32 %v6806_v46  ;;  %vm1237_vm14 = vweird.f32 %v7448_v47 }
 0x204   : > { %3506 = vst.msk [vmem:[#allocation3 + $0x10] sm:$0xf] %vm2205_vm3, %v3452_v43  ;;  %v1229_v52 = vsel %vm1226_vm12, %v1228_v48, %v1224_v50  ;;  %7451 = vrcp.f32 %v7898_v49  ;;  %vm1238_vm15 = vmor %vm1236_vm13, %vm1237_vm14  ;;  %v1257_v16 = vand.u32 2147483648, %v7898_v49  ;;  %v1255_v21 = vand.u32 2147483647, %v7898_v49 }
 0x205   : > { %v1984_v53 = vmul.f32 %v1229_v52, %v7855_v44  ;;  %v1233_v54 = vsub.f32 1.0, %v1232_v51  ;;  %v7404_v44 = vld [vmem:[%s10868_s7 + $0x88] sm:$0xff]  ;;  %vm1251_vm4 = vweird.f32 %v7898_v49 }
 0x206   : > { %v2643_v57 = vld [vmem:[#allocation2 + $0x29] sm:$0xff]  ;;  %5887 = vmatpush.bf16.msra.mxu1 %v7404_v44  ;;  %v1258_v30 = vor.u32 1.1754944e-38, %v1257_v16  ;;  %vm1256_vm6 = vcmp.eq.f32.partialorder %v1255_v21, 8.507059e+37 }
 0x207   : > { %v2265_v58 = vld [vmem:[#allocation2 + $0x30] sm:$0xff]  ;;  %2046 = vst.msk [vmem:[#allocation2 + $0x38] sm:$0xff] %vm382_vm0, %v1984_v53  ;;  %v1234_v61 = vmul.f32 %v7448_v47, %v1233_v54  ;;  %v2697_v62 = vpack.c.bf16 %v2643_v57, %v2643_v57 }
 0x208   : > { %v3020_v59 = vld [vmem:[#allocation2 + $0x2f] sm:$0xff]  ;;  %v2319_v63 = vpack.c.bf16 %v2265_v58, %v2265_v58  ;;  %v7913_v1 = vpop.f32.mrf.mxu2 }
 0x209   : > { %v3399_v0 = vld [vmem:[#allocation2 + $0x30] sm:$0xff]  ;;  %v3074_v2 = vpack.c.bf16 %v3020_v59, %v3020_v59  ;;  %v7450_v4 = vpop.eup %7449  ;;  %v1235_v5 = vadd.f32 %v7448_v47, %v1234_v61  ;;  %v6807_v6 = vmul.f32 -1.442695, %v7913_v1 }
 0x20a   : > { %v3453_v3 = vpack.c.bf16 %v3399_v0, %v3399_v0  ;;  %3721 = vrot.lane.b32.xlu0 %v2696_v39, %s7653_s26  ;;  %v7452_v7 = vpop.eup %7451  ;;  %v7919_v9 = vadd.f32 1.0, %v7450_v4  ;;  %5888 = vmatpush.bf16.msra.mxu1 %v7403_v10 }
 0x20b   : > { %2809 = vrot.lane.b32.xlu1 %v2697_v62, %s7654_s27  ;;  %2432 = vrot.lane.b32.xlu2 %v2319_v63, %s7653_s26  ;;  %2211 = vst.msk [vmem:[#allocation3 + $0x3c] sm:$0xf] %vm2205_vm3, %v3074_v2  ;;  %v1239_v11 = vsel %vm1238_vm15, %v7448_v47, %v1235_v5  ;;  %v1247_v12 = vmul.f32 %v7452_v7, %v7898_v49  ;;  %7453 = vpow2.f32 %v6807_v6  ;;  %vm1252_vm2 = vweird.f32 %v7452_v7 }
 0x20c   : > { %3507 = vst.msk [vmem:[#allocation3 + $0x1c] sm:$0xf] %vm2205_vm3, %v3453_v3  ;;  %v1244_v13 = vsel %vm1241_vm1, %v1243_v8, %v1239_v11  ;;  %7455 = vrcp.f32 %v7919_v9  ;;  %vm1253_vm5 = vmor %vm1251_vm4, %vm1252_vm2  ;;  %vm1266_vm7 = vweird.f32 %v7919_v9  ;;  %v1272_v37 = vand.u32 2147483648, %v7919_v9 }
 0x20d   : > { %v1985_v14 = vmul.f32 %v1244_v13, %v7864_v60  ;;  %v1248_v15 = vsub.f32 1.0, %v1247_v12  ;;  %v1270_v40 = vand.u32 2147483647, %v7919_v9 }
 0x20e   : > { %v2266_v18 = vld [vmem:[#allocation2 + $0x38] sm:$0xff] }
 0x20f   : > { %v3021_v19 = vld [vmem:[#allocation2 + $0x37] sm:$0xff]  ;;  %2047 = vst.msk [vmem:[#allocation2 + $0x40] sm:$0xff] %vm382_vm0, %v1985_v14  ;;  %v1249_v20 = vmul.f32 %v7452_v7, %v1248_v15  ;;  %v2320_v22 = vpack.c.bf16 %v2266_v18, %v2266_v18  ;;  %vm1271_vm11 = vcmp.eq.f32.partialorder %v1270_v40, 8.507059e+37 }
 0x210   : > { %v3400_v23 = vld [vmem:[#allocation2 + $0x38] sm:$0xff]  ;;  %v7934_v24 = vpop.f32.mrf.mxu2  ;;  %v7936_v25 = vpack.c.bf16 %v3021_v19, %v3021_v19 }
 0x211   : > { %v3454_v26 = vpack.c.bf16 %v3400_v23, %v3400_v23  ;;  %v7454_v60 = vpop.eup %7453  ;;  %v1250_v27 = vadd.f32 %v7452_v7, %v1249_v20  ;;  %v6808_v28 = vmul.f32 -1.442695, %v7934_v24  ;;  %v2644_v42 = vld [vmem:[#allocation2 + $0x31] sm:$0xff] }
 0x212   : > { %2434 = vrot.lane.b32.xlu0 %v2320_v22, %s7653_s26  ;;  %v7456_v29 = vpop.eup %7455  ;;  %v7941_v31 = vadd.f32 1.0, %v7454_v60  ;;  %2212 = vst.msk [vmem:[#allocation3 + $0x48] sm:$0xf] %vm2205_vm3, %v7936_v25  ;;  %v2698_v50 = vpack.c.bf16 %v2644_v42, %v2644_v42 }
 0x213   : > { %3723 = vrot.lane.b32.xlu1 %v2697_v62, %s7653_s26  ;;  %3184 = vrot.lane.b32.xlu2 %v3074_v2, %s7655_s28  ;;  %v1254_v32 = vsel %vm1253_vm5, %v7452_v7, %v1250_v27  ;;  %v1262_v33 = vmul.f32 %v7456_v29, %v7919_v9  ;;  %7457 = vpow2.f32 %v6808_v28  ;;  %3508 = vst.msk [vmem:[#allocation3 + $0x28] sm:$0xf] %vm2205_vm3, %v3454_v26  ;;  %vm1267_vm8 = vweird.f32 %v7456_v29 }
 0x214   : > { %v1259_v36 = vsel %vm1256_vm6, %v1258_v30, %v1254_v32  ;;  %7459 = vrcp.f32 %v7941_v31  ;;  %vm7961_vm10 = vmor %vm1266_vm7, %vm1267_vm8  ;;  %vm1281_vm12 = vweird.f32 %v7941_v31  ;;  %v1287_v62 = vand.u32 2147483648, %v7941_v31 }
 0x215   : > { %v1986_v38 = vmul.f32 %v1259_v36, %v7874_v17  ;;  %v1263_v39 = vsub.f32 1.0, %v1262_v33  ;;  %v1273_v17 = vor.u32 1.1754944e-38, %v1272_v37  ;;  %v1285_v0 = vand.u32 2147483647, %v7941_v31 }
 0x216   : > { %v4693_v43 = vld [vmem:[#allocation2 + $0x39] sm:$0xff]  ;;  %v1288_v9 = vor.u32 1.1754944e-38, %v1287_v62 }
 0x217   : > { %v3022_v34 = vld [vmem:[#allocation2 + $0x3f] sm:$0xff]  ;;  %v7956_v45 = vpack.c.bf16 %v4693_v43, %v4693_v43  ;;  %2048 = vst.msk [vmem:[#allocation2 + $0x48] sm:$0xff] %vm382_vm0, %v1986_v38  ;;  %v1264_v46 = vmul.f32 %v7456_v29, %v1263_v39  ;;  %vm1286_vm15 = vcmp.eq.f32.partialorder %v1285_v0, 8.507059e+37 }
 0x218   : > { %v3401_v47 = vld [vmem:[#allocation2 + $0x40] sm:$0xff]  ;;  %v7965_v49 = vpop.f32.mrf.mxu2  ;;  %v7967_v51 = vpack.c.bf16 %v3022_v34, %v3022_v34 }
 0x219   : > { %v3455_v52 = vpack.c.bf16 %v3401_v47, %v3401_v47  ;;  %v7458_v53 = vpop.eup %7457  ;;  %4801 = vst.msk [vmem:[#allocation3 + $0x8] sm:$0xf] %vm2205_vm3, %v7956_v45  ;;  %v1265_v54 = vadd.f32 %v7456_v29, %v1264_v46  ;;  %v6809_v55 = vmul.f32 -1.442695, %v7965_v49  ;;  %v2267_v2 = vld [vmem:[#allocation2 + $0x40] sm:$0xff] }
 0x21a   : > { %3186 = vrot.lane.b32.xlu0 %v7936_v25, %s7655_s28  ;;  %v7460_v56 = vpop.eup %7459  ;;  %v7974_v57 = vadd.f32 1.0, %v7458_v53  ;;  %2213 = vst.msk [vmem:[#allocation3 + $0x54] sm:$0xf] %vm2205_vm3, %v7967_v51 }
 0x21b   : > { %4477 = vrot.lane.b32.xlu1 %v2320_v22, %s7655_s28  ;;  %2811 = vrot.lane.b32.xlu2 %v2698_v50, %s7654_s27  ;;  %v1269_v58 = vsel %vm7961_vm10, %v7456_v29, %v1265_v54  ;;  %v1277_v59 = vmul.f32 %v7460_v56, %v7941_v31  ;;  %7461 = vpow2.f32 %v6809_v55  ;;  %3509 = vst.msk [vmem:[#allocation3 + $0x34] sm:$0xf] %vm2205_vm3, %v3455_v52  ;;  %vm1282_vm13 = vweird.f32 %v7460_v56 }
 0x21c   : > { %v1274_v61 = vsel %vm1271_vm11, %v1273_v17, %v1269_v58  ;;  %7463 = vrcp.f32 %v7974_v57  ;;  %vm7992_vm14 = vmor %vm1281_vm12, %vm1282_vm13  ;;  %vm1296_vm1 = vweird.f32 %v7974_v57  ;;  %v1302_v22 = vand.u32 2147483648, %v7974_v57  ;;  %v8056_v58 = vpop.permute.xlu0 %2422 }
 0x21d   : > { %v1987_v63 = vmul.f32 %v1274_v61, %v7892_v41  ;;  %v1278_v44 = vsub.f32 1.0, %v1277_v59  ;;  %v2321_v41 = vpack.c.bf16 %v2267_v2, %v2267_v2  ;;  %v1300_v26 = vand.u32 2147483647, %v7974_v57 }
 0x21e   : > { %v4694_v3 = vld [vmem:[#allocation2 + $0x41] sm:$0xff]  ;;  %v1303_v32 = vor.u32 1.1754944e-38, %v1302_v22  ;;  %vm2584_vm13 = vcmask 519424  }
 0x21f   : > { %v3023_v4 = vld [vmem:[#allocation2 + $0x47] sm:$0xff]  ;;  %v7989_v5 = vpack.c.bf16 %v4694_v3, %v4694_v3  ;;  %2049 = vst.msk [vmem:[#allocation2 + $0x50] sm:$0xff] %vm382_vm0, %v1987_v63  ;;  %v1279_v6 = vmul.f32 %v7460_v56, %v1278_v44  ;;  %vm1301_vm5 = vcmp.eq.f32.partialorder %v1300_v26, 8.507059e+37 }
 0x220   : > { %v3402_v7 = vld [vmem:[#allocation2 + $0x48] sm:$0xff]  ;;  %v7996_v10 = vpop.f32.mrf.mxu2  ;;  %v7998_v11 = vpack.c.bf16 %v3023_v4, %v3023_v4 }
 0x221   : > { %v3456_v12 = vpack.c.bf16 %v3402_v7, %v3402_v7  ;;  %v7462_v13 = vpop.eup %7461  ;;  %4802 = vst.msk [vmem:[#allocation3 + $0x14] sm:$0xf] %vm2205_vm3, %v7989_v5  ;;  %v1280_v14 = vadd.f32 %v7460_v56, %v1279_v6  ;;  %v6810_v15 = vmul.f32 -1.442695, %v7996_v10  ;;  %v2268_v54 = vld [vmem:[#allocation2 + $0x48] sm:$0xff] }
 0x222   : > { %3725 = vrot.lane.b32.xlu0 %v2698_v50, %s7653_s26  ;;  %v7464_v16 = vpop.eup %7463  ;;  %v8004_v18 = vadd.f32 1.0, %v7462_v13  ;;  %2214 = vst.msk [vmem:[#allocation3 + $0x60] sm:$0xf] %vm2205_vm3, %v7998_v11  ;;  %v8066_v44 = vpack.c.bf16 %v2268_v54, %v2268_v54  ;;  %v2099_v13 = vld [vmem:[#allocation2 + $0x17] sm:$0xff] }
 0x223   : > { %4099 = vrot.lane.b32.xlu2 %v7936_v25, %s7654_s27  ;;  %2436 = vrot.lane.b32.xlu1 %v2321_v41, %s7653_s26  ;;  %v1284_v19 = vsel %vm7992_vm14, %v7460_v56, %v1280_v14  ;;  %v1292_v20 = vmul.f32 %v7464_v16, %v7974_v57  ;;  %7465 = vpow2.f32 %v6810_v15  ;;  %3510 = vst.msk [vmem:[#allocation3 + $0x40] sm:$0xf] %vm2205_vm3, %v3456_v12  ;;  %vm1297_vm2 = vweird.f32 %v7464_v16 }
 0x224   : > { %v1289_v21 = vsel %vm1286_vm15, %v1288_v9, %v1284_v19  ;;  %7467 = vrcp.f32 %v8004_v18  ;;  %vm8023_vm4 = vmor %vm1296_vm1, %vm1297_vm2  ;;  %vm1311_vm6 = vweird.f32 %v8004_v18  ;;  %v1317_v17 = vand.u32 2147483648, %v8004_v18 }
 0x225   : > { %v1988_v23 = vmul.f32 %v1289_v21, %v7913_v1  ;;  %v1293_v25 = vsub.f32 1.0, %v1292_v20  ;;  %v6864_v1 = vld [vmem:[#allocation3 + $0x8] sm:$0xf]  ;;  %v1315_v53 = vand.u32 2147483647, %v8004_v18 }
 0x226   : > { %v4695_v60 = vld [vmem:[#allocation2 + $0x49] sm:$0xff] }
 0x227   : > { %v3024_v27 = vld [vmem:[#allocation2 + $0x4f] sm:$0xff]  ;;  %v8020_v28 = vpack.c.bf16 %v4695_v60, %v4695_v60  ;;  %2050 = vst.msk [vmem:[#allocation2 + $0x58] sm:$0xff] %vm382_vm0, %v1988_v23  ;;  %v1294_v29 = vmul.f32 %v7464_v16, %v1293_v25  ;;  %vm1316_vm10 = vcmp.eq.f32.partialorder %v1315_v53, 8.507059e+37  ;;  %v2427_v25 = vpop.permute.xlu1 %2426 }
 0x228   : > { %v3403_v30 = vld [vmem:[#allocation2 + $0x50] sm:$0xff]  ;;  %v8027_v33 = vpop.f32.mrf.mxu2  ;;  %v7308_v35 = vld [vmem:[#allocation3 + $0x10] sm:$0xf0]  ;;  %v8029_v36 = vpack.c.bf16 %v3024_v27, %v3024_v27 }
 0x229   : > { %v3457_v37 = vpack.c.bf16 %v3403_v30, %v3403_v30  ;;  %v7466_v38 = vpop.eup %7465  ;;  %4803 = vst.msk [vmem:[#allocation3 + $0x20] sm:$0xf] %vm2205_vm3, %v8020_v28  ;;  %v1295_v39 = vadd.f32 %v7464_v16, %v1294_v29  ;;  %v6811_v40 = vmul.f32 -1.442695, %v8027_v33  ;;  %v6865_v42 = vor.u32 %v7308_v35, %v6864_v1  ;;  %v8103_v30 = vpop.permute.xlu0 %2424 }
 0x22a   : > { %2813 = vrot.lane.b32.xlu0 %v7956_v45, %s7654_s27  ;;  %v7468_v43 = vpop.eup %7467  ;;  %v8036_v34 = vadd.f32 1.0, %v7466_v38  ;;  %2215 = vst.msk [vmem:[#allocation3 + $0x6c] sm:$0xf] %vm2205_vm3, %v8029_v36 }
 0x22b   : > { %4479 = vrot.lane.b32.xlu2 %v2321_v41, %s7655_s28  ;;  %3188 = vrot.lane.b32.xlu1 %v7967_v51, %s7655_s28  ;;  %v1299_v46 = vsel %vm8023_vm4, %v7464_v16, %v1295_v39  ;;  %v1307_v47 = vmul.f32 %v7468_v43, %v8004_v18  ;;  %7469 = vpow2.f32 %v6811_v40  ;;  %3511 = vst.msk [vmem:[#allocation3 + $0x4c] sm:$0xf] %vm2205_vm3, %v3457_v37  ;;  %vm1312_vm7 = vweird.f32 %v7468_v43 }
 0x22c   : > { %7250 = vmatmul.msk.bf16.vlgmr.msra.gmra.mxu1 %vm382_vm0, %v6865_v42  ;;  %v1304_v48 = vsel %vm1301_vm5, %v1303_v32, %v1299_v46  ;;  %7471 = vrcp.f32 %v8036_v34  ;;  %vm8060_vm8 = vmor %vm1311_vm6, %vm1312_vm7  ;;  %v1332_v12 = vand.u32 2147483648, %v8036_v34  ;;  %vm1326_vm11 = vweird.f32 %v8036_v34  ;;  %v2097_v46 = vld [vmem:[#allocation2 + $0x7] sm:$0xff] }
 0x22d   : > { %v1989_v50 = vmul.f32 %v1304_v48, %v7934_v24  ;;  %v1308_v52 = vsub.f32 1.0, %v1307_v47  ;;  %v1318_v24 = vor.u32 1.1754944e-38, %v1317_v17  ;;  %v2153_v18 = vpack.c.bf16 %v2099_v13, %v2099_v13  ;;  %v2269_v17 = vld [vmem:[#allocation2 + $0x50] sm:$0xff] }
 0x22e   : > { %v4696_v55 = vld [vmem:[#allocation2 + $0x51] sm:$0xff]  ;;  %v1333_v23 = vor.u32 1.1754944e-38, %v1332_v12  ;;  %v2151_v53 = vpack.c.bf16 %v2097_v46, %v2097_v46  ;;  %vm2963_vm6 = vcmask 781824  }
 0x22f   : > { %v8053_v56 = vpack.c.bf16 %v4696_v55, %v4696_v55  ;;  %2051 = vst.msk [vmem:[#allocation2 + $0x60] sm:$0xff] %vm382_vm0, %v1989_v50  ;;  %v1309_v57 = vmul.f32 %v7468_v43, %v1308_v52  ;;  %v2107_v59 = vld [vmem:[#allocation2 + $0x57] sm:$0xff] }
 0x230   : > { %v3404_v61 = vld [vmem:[#allocation2 + $0x58] sm:$0xff]  ;;  %v8064_v63 = vpop.f32.mrf.mxu2  ;;  %v2161_v0 = vpack.c.bf16 %v2107_v59, %v2107_v59  ;;  %v6876_v27 = vld [vmem:[#allocation3 + $0x20] sm:$0xf]  ;;  %2208 = vst.msk [vmem:[#allocation3 + $0x18] sm:$0xf] %vm2205_vm3, %v2153_v18  ;;  %v8140_v59 = vpack.c.bf16 %v2269_v17, %v2269_v17 }
 0x231   : > { %v3458_v2 = vpack.c.bf16 %v3404_v61, %v3404_v61  ;;  %v7470_v3 = vpop.eup %7469  ;;  %4804 = vst.msk [vmem:[#allocation3 + $0x2c] sm:$0xf] %vm2205_vm3, %v8053_v56  ;;  %v1310_v4 = vadd.f32 %v7468_v43, %v1309_v57  ;;  %v6812_v6 = vmul.f32 -1.442695, %v8064_v63  ;;  %v2802_v12 = vpop.permute.xlu0 %2801  ;;  %v7393_v18 = vld [vmem:[%s10868_s7 + $0x30] sm:$0xff] }
 0x232   : > { %4101 = vrot.lane.b32.xlu0 %v7967_v51, %s7654_s27  ;;  %v7472_v7 = vpop.eup %7471  ;;  %v8073_v8 = vadd.f32 1.0, %v7470_v3  ;;  %2216 = vst.msk [vmem:[#allocation3 + $0x78] sm:$0xf] %vm2205_vm3, %v2161_v0  ;;  %v7290_v51 = vld [vmem:[%s7818_s25 + $0x58] sm:$0xff] }
 0x233   : > { %3727 = vrot.lane.b32.xlu1 %v7956_v45, %s7653_s26  ;;  %2438 = vrot.lane.b32.xlu2 %v8066_v44, %s7653_s26  ;;  %v1314_v9 = vsel %vm8060_vm8, %v7468_v43, %v1310_v4  ;;  %v1322_v41 = vmul.f32 %v7472_v7, %v8036_v34  ;;  %7473 = vpow2.f32 %v6812_v6  ;;  %3512 = vst.msk [vmem:[#allocation3 + $0x58] sm:$0xf] %vm2205_vm3, %v3458_v2  ;;  %v1330_v45 = vand.u32 2147483647, %v8036_v34  ;;  %v2098_v4 = vld [vmem:[#allocation2 + $0xf] sm:$0xff] }
 0x234   : > { %v1319_v14 = vsel %vm1316_vm10, %v1318_v24, %v1314_v9  ;;  %7475 = vrcp.f32 %v8073_v8  ;;  %vm1327_vm12 = vweird.f32 %v7472_v7  ;;  %6784 = vmatmul.msk.bf16.gmra.mxu2 %vm729_vm9, %v7290_v51  ;;  %2587 = vst.msk [vmem:[#allocation3 + $0x18] sm:$0xf] %vm2584_vm13, %v2427_v25  ;;  %vm1341_vm1 = vweird.f32 %v8073_v8  ;;  %v2804_v25 = vpop.permute.xlu1 %2803 }
 0x235   : > { %v1990_v15 = vmul.f32 %v1319_v14, %v7965_v49  ;;  %v1323_v16 = vsub.f32 1.0, %v1322_v41  ;;  %vm8096_vm14 = vmor %vm1326_vm11, %vm1327_vm12  ;;  %vm8109_vm15 = vcmp.eq.f32.partialorder %v1330_v45, 8.507059e+37  ;;  %v1345_v47 = vand.u32 2147483647, %v8073_v8  ;;  %2206 = vst.msk [vmem:[#allocation3] sm:$0xf] %vm2205_vm3, %v2151_v53 }
 0x236   : > { %v4697_v19 = vld [vmem:[#allocation2 + $0x59] sm:$0xff]  ;;  %v1347_v48 = vand.u32 2147483648, %v8073_v8  ;;  %2585 = vst.msk [vmem:[#allocation3] sm:$0xf] %vm2584_vm13, %v8056_v58  ;;  %v2152_v41 = vpack.c.bf16 %v2098_v4, %v2098_v4 }
 0x237   : > { %v3942_v20 = vld [vmem:[#allocation2 + $0x5f] sm:$0xff]  ;;  %v8091_v21 = vpack.c.bf16 %v4697_v19, %v4697_v19  ;;  %2052 = vst.msk [vmem:[#allocation2 + $0x68] sm:$0xff] %vm382_vm0, %v1990_v15  ;;  %v1324_v22 = vmul.f32 %v7472_v7, %v1323_v16  ;;  %vm8148_vm5 = vcmp.eq.f32.partialorder %v1345_v47, 8.507059e+37 }
 0x238   : > { %v3405_v26 = vld [vmem:[#allocation2 + $0x60] sm:$0xff]  ;;  %v8100_v60 = vpop.f32.mrf.mxu2  ;;  %v7311_v29 = vld [vmem:[#allocation3 + $0x28] sm:$0xf0]  ;;  %v8105_v31 = vpack.c.bf16 %v3942_v20, %v3942_v20  ;;  %v1348_v24 = vor.u32 1.1754944e-38, %v1347_v48  ;;  %2964 = vst.msk [vmem:[#allocation3] sm:$0xf] %vm2963_vm6, %v2802_v12 }
 0x239   : > { %v3459_v32 = vpack.c.bf16 %v3405_v26, %v3405_v26  ;;  %v7474_v1 = vpop.eup %7473  ;;  %4805 = vst.msk [vmem:[#allocation3 + $0x38] sm:$0xf] %vm2205_vm3, %v8091_v21  ;;  %v1325_v35 = vadd.f32 %v7472_v7, %v1324_v22  ;;  %v6813_v38 = vmul.f32 -1.442695, %v8100_v60  ;;  %v6877_v39 = vor.u32 %v7311_v29, %v6876_v27  ;;  %v7291_v48 = vld [vmem:[%s7818_s25 + $0x60] sm:$0xff] }
 0x23a   : > { %3729 = vrot.lane.b32.xlu0 %v7989_v5, %s7653_s26  ;;  %v7476_v40 = vpop.eup %7475  ;;  %v8116_v42 = vadd.f32 1.0, %v7474_v1  ;;  %2217 = vst.msk [vmem:[#allocation3 + $0x84] sm:$0xf] %vm2205_vm3, %v8105_v31 }
 0x23b   : > { %2815 = vrot.lane.b32.xlu1 %v7989_v5, %s7654_s27  ;;  %3190 = vrot.lane.b32.xlu2 %v7998_v11, %s7655_s28  ;;  %v1329_v43 = vsel %vm8096_vm14, %v7472_v7, %v1325_v35  ;;  %v1337_v34 = vmul.f32 %v7476_v40, %v8073_v8  ;;  %7477 = vpow2.f32 %v6813_v38  ;;  %3513 = vst.msk [vmem:[#allocation3 + $0x64] sm:$0xf] %vm2205_vm3, %v3459_v32  ;;  %vm1342_vm2 = vweird.f32 %v7476_v40  ;;  %v7394_v7 = vld [vmem:[%s10868_s7 + $0x38] sm:$0xff] }
 0x23c   : > { %7251 = vmatmul.msk.bf16.gmra.mxu1 %vm382_vm0, %v6877_v39  ;;  %v1334_v5 = vsel %vm8109_vm15, %v1333_v23, %v1329_v43  ;;  %7479 = vrcp.f32 %v8116_v42  ;;  %vm8144_vm4 = vmor %vm1341_vm1, %vm1342_vm2  ;;  %v1362_v45 = vand.u32 2147483648, %v8116_v42  ;;  %5593 = vmatpush.bf16.msra.mxu3 %v7394_v7  ;;  %vm1356_vm7 = vweird.f32 %v8116_v42  ;;  %2207 = vst.msk [vmem:[#allocation3 + $0xc] sm:$0xf] %vm2205_vm3, %v2152_v41  ;;  %v7392_v43 = vld [vmem:[%s10868_s7 + $0x28] sm:$0xff] }
 0x23d   : > { %v1991_v50 = vmul.f32 %v1334_v5, %v7996_v10  ;;  %v1338_v52 = vsub.f32 1.0, %v1337_v34  ;;  %v1360_v16 = vand.u32 2147483647, %v8116_v42  ;;  %2586 = vst.msk [vmem:[#allocation3 + $0xc] sm:$0xf] %vm2584_vm13, %v8103_v30 }
 0x23e   : > { %v4698_v54 = vld [vmem:[#allocation2 + $0x61] sm:$0xff]  ;;  %v1363_v23 = vor.u32 1.1754944e-38, %v1362_v45  ;;  %2965 = vst.msk [vmem:[#allocation3 + $0xc] sm:$0xf] %vm2963_vm6, %v2804_v25 }
 0x23f   : > { %v8137_v55 = vpack.c.bf16 %v4698_v54, %v4698_v54  ;;  %2053 = vst.msk [vmem:[#allocation2 + $0x70] sm:$0xff] %vm382_vm0, %v1991_v50  ;;  %v1339_v57 = vmul.f32 %v7476_v40, %v1338_v52  ;;  %v3027_v61 = vld [vmem:[#allocation2 + $0x67] sm:$0xff]  ;;  %vm8216_vm11 = vcmp.eq.f32.partialorder %v1360_v16, 8.507059e+37  ;;  %v2270_v54 = vld [vmem:[#allocation2 + $0x58] sm:$0xff] }
 0x240   : > { %v8153_v0 = vpop.f32.mrf.mxu2  ;;  %v8173_v51 = vpack.c.bf16 %v3027_v61, %v3027_v61  ;;  %v3406_v58 = vld [vmem:[#allocation2 + $0x68] sm:$0xff]  ;;  %5594 = vmatpush.bf16.msra.mxu3 %v7393_v18  ;;  %v8262_v4 = vpack.c.bf16 %v2270_v54, %v2270_v54  ;;  %v3941_v18 = vld [vmem:[#allocation2 + $0x57] sm:$0xff] }
 0x241   : > { %v7478_v2 = vpop.eup %7477  ;;  %4806 = vst.msk [vmem:[#allocation3 + $0x44] sm:$0xf] %vm2205_vm3, %v8137_v55  ;;  %v1340_v3 = vadd.f32 %v7476_v40, %v1339_v57  ;;  %v6814_v6 = vmul.f32 -1.442695, %v8153_v0  ;;  %v3460_v26 = vpack.c.bf16 %v3406_v58, %v3406_v58  ;;  %v6888_v29 = vld [vmem:[#allocation3 + $0x38] sm:$0xf] }
 0x242   : > { %2440 = vrot.lane.b32.xlu0 %v8140_v59, %s7653_s26  ;;  %v8163_v8 = vpop.eup %7479  ;;  %v8165_v9 = vadd.f32 1.0, %v7478_v2  ;;  %2218 = vst.msk [vmem:[#allocation3 + $0x90] sm:$0xf] %vm2205_vm3, %v8173_v51  ;;  %v7391_v57 = vld [vmem:[%s10868_s7 + $0x20] sm:$0xff] }
 0x243   : > { %4481 = vrot.lane.b32.xlu1 %v8066_v44, %s7655_s28  ;;  %4103 = vrot.lane.b32.xlu2 %v7998_v11, %s7654_s27  ;;  %v1344_v13 = vsel %vm8144_vm4, %v7476_v40, %v1340_v3  ;;  %v1352_v14 = vmul.f32 %v8163_v8, %v8116_v42  ;;  %7481 = vpow2.f32 %v6814_v6  ;;  %vm1357_vm8 = vweird.f32 %v8163_v8  ;;  %3514 = vst.msk [vmem:[#allocation3 + $0x70] sm:$0xf] %vm2205_vm3, %v3460_v26 }
 0x244   : > { %v1349_v11 = vsel %vm8148_vm5, %v1348_v24, %v1344_v13  ;;  %7483 = vrcp.f32 %v8165_v9  ;;  %vm8204_vm10 = vmor %vm1356_vm7, %vm1357_vm8  ;;  %5595 = vmatpush.bf16.msra.mxu3 %v7392_v43  ;;  %vm1371_vm12 = vweird.f32 %v8165_v9  ;;  %v1377_v17 = vand.u32 2147483648, %v8165_v9  ;;  %6785 = vmatmul.msk.bf16.gmra.mxu2 %vm729_vm9, %v7291_v48 }
 0x245   : > { %v1992_v44 = vmul.f32 %v1349_v11, %v8027_v33  ;;  %v1353_v15 = vsub.f32 1.0, %v1352_v14  ;;  %v1375_v53 = vand.u32 2147483647, %v8165_v9  ;;  %v7389_v11 = vld [vmem:[%s10868_s7 + $0x10] sm:$0xff] }
 0x246   : > { %v4699_v19 = vld [vmem:[#allocation2 + $0x69] sm:$0xff]  ;;  %v1378_v3 = vor.u32 1.1754944e-38, %v1377_v17 }
 0x247   : > { %v3028_v20 = vld [vmem:[#allocation2 + $0x6f] sm:$0xff]  ;;  %v8196_v22 = vpack.c.bf16 %v4699_v19, %v4699_v19  ;;  %2054 = vst.msk [vmem:[#allocation2 + $0x78] sm:$0xff] %vm382_vm0, %v1992_v44  ;;  %v1354_v33 = vmul.f32 %v8163_v8, %v1353_v15  ;;  %vm1376_vm1 = vcmp.eq.f32.partialorder %v1375_v53, 8.507059e+37 }
 0x248   : > { %v3407_v49 = vld [vmem:[#allocation2 + $0x70] sm:$0xff]  ;;  %v8208_v32 = vpop.f32.mrf.mxu2  ;;  %v8211_v1 = vpack.c.bf16 %v3028_v20, %v3028_v20  ;;  %5596 = vmatpush.bf16.msra.mxu3 %v7391_v57 }
 0x249   : > { %v7314_v30 = vld [vmem:[#allocation3 + $0x40] sm:$0xf0]  ;;  %v3461_v35 = vpack.c.bf16 %v3407_v49, %v3407_v49  ;;  %v7482_v37 = vpop.eup %7481  ;;  %4807 = vst.msk [vmem:[#allocation3 + $0x50] sm:$0xf] %vm2205_vm3, %v8196_v22  ;;  %v1355_v38 = vadd.f32 %v8163_v8, %v1354_v33  ;;  %v6815_v42 = vmul.f32 -1.442695, %v8208_v32  ;;  %v3995_v49 = vpack.c.bf16 %v3941_v18, %v3941_v18 }
 0x24a   : > { %3192 = vrot.lane.b32.xlu0 %v8029_v36, %s7655_s28  ;;  %v6889_v40 = vor.u32 %v7314_v30, %v6888_v29  ;;  %v7484_v34 = vpop.eup %7483  ;;  %v8230_v46 = vadd.f32 1.0, %v7482_v37  ;;  %2219 = vst.msk [vmem:[#allocation3 + $0x9c] sm:$0xf] %vm2205_vm3, %v8211_v1 }
 0x24b   : > { %3731 = vrot.lane.b32.xlu1 %v8020_v28, %s7653_s26  ;;  %2817 = vrot.lane.b32.xlu2 %v8020_v28, %s7654_s27  ;;  %v1359_v5 = vsel %vm8204_vm10, %v8163_v8, %v1355_v38  ;;  %v1367_v47 = vmul.f32 %v7484_v34, %v8165_v9  ;;  %7485 = vpow2.f32 %v6815_v42  ;;  %3515 = vst.msk [vmem:[#allocation3 + $0x7c] sm:$0xf] %vm2205_vm3, %v3461_v35  ;;  %vm1372_vm14 = vweird.f32 %v7484_v34  ;;  %v7390_v9 = vld [vmem:[%s10868_s7 + $0x18] sm:$0xff]  ;;  %v7388_v38 = vld [vmem:[%s10868_s7 + $0x8] sm:$0xff] }
 0x24c   : > { %7252 = vmatmul.msk.bf16.gmra.mxu1 %vm382_vm0, %v6889_v40  ;;  %v1364_v28 = vsel %vm8216_vm11, %v1363_v23, %v1359_v5  ;;  %7487 = vrcp.f32 %v8230_v46  ;;  %vm8258_vm15 = vmor %vm1371_vm12, %vm1372_vm14  ;;  %5597 = vmatpush.bf16.msra.mxu3 %v7390_v9  ;;  %vm1386_vm2 = vweird.f32 %v8230_v46  ;;  %v1392_v58 = vand.u32 2147483648, %v8230_v46 }
 0x24d   : > { %v1993_v50 = vmul.f32 %v1364_v28, %v8064_v63  ;;  %v1368_v52 = vsub.f32 1.0, %v1367_v47  ;;  %v1390_v16 = vand.u32 2147483647, %v8230_v46  ;;  %v2271_v47 = vld [vmem:[#allocation2 + $0x60] sm:$0xff]  ;;  %vm3342_vm14 = vcmask 1044224  }
 0x24e   : > { %v4700_v61 = vld [vmem:[#allocation2 + $0x71] sm:$0xff]  ;;  %v1393_v26 = vor.u32 1.1754944e-38, %v1392_v58 }
 0x24f   : > { %v3029_v62 = vld [vmem:[#allocation2 + $0x77] sm:$0xff]  ;;  %v8253_v10 = vpack.c.bf16 %v4700_v61, %v4700_v61  ;;  %2055 = vst.msk [vmem:[#allocation2 + $0x80] sm:$0xff] %vm382_vm0, %v1993_v50  ;;  %v1369_v24 = vmul.f32 %v7484_v34, %v1368_v52  ;;  %vm1391_vm7 = vcmp.eq.f32.partialorder %v1390_v16, 8.507059e+37  ;;  %v7387_v50 = vld [vmem:[%s10868_s7] sm:$0xff]  ;;  %v8333_v61 = vpack.c.bf16 %v2271_v47, %v2271_v47 }
 0x250   : > { %v3408_v63 = vld [vmem:[#allocation2 + $0x78] sm:$0xff]  ;;  %v8264_v6 = vpack.c.bf16 %v3029_v62, %v3029_v62  ;;  %5598 = vmatpush.bf16.msra.mxu3 %v7389_v11  ;;  %v6900_v27 = vld [vmem:[#allocation3 + $0x50] sm:$0xf]  ;;  %v8304_v37 = vpop.f32.mrf.mxu2 }
 0x251   : > { %v3462_v7 = vpack.c.bf16 %v3408_v63, %v3408_v63  ;;  %v7486_v8 = vpop.eup %7485  ;;  %4808 = vst.msk [vmem:[#allocation3 + $0x5c] sm:$0xf] %vm2205_vm3, %v8253_v10  ;;  %v1370_v41 = vadd.f32 %v7484_v34, %v1369_v24  ;;  %v6816_v40 = vmul.f32 -1.442695, %v8304_v37  ;;  %v8338_v24 = vpop.permute.xlu0 %4579 }
 0x252   : > { %4105 = vrot.lane.b32.xlu0 %v8029_v36, %s7654_s27  ;;  %v7488_v12 = vpop.eup %7487  ;;  %v8277_v13 = vadd.f32 1.0, %v7486_v8  ;;  %2220 = vst.msk [vmem:[#allocation3 + $0xa8] sm:$0xf] %vm2205_vm3, %v8264_v6 }
 0x253   : > { %4483 = vrot.lane.b32.xlu2 %v8140_v59, %s7655_s28  ;;  %2442 = vrot.lane.b32.xlu1 %v8262_v4, %s7653_s26  ;;  %v1374_v14 = vsel %vm8258_vm15, %v7484_v34, %v1370_v41  ;;  %v1382_v45 = vmul.f32 %v7488_v12, %v8230_v46  ;;  %3516 = vst.msk [vmem:[#allocation3 + $0x88] sm:$0xf] %vm2205_vm3, %v3462_v7  ;;  %vm1387_vm4 = vweird.f32 %v7488_v12 }
 0x254   : > { %v2806_v36 = vpop.permute.xlu2 %2805  ;;  %v1379_v59 = vsel %vm1376_vm1, %v1378_v3, %v1374_v14  ;;  %7489 = vrcp.f32 %v8277_v13  ;;  %vm8295_vm5 = vmor %vm1386_vm2, %vm1387_vm4  ;;  %5599 = vmatpush.bf16.msra.mxu3 %v7388_v38  ;;  %vm1401_vm8 = vweird.f32 %v8277_v13  ;;  %v1407_v5 = vand.u32 2147483648, %v8277_v13 }
 0x255   : > { %2966 = vst.msk [vmem:[#allocation3 + $0x18] sm:$0xf] %vm2963_vm6, %v2806_v36  ;;  %v1994_v44 = vmul.f32 %v1379_v59, %v8100_v60  ;;  %v1383_v15 = vsub.f32 1.0, %v1382_v45  ;;  %7491 = vpow2.f32 %v6816_v40  ;;  %v1405_v17 = vand.u32 2147483647, %v8277_v13 }
 0x256   : > { %v4701_v19 = vld [vmem:[#allocation2 + $0x79] sm:$0xff]  ;;  %v1408_v57 = vor.u32 1.1754944e-38, %v1407_v5 }
 0x257   : > { %v3030_v20 = vld [vmem:[#allocation2 + $0x7f] sm:$0xff]  ;;  %v4755_v33 = vpack.c.bf16 %v4701_v19, %v4701_v19  ;;  %2056 = vst.msk [vmem:[#allocation2 + $0x88] sm:$0xff] %vm382_vm0, %v1994_v44  ;;  %v1384_v23 = vmul.f32 %v7488_v12, %v1383_v15  ;;  %vm1406_vm12 = vcmp.eq.f32.partialorder %v1405_v17, 8.507059e+37  ;;  %v2272_v15 = vld [vmem:[#allocation2 + $0x68] sm:$0xff] }
 0x258   : > { %v7317_v60 = vld [vmem:[#allocation3 + $0x58] sm:$0xf0]  ;;  %v8299_v29 = vpack.c.bf16 %v3030_v20, %v3030_v20  ;;  %5600 = vmatpush.bf16.msra.mxu3 %v7387_v50  ;;  %v8340_v63 = vpop.f32.mrf.mxu2 }
 0x259   : > { %4809 = vst.msk [vmem:[#allocation3 + $0x68] sm:$0xf] %vm2205_vm3, %v4755_v33  ;;  %v1385_v30 = vadd.f32 %v7488_v12, %v1384_v23  ;;  %v6901_v35 = vor.u32 %v7317_v60, %v6900_v27  ;;  %v6817_v3 = vmul.f32 -1.442695, %v8340_v63  ;;  %v2326_v23 = vpack.c.bf16 %v2272_v15, %v2272_v15 }
 0x25a   : > { %2819 = vrot.lane.b32.xlu0 %v8053_v56, %s7654_s27  ;;  %v7490_v39 = vpop.eup %7489  ;;  %2221 = vst.msk [vmem:[#allocation3 + $0xb4] sm:$0xf] %vm2205_vm3, %v8299_v29 }
 0x25b   : > { %4107 = vrot.lane.b32.xlu2 %v3995_v49, %s7654_s27  ;;  %3194 = vrot.lane.b32.xlu1 %v3995_v49, %s7655_s28  ;;  %v1389_v42 = vsel %vm8295_vm5, %v7488_v12, %v1385_v30  ;;  %v1397_v43 = vmul.f32 %v7490_v39, %v8277_v13  ;;  %vm1402_vm10 = vweird.f32 %v7490_v39  ;;  %v7492_v2 = vpop.eup %7491  ;;  %7493 = vpow2.f32 %v6817_v3  ;;  %v3409_v30 = vld [vmem:[#allocation2 + $0x80] sm:$0xff]  ;;  %v7401_v3 = vld [vmem:[%s10868_s7 + $0x70] sm:$0xff] }
 0x25c   : > { %7253 = vmatmul.msk.bf16.gmra.mxu1 %vm382_vm0, %v6901_v35  ;;  %v1394_v34 = vsel %vm1391_vm7, %v1393_v26, %v1389_v42  ;;  %vm8329_vm11 = vmor %vm1401_vm8, %vm1402_vm10  ;;  %v1133_v8 = vadd.f32 1.0, %v7492_v2 }
 0x25d   : > { %v2431_v46 = vpop.permute.xlu2 %2430  ;;  %v1995_v48 = vmul.f32 %v1394_v34, %v8153_v0  ;;  %v1398_v28 = vsub.f32 1.0, %v1397_v43  ;;  %v7402_v34 = vld [vmem:[%s10868_s7 + $0x78] sm:$0xff] }
 0x25e   : > { %2589 = vst.msk [vmem:[#allocation3 + $0x30] sm:$0xf] %vm2584_vm13, %v2431_v46  ;;  %v4702_v52 = vld [vmem:[#allocation2 + $0x81] sm:$0xff]  ;;  %7495 = vrcp.f32 %v1133_v8  ;;  %v1422_v18 = vand.u32 2147483648, %v1133_v8  ;;  %vm1416_vm15 = vweird.f32 %v1133_v8  ;;  %v1420_v20 = vand.u32 2147483647, %v1133_v8  ;;  %5737 = vmatpush.bf16.msra.mxu0 %v7402_v34 }
 0x25f   : > { %v4756_v53 = vpack.c.bf16 %v4702_v52, %v4702_v52  ;;  %2057 = vst.msk [vmem:[#allocation2 + $0x90] sm:$0xff] %vm382_vm0, %v1995_v48  ;;  %v1399_v54 = vmul.f32 %v7490_v39, %v1398_v28  ;;  %v3947_v25 = vld [vmem:[#allocation2 + $0x87] sm:$0xff]  ;;  %v3463_v48 = vpack.c.bf16 %v3409_v30, %v3409_v30 }
 0x260   : > { %v6912_v13 = vld [vmem:[#allocation3 + $0x68] sm:$0xf]  ;;  %v8366_v27 = vpop.f32.mrf.mxu2  ;;  %v8368_v60 = vpack.c.bf16 %v3947_v25, %v3947_v25  ;;  %v1423_v38 = vor.u32 1.1754944e-38, %v1422_v18  ;;  %vm8383_vm4 = vcmp.eq.f32.partialorder %v1420_v20, 8.507059e+37  ;;  %v3410_v46 = vld [vmem:[#allocation2 + $0x88] sm:$0xff]  ;;  %v2273_v18 = vld [vmem:[#allocation2 + $0x70] sm:$0xff] }
 0x261   : > { %4810 = vst.msk [vmem:[#allocation3 + $0x74] sm:$0xf] %vm2205_vm3, %v4756_v53  ;;  %v1400_v62 = vadd.f32 %v7490_v39, %v1399_v54  ;;  %v7494_v45 = vpop.eup %7493 }
 0x262   : > { %3733 = vrot.lane.b32.xlu0 %v8053_v56, %s7653_s26  ;;  %v8360_v59 = vadd.f32 1.0, %v7494_v45  ;;  %2222 = vst.msk [vmem:[#allocation3 + $0xc0] sm:$0xf] %vm2205_vm3, %v8368_v60  ;;  %5738 = vmatpush.bf16.msra.mxu0 %v7401_v3 }
 0x263   : > { %4485 = vrot.lane.b32.xlu1 %v8262_v4, %s7655_s28  ;;  %2444 = vrot.lane.b32.xlu2 %v8333_v61, %s7653_s26  ;;  %v1404_v7 = vsel %vm8329_vm11, %v7490_v39, %v1400_v62  ;;  %v6818_v39 = vmul.f32 -1.442695, %v8366_v27  ;;  %3517 = vst.msk [vmem:[#allocation3 + $0x94] sm:$0xf] %vm2205_vm3, %v3463_v48  ;;  %v7396_v48 = vld [vmem:[%s10868_s7 + $0x48] sm:$0xff] }
 0x264   : > { %v1409_v41 = vsel %vm1406_vm12, %v1408_v57, %v1404_v7  ;;  %7497 = vrcp.f32 %v8360_v59  ;;  %v1435_v54 = vand.u32 2147483647, %v8360_v59  ;;  %v1437_v0 = vand.u32 2147483648, %v8360_v59 }
 0x265   : > { %v2433_v9 = vpop.permute.xlu2 %2432  ;;  %v1996_v56 = vmul.f32 %v1409_v41, %v8208_v32  ;;  %v7496_v32 = vpop.eup %7495  ;;  %7499 = vpow2.f32 %v6818_v39  ;;  %v3464_v57 = vpack.c.bf16 %v3410_v46, %v3410_v46  ;;  %vm1431_vm5 = vweird.f32 %v8360_v59 }
 0x266   : > { %2590 = vst.msk [vmem:[#allocation3 + $0x3c] sm:$0xf] %vm2584_vm13, %v2433_v9  ;;  %v4703_v12 = vld [vmem:[#allocation2 + $0x89] sm:$0xff]  ;;  %v1412_v16 = vmul.f32 %v7496_v32, %v1133_v8  ;;  %vm1417_vm1 = vweird.f32 %v7496_v32  ;;  %vm1436_vm10 = vcmp.eq.f32.partialorder %v1435_v54, 8.507059e+37 }
 0x267   : > { %v4757_v4 = vpack.c.bf16 %v4703_v12, %v4703_v12  ;;  %2058 = vst.msk [vmem:[#allocation2 + $0x98] sm:$0xff] %vm382_vm0, %v1996_v56  ;;  %v3948_v26 = vld [vmem:[#allocation2 + $0x8f] sm:$0xff]  ;;  %vm8372_vm2 = vmor %vm1416_vm15, %vm1417_vm1  ;;  %v1438_v56 = vor.u32 1.1754944e-38, %v1437_v0 }
 0x268   : > { %v7320_v14 = vld [vmem:[#allocation3 + $0x70] sm:$0xf0]  ;;  %v8377_v40 = vpack.c.bf16 %v3948_v26, %v3948_v26  ;;  %v8413_v41 = vpop.f32.mrf.mxu2  ;;  %3518 = vst.msk [vmem:[#allocation3 + $0xa0] sm:$0xf] %vm2205_vm3, %v3464_v57  ;;  %v7398_v26 = vld [vmem:[%s10868_s7 + $0x58] sm:$0xff] }
 0x269   : > { %4811 = vst.msk [vmem:[#allocation3 + $0x80] sm:$0xf] %vm2205_vm3, %v4757_v4  ;;  %v6913_v36 = vor.u32 %v7320_v14, %v6912_v13  ;;  %v6819_v13 = vmul.f32 -1.442695, %v8413_v41 }
 0x26a   : > { %4109 = vrot.lane.b32.xlu0 %v8105_v31, %s7654_s27  ;;  %v7498_v5 = vpop.eup %7497  ;;  %2223 = vst.msk [vmem:[#allocation3 + $0xcc] sm:$0xf] %vm2205_vm3, %v8377_v40 }
 0x26b   : > { %2821 = vrot.lane.b32.xlu1 %v8091_v21, %s7654_s27  ;;  %3196 = vrot.lane.b32.xlu2 %v8105_v31, %s7655_s28  ;;  %v3181_v11 = vpop.permute.xlu0 %3180  ;;  %v1413_v31 = vsub.f32 1.0, %v1412_v16  ;;  %v1427_v52 = vmul.f32 %v7498_v5, %v8360_v59  ;;  %vm1432_vm7 = vweird.f32 %v7498_v5  ;;  %v7500_v9 = vpop.eup %7499  ;;  %7501 = vpow2.f32 %v6819_v13 }
 0x26c   : > { %7254 = vmatmul.msk.bf16.gmra.mxu1 %vm382_vm0, %v6913_v36  ;;  %3343 = vst.msk [vmem:[#allocation3] sm:$0xf] %vm3342_vm14, %v3181_v11  ;;  %vm8417_vm8 = vmor %vm1431_vm5, %vm1432_vm7  ;;  %v1135_v14 = vadd.f32 1.0, %v7500_v9  ;;  %v7400_v36 = vld [vmem:[%s10868_s7 + $0x68] sm:$0xff] }
 0x26d   : > { %v2429_v58 = vpop.permute.xlu1 %2428  ;;  %v3185_v44 = vpop.permute.xlu2 %3184  ;;  %v1414_v49 = vmul.f32 %v7496_v32, %v1413_v31  ;;  %v1428_v62 = vsub.f32 1.0, %v1427_v52  ;;  %5739 = vmatpush.bf16.msra.mxu0 %v7400_v36  ;;  %v7399_v31 = vld [vmem:[%s10868_s7 + $0x60] sm:$0xff]  ;;  %v3411_v36 = vld [vmem:[#allocation2 + $0x90] sm:$0xff] }
 0x26e   : > { %2588 = vst.msk [vmem:[#allocation3 + $0x24] sm:$0xf] %vm2584_vm13, %v2429_v58  ;;  %v4704_v19 = vld [vmem:[#allocation2 + $0x91] sm:$0xff]  ;;  %7503 = vrcp.f32 %v1135_v14  ;;  %vm1446_vm11 = vweird.f32 %v1135_v14  ;;  %v1450_v43 = vand.u32 2147483647, %v1135_v14 }
 0x26f   : > { %3345 = vst.msk [vmem:[#allocation3 + $0x18] sm:$0xf] %vm3342_vm14, %v3185_v44  ;;  %v4758_v33 = vpack.c.bf16 %v4704_v19, %v4704_v19  ;;  %v1415_v42 = vadd.f32 %v7496_v32, %v1414_v49  ;;  %v1429_v7 = vmul.f32 %v7498_v5, %v1428_v62 }
 0x270   : > { %v6924_v2 = vld [vmem:[#allocation3 + $0x80] sm:$0xf]  ;;  %vm1451_vm1 = vcmp.eq.f32.partialorder %v1450_v43, 8.507059e+37 }
 0x271   : > { %4812 = vst.msk [vmem:[#allocation3 + $0x8c] sm:$0xf] %vm2205_vm3, %v4758_v33  ;;  %v1419_v50 = vsel %vm8372_vm2, %v7496_v32, %v1415_v42  ;;  %v1430_v4 = vadd.f32 %v7498_v5, %v1429_v7  ;;  %5740 = vmatpush.bf16.msra.mxu0 %v7399_v31  ;;  %v7502_v25 = vpop.eup %7501 }
 0x272   : > { %2446 = vrot.lane.b32.xlu0 %v2326_v23, %s7653_s26  ;;  %v1424_v53 = vsel %vm8383_vm4, %v1423_v38, %v1419_v50  ;;  %v1136_v49 = vadd.f32 1.0, %v7502_v25 }
 0x273   : > { %3735 = vrot.lane.b32.xlu1 %v8091_v21, %s7653_s26  ;;  %4487 = vrot.lane.b32.xlu2 %v8333_v61, %s7655_s28  ;;  %v7292_v21 = vld [vmem:[%s7818_s25 + $0x68] sm:$0xff]  ;;  %v1997_v61 = vmul.f32 %v1424_v53, %v8304_v37  ;;  %v1434_v59 = vsel %vm8417_vm8, %v7498_v5, %v1430_v4  ;;  %v6856_v58 = vld [vmem:[#allocation3] sm:$0xf] }
 0x274   : > { %v2808_v47 = vpop.permute.xlu0 %2807  ;;  %6786 = vmatmul.msk.bf16.gmra.mxu2 %vm729_vm9, %v7292_v21  ;;  %v1439_v15 = vsel %vm1436_vm10, %v1438_v56, %v1434_v59  ;;  %7505 = vrcp.f32 %v1136_v49  ;;  %vm1461_vm2 = vweird.f32 %v1136_v49  ;;  %v1467_v62 = vand.u32 2147483648, %v1136_v49  ;;  %v3033_v56 = vld [vmem:[#allocation2 + $0x97] sm:$0xff] }
 0x275   : > { %v3183_v28 = vpop.permute.xlu1 %3182  ;;  %2967 = vst.msk [vmem:[#allocation3 + $0x24] sm:$0xf] %vm2963_vm6, %v2808_v47  ;;  %v2812_v17 = vpop.permute.xlu2 %2811  ;;  %v1998_v19 = vmul.f32 %v1439_v15, %v8340_v63  ;;  %5741 = vmatpush.bf16.msra.mxu0 %v7398_v26  ;;  %v1465_v7 = vand.u32 2147483647, %v1136_v49  ;;  %v7293_v4 = vld [vmem:[%s7818_s25 + $0x70] sm:$0xff] }
 0x276   : > { %3344 = vst.msk [vmem:[#allocation3 + $0xc] sm:$0xf] %vm3342_vm14, %v3183_v28  ;;  %v7504_v63 = vpop.eup %7503 }
 0x277   : > { %2969 = vst.msk [vmem:[#allocation3 + $0x3c] sm:$0xf] %vm2963_vm6, %v2812_v17  ;;  %v1442_v35 = vmul.f32 %v7504_v63, %v1135_v14  ;;  %vm1447_vm12 = vweird.f32 %v7504_v63  ;;  %vm8489_vm7 = vcmp.eq.f32.partialorder %v1465_v7, 8.507059e+37  ;;  %v7294_v7 = vld [vmem:[%s7818_s25 + $0x78] sm:$0xff] }
 0x278   : > { %2059 = vst.msk [vmem:[#allocation2 + $0xa0] sm:$0xff] %vm382_vm0, %v1997_v61  ;;  %v7323_v8 = vld [vmem:[#allocation3 + $0x88] sm:$0xf0]  ;;  %vm8456_vm15 = vmor %vm1446_vm11, %vm1447_vm12 }
 0x279   : > { %v6925_v12 = vor.u32 %v7323_v8, %v6924_v2  ;;  %2060 = vst.msk [vmem:[#allocation2 + $0xa8] sm:$0xff] %vm382_vm0, %v1998_v19  ;;  %v1443_v42 = vsub.f32 1.0, %v1442_v35  ;;  %v2274_v61 = vld [vmem:[#allocation2 + $0x78] sm:$0xff]  ;;  %v7395_v8 = vld [vmem:[%s10868_s7 + $0x40] sm:$0xff] }
 0x27a   : > { %3198 = vrot.lane.b32.xlu0 %v8173_v51, %s7655_s28  ;;  %v7506_v17 = vpop.eup %7505  ;;  %v3412_v19 = vld [vmem:[#allocation2 + $0x98] sm:$0xff] }
 0x27b   : > { %4489 = vrot.lane.b32.xlu1 %v2326_v23, %s7655_s28  ;;  %2823 = vrot.lane.b32.xlu2 %v8137_v55, %s7654_s27  ;;  %v2327_v23 = vpack.c.bf16 %v2273_v18, %v2273_v18  ;;  %v1444_v46 = vmul.f32 %v7504_v63, %v1443_v42  ;;  %v1457_v53 = vmul.f32 %v7506_v17, %v1136_v49  ;;  %vm1462_vm4 = vweird.f32 %v7506_v17  ;;  %v2275_v42 = vld [vmem:[#allocation2 + $0x80] sm:$0xff] }
 0x27c   : > { %v3722_v45 = vpop.permute.xlu0 %3721  ;;  %7255 = vmatmul.msk.bf16.gmra.mxu1 %vm382_vm0, %v6925_v12  ;;  %v2328_v12 = vpack.c.bf16 %v2274_v61, %v2274_v61  ;;  %vm8480_vm5 = vmor %vm1461_vm2, %vm1462_vm4 }
 0x27d   : > { %3883 = vst.msk [vmem:[#allocation3 + $0x4] sm:$0xf] %vm2584_vm13, %v3722_v45  ;;  %v2810_v32 = vpop.permute.xlu1 %2809  ;;  %v4100_v11 = vpop.permute.xlu2 %4099  ;;  %v7307_v44 = vld [vmem:[#allocation3 + $0x8] sm:$0xf0]  ;;  %v1445_v28 = vadd.f32 %v7504_v63, %v1444_v46  ;;  %v1458_v3 = vsub.f32 1.0, %v1457_v53 }
 0x27e   : > { %2968 = vst.msk [vmem:[#allocation3 + $0x30] sm:$0xf] %vm2963_vm6, %v2810_v32  ;;  %v6857_v16 = vor.u32 %v7307_v44, %v6856_v58  ;;  %v3465_v58 = vpack.c.bf16 %v3411_v36, %v3411_v36  ;;  %v6868_v44 = vld [vmem:[#allocation3 + $0x18] sm:$0xf]  ;;  %v3570_v53 = vld [vmem:[#allocation2 + $0x79] sm:$0xff] }
 0x27f   : > { %4261 = vst.msk [vmem:[#allocation3 + $0x4] sm:$0xf] %vm2963_vm6, %v4100_v11  ;;  %v4705_v20 = vld [vmem:[#allocation2 + $0x99] sm:$0xff]  ;;  %v1449_v52 = vsel %vm8456_vm15, %v7504_v63, %v1445_v28  ;;  %v1459_v9 = vmul.f32 %v7506_v17, %v1458_v3  ;;  %v3466_v63 = vpack.c.bf16 %v3412_v19, %v3412_v19 }
 0x280   : > { %5601 = vmatmul.bf16.vlgmr.msra.gmra.mxu3 %v6857_v16  ;;  %v4759_v33 = vpack.c.bf16 %v4705_v20, %v4705_v20  ;;  %v4706_v34 = vld [vmem:[#allocation2 + $0xa1] sm:$0xff]  ;;  %3519 = vst.msk [vmem:[#allocation3 + $0xac] sm:$0xf] %vm2205_vm3, %v3465_v58 }
 0x281   : > { %v4760_v5 = vpack.c.bf16 %v4706_v34, %v4706_v34  ;;  %v1460_v45 = vadd.f32 %v7506_v17, %v1459_v9  ;;  %v3034_v59 = vld [vmem:[#allocation2 + $0x9f] sm:$0xff]  ;;  %3520 = vst.msk [vmem:[#allocation3 + $0xb8] sm:$0xf] %vm2205_vm3, %v3466_v63  ;;  %v8528_v34 = vpack.c.bf16 %v2275_v42, %v2275_v42  ;;  %v3414_v9 = vld [vmem:[#allocation2 + $0xa8] sm:$0xff] }
 0x282   : > { %3737 = vrot.lane.b32.xlu0 %v8137_v55, %s7653_s26  ;;  %4813 = vst.msk [vmem:[#allocation3 + $0x98] sm:$0xf] %vm2205_vm3, %v4759_v33  ;;  %v1452_v55 = vand.u32 2147483648, %v1135_v14  ;;  %v8485_v14 = vpack.c.bf16 %v3033_v56, %v3033_v56  ;;  %v3468_v36 = vpack.c.bf16 %v3414_v9, %v3414_v9 }
 0x283   : > { %4111 = vrot.lane.b32.xlu2 %v8173_v51, %s7654_s27  ;;  %2448 = vrot.lane.b32.xlu1 %v2327_v23, %s7653_s26  ;;  %v7397_v51 = vld [vmem:[%s10868_s7 + $0x50] sm:$0xff]  ;;  %4814 = vst.msk [vmem:[#allocation3 + $0xa4] sm:$0xf] %vm2205_vm3, %v4760_v5 }
 0x284   : > { %v2435_v30 = vpop.permute.xlu0 %2434  ;;  %v1453_v21 = vor.u32 1.1754944e-38, %v1452_v55  ;;  %5742 = vmatpush.bf16.msra.mxu0 %v7397_v51  ;;  %2224 = vst.msk [vmem:[#allocation3 + $0xd8] sm:$0xf] %vm2205_vm3, %v8485_v14  ;;  %6787 = vmatmul.msk.bf16.gmra.mxu2 %vm729_vm9, %v7293_v4 }
 0x285   : > { %v3724_v38 = vpop.permute.xlu1 %3723  ;;  %2591 = vst.msk [vmem:[#allocation3 + $0x48] sm:$0xf] %vm2584_vm13, %v2435_v30  ;;  %v8450_v39 = vpop.permute.xlu2 %4479 }
 0x286   : > { %3884 = vst.msk [vmem:[#allocation3 + $0x10] sm:$0xf] %vm2584_vm13, %v3724_v38  ;;  %v1454_v57 = vsel %vm1451_vm1, %v1453_v21, %v1449_v52  ;;  %v8512_v30 = vpop.f32.mrf.mxu2 }
 0x287   : > { %v1999_v2 = vmul.f32 %v1454_v57, %v8366_v27  ;;  %v1468_v27 = vor.u32 1.1754944e-38, %v1467_v62  ;;  %3522 = vst.msk [vmem:[#allocation3 + $0xd0] sm:$0xf] %vm2205_vm3, %v3468_v36 }
 0x288   : > { %5743 = vmatpush.bf16.msra.mxu0 %v7396_v48 }
 0x289   : > { %2061 = vst.msk [vmem:[#allocation2 + $0xb0] sm:$0xff] %vm382_vm0, %v1999_v2  ;;  %v6936_v37 = vld [vmem:[#allocation3 + $0x98] sm:$0xf]  ;;  %v3413_v2 = vld [vmem:[#allocation2 + $0xa0] sm:$0xff] }
 0x28a   : > { %2825 = vrot.lane.b32.xlu0 %v8196_v22, %s7654_s27  ;;  %v7326_v11 = vld [vmem:[#allocation3 + $0xa0] sm:$0xf0] }
 0x28b   : > { %4491 = vrot.lane.b32.xlu2 %v2327_v23, %s7655_s28  ;;  %3200 = vrot.lane.b32.xlu1 %v8211_v1, %s7655_s28  ;;  %v6937_v15 = vor.u32 %v7326_v11, %v6936_v37  ;;  %v8506_v23 = vpack.c.bf16 %v3034_v59, %v3034_v59 }
 0x28c   : > { %v3187_v50 = vpop.permute.xlu0 %3186  ;;  %5744 = vmatpush.bf16.msra.mxu0 %v7395_v8  ;;  %v3467_v8 = vpack.c.bf16 %v3413_v2, %v3413_v2 }
 0x28d   : > { %v4478_v54 = vpop.permute.xlu1 %4477  ;;  %3346 = vst.msk [vmem:[#allocation3 + $0x24] sm:$0xf] %vm3342_vm14, %v3187_v50  ;;  %v2439_v0 = vpop.permute.xlu2 %2438  ;;  %7256 = vmatmul.msk.bf16.gmra.mxu1 %vm382_vm0, %v6937_v15 }
 0x28e   : > { %4639 = vst.msk [vmem:[#allocation3 + $0x4] sm:$0xf] %vm3342_vm14, %v4478_v54 }
 0x28f   : > { %2593 = vst.msk [vmem:[#allocation3 + $0x60] sm:$0xf] %vm2584_vm13, %v2439_v0  ;;  %v3624_v0 = vpack.c.bf16 %v3570_v53, %v3570_v53 }
 0x290   : > { %v4707_v26 = vld [vmem:[#allocation2 + $0xa9] sm:$0xff]  ;;  %2225 = vst.msk [vmem:[#allocation3 + $0xe4] sm:$0xf] %vm2205_vm3, %v8506_v23 }
 0x291   : > { %v4761_v49 = vpack.c.bf16 %v4707_v26, %v4707_v26  ;;  %v3036_v54 = vld [vmem:[#allocation2 + $0xaf] sm:$0xff]  ;;  %3521 = vst.msk [vmem:[#allocation3 + $0xc4] sm:$0xf] %vm2205_vm3, %v3467_v8 }
 0x292   : > { %4113 = vrot.lane.b32.xlu0 %v8211_v1, %s7654_s27  ;;  %v1464_v1 = vsel %vm8480_vm5, %v7506_v17, %v1460_v45 }
 0x293   : > { %3739 = vrot.lane.b32.xlu1 %v8196_v22, %s7653_s26  ;;  %2450 = vrot.lane.b32.xlu2 %v2328_v12, %s7653_s26  ;;  %v1469_v20 = vsel %vm8489_vm7, %v1468_v27, %v1464_v1  ;;  %4815 = vst.msk [vmem:[#allocation3 + $0xb0] sm:$0xf] %vm2205_vm3, %v4761_v49 }
 0x294   : > { %v3726_v16 = vpop.permute.xlu0 %3725  ;;  %v7310_v18 = vld [vmem:[#allocation3 + $0x20] sm:$0xf0]  ;;  %v2000_v25 = vmul.f32 %v1469_v20, %v8413_v41  ;;  %v6820_v41 = vmul.f32 -1.442695, %v8512_v30  ;;  %6788 = vmatmul.msk.bf16.gmra.mxu2 %vm729_vm9, %v7294_v7 }
 0x295   : > { %3885 = vst.msk [vmem:[#allocation3 + $0x1c] sm:$0xf] %vm2584_vm13, %v3726_v16  ;;  %v2437_v22 = vpop.permute.xlu1 %2436  ;;  %v3191_v31 = vpop.permute.xlu2 %3190  ;;  %v6869_v33 = vor.u32 %v7310_v18, %v6868_v44  ;;  %v7306_v27 = vld [vmem:[#allocation3 + $0x4] sm:$0xf]  ;;  %v2276_v44 = vld [vmem:[#allocation2 + $0x88] sm:$0xff] }
 0x296   : > { %2592 = vst.msk [vmem:[#allocation3 + $0x54] sm:$0xf] %vm2584_vm13, %v2437_v22  ;;  %7507 = vpow2.f32 %v6820_v41  ;;  %v2330_v18 = vpack.c.bf16 %v2276_v44, %v2276_v44  ;;  %v2654_v41 = vld [vmem:[#allocation2 + $0x81] sm:$0xff] }
 0x297   : > { %3348 = vst.msk [vmem:[#allocation3 + $0x3c] sm:$0xf] %vm3342_vm14, %v3191_v31  ;;  %5606 = vmatmul.bf16.gmra.mxu3 %v6869_v33  ;;  %v2708_v42 = vpack.c.bf16 %v2654_v41, %v2654_v41 }
 0x298   : > { %2062 = vst.msk [vmem:[#allocation2 + $0xb8] sm:$0xff] %vm382_vm0, %v2000_v25 }
 0x29a   : > { %3741 = vrot.lane.b32.xlu0 %v8253_v10, %s7653_s26  ;;  %v6948_v57 = vld [vmem:[#allocation3 + $0xb0] sm:$0xf] }
 0x29b   : > { %2827 = vrot.lane.b32.xlu1 %v8253_v10, %s7654_s27  ;;  %3202 = vrot.lane.b32.xlu2 %v8264_v6, %s7655_s28  ;;  %v8530_v10 = vpop.f32.mrf.mxu2 }
 0x29c   : > { %v2814_v35 = vpop.permute.xlu0 %2813  ;;  %v7508_v46 = vpop.eup %7507  ;;  %v6821_v5 = vmul.f32 -1.442695, %v8530_v10 }
 0x29d   : > { %2970 = vst.msk [vmem:[#allocation3 + $0x48] sm:$0xf] %vm2963_vm6, %v2814_v35  ;;  %v3189_v38 = vpop.permute.xlu1 %3188  ;;  %v4104_v55 = vpop.permute.xlu2 %4103  ;;  %v8539_v47 = vadd.f32 1.0, %v7508_v46 }
 0x29e   : > { %3347 = vst.msk [vmem:[#allocation3 + $0x30] sm:$0xf] %vm3342_vm14, %v3189_v38  ;;  %7509 = vpow2.f32 %v6821_v5  ;;  %v7313_v50 = vld [vmem:[#allocation3 + $0x38] sm:$0xf0] }
 0x29f   : > { %v4708_v43 = vld [vmem:[#allocation2 + $0xb1] sm:$0xff]  ;;  %4263 = vst.msk [vmem:[#allocation3 + $0x1c] sm:$0xf] %vm2963_vm6, %v4104_v55  ;;  %7511 = vrcp.f32 %v8539_v47  ;;  %vm1476_vm8 = vweird.f32 %v8539_v47  ;;  %v1482_v59 = vand.u32 2147483648, %v8539_v47  ;;  %v1480_v16 = vand.u32 2147483647, %v8539_v47 }
 0x2a0   : > { %v4762_v51 = vpack.c.bf16 %v4708_v43, %v4708_v43 }
 0x2a1   : > { %v1483_v19 = vor.u32 1.1754944e-38, %v1482_v59  ;;  %vm1481_vm12 = vcmp.eq.f32.partialorder %v1480_v16, 8.507059e+37  ;;  %v2278_v59 = vld [vmem:[#allocation2 + $0x98] sm:$0xff] }
 0x2a2   : > { %4816 = vst.msk [vmem:[#allocation3 + $0xbc] sm:$0xf] %vm2205_vm3, %v4762_v51  ;;  %2452 = vrot.lane.b32.xlu0 %v8528_v34, %s7653_s26  ;;  %v2332_v16 = vpack.c.bf16 %v2278_v59, %v2278_v59 }
 0x2a3   : > { %4493 = vrot.lane.b32.xlu1 %v2328_v12, %s7655_s28  ;;  %4115 = vrot.lane.b32.xlu2 %v8264_v6, %s7654_s27  ;;  %v3035_v6 = vld [vmem:[#allocation2 + $0xa7] sm:$0xff]  ;;  %v8554_v12 = vpack.c.bf16 %v3036_v54, %v3036_v54 }
 0x2a4   : > { %v4102_v21 = vpop.permute.xlu0 %4101  ;;  %v8547_v62 = vpack.c.bf16 %v3035_v6, %v3035_v6  ;;  %v7510_v3 = vpop.eup %7509 }
 0x2a5   : > { %4262 = vst.msk [vmem:[#allocation3 + $0x10] sm:$0xf] %vm2963_vm6, %v4102_v21  ;;  %v3728_v48 = vpop.permute.xlu1 %3727  ;;  %v2818_v28 = vpop.permute.xlu2 %2817  ;;  %v6880_v17 = vld [vmem:[#allocation3 + $0x30] sm:$0xf]  ;;  %v1138_v56 = vadd.f32 1.0, %v7510_v3 }
 0x2a6   : > { %4640 = vst.msk [vmem:[#allocation3 + $0x10] sm:$0xf] %vm3342_vm14, %v8450_v39  ;;  %v6881_v52 = vor.u32 %v7313_v50, %v6880_v17  ;;  %v7512_v37 = vpop.eup %7511 }
 0x2a7   : > { %3886 = vst.msk [vmem:[#allocation3 + $0x28] sm:$0xf] %vm2584_vm13, %v3728_v48  ;;  %v1472_v4 = vmul.f32 %v7512_v37, %v8539_v47  ;;  %7513 = vrcp.f32 %v1138_v56  ;;  %vm1477_vm10 = vweird.f32 %v7512_v37  ;;  %vm1491_vm15 = vweird.f32 %v1138_v56 }
 0x2a8   : > { %2972 = vst.msk [vmem:[#allocation3 + $0x60] sm:$0xf] %vm2963_vm6, %v2818_v28  ;;  %5611 = vmatmul.bf16.gmra.mxu3 %v6881_v52  ;;  %vm1478_vm11 = vmor %vm1476_vm8, %vm1477_vm10  ;;  %v1497_v35 = vand.u32 2147483648, %v1138_v56  ;;  %v1495_v55 = vand.u32 2147483647, %v1138_v56  ;;  %v2277_v52 = vld [vmem:[#allocation2 + $0x90] sm:$0xff] }
 0x2a9   : > { %v7329_v61 = vld [vmem:[#allocation3 + $0xb8] sm:$0xf0]  ;;  %2226 = vst.msk [vmem:[#allocation3 + $0xf0] sm:$0xf] %vm2205_vm3, %v8547_v62  ;;  %v1473_v15 = vsub.f32 1.0, %v1472_v4 }
 0x2aa   : > { %3204 = vrot.lane.b32.xlu0 %v8299_v29, %s7655_s28  ;;  %v6949_v39 = vor.u32 %v7329_v61, %v6948_v57  ;;  %2227 = vst.msk [vmem:[#allocation3 + $0xfc] sm:$0xf] %vm2205_vm3, %v8554_v12  ;;  %vm1496_vm4 = vcmp.eq.f32.partialorder %v1495_v55, 8.507059e+37  ;;  %v3416_v55 = vld [vmem:[#allocation2 + $0xb8] sm:$0xff] }
 0x2ab   : > { %3743 = vrot.lane.b32.xlu1 %v3624_v0, %s7653_s26  ;;  %2829 = vrot.lane.b32.xlu2 %v3624_v0, %s7654_s27  ;;  %v1474_v1 = vmul.f32 %v7512_v37, %v1473_v15 }
 0x2ac   : > { %v3730_v13 = vpop.permute.xlu0 %3729  ;;  %7257 = vmatmul.msk.bf16.gmra.mxu1 %vm382_vm0, %v6949_v39  ;;  %v2655_v39 = vld [vmem:[#allocation2 + $0x89] sm:$0xff] }
 0x2ad   : > { %3887 = vst.msk [vmem:[#allocation3 + $0x34] sm:$0xf] %vm2584_vm13, %v3730_v13  ;;  %v2816_v45 = vpop.permute.xlu1 %2815  ;;  %v8563_v32 = vpop.permute.xlu2 %4483  ;;  %v6858_v11 = vld [vmem:[#allocation3 + $0xc] sm:$0xf0]  ;;  %v1475_v22 = vadd.f32 %v7512_v37, %v1474_v1  ;;  %v2709_v9 = vpack.c.bf16 %v2655_v39, %v2655_v39 }
 0x2ae   : > { %2971 = vst.msk [vmem:[#allocation3 + $0x54] sm:$0xf] %vm2963_vm6, %v2816_v45  ;;  %v6861_v58 = vor.u32 %v7306_v27, %v6858_v11  ;;  %v7514_v31 = vpop.eup %7513 }
 0x2af   : > { %v1479_v33 = vsel %vm1478_vm11, %v7512_v37, %v1475_v22  ;;  %v1487_v25 = vmul.f32 %v7514_v31, %v1138_v56  ;;  %vm1492_vm1 = vweird.f32 %v7514_v31 }
 0x2b0   : > { %5745 = vmatmul.bf16.vlgmr.msra.gmra.mxu0 %v6861_v58  ;;  %v1484_v49 = vsel %vm1481_vm12, %v1483_v19, %v1479_v33  ;;  %vm8582_vm2 = vmor %vm1491_vm15, %vm1492_vm1 }
 0x2b1   : > { %v1488_v38 = vsub.f32 1.0, %v1487_v25 }
 0x2b2   : > { %4117 = vrot.lane.b32.xlu0 %v8299_v29, %s7654_s27  ;;  %v2001_v29 = vmul.f32 %v1484_v49, %v8512_v30 }
 0x2b3   : > { %4495 = vrot.lane.b32.xlu2 %v8528_v34, %s7655_s28  ;;  %2454 = vrot.lane.b32.xlu1 %v2330_v18, %s7653_s26  ;;  %v1489_v43 = vmul.f32 %v7514_v31, %v1488_v38  ;;  %v1498_v34 = vor.u32 1.1754944e-38, %v1497_v35  ;;  %v3415_v38 = vld [vmem:[#allocation2 + $0xb0] sm:$0xff] }
 0x2b4   : > { %v2441_v20 = vpop.permute.xlu0 %2440  ;;  %2063 = vst.msk [vmem:[#allocation2 + $0xc0] sm:$0xff] %vm382_vm0, %v2001_v29 }
 0x2b5   : > { %v4482_v26 = vpop.permute.xlu1 %4481  ;;  %2594 = vst.msk [vmem:[#allocation3 + $0x6c] sm:$0xf] %vm2584_vm13, %v2441_v20  ;;  %v4108_v63 = vpop.permute.xlu2 %4107  ;;  %v1490_v5 = vadd.f32 %v7514_v31, %v1489_v43 }
 0x2b6   : > { %4641 = vst.msk [vmem:[#allocation3 + $0x1c] sm:$0xf] %vm3342_vm14, %v4482_v26 }
 0x2b7   : > { %4265 = vst.msk [vmem:[#allocation3 + $0x34] sm:$0xf] %vm2963_vm6, %v4108_v63  ;;  %v8586_v46 = vpop.f32.mrf.mxu2  ;;  %v1494_v21 = vsel %vm8582_vm2, %v7514_v31, %v1490_v5 }
 0x2b8   : > { %v6822_v30 = vmul.f32 -1.442695, %v8586_v46  ;;  %v1499_v17 = vsel %vm1496_vm4, %v1498_v34, %v1494_v21 }
 0x2b9   : > { %v2002_v50 = vmul.f32 %v1499_v17, %v8530_v10 }
 0x2ba   : > { %2831 = vrot.lane.b32.xlu0 %v2708_v42, %s7654_s27  ;;  %7515 = vpow2.f32 %v6822_v30 }
 0x2bb   : > { %4119 = vrot.lane.b32.xlu2 %v8368_v60, %s7654_s27  ;;  %3206 = vrot.lane.b32.xlu1 %v8368_v60, %s7655_s28  ;;  %v4709_v53 = vld [vmem:[#allocation2 + $0xb9] sm:$0xff]  ;;  %2064 = vst.msk [vmem:[#allocation2 + $0xc8] sm:$0xff] %vm382_vm0, %v2002_v50  ;;  %v8603_v60 = vpack.c.bf16 %v2277_v52, %v2277_v52  ;;  %v3469_v52 = vpack.c.bf16 %v3415_v38, %v3415_v38 }
 0x2bc   : > { %v3193_v47 = vpop.permute.xlu0 %3192  ;;  %v8600_v6 = vpack.c.bf16 %v4709_v53, %v4709_v53  ;;  %v3954_v19 = vld [vmem:[#allocation2 + $0xbf] sm:$0xff]  ;;  %v3470_v53 = vpack.c.bf16 %v3416_v55, %v3416_v55 }
 0x2bd   : > { %v3732_v48 = vpop.permute.xlu1 %3731  ;;  %3349 = vst.msk [vmem:[#allocation3 + $0x48] sm:$0xf] %vm3342_vm14, %v3193_v47  ;;  %v2445_v28 = vpop.permute.xlu2 %2444  ;;  %v7309_v4 = vld [vmem:[#allocation3 + $0x1c] sm:$0xf]  ;;  %v8640_v63 = vpack.c.bf16 %v3954_v19, %v3954_v19  ;;  %v7295_v47 = vld [vmem:[%s7818_s25 + $0x80] sm:$0xff] }
 0x2be   : > { %3888 = vst.msk [vmem:[#allocation3 + $0x40] sm:$0xf] %vm2584_vm13, %v3732_v48  ;;  %6789 = vmatmul.msk.bf16.gmra.mxu2 %vm729_vm9, %v7295_v47 }
 0x2bf   : > { %2596 = vst.msk [vmem:[#allocation3 + $0x84] sm:$0xf] %vm2584_vm13, %v2445_v28  ;;  %v8605_v54 = vpop.f32.mrf.mxu2 }
 0x2c0   : > { %v7516_v0 = vpop.eup %7515  ;;  %4817 = vst.msk [vmem:[#allocation3 + $0xc8] sm:$0xf] %vm2205_vm3, %v8600_v6  ;;  %v6823_v10 = vmul.f32 -1.442695, %v8605_v54 }
 0x2c1   : > { %v1139_v57 = vadd.f32 1.0, %v7516_v0  ;;  %2229 = vst.msk [vmem:[#allocation3 + $0x114] sm:$0xf] %vm2205_vm3, %v8640_v63 }
 0x2c2   : > { %3745 = vrot.lane.b32.xlu0 %v2708_v42, %s7653_s26  ;;  %7517 = vpow2.f32 %v6823_v10  ;;  %v4710_v7 = vld [vmem:[#allocation2 + $0xc1] sm:$0xff]  ;;  %v2656_v10 = vld [vmem:[#allocation2 + $0x91] sm:$0xff]  ;;  %3523 = vst.msk [vmem:[#allocation3 + $0xdc] sm:$0xf] %vm2205_vm3, %v3469_v52 }
 0x2c3   : > { %4497 = vrot.lane.b32.xlu1 %v2330_v18, %s7655_s28  ;;  %2456 = vrot.lane.b32.xlu2 %v8603_v60, %s7653_s26  ;;  %7519 = vrcp.f32 %v1139_v57  ;;  %v4764_v8 = vpack.c.bf16 %v4710_v7, %v4710_v7  ;;  %vm1506_vm5 = vweird.f32 %v1139_v57  ;;  %v1512_v58 = vand.u32 2147483648, %v1139_v57  ;;  %v3953_v18 = vld [vmem:[#allocation2 + $0xb7] sm:$0xff]  ;;  %3524 = vst.msk [vmem:[#allocation3 + $0xe8] sm:$0xf] %vm2205_vm3, %v3470_v53 }
 0x2c4   : > { %v4106_v61 = vpop.permute.xlu0 %4105  ;;  %v1510_v15 = vand.u32 2147483647, %v1139_v57  ;;  %v8638_v26 = vpack.c.bf16 %v3953_v18, %v3953_v18  ;;  %v6892_v43 = vld [vmem:[#allocation3 + $0x48] sm:$0xf] }
 0x2c5   : > { %4264 = vst.msk [vmem:[#allocation3 + $0x28] sm:$0xf] %vm2963_vm6, %v4106_v61  ;;  %v2443_v2 = vpop.permute.xlu1 %2442  ;;  %v3197_v3 = vpop.permute.xlu2 %3196  ;;  %v1513_v31 = vor.u32 1.1754944e-38, %v1512_v58 }
 0x2c6   : > { %4642 = vst.msk [vmem:[#allocation3 + $0x28] sm:$0xf] %vm3342_vm14, %v8563_v32  ;;  %vm8643_vm10 = vcmp.eq.f32.partialorder %v1510_v15, 8.507059e+37 }
 0x2c7   : > { %2595 = vst.msk [vmem:[#allocation3 + $0x78] sm:$0xf] %vm2584_vm13, %v2443_v2  ;;  %v8636_v20 = vpop.f32.mrf.mxu2  ;;  %v6960_v33 = vld [vmem:[#allocation3 + $0xc8] sm:$0xf]  ;;  %v2710_v2 = vpack.c.bf16 %v2656_v10, %v2656_v10  ;;  %v7296_v10 = vld [vmem:[%s7818_s25 + $0x88] sm:$0xff] }
 0x2c8   : > { %3351 = vst.msk [vmem:[#allocation3 + $0x60] sm:$0xf] %vm3342_vm14, %v3197_v3  ;;  %v7518_v37 = vpop.eup %7517  ;;  %v6824_v35 = vmul.f32 -1.442695, %v8636_v20 }
 0x2c9   : > { %4818 = vst.msk [vmem:[#allocation3 + $0xd4] sm:$0xf] %vm2205_vm3, %v4764_v8  ;;  %v7520_v56 = vpop.eup %7519  ;;  %v8625_v13 = vadd.f32 1.0, %v7518_v37 }
 0x2ca   : > { %4121 = vrot.lane.b32.xlu0 %v8377_v40, %s7654_s27  ;;  %v1502_v36 = vmul.f32 %v7520_v56, %v1139_v57  ;;  %vm1507_vm7 = vweird.f32 %v7520_v56  ;;  %2228 = vst.msk [vmem:[#allocation3 + $0x108] sm:$0xf] %vm2205_vm3, %v8638_v26 }
 0x2cb   : > { %2833 = vrot.lane.b32.xlu1 %v2709_v9, %s7654_s27  ;;  %3208 = vrot.lane.b32.xlu2 %v8377_v40, %s7655_s28  ;;  %7521 = vrcp.f32 %v8625_v13  ;;  %vm8632_vm8 = vmor %vm1506_vm5, %vm1507_vm7  ;;  %vm1521_vm11 = vweird.f32 %v8625_v13  ;;  %v1525_v30 = vand.u32 2147483647, %v8625_v13  ;;  %v1527_v50 = vand.u32 2147483648, %v8625_v13 }
 0x2cc   : > { %v2820_v27 = vpop.permute.xlu0 %2819  ;;  %v1503_v40 = vsub.f32 1.0, %v1502_v36  ;;  %7523 = vpow2.f32 %v6824_v35 }
 0x2cd   : > { %2973 = vst.msk [vmem:[#allocation3 + $0x6c] sm:$0xf] %vm2963_vm6, %v2820_v27  ;;  %v3195_v45 = vpop.permute.xlu1 %3194  ;;  %v8628_v32 = vpop.permute.xlu2 %4487  ;;  %v6870_v11 = vld [vmem:[#allocation3 + $0x24] sm:$0xf0]  ;;  %vm1526_vm1 = vcmp.eq.f32.partialorder %v1525_v30, 8.507059e+37 }
 0x2ce   : > { %3350 = vst.msk [vmem:[#allocation3 + $0x54] sm:$0xf] %vm3342_vm14, %v3195_v45  ;;  %v6873_v44 = vor.u32 %v7309_v4, %v6870_v11  ;;  %v1504_v1 = vmul.f32 %v7520_v56, %v1503_v40  ;;  %v2279_v11 = vld [vmem:[#allocation2 + $0xa0] sm:$0xff]  ;;  %6790 = vmatmul.msk.bf16.gmra.mxu2 %vm729_vm9, %v7296_v10  ;;  %v7297_v10 = vld [vmem:[%s7818_s25 + $0x90] sm:$0xff] }
 0x2cf   : > { %v8677_v39 = vpop.f32.mrf.mxu2 }
 0x2d0   : > { %5750 = vmatmul.bf16.gmra.mxu0 %v6873_v44  ;;  %v7332_v25 = vld [vmem:[#allocation3 + $0xd0] sm:$0xf0]  ;;  %v1505_v49 = vadd.f32 %v7520_v56, %v1504_v1  ;;  %v2333_v44 = vpack.c.bf16 %v2279_v11, %v2279_v11 }
 0x2d1   : > { %v6961_v29 = vor.u32 %v7332_v25, %v6960_v33  ;;  %v7522_v42 = vpop.eup %7521 }
 0x2d2   : > { %2458 = vrot.lane.b32.xlu0 %v2332_v16, %s7653_s26  ;;  %v1509_v34 = vsel %vm8632_vm8, %v7520_v56, %v1505_v49  ;;  %v1517_v5 = vmul.f32 %v7522_v42, %v8625_v13  ;;  %vm1522_vm12 = vweird.f32 %v7522_v42  ;;  %v7524_v7 = vpop.eup %7523 }
 0x2d3   : > { %3747 = vrot.lane.b32.xlu1 %v2709_v9, %s7653_s26  ;;  %4499 = vrot.lane.b32.xlu2 %v8603_v60, %s7655_s28  ;;  %v1514_v28 = vsel %vm8643_vm10, %v1513_v31, %v1509_v34  ;;  %vm8673_vm15 = vmor %vm1521_vm11, %vm1522_vm12  ;;  %v6825_v9 = vmul.f32 -1.442695, %v8677_v39  ;;  %v1141_v37 = vadd.f32 1.0, %v7524_v7  ;;  %v2657_v31 = vld [vmem:[#allocation2 + $0x99] sm:$0xff] }
 0x2d4   : > { %v3734_v51 = vpop.permute.xlu0 %3733  ;;  %7258 = vmatmul.msk.bf16.gmra.mxu1 %vm382_vm0, %v6961_v29  ;;  %v2003_v60 = vmul.f32 %v1514_v28, %v8586_v46  ;;  %v1518_v57 = vsub.f32 1.0, %v1517_v5  ;;  %v1528_v46 = vor.u32 1.1754944e-38, %v1527_v50  ;;  %v2711_v35 = vpack.c.bf16 %v2657_v31, %v2657_v31  ;;  %v2280_v50 = vld [vmem:[#allocation2 + $0xa8] sm:$0xff] }
 0x2d5   : > { %3889 = vst.msk [vmem:[#allocation3 + $0x4c] sm:$0xf] %vm2584_vm13, %v3734_v51  ;;  %v4486_v21 = vpop.permute.xlu1 %4485  ;;  %v2824_v48 = vpop.permute.xlu2 %2823  ;;  %v7316_v17 = vld [vmem:[#allocation3 + $0x50] sm:$0xf0]  ;;  %7525 = vpow2.f32 %v6825_v9  ;;  %vm1536_vm2 = vweird.f32 %v1141_v37  ;;  %v1542_v33 = vand.u32 2147483648, %v1141_v37 }
 0x2d6   : > { %4643 = vst.msk [vmem:[#allocation3 + $0x34] sm:$0xf] %vm3342_vm14, %v4486_v21  ;;  %v6893_v0 = vor.u32 %v7316_v17, %v6892_v43  ;;  %v1519_v61 = vmul.f32 %v7522_v42, %v1518_v57  ;;  %7527 = vrcp.f32 %v1141_v37  ;;  %v1540_v49 = vand.u32 2147483647, %v1141_v37  ;;  %v3039_v57 = vld [vmem:[#allocation2 + $0xc7] sm:$0xff] }
 0x2d7   : > { %2975 = vst.msk [vmem:[#allocation3 + $0x84] sm:$0xf] %vm2963_vm6, %v2824_v48 }
 0x2d8   : > { %2065 = vst.msk [vmem:[#allocation2 + $0xd0] sm:$0xff] %vm382_vm0, %v2003_v60  ;;  %5616 = vmatmul.bf16.gmra.mxu3 %v6893_v0  ;;  %v1520_v8 = vadd.f32 %v7522_v42, %v1519_v61  ;;  %vm1541_vm7 = vcmp.eq.f32.partialorder %v1540_v49, 8.507059e+37  ;;  %v2334_v61 = vpack.c.bf16 %v2280_v50, %v2280_v50  ;;  %v2281_v49 = vld [vmem:[#allocation2 + $0xb0] sm:$0xff] }
 0x2da   : > { %3210 = vrot.lane.b32.xlu0 %v8485_v14, %s7655_s28  ;;  %v1524_v13 = vsel %vm8673_vm15, %v7522_v42, %v1520_v8  ;;  %v1543_v42 = vor.u32 1.1754944e-38, %v1542_v33 }
 0x2db   : > { %4501 = vrot.lane.b32.xlu1 %v2332_v16, %s7655_s28  ;;  %2835 = vrot.lane.b32.xlu2 %v2710_v2, %s7654_s27  ;;  %v1529_v36 = vsel %vm1526_vm1, %v1528_v46, %v1524_v13  ;;  %v7526_v40 = vpop.eup %7525  ;;  %v6904_v13 = vld [vmem:[#allocation3 + $0x60] sm:$0xf] }
 0x2dc   : > { %v4110_v56 = vpop.permute.xlu0 %4109  ;;  %v2004_v45 = vmul.f32 %v1529_v36, %v8605_v54  ;;  %v1142_v54 = vadd.f32 1.0, %v7526_v40 }
 0x2dd   : > { %4266 = vst.msk [vmem:[#allocation3 + $0x40] sm:$0xf] %vm2963_vm6, %v4110_v56  ;;  %v2822_v27 = vpop.permute.xlu1 %2821  ;;  %v4112_v4 = vpop.permute.xlu2 %4111  ;;  %v7312_v16 = vld [vmem:[#allocation3 + $0x34] sm:$0xf] }
 0x2de   : > { %4644 = vst.msk [vmem:[#allocation3 + $0x40] sm:$0xf] %vm3342_vm14, %v8628_v32  ;;  %v7528_v32 = vpop.eup %7527  ;;  %7529 = vrcp.f32 %v1142_v54  ;;  %vm1551_vm8 = vweird.f32 %v1142_v54  ;;  %v1557_v28 = vand.u32 2147483648, %v1142_v54  ;;  %v1555_v53 = vand.u32 2147483647, %v1142_v54  ;;  %v3417_v56 = vld [vmem:[#allocation2 + $0xc0] sm:$0xff]  ;;  %6791 = vmatmul.msk.bf16.gmra.mxu2 %vm729_vm9, %v7297_v10 }
 0x2df   : > { %v4711_v59 = vld [vmem:[#allocation2 + $0xc9] sm:$0xff]  ;;  %2974 = vst.msk [vmem:[#allocation3 + $0x78] sm:$0xf] %vm2963_vm6, %v2822_v27  ;;  %v1532_v1 = vmul.f32 %v7528_v32, %v1141_v37  ;;  %vm1537_vm4 = vweird.f32 %v7528_v32 }
 0x2e0   : > { %v8693_v58 = vpack.c.bf16 %v4711_v59, %v4711_v59  ;;  %4267 = vst.msk [vmem:[#allocation3 + $0x4c] sm:$0xf] %vm2963_vm6, %v4112_v4  ;;  %vm8707_vm5 = vmor %vm1536_vm2, %vm1537_vm4  ;;  %v1558_v3 = vor.u32 1.1754944e-38, %v1557_v28  ;;  %v3040_v46 = vld [vmem:[#allocation2 + $0xcf] sm:$0xff]  ;;  %vm8733_vm12 = vcmp.eq.f32.partialorder %v1555_v53, 8.507059e+37 }
 0x2e1   : > { %2066 = vst.msk [vmem:[#allocation2 + $0xd8] sm:$0xff] %vm382_vm0, %v2004_v45  ;;  %v8738_v37 = vpack.c.bf16 %v3040_v46, %v3040_v46  ;;  %v3418_v45 = vld [vmem:[#allocation2 + $0xc8] sm:$0xff] }
 0x2e2   : > { %4819 = vst.msk [vmem:[#allocation3 + $0xe0] sm:$0xf] %vm2205_vm3, %v8693_v58  ;;  %3749 = vrot.lane.b32.xlu0 %v2710_v2, %s7653_s26 }
 0x2e3   : > { %4123 = vrot.lane.b32.xlu2 %v8485_v14, %s7654_s27  ;;  %2460 = vrot.lane.b32.xlu1 %v2333_v44, %s7653_s26  ;;  %v1533_v14 = vsub.f32 1.0, %v1532_v1  ;;  %2231 = vst.msk [vmem:[#allocation3 + $0x12c] sm:$0xf] %vm2205_vm3, %v8738_v37  ;;  %v3472_v1 = vpack.c.bf16 %v3418_v45, %v3418_v45  ;;  %v2282_v45 = vld [vmem:[#allocation2 + $0xb8] sm:$0xff] }
 0x2e4   : > { %v2447_v15 = vpop.permute.xlu0 %2446  ;;  %v7530_v51 = vpop.eup %7529 }
 0x2e5   : > { %v3736_v18 = vpop.permute.xlu1 %3735  ;;  %2597 = vst.msk [vmem:[#allocation3 + $0x90] sm:$0xf] %vm2584_vm13, %v2447_v15  ;;  %v8704_v19 = vpop.permute.xlu2 %4491  ;;  %v6882_v22 = vld [vmem:[#allocation3 + $0x3c] sm:$0xf0]  ;;  %v1534_v29 = vmul.f32 %v7528_v32, %v1533_v14  ;;  %v1547_v30 = vmul.f32 %v7530_v51, %v1142_v54  ;;  %vm1552_vm10 = vweird.f32 %v7530_v51  ;;  %v3471_v54 = vpack.c.bf16 %v3417_v56, %v3417_v56 }
 0x2e6   : > { %3890 = vst.msk [vmem:[#allocation3 + $0x58] sm:$0xf] %vm2584_vm13, %v3736_v18  ;;  %v6885_v25 = vor.u32 %v7312_v16, %v6882_v22  ;;  %vm8725_vm11 = vmor %vm1551_vm8, %vm1552_vm10 }
 0x2e7   : > { %v1535_v43 = vadd.f32 %v7528_v32, %v1534_v29  ;;  %v1548_v52 = vsub.f32 1.0, %v1547_v30  ;;  %3525 = vst.msk [vmem:[#allocation3 + $0xf4] sm:$0xf] %vm2205_vm3, %v3471_v54  ;;  %v8769_v29 = vpack.c.bf16 %v2281_v49, %v2281_v49 }
 0x2e8   : > { %v4712_v41 = vld [vmem:[#allocation2 + $0xd1] sm:$0xff]  ;;  %5755 = vmatmul.bf16.gmra.mxu0 %v6885_v25  ;;  %3526 = vst.msk [vmem:[#allocation3 + $0x100] sm:$0xf] %vm2205_vm3, %v3472_v1 }
 0x2e9   : > { %v4766_v38 = vpack.c.bf16 %v4712_v41, %v4712_v41  ;;  %v1539_v5 = vsel %vm8707_vm5, %v7528_v32, %v1535_v43  ;;  %v1549_v60 = vmul.f32 %v7530_v51, %v1548_v52  ;;  %v6972_v0 = vld [vmem:[#allocation3 + $0xe0] sm:$0xf]  ;;  %v3575_v32 = vld [vmem:[#allocation2 + $0xa1] sm:$0xff] }
 0x2ea   : > { %2837 = vrot.lane.b32.xlu0 %v2711_v35, %s7654_s27  ;;  %v1544_v48 = vsel %vm1541_vm7, %v1543_v42, %v1539_v5  ;;  %v3629_v22 = vpack.c.bf16 %v3575_v32, %v3575_v32 }
 0x2eb   : > { %4820 = vst.msk [vmem:[#allocation3 + $0xec] sm:$0xf] %vm2205_vm3, %v4766_v38  ;;  %4503 = vrot.lane.b32.xlu2 %v2333_v44, %s7655_s28  ;;  %3212 = vrot.lane.b32.xlu1 %v8506_v23, %s7655_s28  ;;  %v2005_v17 = vmul.f32 %v1544_v48, %v8636_v20  ;;  %v8729_v20 = vpack.c.bf16 %v3039_v57, %v3039_v57  ;;  %v3576_v48 = vld [vmem:[#allocation2 + $0xa9] sm:$0xff] }
 0x2ec   : > { %v3199_v34 = vpop.permute.xlu0 %3198  ;;  %v1550_v7 = vadd.f32 %v7530_v51, %v1549_v60  ;;  %v3419_v60 = vld [vmem:[#allocation2 + $0xd0] sm:$0xff] }
 0x2ed   : > { %v4490_v47 = vpop.permute.xlu1 %4489  ;;  %3352 = vst.msk [vmem:[#allocation3 + $0x6c] sm:$0xf] %vm3342_vm14, %v3199_v34  ;;  %v2451_v21 = vpop.permute.xlu2 %2450  ;;  %v3473_v57 = vpack.c.bf16 %v3419_v60, %v3419_v60 }
 0x2ee   : > { %4645 = vst.msk [vmem:[#allocation3 + $0x4c] sm:$0xf] %vm3342_vm14, %v4490_v47  ;;  %v1554_v4 = vsel %vm8725_vm11, %v7530_v51, %v1550_v7 }
 0x2ef   : > { %2599 = vst.msk [vmem:[#allocation3 + $0xa8] sm:$0xf] %vm2584_vm13, %v2451_v21  ;;  %v1559_v44 = vsel %vm8733_vm12, %v1558_v3, %v1554_v4 }
 0x2f0   : > { %2067 = vst.msk [vmem:[#allocation2 + $0xe0] sm:$0xff] %vm382_vm0, %v2005_v17  ;;  %v2006_v15 = vmul.f32 %v1559_v44, %v8677_v39  ;;  %v3630_v17 = vpack.c.bf16 %v3576_v48, %v3576_v48  ;;  %v2283_v48 = vld [vmem:[#allocation2 + $0xc0] sm:$0xff] }
 0x2f1   : > { %2230 = vst.msk [vmem:[#allocation3 + $0x120] sm:$0xf] %vm2205_vm3, %v8729_v20 }
 0x2f2   : > { %4125 = vrot.lane.b32.xlu0 %v8506_v23, %s7654_s27  ;;  %v7335_v9 = vld [vmem:[#allocation3 + $0xe8] sm:$0xf0]  ;;  %2068 = vst.msk [vmem:[#allocation2 + $0xe8] sm:$0xff] %vm382_vm0, %v2006_v15 }
 0x2f3   : > { %3751 = vrot.lane.b32.xlu1 %v2711_v35, %s7653_s26  ;;  %2462 = vrot.lane.b32.xlu2 %v2334_v61, %s7653_s26  ;;  %v6973_v27 = vor.u32 %v7335_v9, %v6972_v0  ;;  %3527 = vst.msk [vmem:[#allocation3 + $0x10c] sm:$0xf] %vm2205_vm3, %v3473_v57 }
 0x2f4   : > { %v3738_v23 = vpop.permute.xlu0 %3737  ;;  %v7319_v36 = vld [vmem:[#allocation3 + $0x68] sm:$0xf0] }
 0x2f5   : > { %3891 = vst.msk [vmem:[#allocation3 + $0x64] sm:$0xf] %vm2584_vm13, %v3738_v23  ;;  %v2449_v11 = vpop.permute.xlu1 %2448  ;;  %v3203_v59 = vpop.permute.xlu2 %3202  ;;  %v6905_v40 = vor.u32 %v7319_v36, %v6904_v13  ;;  %7259 = vmatmul.msk.bf16.gmra.mxu1 %vm382_vm0, %v6973_v27  ;;  %v7315_v8 = vld [vmem:[#allocation3 + $0x4c] sm:$0xf] }
 0x2f6   : > { %2598 = vst.msk [vmem:[#allocation3 + $0x9c] sm:$0xf] %vm2584_vm13, %v2449_v11 }
 0x2f7   : > { %v4713_v16 = vld [vmem:[#allocation2 + $0xd9] sm:$0xff]  ;;  %3354 = vst.msk [vmem:[#allocation3 + $0x84] sm:$0xf] %vm3342_vm14, %v3203_v59  ;;  %5621 = vmatmul.bf16.gmra.mxu3 %v6905_v40  ;;  %v8756_v31 = vpop.f32.mrf.mxu2  ;;  %v2336_v40 = vpack.c.bf16 %v2282_v45, %v2282_v45 }
 0x2f8   : > { %v4767_v18 = vpack.c.bf16 %v4713_v16, %v4713_v16  ;;  %v6826_v33 = vmul.f32 -1.442695, %v8756_v31  ;;  %v3042_v28 = vld [vmem:[#allocation2 + $0xdf] sm:$0xff] }
 0x2f9   : > { %v4714_v41 = vld [vmem:[#allocation2 + $0xe1] sm:$0xff]  ;;  %v8795_v46 = vpack.c.bf16 %v3042_v28, %v3042_v28 }
 0x2fa   : > { %4821 = vst.msk [vmem:[#allocation3 + $0xf8] sm:$0xf] %vm2205_vm3, %v4767_v18  ;;  %3753 = vrot.lane.b32.xlu0 %v3629_v22, %s7653_s26  ;;  %7531 = vpow2.f32 %v6826_v33  ;;  %v4768_v35 = vpack.c.bf16 %v4714_v41, %v4714_v41 }
 0x2fb   : > { %2839 = vrot.lane.b32.xlu1 %v3629_v22, %s7654_s27  ;;  %3214 = vrot.lane.b32.xlu2 %v8547_v62, %s7655_s28  ;;  %2233 = vst.msk [vmem:[#allocation3 + $0x144] sm:$0xf] %vm2205_vm3, %v8795_v46 }
 0x2fc   : > { %v2826_v39 = vpop.permute.xlu0 %2825  ;;  %4822 = vst.msk [vmem:[#allocation3 + $0x104] sm:$0xf] %vm2205_vm3, %v4768_v35 }
 0x2fd   : > { %2976 = vst.msk [vmem:[#allocation3 + $0x90] sm:$0xf] %vm2963_vm6, %v2826_v39  ;;  %v3201_v25 = vpop.permute.xlu1 %3200  ;;  %v4116_v14 = vpop.permute.xlu2 %4115 }
 0x2fe   : > { %3353 = vst.msk [vmem:[#allocation3 + $0x78] sm:$0xf] %vm3342_vm14, %v3201_v25  ;;  %v7322_v47 = vld [vmem:[#allocation3 + $0x80] sm:$0xf0] }
 0x2ff   : > { %4269 = vst.msk [vmem:[#allocation3 + $0x64] sm:$0xf] %vm2963_vm6, %v4116_v14  ;;  %v8771_v38 = vpop.f32.mrf.mxu2  ;;  %v2660_v25 = vld [vmem:[#allocation2 + $0xb1] sm:$0xff] }
 0x300   : > { %v7532_v55 = vpop.eup %7531  ;;  %v6827_v42 = vmul.f32 -1.442695, %v8771_v38 }
 0x301   : > { %v8780_v43 = vadd.f32 1.0, %v7532_v55  ;;  %v6984_v50 = vld [vmem:[#allocation3 + $0xf8] sm:$0xf] }
 0x302   : > { %2464 = vrot.lane.b32.xlu0 %v8769_v29, %s7653_s26  ;;  %7533 = vpow2.f32 %v6827_v42 }
 0x303   : > { %4505 = vrot.lane.b32.xlu1 %v2334_v61, %s7655_s28  ;;  %4127 = vrot.lane.b32.xlu2 %v8547_v62, %s7654_s27  ;;  %7535 = vrcp.f32 %v8780_v43  ;;  %v3041_v62 = vld [vmem:[#allocation2 + $0xd7] sm:$0xff]  ;;  %vm1566_vm15 = vweird.f32 %v8780_v43  ;;  %v1572_v4 = vand.u32 2147483648, %v8780_v43  ;;  %v1570_v59 = vand.u32 2147483647, %v8780_v43 }
 0x304   : > { %v4114_v51 = vpop.permute.xlu0 %4113  ;;  %v7338_v52 = vld [vmem:[#allocation3 + $0x100] sm:$0xf0]  ;;  %v8788_v53 = vpack.c.bf16 %v3041_v62, %v3041_v62  ;;  %v3420_v61 = vld [vmem:[#allocation2 + $0xd8] sm:$0xff] }
 0x305   : > { %4268 = vst.msk [vmem:[#allocation3 + $0x58] sm:$0xf] %vm2963_vm6, %v4114_v51  ;;  %v3740_v34 = vpop.permute.xlu1 %3739  ;;  %v2830_v5 = vpop.permute.xlu2 %2829  ;;  %v6916_v30 = vld [vmem:[#allocation3 + $0x78] sm:$0xf]  ;;  %v3474_v56 = vpack.c.bf16 %v3420_v61, %v3420_v61  ;;  %v1573_v32 = vor.u32 1.1754944e-38, %v1572_v4  ;;  %vm1571_vm4 = vcmp.eq.f32.partialorder %v1570_v59, 8.507059e+37 }
 0x306   : > { %4646 = vst.msk [vmem:[#allocation3 + $0x58] sm:$0xf] %vm3342_vm14, %v8704_v19  ;;  %v6917_v21 = vor.u32 %v7322_v47, %v6916_v30  ;;  %v6985_v19 = vor.u32 %v7338_v52, %v6984_v50  ;;  %v3578_v59 = vld [vmem:[#allocation2 + $0xb9] sm:$0xff] }
 0x307   : > { %3892 = vst.msk [vmem:[#allocation3 + $0x70] sm:$0xf] %vm2584_vm13, %v3740_v34  ;;  %v8822_v35 = vpop.f32.mrf.mxu2 }
 0x308   : > { %2978 = vst.msk [vmem:[#allocation3 + $0xa8] sm:$0xf] %vm2963_vm6, %v2830_v5  ;;  %5626 = vmatmul.bf16.gmra.mxu3 %v6917_v21  ;;  %v7534_v0 = vpop.eup %7533  ;;  %7260 = vmatmul.msk.bf16.gmra.mxu1 %vm382_vm0, %v6985_v19  ;;  %v6828_v42 = vmul.f32 -1.442695, %v8822_v35 }
 0x309   : > { %v7536_v2 = vpop.eup %7535  ;;  %v1144_v3 = vadd.f32 1.0, %v7534_v0  ;;  %2232 = vst.msk [vmem:[#allocation3 + $0x138] sm:$0xf] %vm2205_vm3, %v8788_v53 }
 0x30a   : > { %3216 = vrot.lane.b32.xlu0 %v8554_v12, %s7655_s28  ;;  %v1562_v9 = vmul.f32 %v7536_v2, %v8780_v43  ;;  %vm1567_vm1 = vweird.f32 %v7536_v2  ;;  %3528 = vst.msk [vmem:[#allocation3 + $0x118] sm:$0xf] %vm2205_vm3, %v3474_v56  ;;  %v2284_v56 = vld [vmem:[#allocation2 + $0xc8] sm:$0xff] }
 0x30b   : > { %3755 = vrot.lane.b32.xlu1 %v3630_v17, %s7653_s26  ;;  %2841 = vrot.lane.b32.xlu2 %v3630_v17, %s7654_s27  ;;  %7537 = vrcp.f32 %v1144_v3  ;;  %vm1568_vm2 = vmor %vm1566_vm15, %vm1567_vm1  ;;  %vm1581_vm5 = vweird.f32 %v1144_v3  ;;  %v1587_v14 = vand.u32 2147483648, %v1144_v3  ;;  %v1585_v41 = vand.u32 2147483647, %v1144_v3 }
 0x30c   : > { %v3742_v7 = vpop.permute.xlu0 %3741  ;;  %v1563_v11 = vsub.f32 1.0, %v1562_v9  ;;  %7539 = vpow2.f32 %v6828_v42  ;;  %v3421_v42 = vld [vmem:[#allocation2 + $0xe0] sm:$0xff] }
 0x30d   : > { %3893 = vst.msk [vmem:[#allocation3 + $0x7c] sm:$0xf] %vm2584_vm13, %v3742_v7  ;;  %v2828_v13 = vpop.permute.xlu1 %2827  ;;  %v8804_v27 = vpop.permute.xlu2 %4495  ;;  %v6894_v23 = vld [vmem:[#allocation3 + $0x54] sm:$0xf0]  ;;  %v1588_v43 = vor.u32 1.1754944e-38, %v1587_v14  ;;  %vm1586_vm10 = vcmp.eq.f32.partialorder %v1585_v41, 8.507059e+37 }
 0x30e   : > { %2977 = vst.msk [vmem:[#allocation3 + $0x9c] sm:$0xf] %vm2963_vm6, %v2828_v13  ;;  %v6897_v36 = vor.u32 %v7315_v8, %v6894_v23  ;;  %v1564_v44 = vmul.f32 %v7536_v2, %v1563_v11 }
 0x30f   : > { %v8838_v52 = vpop.f32.mrf.mxu2 }
 0x310   : > { %5760 = vmatmul.bf16.gmra.mxu0 %v6897_v36  ;;  %v1565_v54 = vadd.f32 %v7536_v2, %v1564_v44  ;;  %v6829_v60 = vmul.f32 -1.442695, %v8838_v52 }
 0x311   : > { %v7538_v15 = vpop.eup %7537 }
 0x312   : > { %4129 = vrot.lane.b32.xlu0 %v8554_v12, %s7654_s27  ;;  %v1569_v1 = vsel %vm1568_vm2, %v7536_v2, %v1565_v54  ;;  %v1577_v18 = vmul.f32 %v7538_v15, %v1144_v3  ;;  %vm1582_vm7 = vweird.f32 %v7538_v15  ;;  %v7540_v28 = vpop.eup %7539 }
 0x313   : > { %4507 = vrot.lane.b32.xlu2 %v8769_v29, %s7655_s28  ;;  %2466 = vrot.lane.b32.xlu1 %v2336_v40, %s7653_s26  ;;  %v1574_v39 = vsel %vm1571_vm4, %v1573_v32, %v1569_v1  ;;  %v2714_v29 = vpack.c.bf16 %v2660_v25, %v2660_v25  ;;  %vm1583_vm8 = vmor %vm1581_vm5, %vm1582_vm7  ;;  %v1145_v50 = vadd.f32 1.0, %v7540_v28  ;;  %v3632_v25 = vpack.c.bf16 %v3578_v59, %v3578_v59 }
 0x314   : > { %v2453_v16 = vpop.permute.xlu0 %2452  ;;  %v2007_v12 = vmul.f32 %v1574_v39, %v8756_v31  ;;  %v1578_v49 = vsub.f32 1.0, %v1577_v18 }
 0x315   : > { %v4494_v22 = vpop.permute.xlu1 %4493  ;;  %2600 = vst.msk [vmem:[#allocation3 + $0xb4] sm:$0xf] %vm2584_vm13, %v2453_v16  ;;  %v4120_v33 = vpop.permute.xlu2 %4119  ;;  %7541 = vrcp.f32 %v1145_v50  ;;  %v1602_v7 = vand.u32 2147483648, %v1145_v50  ;;  %vm1596_vm11 = vweird.f32 %v1145_v50  ;;  %v2338_v16 = vpack.c.bf16 %v2284_v56, %v2284_v56 }
 0x316   : > { %4647 = vst.msk [vmem:[#allocation3 + $0x64] sm:$0xf] %vm3342_vm14, %v4494_v22  ;;  %v1579_v55 = vmul.f32 %v7538_v15, %v1578_v49  ;;  %7543 = vpow2.f32 %v6829_v60  ;;  %v2662_v60 = vld [vmem:[#allocation2 + $0xc1] sm:$0xff] }
 0x317   : > { %4271 = vst.msk [vmem:[#allocation3 + $0x7c] sm:$0xf] %vm2963_vm6, %v4120_v33  ;;  %v1603_v54 = vor.u32 1.1754944e-38, %v1602_v7  ;;  %v3959_v33 = vld [vmem:[#allocation2 + $0xe7] sm:$0xff] }
 0x318   : > { %2069 = vst.msk [vmem:[#allocation2 + $0xf0] sm:$0xff] %vm382_vm0, %v2007_v12  ;;  %v1580_v51 = vadd.f32 %v7538_v15, %v1579_v55  ;;  %v8880_v49 = vpack.c.bf16 %v3959_v33, %v3959_v33 }
 0x31a   : > { %2843 = vrot.lane.b32.xlu0 %v2714_v29, %s7654_s27  ;;  %v1584_v34 = vsel %vm1583_vm8, %v7538_v15, %v1580_v51  ;;  %v8873_v15 = vpop.f32.mrf.mxu2  ;;  %2234 = vst.msk [vmem:[#allocation3 + $0x150] sm:$0xf] %vm2205_vm3, %v8880_v49 }
 0x31b   : > { %4131 = vrot.lane.b32.xlu2 %v8638_v26, %s7654_s27  ;;  %3218 = vrot.lane.b32.xlu1 %v8638_v26, %s7655_s28  ;;  %v1589_v47 = vsel %vm1586_vm10, %v1588_v43, %v1584_v34  ;;  %v8836_v26 = vpack.c.bf16 %v2283_v48, %v2283_v48  ;;  %v7542_v61 = vpop.eup %7541  ;;  %v6830_v22 = vmul.f32 -1.442695, %v8873_v15  ;;  %v3422_v34 = vld [vmem:[#allocation2 + $0xe8] sm:$0xff]  ;;  %v7298_v48 = vld [vmem:[%s7818_s25 + $0x98] sm:$0xff] }
 0x31c   : > { %v3205_v31 = vpop.permute.xlu0 %3204  ;;  %v2008_v21 = vmul.f32 %v1589_v47, %v8771_v38  ;;  %v7544_v2 = vpop.eup %7543  ;;  %v1592_v3 = vmul.f32 %v7542_v61, %v1145_v50  ;;  %vm1597_vm12 = vweird.f32 %v7542_v61  ;;  %6792 = vmatmul.msk.bf16.gmra.mxu2 %vm729_vm9, %v7298_v48 }
 0x31d   : > { %v3744_v5 = vpop.permute.xlu1 %3743  ;;  %3355 = vst.msk [vmem:[#allocation3 + $0x90] sm:$0xf] %vm3342_vm14, %v3205_v31  ;;  %v2457_v30 = vpop.permute.xlu2 %2456  ;;  %v8858_v8 = vadd.f32 1.0, %v7544_v2  ;;  %v7318_v36 = vld [vmem:[#allocation3 + $0x64] sm:$0xf]  ;;  %vm8869_vm15 = vmor %vm1596_vm11, %vm1597_vm12 }
 0x31e   : > { %3894 = vst.msk [vmem:[#allocation3 + $0x88] sm:$0xf] %vm2584_vm13, %v3744_v5  ;;  %v1593_v13 = vsub.f32 1.0, %v1592_v3 }
 0x31f   : > { %v4715_v62 = vld [vmem:[#allocation2 + $0xe9] sm:$0xff]  ;;  %2602 = vst.msk [vmem:[#allocation3 + $0xcc] sm:$0xf] %vm2584_vm13, %v2457_v30  ;;  %7545 = vrcp.f32 %v8858_v8  ;;  %vm1611_vm2 = vweird.f32 %v8858_v8 }
 0x320   : > { %v4769_v17 = vpack.c.bf16 %v4715_v62, %v4715_v62  ;;  %2070 = vst.msk [vmem:[#allocation2 + $0xf8] sm:$0xff] %vm382_vm0, %v2008_v21  ;;  %v1594_v44 = vmul.f32 %v7542_v61, %v1593_v13  ;;  %v3960_v39 = vld [vmem:[#allocation2 + $0xef] sm:$0xff]  ;;  %7547 = vpow2.f32 %v6830_v22  ;;  %v1615_v21 = vand.u32 2147483647, %v8858_v8 }
 0x321   : > { %v8885_v55 = vpack.c.bf16 %v3960_v39, %v3960_v39 }
 0x322   : > { %4823 = vst.msk [vmem:[#allocation3 + $0x110] sm:$0xf] %vm2205_vm3, %v4769_v17  ;;  %3757 = vrot.lane.b32.xlu0 %v2714_v29, %s7653_s26  ;;  %v1595_v1 = vadd.f32 %v7542_v61, %v1594_v44  ;;  %v8914_v7 = vpop.f32.mrf.mxu2  ;;  %vm1616_vm7 = vcmp.eq.f32.partialorder %v1615_v21, 8.507059e+37 }
 0x323   : > { %4509 = vrot.lane.b32.xlu1 %v2336_v40, %s7655_s28  ;;  %2468 = vrot.lane.b32.xlu2 %v8836_v26, %s7653_s26  ;;  %2235 = vst.msk [vmem:[#allocation3 + $0x15c] sm:$0xf] %vm2205_vm3, %v8885_v55  ;;  %v6831_v56 = vmul.f32 -1.442695, %v8914_v7 }
 0x324   : > { %v4118_v38 = vpop.permute.xlu0 %4117  ;;  %v1599_v41 = vsel %vm8869_vm15, %v7542_v61, %v1595_v1  ;;  %v6928_v31 = vld [vmem:[#allocation3 + $0x90] sm:$0xf] }
 0x325   : > { %4270 = vst.msk [vmem:[#allocation3 + $0x70] sm:$0xf] %vm2963_vm6, %v4118_v38  ;;  %v2455_v0 = vpop.permute.xlu1 %2454  ;;  %v3209_v19 = vpop.permute.xlu2 %3208 }
 0x326   : > { %4648 = vst.msk [vmem:[#allocation3 + $0x70] sm:$0xf] %vm3342_vm14, %v8804_v27  ;;  %v1600_v27 = vand.u32 2147483647, %v1145_v50  ;;  %v7546_v43 = vpop.eup %7545 }
 0x327   : > { %v4716_v10 = vld [vmem:[#allocation2 + $0xf1] sm:$0xff]  ;;  %2601 = vst.msk [vmem:[#allocation3 + $0xc0] sm:$0xf] %vm2584_vm13, %v2455_v0  ;;  %v1607_v47 = vmul.f32 %v7546_v43, %v8858_v8  ;;  %vm1612_vm4 = vweird.f32 %v7546_v43  ;;  %v3476_v0 = vpack.c.bf16 %v3422_v34, %v3422_v34 }
 0x328   : > { %v4770_v57 = vpack.c.bf16 %v4716_v10, %v4716_v10  ;;  %3357 = vst.msk [vmem:[#allocation3 + $0xa8] sm:$0xf] %vm3342_vm14, %v3209_v19  ;;  %vm8875_vm1 = vcmp.eq.f32.partialorder %v1600_v27, 8.507059e+37  ;;  %v7548_v19 = vpop.eup %7547  ;;  %vm8910_vm5 = vmor %vm1611_vm2, %vm1612_vm4 }
 0x329   : > { %v6996_v14 = vld [vmem:[#allocation3 + $0x110] sm:$0xf]  ;;  %v1604_v51 = vsel %vm8875_vm1, %v1603_v54, %v1599_v41  ;;  %v1608_v38 = vsub.f32 1.0, %v1607_v47  ;;  %v1147_v3 = vadd.f32 1.0, %v7548_v19  ;;  %3530 = vst.msk [vmem:[#allocation3 + $0x130] sm:$0xf] %vm2205_vm3, %v3476_v0 }
 0x32a   : > { %4824 = vst.msk [vmem:[#allocation3 + $0x11c] sm:$0xf] %vm2205_vm3, %v4770_v57  ;;  %4133 = vrot.lane.b32.xlu0 %v8640_v63, %s7654_s27  ;;  %v2009_v30 = vmul.f32 %v1604_v51, %v8822_v35  ;;  %v3475_v35 = vpack.c.bf16 %v3421_v42, %v3421_v42  ;;  %v2716_v57 = vpack.c.bf16 %v2662_v60, %v2662_v60 }
 0x32b   : > { %2845 = vrot.lane.b32.xlu1 %v8600_v6, %s7654_s27  ;;  %3220 = vrot.lane.b32.xlu2 %v8640_v63, %s7655_s28  ;;  %v5602_v6 = vpop.f32.mrf.mxu3  ;;  %v1609_v10 = vmul.f32 %v7546_v43, %v1608_v38  ;;  %7549 = vrcp.f32 %v1147_v3  ;;  %vm1626_vm8 = vweird.f32 %v1147_v3  ;;  %v1630_v18 = vand.u32 2147483647, %v1147_v3 }
 0x32c   : > { %v2832_v9 = vpop.permute.xlu0 %2831  ;;  %2071 = vst.msk [vmem:[#allocation2 + $0x100] sm:$0xff] %vm382_vm0, %v2009_v30  ;;  %7551 = vpow2.f32 %v6831_v56 }
 0x32d   : > { %2979 = vst.msk [vmem:[#allocation3 + $0xb4] sm:$0xf] %vm2963_vm6, %v2832_v9  ;;  %v3207_v23 = vpop.permute.xlu1 %3206  ;;  %v8861_v4 = vpop.permute.xlu2 %4499  ;;  %v6906_v45 = vld [vmem:[#allocation3 + $0x6c] sm:$0xf0]  ;;  %v1610_v9 = vadd.f32 %v7546_v43, %v1609_v10  ;;  %vm1631_vm12 = vcmp.eq.f32.partialorder %v1630_v18, 8.507059e+37  ;;  %v3045_v10 = vld [vmem:[#allocation2 + $0xf7] sm:$0xff] }
 0x32e   : > { %3356 = vst.msk [vmem:[#allocation3 + $0x9c] sm:$0xf] %vm3342_vm14, %v3207_v23  ;;  %v5746_v63 = vpop.f32.mrf.mxu0  ;;  %v6909_v11 = vor.u32 %v7318_v36, %v6906_v45  ;;  %v8974_v56 = vpack.c.bf16 %v3045_v10, %v3045_v10 }
 0x32f   : > { %v8865_v40 = vadd.f32 %v5746_v63, %v5602_v6  ;;  %3529 = vst.msk [vmem:[#allocation3 + $0x124] sm:$0xf] %vm2205_vm3, %v3475_v35  ;;  %v1614_v13 = vsel %vm8910_vm5, %v7546_v43, %v1610_v9  ;;  %v2285_v6 = vld [vmem:[#allocation2 + $0xd0] sm:$0xff]  ;;  %v7299_v9 = vld [vmem:[%s7818_s25 + $0xa0] sm:$0xff] }
 0x330   : > { %5765 = vmatmul.bf16.gmra.mxu0 %v6909_v11  ;;  %v2339_v44 = vpack.c.bf16 %v2285_v6, %v2285_v6  ;;  %v6940_v6 = vld [vmem:[#allocation3 + $0xa8] sm:$0xf]  ;;  %2236 = vst.msk [vmem:[#allocation3 + $0x168] sm:$0xf] %vm2205_vm3, %v8974_v56  ;;  %6793 = vmatmul.msk.bf16.gmra.mxu2 %vm729_vm9, %v7299_v9 }
 0x331   : > { %v7341_v12 = vld [vmem:[#allocation3 + $0x118] sm:$0xf0]  ;;  %v7550_v59 = vpop.eup %7549 }
 0x332   : > { %2470 = vrot.lane.b32.xlu0 %v2338_v16, %s7653_s26  ;;  %v6997_v29 = vor.u32 %v7341_v12, %v6996_v14  ;;  %v7552_v32 = vpop.eup %7551  ;;  %v1622_v54 = vmul.f32 %v7550_v59, %v1147_v3  ;;  %vm1627_vm10 = vweird.f32 %v7550_v59 }
 0x333   : > { %3759 = vrot.lane.b32.xlu1 %v3632_v25, %s7653_s26  ;;  %4511 = vrot.lane.b32.xlu2 %v8836_v26, %s7655_s28  ;;  %v1617_v26 = vand.u32 2147483648, %v8858_v8  ;;  %v4717_v63 = vld [vmem:[#allocation2 + $0xf9] sm:$0xff]  ;;  %vm1628_vm11 = vmor %vm1626_vm8, %vm1627_vm10 }
 0x334   : > { %v3746_v5 = vpop.permute.xlu0 %3745  ;;  %7261 = vmatmul.msk.bf16.gmra.mxu1 %vm382_vm0, %v6997_v29  ;;  %v4771_v11 = vpack.c.bf16 %v4717_v63, %v4717_v63  ;;  %v1623_v1 = vsub.f32 1.0, %v1622_v54 }
 0x335   : > { %3895 = vst.msk [vmem:[#allocation3 + $0x94] sm:$0xf] %vm2584_vm13, %v3746_v5  ;;  %v4498_v62 = vpop.permute.xlu1 %4497  ;;  %v2836_v28 = vpop.permute.xlu2 %2835  ;;  %v7325_v17 = vld [vmem:[#allocation3 + $0x98] sm:$0xf0]  ;;  %v1618_v2 = vor.u32 1.1754944e-38, %v1617_v26 }
 0x336   : > { %4649 = vst.msk [vmem:[#allocation3 + $0x7c] sm:$0xf] %vm3342_vm14, %v4498_v62  ;;  %v6929_v50 = vor.u32 %v7325_v17, %v6928_v31  ;;  %v8945_v14 = vpop.f32.mrf.mxu0  ;;  %v1624_v41 = vmul.f32 %v7550_v59, %v1623_v1  ;;  %v8948_v31 = vpop.f32.mrf.mxu1  ;;  %v3581_v1 = vld [vmem:[#allocation2 + $0xd1] sm:$0xff] }
 0x337   : > { %2981 = vst.msk [vmem:[#allocation3 + $0xcc] sm:$0xf] %vm2963_vm6, %v2836_v28  ;;  %v1619_v36 = vsel %vm1616_vm7, %v1618_v2, %v1614_v13 }
 0x338   : > { %5631 = vmatmul.bf16.gmra.mxu3 %v6929_v50  ;;  %v2010_v45 = vmul.f32 %v1619_v36, %v8838_v52  ;;  %4825 = vst.msk [vmem:[#allocation3 + $0x128] sm:$0xf] %vm2205_vm3, %v4771_v11  ;;  %v1632_v52 = vand.u32 2147483648, %v1147_v3  ;;  %v1625_v43 = vadd.f32 %v7550_v59, %v1624_v41  ;;  %v2286_v50 = vld [vmem:[#allocation2 + $0xd8] sm:$0xff]  ;;  %v3635_v41 = vpack.c.bf16 %v3581_v1, %v3581_v1 }
 0x339   : > { %v8971_v61 = vpack.c.bf16 %v2286_v50, %v2286_v50  ;;  %v3046_v36 = vld [vmem:[#allocation2 + $0xff] sm:$0xff] }
 0x33a   : > { %3222 = vrot.lane.b32.xlu0 %v8729_v20, %s7655_s28  ;;  %2072 = vst.msk [vmem:[#allocation2 + $0x108] sm:$0xff] %vm382_vm0, %v2010_v45  ;;  %v1633_v29 = vor.u32 1.1754944e-38, %v1632_v52  ;;  %v1629_v34 = vsel %vm1628_vm11, %v7550_v59, %v1625_v43  ;;  %v8997_v18 = vpack.c.bf16 %v3046_v36, %v3046_v36 }
 0x33b   : > { %4513 = vrot.lane.b32.xlu1 %v2338_v16, %s7655_s28  ;;  %2847 = vrot.lane.b32.xlu2 %v2716_v57, %s7654_s27 }
 0x33c   : > { %v4122_v8 = vpop.permute.xlu0 %4121  ;;  %v1634_v30 = vsel %vm1631_vm12, %v1633_v29, %v1629_v34  ;;  %2237 = vst.msk [vmem:[#allocation3 + $0x174] sm:$0xf] %vm2205_vm3, %v8997_v18 }
 0x33d   : > { %4272 = vst.msk [vmem:[#allocation3 + $0x88] sm:$0xf] %vm2963_vm6, %v4122_v8  ;;  %v2834_v27 = vpop.permute.xlu1 %2833  ;;  %v4124_v23 = vpop.permute.xlu2 %4123  ;;  %v7321_v39 = vld [vmem:[#allocation3 + $0x7c] sm:$0xf]  ;;  %v2011_v21 = vmul.f32 %v1634_v30, %v8873_v15  ;;  %v3423_v8 = vld [vmem:[#allocation2 + $0xf0] sm:$0xff] }
 0x33e   : > { %4650 = vst.msk [vmem:[#allocation3 + $0x88] sm:$0xf] %vm3342_vm14, %v8861_v4  ;;  %v8937_v4 = vadd.f32 1.0, %v7552_v32  ;;  %v3477_v45 = vpack.c.bf16 %v3423_v8, %v3423_v8  ;;  %v8987_v11 = vpop.f32.mrf.mxu1  ;;  %v3424_v32 = vld [vmem:[#allocation2 + $0xf8] sm:$0xff] }
 0x33f   : > { %2980 = vst.msk [vmem:[#allocation3 + $0xc0] sm:$0xf] %vm2963_vm6, %v2834_v27  ;;  %v7008_v3 = vld [vmem:[#allocation3 + $0x128] sm:$0xf] }
 0x340   : > { %4273 = vst.msk [vmem:[#allocation3 + $0x94] sm:$0xf] %vm2963_vm6, %v4124_v23  ;;  %7553 = vrcp.f32 %v8937_v4  ;;  %vm1641_vm15 = vweird.f32 %v8937_v4  ;;  %v1647_v17 = vand.u32 2147483648, %v8937_v4  ;;  %v1645_v15 = vand.u32 2147483647, %v8937_v4 }
 0x341   : > { %v4718_v42 = vld [vmem:[#allocation2 + $0x101] sm:$0xff]  ;;  %2073 = vst.msk [vmem:[#allocation2 + $0x110] sm:$0xff] %vm382_vm0, %v2011_v21  ;;  %v9003_v29 = vpop.f32.mrf.mxu2 }
 0x342   : > { %3761 = vrot.lane.b32.xlu0 %v2716_v57, %s7653_s26  ;;  %v4772_v51 = vpack.c.bf16 %v4718_v42, %v4718_v42  ;;  %v1648_v2 = vor.u32 1.1754944e-38, %v1647_v17  ;;  %vm8978_vm4 = vcmp.eq.f32.partialorder %v1645_v15, 8.507059e+37  ;;  %3531 = vst.msk [vmem:[#allocation3 + $0x13c] sm:$0xf] %vm2205_vm3, %v3477_v45  ;;  %v7300_v45 = vld [vmem:[%s7818_s25 + $0xa8] sm:$0xff] }
 0x343   : > { %4135 = vrot.lane.b32.xlu2 %v8729_v20, %s7654_s27  ;;  %2472 = vrot.lane.b32.xlu1 %v2339_v44, %s7653_s26  ;;  %v8943_v20 = vpop.f32.mrf.mxu3 }
 0x344   : > { %v2459_v16 = vpop.permute.xlu0 %2458  ;;  %4826 = vst.msk [vmem:[#allocation3 + $0x134] sm:$0xf] %vm2205_vm3, %v4772_v51  ;;  %6794 = vmatmul.msk.bf16.gmra.mxu2 %vm729_vm9, %v7300_v45  ;;  %v2289_v45 = vld [vmem:[#allocation2 + $0xf0] sm:$0xff] }
 0x345   : > { %v3748_v22 = vpop.permute.xlu1 %3747  ;;  %2603 = vst.msk [vmem:[#allocation3 + $0xd8] sm:$0xf] %vm2584_vm13, %v2459_v16  ;;  %v8940_v33 = vpop.permute.xlu2 %4503  ;;  %v6918_v25 = vld [vmem:[#allocation3 + $0x84] sm:$0xf0] }
 0x346   : > { %3896 = vst.msk [vmem:[#allocation3 + $0xa0] sm:$0xf] %vm2584_vm13, %v3748_v22  ;;  %v6921_v12 = vor.u32 %v7321_v39, %v6918_v25  ;;  %v7554_v5 = vpop.eup %7553  ;;  %v3478_v25 = vpack.c.bf16 %v3424_v32, %v3424_v32 }
 0x347   : > { %v1637_v48 = vmul.f32 %v7554_v5, %v8937_v4  ;;  %vm1642_vm1 = vweird.f32 %v7554_v5 }
 0x348   : > { %5770 = vmatmul.bf16.gmra.mxu0 %v6921_v12  ;;  %vm8967_vm2 = vmor %vm1641_vm15, %vm1642_vm1  ;;  %v4719_v39 = vld [vmem:[#allocation2 + $0x109] sm:$0xff]  ;;  %3532 = vst.msk [vmem:[#allocation3 + $0x148] sm:$0xf] %vm2205_vm3, %v3478_v25 }
 0x349   : > { %v1638_v60 = vsub.f32 1.0, %v1637_v48  ;;  %v4773_v12 = vpack.c.bf16 %v4719_v39, %v4719_v39 }
 0x34a   : > { %2849 = vrot.lane.b32.xlu0 %v8693_v58, %s7654_s27  ;;  %v3580_v58 = vld [vmem:[#allocation2 + $0xc9] sm:$0xff] }
 0x34b   : > { %4515 = vrot.lane.b32.xlu2 %v2339_v44, %s7655_s28  ;;  %3224 = vrot.lane.b32.xlu1 %v8738_v37, %s7655_s28  ;;  %v5607_v26 = vpop.f32.mrf.mxu3  ;;  %v1639_v0 = vmul.f32 %v7554_v5, %v1638_v60  ;;  %v3634_v57 = vpack.c.bf16 %v3580_v58, %v3580_v58  ;;  %v7344_v23 = vld [vmem:[#allocation3 + $0x130] sm:$0xf0]  ;;  %4827 = vst.msk [vmem:[#allocation3 + $0x140] sm:$0xf] %vm2205_vm3, %v4773_v12  ;;  %v9025_v58 = vpop.f32.mrf.mxu1 }
 0x34c   : > { %v3211_v47 = vpop.permute.xlu0 %3210  ;;  %v7009_v63 = vor.u32 %v7344_v23, %v7008_v3  ;;  %v3048_v3 = vld [vmem:[#allocation2 + $0x10f] sm:$0xff]  ;;  %v3425_v23 = vld [vmem:[#allocation2 + $0x100] sm:$0xff] }
 0x34d   : > { %v4502_v62 = vpop.permute.xlu1 %4501  ;;  %3358 = vst.msk [vmem:[#allocation3 + $0xb4] sm:$0xf] %vm3342_vm14, %v3211_v47  ;;  %v2463_v28 = vpop.permute.xlu2 %2462  ;;  %v1640_v13 = vadd.f32 %v7554_v5, %v1639_v0 }
 0x34e   : > { %4651 = vst.msk [vmem:[#allocation3 + $0x94] sm:$0xf] %vm3342_vm14, %v4502_v62  ;;  %v5751_v35 = vpop.f32.mrf.mxu0  ;;  %7262 = vmatmul.msk.bf16.gmra.mxu1 %vm382_vm0, %v7009_v63  ;;  %v9023_v62 = vpop.f32.mrf.mxu2  ;;  %v3426_v63 = vld [vmem:[#allocation2 + $0x108] sm:$0xff] }
 0x34f   : > { %2605 = vst.msk [vmem:[#allocation3 + $0xf0] sm:$0xf] %vm2584_vm13, %v2463_v28  ;;  %v8964_v38 = vadd.f32 %v5751_v35, %v5607_v26  ;;  %v1644_v59 = vsel %vm8967_vm2, %v7554_v5, %v1640_v13  ;;  %v2287_v5 = vld [vmem:[#allocation2 + $0xe0] sm:$0xff]  ;;  %v6833_v17 = vmul.f32 -1.442695, %v9023_v62 }
 0x350   : > { %v1649_v4 = vsel %vm8978_vm4, %v1648_v2, %v1644_v59  ;;  %v9021_v48 = vpack.c.bf16 %v2287_v5, %v2287_v5  ;;  %v3047_v2 = vld [vmem:[#allocation2 + $0x107] sm:$0xff] }
 0x351   : > { %v2012_v22 = vmul.f32 %v1649_v4, %v8914_v7  ;;  %v6832_v7 = vmul.f32 -1.442695, %v9003_v29  ;;  %v9045_v27 = vpack.c.bf16 %v3047_v2, %v3047_v2 }
 0x352   : > { %4137 = vrot.lane.b32.xlu0 %v8738_v37, %s7654_s27  ;;  %v7020_v8 = vld [vmem:[#allocation3 + $0x140] sm:$0xf] }
 0x353   : > { %3763 = vrot.lane.b32.xlu1 %v3634_v57, %s7653_s26  ;;  %2474 = vrot.lane.b32.xlu2 %v8971_v61, %s7653_s26  ;;  %2074 = vst.msk [vmem:[#allocation2 + $0x118] sm:$0xff] %vm382_vm0, %v2012_v22  ;;  %v9014_v42 = vpop.f32.mrf.mxu3  ;;  %7555 = vpow2.f32 %v6832_v7  ;;  %v9056_v32 = vpop.f32.mrf.mxu1 }
 0x354   : > { %v3750_v37 = vpop.permute.xlu0 %3749  ;;  %v7328_v44 = vld [vmem:[#allocation3 + $0xb0] sm:$0xf0]  ;;  %7557 = vpow2.f32 %v6833_v17  ;;  %2238 = vst.msk [vmem:[#allocation3 + $0x180] sm:$0xf] %vm2205_vm3, %v9045_v27 }
 0x355   : > { %3897 = vst.msk [vmem:[#allocation3 + $0xac] sm:$0xf] %vm2584_vm13, %v3750_v37  ;;  %v2461_v54 = vpop.permute.xlu1 %2460  ;;  %v3215_v52 = vpop.permute.xlu2 %3214  ;;  %v6941_v16 = vor.u32 %v7328_v44, %v6940_v6  ;;  %v3479_v6 = vpack.c.bf16 %v3425_v23, %v3425_v23  ;;  %v9052_v44 = vpack.c.bf16 %v3048_v3, %v3048_v3 }
 0x356   : > { %2604 = vst.msk [vmem:[#allocation3 + $0xe4] sm:$0xf] %vm2584_vm13, %v2461_v54  ;;  %v9017_v30 = vpop.f32.mrf.mxu0 }
 0x357   : > { %3360 = vst.msk [vmem:[#allocation3 + $0xcc] sm:$0xf] %vm3342_vm14, %v3215_v52  ;;  %5636 = vmatmul.bf16.gmra.mxu3 %v6941_v16  ;;  %v7324_v52 = vld [vmem:[#allocation3 + $0x94] sm:$0xf]  ;;  %v3480_v16 = vpack.c.bf16 %v3426_v63, %v3426_v63 }
 0x358   : > { %3533 = vst.msk [vmem:[#allocation3 + $0x154] sm:$0xf] %vm2205_vm3, %v3479_v6 }
 0x359   : > { %v7556_v28 = vpop.eup %7555  ;;  %2239 = vst.msk [vmem:[#allocation3 + $0x18c] sm:$0xf] %vm2205_vm3, %v9052_v44 }
 0x35a   : > { %3765 = vrot.lane.b32.xlu0 %v3635_v41, %s7653_s26  ;;  %v4720_v47 = vld [vmem:[#allocation2 + $0x111] sm:$0xff]  ;;  %v9035_v26 = vadd.f32 1.0, %v7556_v28  ;;  %3534 = vst.msk [vmem:[#allocation3 + $0x160] sm:$0xf] %vm2205_vm3, %v3480_v16 }
 0x35b   : > { %2851 = vrot.lane.b32.xlu1 %v3635_v41, %s7654_s27  ;;  %3226 = vrot.lane.b32.xlu2 %v8788_v53, %s7655_s28  ;;  %v4774_v21 = vpack.c.bf16 %v4720_v47, %v4720_v47  ;;  %v5612_v19 = vpop.f32.mrf.mxu3  ;;  %v2288_v41 = vld [vmem:[#allocation2 + $0xe8] sm:$0xff] }
 0x35c   : > { %v2838_v43 = vpop.permute.xlu0 %2837  ;;  %7559 = vrcp.f32 %v9035_v26  ;;  %vm1656_vm5 = vweird.f32 %v9035_v26  ;;  %v1662_v25 = vand.u32 2147483648, %v9035_v26 }
 0x35d   : > { %2982 = vst.msk [vmem:[#allocation3 + $0xd8] sm:$0xf] %vm2963_vm6, %v2838_v43  ;;  %v3213_v51 = vpop.permute.xlu1 %3212  ;;  %v4128_v34 = vpop.permute.xlu2 %4127  ;;  %v1660_v43 = vand.u32 2147483647, %v9035_v26 }
 0x35e   : > { %3359 = vst.msk [vmem:[#allocation3 + $0xc0] sm:$0xf] %vm3342_vm14, %v3213_v51  ;;  %v7331_v0 = vld [vmem:[#allocation3 + $0xc8] sm:$0xf0]  ;;  %v1663_v5 = vor.u32 1.1754944e-38, %v1662_v25  ;;  %v2667_v25 = vld [vmem:[#allocation2 + $0xe9] sm:$0xff] }
 0x35f   : > { %4275 = vst.msk [vmem:[#allocation3 + $0xac] sm:$0xf] %vm2963_vm6, %v4128_v34  ;;  %v2342_v34 = vpack.c.bf16 %v2288_v41, %v2288_v41  ;;  %vm1661_vm10 = vcmp.eq.f32.partialorder %v1660_v43, 8.507059e+37  ;;  %v2721_v43 = vpack.c.bf16 %v2667_v25, %v2667_v25 }
 0x360   : > { %4828 = vst.msk [vmem:[#allocation3 + $0x14c] sm:$0xf] %vm2205_vm3, %v4774_v21 }
 0x362   : > { %2476 = vrot.lane.b32.xlu0 %v9021_v48, %s7653_s26 }
 0x363   : > { %4517 = vrot.lane.b32.xlu1 %v8971_v61, %s7655_s28  ;;  %4139 = vrot.lane.b32.xlu2 %v8788_v53, %s7654_s27  ;;  %v3582_v53 = vld [vmem:[#allocation2 + $0xd9] sm:$0xff] }
 0x364   : > { %v4126_v35 = vpop.permute.xlu0 %4125  ;;  %v3636_v9 = vpack.c.bf16 %v3582_v53, %v3582_v53 }
 0x365   : > { %4274 = vst.msk [vmem:[#allocation3 + $0xa0] sm:$0xf] %vm2963_vm6, %v4126_v35  ;;  %v3752_v50 = vpop.permute.xlu1 %3751  ;;  %v2842_v60 = vpop.permute.xlu2 %2841  ;;  %v6952_v15 = vld [vmem:[#allocation3 + $0xc0] sm:$0xf] }
 0x366   : > { %4652 = vst.msk [vmem:[#allocation3 + $0xa0] sm:$0xf] %vm3342_vm14, %v8940_v33  ;;  %v5756_v10 = vpop.f32.mrf.mxu0  ;;  %v6953_v57 = vor.u32 %v7331_v0, %v6952_v15  ;;  %v7558_v33 = vpop.eup %7557  ;;  %v2666_v15 = vld [vmem:[#allocation2 + $0xe1] sm:$0xff] }
 0x367   : > { %3898 = vst.msk [vmem:[#allocation3 + $0xb8] sm:$0xf] %vm2584_vm13, %v3752_v50  ;;  %v9042_v61 = vadd.f32 %v5756_v10, %v5612_v19  ;;  %v7347_v13 = vld [vmem:[#allocation3 + $0x148] sm:$0xf0]  ;;  %v7560_v37 = vpop.eup %7559  ;;  %v1150_v59 = vadd.f32 1.0, %v7558_v33  ;;  %v9081_v10 = vpop.f32.mrf.mxu2 }
 0x368   : > { %2984 = vst.msk [vmem:[#allocation3 + $0xf0] sm:$0xf] %vm2963_vm6, %v2842_v60  ;;  %5641 = vmatmul.bf16.gmra.mxu3 %v6953_v57  ;;  %v7021_v36 = vor.u32 %v7347_v13, %v7020_v8  ;;  %v1652_v4 = vmul.f32 %v7560_v37, %v9035_v26  ;;  %vm1657_vm7 = vweird.f32 %v7560_v37  ;;  %v2720_v57 = vpack.c.bf16 %v2666_v15, %v2666_v15 }
 0x369   : > { %7561 = vrcp.f32 %v1150_v59  ;;  %vm1658_vm8 = vmor %vm1656_vm5, %vm1657_vm7  ;;  %vm1671_vm11 = vweird.f32 %v1150_v59  ;;  %v1677_v0 = vand.u32 2147483648, %v1150_v59  ;;  %v6834_v2 = vmul.f32 -1.442695, %v9081_v10 }
 0x36a   : > { %3228 = vrot.lane.b32.xlu0 %v8795_v46, %s7655_s28  ;;  %7263 = vmatmul.msk.bf16.gmra.mxu1 %vm382_vm0, %v7021_v36  ;;  %v1653_v7 = vsub.f32 1.0, %v1652_v4 }
 0x36b   : > { %3767 = vrot.lane.b32.xlu1 %v3636_v9, %s7653_s26  ;;  %2853 = vrot.lane.b32.xlu2 %v3636_v9, %s7654_s27  ;;  %v1678_v3 = vor.u32 1.1754944e-38, %v1677_v0  ;;  %7563 = vpow2.f32 %v6834_v2 }
 0x36c   : > { %v3754_v54 = vpop.permute.xlu0 %3753  ;;  %v1654_v51 = vmul.f32 %v7560_v37, %v1653_v7 }
 0x36d   : > { %3899 = vst.msk [vmem:[#allocation3 + $0xc4] sm:$0xf] %vm2584_vm13, %v3754_v54  ;;  %v2840_v1 = vpop.permute.xlu1 %2839  ;;  %v9063_v22 = vpop.permute.xlu2 %4507  ;;  %v6930_v39 = vld [vmem:[#allocation3 + $0x9c] sm:$0xf0] }
 0x36e   : > { %2983 = vst.msk [vmem:[#allocation3 + $0xe4] sm:$0xf] %vm2963_vm6, %v2840_v1  ;;  %v6933_v12 = vor.u32 %v7324_v52, %v6930_v39  ;;  %v1655_v47 = vadd.f32 %v7560_v37, %v1654_v51  ;;  %v9106_v1 = vpop.f32.mrf.mxu3  ;;  %v9108_v39 = vpop.f32.mrf.mxu0 }
 0x36f   : > { %v7562_v21 = vpop.eup %7561  ;;  %v9097_v54 = vpop.f32.mrf.mxu2 }
 0x370   : > { %5775 = vmatmul.bf16.gmra.mxu0 %v6933_v12  ;;  %v1659_v17 = vsel %vm1658_vm8, %v7560_v37, %v1655_v47  ;;  %v1667_v26 = vmul.f32 %v7562_v21, %v1150_v59  ;;  %vm1672_vm12 = vweird.f32 %v7562_v21  ;;  %v6835_v52 = vmul.f32 -1.442695, %v9097_v54 }
 0x371   : > { %v1664_v60 = vsel %vm1661_vm10, %v1663_v5, %v1659_v17  ;;  %vm1673_vm15 = vmor %vm1671_vm11, %vm1672_vm12  ;;  %v7564_v63 = vpop.eup %7563  ;;  %v2290_v17 = vld [vmem:[#allocation2 + $0xf8] sm:$0xff] }
 0x372   : > { %4141 = vrot.lane.b32.xlu0 %v8795_v46, %s7654_s27  ;;  %v2013_v46 = vmul.f32 %v1664_v60, %v9003_v29  ;;  %v1668_v19 = vsub.f32 1.0, %v1667_v26 }
 0x373   : > { %4519 = vrot.lane.b32.xlu2 %v9021_v48, %s7655_s28  ;;  %2478 = vrot.lane.b32.xlu1 %v2342_v34, %s7653_s26  ;;  %v1675_v48 = vand.u32 2147483647, %v1150_v59  ;;  %v1151_v59 = vadd.f32 1.0, %v7564_v63 }
 0x374   : > { %v2465_v28 = vpop.permute.xlu0 %2464  ;;  %2075 = vst.msk [vmem:[#allocation2 + $0x120] sm:$0xff] %vm382_vm0, %v2013_v46  ;;  %v1669_v53 = vmul.f32 %v7562_v21, %v1668_v19 }
 0x375   : > { %v4506_v35 = vpop.permute.xlu1 %4505  ;;  %2606 = vst.msk [vmem:[#allocation3 + $0xfc] sm:$0xf] %vm2584_vm13, %v2465_v28  ;;  %v4132_v50 = vpop.permute.xlu2 %4131  ;;  %vm1676_vm1 = vcmp.eq.f32.partialorder %v1675_v48, 8.507059e+37  ;;  %7565 = vrcp.f32 %v1151_v59  ;;  %vm1686_vm2 = vweird.f32 %v1151_v59 }
 0x376   : > { %4653 = vst.msk [vmem:[#allocation3 + $0xac] sm:$0xf] %vm3342_vm14, %v4506_v35  ;;  %v1670_v9 = vadd.f32 %v7562_v21, %v1669_v53  ;;  %7567 = vpow2.f32 %v6835_v52  ;;  %v1690_v35 = vand.u32 2147483647, %v1151_v59  ;;  %v3427_v52 = vld [vmem:[#allocation2 + $0x110] sm:$0xff] }
 0x377   : > { %4277 = vst.msk [vmem:[#allocation3 + $0xc4] sm:$0xf] %vm2963_vm6, %v4132_v50 }
 0x378   : > { %v1674_v8 = vsel %vm1673_vm15, %v7562_v21, %v1670_v9  ;;  %v7301_v21 = vld [vmem:[%s7818_s25 + $0xb0] sm:$0xff]  ;;  %v2344_v9 = vpack.c.bf16 %v2290_v17, %v2290_v17  ;;  %vm9141_vm7 = vcmp.eq.f32.partialorder %v1690_v35, 8.507059e+37 }
 0x379   : > { %v1679_v33 = vsel %vm1676_vm1, %v1678_v3, %v1674_v8  ;;  %6795 = vmatmul.msk.bf16.gmra.mxu2 %vm729_vm9, %v7301_v21  ;;  %v9139_v3 = vpop.f32.mrf.mxu2  ;;  %v2668_v17 = vld [vmem:[#allocation2 + $0xf1] sm:$0xff] }
 0x37a   : > { %2855 = vrot.lane.b32.xlu0 %v2720_v57, %s7654_s27  ;;  %v2014_v36 = vmul.f32 %v1679_v33, %v9023_v62 }
 0x37b   : > { %4143 = vrot.lane.b32.xlu2 %v8880_v49, %s7654_s27  ;;  %3230 = vrot.lane.b32.xlu1 %v8880_v49, %s7655_s28  ;;  %v4721_v6 = vld [vmem:[#allocation2 + $0x119] sm:$0xff]  ;;  %v9095_v49 = vpack.c.bf16 %v2289_v45, %v2289_v45  ;;  %v7566_v7 = vpop.eup %7565 }
 0x37c   : > { %v3217_v29 = vpop.permute.xlu0 %3216  ;;  %v4775_v37 = vpack.c.bf16 %v4721_v6, %v4721_v6  ;;  %2076 = vst.msk [vmem:[#allocation2 + $0x128] sm:$0xff] %vm382_vm0, %v2014_v36  ;;  %v7568_v51 = vpop.eup %7567  ;;  %v1682_v5 = vmul.f32 %v7566_v7, %v1151_v59  ;;  %vm1687_vm4 = vweird.f32 %v7566_v7  ;;  %v3966_v33 = vld [vmem:[#allocation2 + $0x11f] sm:$0xff] }
 0x37d   : > { %v3756_v13 = vpop.permute.xlu1 %3755  ;;  %3361 = vst.msk [vmem:[#allocation3 + $0xd8] sm:$0xf] %vm3342_vm14, %v3217_v29  ;;  %v2469_v23 = vpop.permute.xlu2 %2468  ;;  %v9122_v47 = vadd.f32 1.0, %v7568_v51  ;;  %v7327_v15 = vld [vmem:[#allocation3 + $0xac] sm:$0xf]  ;;  %vm9135_vm5 = vmor %vm1686_vm2, %vm1687_vm4 }
 0x37e   : > { %3900 = vst.msk [vmem:[#allocation3 + $0xd0] sm:$0xf] %vm2584_vm13, %v3756_v13  ;;  %v1683_v26 = vsub.f32 1.0, %v1682_v5  ;;  %v6836_v13 = vmul.f32 -1.442695, %v9139_v3 }
 0x37f   : > { %2608 = vst.msk [vmem:[#allocation3 + $0x114] sm:$0xf] %vm2584_vm13, %v2469_v23  ;;  %7569 = vrcp.f32 %v9122_v47  ;;  %v3965_v23 = vld [vmem:[#allocation2 + $0x117] sm:$0xff]  ;;  %vm1701_vm8 = vweird.f32 %v9122_v47  ;;  %v1707_v21 = vand.u32 2147483648, %v9122_v47 }
 0x380   : > { %4829 = vst.msk [vmem:[#allocation3 + $0x158] sm:$0xf] %vm2205_vm3, %v4775_v37  ;;  %v1684_v48 = vmul.f32 %v7566_v7, %v1683_v26  ;;  %v9146_v6 = vpack.c.bf16 %v3965_v23, %v3965_v23  ;;  %7571 = vpow2.f32 %v6836_v13 }
 0x382   : > { %3769 = vrot.lane.b32.xlu0 %v2720_v57, %s7653_s26  ;;  %v1685_v29 = vadd.f32 %v7566_v7, %v1684_v48  ;;  %2240 = vst.msk [vmem:[#allocation3 + $0x198] sm:$0xf] %vm2205_vm3, %v9146_v6  ;;  %v9180_v48 = vpop.f32.mrf.mxu2 }
 0x383   : > { %4521 = vrot.lane.b32.xlu1 %v2342_v34, %s7655_s28  ;;  %2480 = vrot.lane.b32.xlu2 %v9095_v49, %s7653_s26  ;;  %v4722_v12 = vld [vmem:[#allocation2 + $0x121] sm:$0xff]  ;;  %v9114_v34 = vpop.f32.mrf.mxu1 }
 0x384   : > { %v4130_v62 = vpop.permute.xlu0 %4129  ;;  %v4776_v41 = vpack.c.bf16 %v4722_v12, %v4722_v12  ;;  %v1689_v63 = vsel %vm9135_vm5, %v7566_v7, %v1685_v29  ;;  %v6964_v7 = vld [vmem:[#allocation3 + $0xd8] sm:$0xf] }
 0x385   : > { %4276 = vst.msk [vmem:[#allocation3 + $0xb8] sm:$0xf] %vm2963_vm6, %v4130_v62  ;;  %v2467_v4 = vpop.permute.xlu1 %2466  ;;  %v3221_v16 = vpop.permute.xlu2 %3220 }
 0x386   : > { %4654 = vst.msk [vmem:[#allocation3 + $0xb8] sm:$0xf] %vm3342_vm14, %v9063_v22  ;;  %v1692_v22 = vand.u32 2147483648, %v1151_v59  ;;  %v9151_v59 = vpack.c.bf16 %v3966_v33, %v3966_v33  ;;  %v7570_v62 = vpop.eup %7569 }
 0x387   : > { %2607 = vst.msk [vmem:[#allocation3 + $0x108] sm:$0xf] %vm2584_vm13, %v2467_v4  ;;  %v7032_v36 = vld [vmem:[#allocation3 + $0x158] sm:$0xf]  ;;  %v1697_v51 = vmul.f32 %v7570_v62, %v9122_v47  ;;  %vm1702_vm10 = vweird.f32 %v7570_v62 }
 0x388   : > { %3363 = vst.msk [vmem:[#allocation3 + $0xf0] sm:$0xf] %vm3342_vm14, %v3221_v16  ;;  %v1693_v2 = vor.u32 1.1754944e-38, %v1692_v22  ;;  %v3428_v16 = vld [vmem:[#allocation2 + $0x118] sm:$0xff]  ;;  %vm9176_vm11 = vmor %vm1701_vm8, %vm1702_vm10 }
 0x389   : > { %4830 = vst.msk [vmem:[#allocation3 + $0x164] sm:$0xf] %vm2205_vm3, %v4776_v41  ;;  %v1698_v26 = vsub.f32 1.0, %v1697_v51  ;;  %v3482_v35 = vpack.c.bf16 %v3428_v16, %v3428_v16  ;;  %v2669_v16 = vld [vmem:[#allocation2 + $0xf9] sm:$0xff] }
 0x38a   : > { %4145 = vrot.lane.b32.xlu0 %v8885_v55, %s7654_s27  ;;  %v1694_v4 = vsel %vm9141_vm7, %v1693_v2, %v1689_v63  ;;  %2241 = vst.msk [vmem:[#allocation3 + $0x1a4] sm:$0xf] %vm2205_vm3, %v9151_v59  ;;  %v6837_v2 = vmul.f32 -1.442695, %v9180_v48 }
 0x38b   : > { %2857 = vrot.lane.b32.xlu1 %v2721_v43, %s7654_s27  ;;  %3232 = vrot.lane.b32.xlu2 %v8885_v55, %s7655_s28  ;;  %v5617_v55 = vpop.f32.mrf.mxu3  ;;  %v9160_v25 = vpop.f32.mrf.mxu1  ;;  %v2015_v41 = vmul.f32 %v1694_v4, %v9081_v10  ;;  %v3481_v10 = vpack.c.bf16 %v3427_v52, %v3427_v52  ;;  %3536 = vst.msk [vmem:[#allocation3 + $0x178] sm:$0xf] %vm2205_vm3, %v3482_v35 }
 0x38c   : > { %v2844_v28 = vpop.permute.xlu0 %2843 }
 0x38d   : > { %2985 = vst.msk [vmem:[#allocation3 + $0xfc] sm:$0xf] %vm2963_vm6, %v2844_v28  ;;  %v3219_v50 = vpop.permute.xlu1 %3218  ;;  %v9126_v60 = vpop.permute.xlu2 %4511  ;;  %v6942_v0 = vld [vmem:[#allocation3 + $0xb4] sm:$0xf0] }
 0x38e   : > { %3362 = vst.msk [vmem:[#allocation3 + $0xe4] sm:$0xf] %vm3342_vm14, %v3219_v50  ;;  %v5761_v46 = vpop.f32.mrf.mxu0  ;;  %v6945_v19 = vor.u32 %v7327_v15, %v6942_v0  ;;  %v7572_v50 = vpop.eup %7571  ;;  %v1699_v15 = vmul.f32 %v7570_v62, %v1698_v26  ;;  %v2722_v0 = vpack.c.bf16 %v2668_v17, %v2668_v17  ;;  %v2723_v26 = vpack.c.bf16 %v2669_v16, %v2669_v16 }
 0x38f   : > { %v9131_v57 = vadd.f32 %v5761_v46, %v5617_v55  ;;  %2077 = vst.msk [vmem:[#allocation2 + $0x130] sm:$0xff] %vm382_vm0, %v2015_v41  ;;  %v1708_v46 = vor.u32 1.1754944e-38, %v1707_v21 }
 0x390   : > { %5780 = vmatmul.bf16.gmra.mxu0 %v6945_v19  ;;  %v7350_v45 = vld [vmem:[#allocation3 + $0x160] sm:$0xf0]  ;;  %v1153_v19 = vadd.f32 1.0, %v7572_v50  ;;  %3535 = vst.msk [vmem:[#allocation3 + $0x16c] sm:$0xf] %vm2205_vm3, %v3481_v10  ;;  %v1700_v53 = vadd.f32 %v7570_v62, %v1699_v15 }
 0x391   : > { %v7033_v37 = vor.u32 %v7350_v45, %v7032_v36  ;;  %v2291_v36 = vld [vmem:[#allocation2 + $0x100] sm:$0xff] }
 0x392   : > { %2482 = vrot.lane.b32.xlu0 %v2344_v9, %s7653_s26  ;;  %7573 = vrcp.f32 %v1153_v19  ;;  %v1704_v29 = vsel %vm9176_vm11, %v7570_v62, %v1700_v53  ;;  %vm1716_vm15 = vweird.f32 %v1153_v19  ;;  %v1720_v41 = vand.u32 2147483647, %v1153_v19 }
 0x393   : > { %3771 = vrot.lane.b32.xlu1 %v2721_v43, %s7653_s26  ;;  %4523 = vrot.lane.b32.xlu2 %v9095_v49, %s7655_s28  ;;  %v1705_v43 = vand.u32 2147483647, %v9122_v47  ;;  %7575 = vpow2.f32 %v6837_v2  ;;  %v9218_v15 = vpop.f32.mrf.mxu1 }
 0x394   : > { %v3758_v12 = vpop.permute.xlu0 %3757  ;;  %7264 = vmatmul.msk.bf16.gmra.mxu1 %vm382_vm0, %v7033_v37  ;;  %v2345_v37 = vpack.c.bf16 %v2291_v36, %v2291_v36  ;;  %vm1721_vm4 = vcmp.eq.f32.partialorder %v1720_v41, 8.507059e+37 }
 0x395   : > { %3901 = vst.msk [vmem:[#allocation3 + $0xdc] sm:$0xf] %vm2584_vm13, %v3758_v12  ;;  %v4510_v49 = vpop.permute.xlu1 %4509  ;;  %v2848_v5 = vpop.permute.xlu2 %2847  ;;  %v7334_v22 = vld [vmem:[#allocation3 + $0xe0] sm:$0xf0]  ;;  %vm1706_vm12 = vcmp.eq.f32.partialorder %v1705_v43, 8.507059e+37 }
 0x396   : > { %4655 = vst.msk [vmem:[#allocation3 + $0xc4] sm:$0xf] %vm3342_vm14, %v4510_v49  ;;  %v6965_v28 = vor.u32 %v7334_v22, %v6964_v7  ;;  %v1709_v23 = vsel %vm1706_vm12, %v1708_v46, %v1704_v29 }
 0x397   : > { %2987 = vst.msk [vmem:[#allocation3 + $0x114] sm:$0xf] %vm2963_vm6, %v2848_v5  ;;  %v2016_v33 = vmul.f32 %v1709_v23, %v9097_v54  ;;  %v1722_v54 = vand.u32 2147483648, %v1153_v19  ;;  %v9211_v5 = vpop.f32.mrf.mxu0 }
 0x398   : > { %5646 = vmatmul.bf16.gmra.mxu3 %v6965_v28  ;;  %v7574_v63 = vpop.eup %7573 }
 0x399   : > { %2078 = vst.msk [vmem:[#allocation2 + $0x138] sm:$0xff] %vm382_vm0, %v2016_v33  ;;  %v7576_v52 = vpop.eup %7575  ;;  %v1712_v62 = vmul.f32 %v7574_v63, %v1153_v19  ;;  %vm1717_vm1 = vweird.f32 %v7574_v63  ;;  %v1723_v28 = vor.u32 1.1754944e-38, %v1722_v54  ;;  %v2292_v33 = vld [vmem:[#allocation2 + $0x108] sm:$0xff] }
 0x39a   : > { %3234 = vrot.lane.b32.xlu0 %v8974_v56, %s7655_s28  ;;  %vm9214_vm2 = vmor %vm1716_vm15, %vm1717_vm1 }
 0x39b   : > { %4525 = vrot.lane.b32.xlu1 %v2344_v9, %s7655_s28  ;;  %2859 = vrot.lane.b32.xlu2 %v2722_v0, %s7654_s27  ;;  %v4723_v9 = vld [vmem:[#allocation2 + $0x129] sm:$0xff]  ;;  %v1713_v12 = vsub.f32 1.0, %v1712_v62  ;;  %v9258_v10 = vpop.f32.mrf.mxu1 }
 0x39c   : > { %v4134_v47 = vpop.permute.xlu0 %4133  ;;  %v4777_v45 = vpack.c.bf16 %v4723_v9, %v4723_v9 }
 0x39d   : > { %4278 = vst.msk [vmem:[#allocation3 + $0xd0] sm:$0xf] %vm2963_vm6, %v4134_v47  ;;  %v2846_v8 = vpop.permute.xlu1 %2845  ;;  %v4136_v13 = vpop.permute.xlu2 %4135  ;;  %v7330_v43 = vld [vmem:[#allocation3 + $0xc4] sm:$0xf]  ;;  %v1714_v21 = vmul.f32 %v7574_v63, %v1713_v12 }
 0x39e   : > { %4656 = vst.msk [vmem:[#allocation3 + $0xd0] sm:$0xf] %vm3342_vm14, %v9126_v60  ;;  %v9203_v60 = vadd.f32 1.0, %v7576_v52  ;;  %v9242_v52 = vpack.c.bf16 %v2292_v33, %v2292_v33 }
 0x39f   : > { %2986 = vst.msk [vmem:[#allocation3 + $0x108] sm:$0xf] %vm2963_vm6, %v2846_v8  ;;  %v1715_v35 = vadd.f32 %v7574_v63, %v1714_v21 }
 0x3a0   : > { %4279 = vst.msk [vmem:[#allocation3 + $0xdc] sm:$0xf] %vm2963_vm6, %v4136_v13  ;;  %7577 = vrcp.f32 %v9203_v60  ;;  %v4724_v17 = vld [vmem:[#allocation2 + $0x131] sm:$0xff]  ;;  %vm1731_vm5 = vweird.f32 %v9203_v60  ;;  %v1737_v8 = vand.u32 2147483648, %v9203_v60 }
 0x3a1   : > { %4831 = vst.msk [vmem:[#allocation3 + $0x170] sm:$0xf] %vm2205_vm3, %v4777_v45  ;;  %v4778_v50 = vpack.c.bf16 %v4724_v17, %v4724_v17 }
 0x3a2   : > { %3773 = vrot.lane.b32.xlu0 %v2722_v0, %s7653_s26  ;;  %v1719_v0 = vsel %vm9214_vm2, %v7574_v63, %v1715_v35  ;;  %v1738_v62 = vor.u32 1.1754944e-38, %v1737_v8 }
 0x3a3   : > { %4147 = vrot.lane.b32.xlu2 %v8974_v56, %s7654_s27  ;;  %2484 = vrot.lane.b32.xlu1 %v2345_v37, %s7653_s26  ;;  %v9209_v56 = vpop.f32.mrf.mxu3  ;;  %4832 = vst.msk [vmem:[#allocation3 + $0x17c] sm:$0xf] %vm2205_vm3, %v4778_v50  ;;  %v1724_v46 = vsel %vm1721_vm4, %v1723_v28, %v1719_v0 }
 0x3a4   : > { %v2471_v4 = vpop.permute.xlu0 %2470  ;;  %v2017_v53 = vmul.f32 %v1724_v46, %v9139_v3  ;;  %v1735_v3 = vand.u32 2147483647, %v9203_v60 }
 0x3a5   : > { %v3760_v7 = vpop.permute.xlu1 %3759  ;;  %2609 = vst.msk [vmem:[#allocation3 + $0x120] sm:$0xf] %vm2584_vm13, %v2471_v4  ;;  %v9206_v51 = vpop.permute.xlu2 %4515  ;;  %v6954_v49 = vld [vmem:[#allocation3 + $0xcc] sm:$0xf0]  ;;  %v7302_v4 = vld [vmem:[%s7818_s25 + $0xb8] sm:$0xff] }
 0x3a6   : > { %3902 = vst.msk [vmem:[#allocation3 + $0xe8] sm:$0xf] %vm2584_vm13, %v3760_v7  ;;  %v6957_v22 = vor.u32 %v7330_v43, %v6954_v49  ;;  %v7578_v55 = vpop.eup %7577  ;;  %vm9249_vm10 = vcmp.eq.f32.partialorder %v1735_v3, 8.507059e+37  ;;  %v3052_v43 = vld [vmem:[#allocation2 + $0x12f] sm:$0xff]  ;;  %6796 = vmatmul.msk.bf16.gmra.mxu2 %vm729_vm9, %v7302_v4 }
 0x3a7   : > { %v1727_v2 = vmul.f32 %v7578_v55, %v9203_v60  ;;  %vm1732_vm7 = vweird.f32 %v7578_v55  ;;  %2079 = vst.msk [vmem:[#allocation2 + $0x140] sm:$0xff] %vm382_vm0, %v2017_v53  ;;  %v3429_v60 = vld [vmem:[#allocation2 + $0x120] sm:$0xff]  ;;  %v9268_v53 = vpack.c.bf16 %v3052_v43, %v3052_v43 }
 0x3a8   : > { %5785 = vmatmul.bf16.gmra.mxu0 %v6957_v22  ;;  %vm9238_vm8 = vmor %vm1731_vm5, %vm1732_vm7  ;;  %v7044_v54 = vld [vmem:[#allocation3 + $0x170] sm:$0xf]  ;;  %v3483_v49 = vpack.c.bf16 %v3429_v60, %v3429_v60 }
 0x3a9   : > { %v1728_v36 = vsub.f32 1.0, %v1727_v2  ;;  %v6976_v22 = vld [vmem:[#allocation3 + $0xf0] sm:$0xf]  ;;  %2243 = vst.msk [vmem:[#allocation3 + $0x1bc] sm:$0xf] %vm2205_vm3, %v9268_v53 }
 0x3aa   : > { %2861 = vrot.lane.b32.xlu0 %v2723_v26, %s7654_s27  ;;  %v7353_v7 = vld [vmem:[#allocation3 + $0x178] sm:$0xf0]  ;;  %3537 = vst.msk [vmem:[#allocation3 + $0x184] sm:$0xf] %vm2205_vm3, %v3483_v49 }
 0x3ab   : > { %4527 = vrot.lane.b32.xlu2 %v2345_v37, %s7655_s28  ;;  %3236 = vrot.lane.b32.xlu1 %v8997_v18, %s7655_s28  ;;  %v5622_v13 = vpop.f32.mrf.mxu3  ;;  %v1729_v45 = vmul.f32 %v7578_v55, %v1728_v36  ;;  %v3051_v37 = vld [vmem:[#allocation2 + $0x127] sm:$0xff]  ;;  %v7045_v21 = vor.u32 %v7353_v7, %v7044_v54 }
 0x3ac   : > { %v3223_v19 = vpop.permute.xlu0 %3222  ;;  %v9245_v16 = vpack.c.bf16 %v3051_v37, %v3051_v37 }
 0x3ad   : > { %v4514_v47 = vpop.permute.xlu1 %4513  ;;  %3364 = vst.msk [vmem:[#allocation3 + $0xfc] sm:$0xf] %vm3342_vm14, %v3223_v19  ;;  %v2475_v29 = vpop.permute.xlu2 %2474  ;;  %v1730_v12 = vadd.f32 %v7578_v55, %v1729_v45  ;;  %v3587_v19 = vld [vmem:[#allocation2 + $0x101] sm:$0xff]  ;;  %7265 = vmatmul.msk.bf16.gmra.mxu1 %vm382_vm0, %v7045_v21  ;;  %v2293_v45 = vld [vmem:[#allocation2 + $0x110] sm:$0xff] }
 0x3ae   : > { %4657 = vst.msk [vmem:[#allocation3 + $0xdc] sm:$0xf] %vm3342_vm14, %v4514_v47  ;;  %v5766_v23 = vpop.f32.mrf.mxu0  ;;  %v4725_v2 = vld [vmem:[#allocation2 + $0x139] sm:$0xff]  ;;  %v3641_v8 = vpack.c.bf16 %v3587_v19, %v3587_v19  ;;  %v9292_v54 = vpack.c.bf16 %v2293_v45, %v2293_v45 }
 0x3af   : > { %2611 = vst.msk [vmem:[#allocation3 + $0x138] sm:$0xf] %vm2584_vm13, %v2475_v29  ;;  %v9235_v9 = vadd.f32 %v5766_v23, %v5622_v13  ;;  %v1734_v28 = vsel %vm9238_vm8, %v7578_v55, %v1730_v12  ;;  %v4779_v29 = vpack.c.bf16 %v4725_v2, %v4725_v2  ;;  %v9274_v13 = vpop.f32.mrf.mxu2  ;;  %v9296_v12 = vpop.f32.mrf.mxu1  ;;  %v3431_v2 = vld [vmem:[#allocation2 + $0x130] sm:$0xff] }
 0x3b0   : > { %2242 = vst.msk [vmem:[#allocation3 + $0x1b0] sm:$0xf] %vm2205_vm3, %v9245_v16  ;;  %v1739_v0 = vsel %vm9249_vm10, %v1738_v62, %v1734_v28 }
 0x3b1   : > { %v2018_v55 = vmul.f32 %v1739_v0, %v9180_v48  ;;  %4833 = vst.msk [vmem:[#allocation3 + $0x188] sm:$0xf] %vm2205_vm3, %v4779_v29  ;;  %v6838_v48 = vmul.f32 -1.442695, %v9274_v13  ;;  %v7303_v29 = vld [vmem:[%s7818_s25 + $0xc0] sm:$0xff] }
 0x3b2   : > { %4149 = vrot.lane.b32.xlu0 %v8997_v18, %s7654_s27 }
 0x3b3   : > { %3775 = vrot.lane.b32.xlu1 %v2723_v26, %s7653_s26  ;;  %2486 = vrot.lane.b32.xlu2 %v9242_v52, %s7653_s26  ;;  %v3430_v26 = vld [vmem:[#allocation2 + $0x128] sm:$0xff]  ;;  %2080 = vst.msk [vmem:[#allocation2 + $0x148] sm:$0xff] %vm382_vm0, %v2018_v55  ;;  %v9285_v23 = vpop.f32.mrf.mxu3  ;;  %7579 = vpow2.f32 %v6838_v48  ;;  %v3432_v48 = vld [vmem:[#allocation2 + $0x138] sm:$0xff] }
 0x3b4   : > { %v3762_v18 = vpop.permute.xlu0 %3761  ;;  %v7337_v17 = vld [vmem:[#allocation3 + $0xf8] sm:$0xf0]  ;;  %v3484_v47 = vpack.c.bf16 %v3430_v26, %v3430_v26 }
 0x3b5   : > { %3903 = vst.msk [vmem:[#allocation3 + $0xf4] sm:$0xf] %vm2584_vm13, %v3762_v18  ;;  %v2473_v35 = vpop.permute.xlu1 %2472  ;;  %v3227_v50 = vpop.permute.xlu2 %3226  ;;  %v6977_v46 = vor.u32 %v7337_v17, %v6976_v22 }
 0x3b6   : > { %2610 = vst.msk [vmem:[#allocation3 + $0x12c] sm:$0xf] %vm2584_vm13, %v2473_v35  ;;  %v9288_v63 = vpop.f32.mrf.mxu0  ;;  %v3053_v35 = vld [vmem:[#allocation2 + $0x137] sm:$0xff]  ;;  %6797 = vmatmul.msk.bf16.gmra.mxu2 %vm729_vm9, %v7303_v29 }
 0x3b7   : > { %3366 = vst.msk [vmem:[#allocation3 + $0x114] sm:$0xf] %vm3342_vm14, %v3227_v50  ;;  %5651 = vmatmul.bf16.gmra.mxu3 %v6977_v46  ;;  %v9294_v4 = vpop.f32.mrf.mxu2  ;;  %v3970_v50 = vld [vmem:[#allocation2 + $0x13f] sm:$0xff]  ;;  %v9316_v55 = vpack.c.bf16 %v3053_v35, %v3053_v35  ;;  %v9327_v45 = vpop.f32.mrf.mxu1 }
 0x3b8   : > { %3538 = vst.msk [vmem:[#allocation3 + $0x190] sm:$0xf] %vm2205_vm3, %v3484_v47  ;;  %v6839_v41 = vmul.f32 -1.442695, %v9294_v4  ;;  %v7056_v46 = vld [vmem:[#allocation3 + $0x188] sm:$0xf] }
 0x3b9   : > { %v7580_v60 = vpop.eup %7579  ;;  %2244 = vst.msk [vmem:[#allocation3 + $0x1c8] sm:$0xf] %vm2205_vm3, %v9316_v55 }
 0x3ba   : > { %3777 = vrot.lane.b32.xlu0 %v3641_v8, %s7653_s26  ;;  %v4726_v37 = vld [vmem:[#allocation2 + $0x141] sm:$0xff]  ;;  %v9306_v7 = vadd.f32 1.0, %v7580_v60  ;;  %7581 = vpow2.f32 %v6839_v41  ;;  %v3486_v41 = vpack.c.bf16 %v3432_v48, %v3432_v48 }
 0x3bb   : > { %2863 = vrot.lane.b32.xlu1 %v3641_v8, %s7654_s27  ;;  %3238 = vrot.lane.b32.xlu2 %v9045_v27, %s7655_s28  ;;  %v4780_v62 = vpack.c.bf16 %v4726_v37, %v4726_v37  ;;  %v5627_v28 = vpop.f32.mrf.mxu3  ;;  %v3485_v8 = vpack.c.bf16 %v3431_v2, %v3431_v2 }
 0x3bc   : > { %v2850_v33 = vpop.permute.xlu0 %2849  ;;  %7583 = vrcp.f32 %v9306_v7  ;;  %vm1746_vm11 = vweird.f32 %v9306_v7  ;;  %3540 = vst.msk [vmem:[#allocation3 + $0x1a8] sm:$0xf] %vm2205_vm3, %v3486_v41 }
 0x3bd   : > { %2988 = vst.msk [vmem:[#allocation3 + $0x120] sm:$0xf] %vm2963_vm6, %v2850_v33  ;;  %v3225_v36 = vpop.permute.xlu1 %3224  ;;  %v4140_v3 = vpop.permute.xlu2 %4139 }
 0x3be   : > { %3365 = vst.msk [vmem:[#allocation3 + $0x108] sm:$0xf] %vm3342_vm14, %v3225_v36  ;;  %v7340_v18 = vld [vmem:[#allocation3 + $0x110] sm:$0xf0] }
 0x3bf   : > { %4281 = vst.msk [vmem:[#allocation3 + $0xf4] sm:$0xf] %vm2963_vm6, %v4140_v3  ;;  %v9323_v3 = vpack.c.bf16 %v3970_v50, %v3970_v50 }
 0x3c0   : > { %4834 = vst.msk [vmem:[#allocation3 + $0x194] sm:$0xf] %vm2205_vm3, %v4780_v62  ;;  %v7333_v62 = vld [vmem:[#allocation3 + $0xdc] sm:$0xf] }
 0x3c1   : > { %3539 = vst.msk [vmem:[#allocation3 + $0x19c] sm:$0xf] %vm2205_vm3, %v3485_v8  ;;  %v2672_v8 = vld [vmem:[#allocation2 + $0x111] sm:$0xff] }
 0x3c2   : > { %2488 = vrot.lane.b32.xlu0 %v9292_v54, %s7653_s26  ;;  %2245 = vst.msk [vmem:[#allocation3 + $0x1d4] sm:$0xf] %vm2205_vm3, %v9323_v3 }
 0x3c3   : > { %4529 = vrot.lane.b32.xlu1 %v9242_v52, %s7655_s28  ;;  %4151 = vrot.lane.b32.xlu2 %v9045_v27, %s7654_s27  ;;  %v3588_v27 = vld [vmem:[#allocation2 + $0x109] sm:$0xff] }
 0x3c4   : > { %v4138_v43 = vpop.permute.xlu0 %4137  ;;  %v3642_v0 = vpack.c.bf16 %v3588_v27, %v3588_v27 }
 0x3c5   : > { %4280 = vst.msk [vmem:[#allocation3 + $0xe8] sm:$0xf] %vm2963_vm6, %v4138_v43  ;;  %v3764_v49 = vpop.permute.xlu1 %3763  ;;  %v2854_v22 = vpop.permute.xlu2 %2853  ;;  %v6988_v21 = vld [vmem:[#allocation3 + $0x108] sm:$0xf] }
 0x3c6   : > { %4658 = vst.msk [vmem:[#allocation3 + $0xe8] sm:$0xf] %vm3342_vm14, %v9206_v51  ;;  %v5771_v52 = vpop.f32.mrf.mxu0  ;;  %v6989_v17 = vor.u32 %v7340_v18, %v6988_v21  ;;  %v7582_v51 = vpop.eup %7581  ;;  %v1752_v21 = vand.u32 2147483648, %v9306_v7 }
 0x3c7   : > { %3904 = vst.msk [vmem:[#allocation3 + $0x100] sm:$0xf] %vm2584_vm13, %v3764_v49  ;;  %v9313_v26 = vadd.f32 %v5771_v52, %v5627_v28  ;;  %v7356_v19 = vld [vmem:[#allocation3 + $0x190] sm:$0xf0]  ;;  %v7584_v33 = vpop.eup %7583  ;;  %v1156_v36 = vadd.f32 1.0, %v7582_v51  ;;  %v2294_v28 = vld [vmem:[#allocation2 + $0x118] sm:$0xff] }
 0x3c8   : > { %2990 = vst.msk [vmem:[#allocation3 + $0x138] sm:$0xf] %vm2963_vm6, %v2854_v22  ;;  %5656 = vmatmul.bf16.gmra.mxu3 %v6989_v17  ;;  %v7057_v47 = vor.u32 %v7356_v19, %v7056_v46  ;;  %v1742_v60 = vmul.f32 %v7584_v33, %v9306_v7  ;;  %vm1747_vm12 = vweird.f32 %v7584_v33  ;;  %v1750_v17 = vand.u32 2147483647, %v9306_v7 }
 0x3c9   : > { %10969 = vst [vmem:[#allocation4_spill] sm:$0xff] %v9313_v26  ;;  %7585 = vrcp.f32 %v1156_v36  ;;  %v2348_v35 = vpack.c.bf16 %v2294_v28, %v2294_v28  ;;  %vm1748_vm15 = vmor %vm1746_vm11, %vm1747_vm12  ;;  %v1753_v50 = vor.u32 1.1754944e-38, %v1752_v21  ;;  %vm1761_vm2 = vweird.f32 %v1156_v36 }
 0x3ca   : > { %3240 = vrot.lane.b32.xlu0 %v9052_v44, %s7655_s28  ;;  %7266 = vmatmul.msk.bf16.gmra.mxu1 %vm382_vm0, %v7057_v47  ;;  %v1743_v52 = vsub.f32 1.0, %v1742_v60  ;;  %vm1751_vm1 = vcmp.eq.f32.partialorder %v1750_v17, 8.507059e+37  ;;  %v1767_v48 = vand.u32 2147483648, %v1156_v36  ;;  %v2295_v17 = vld [vmem:[#allocation2 + $0x120] sm:$0xff] }
 0x3cb   : > { %3779 = vrot.lane.b32.xlu1 %v3642_v0, %s7653_s26  ;;  %2865 = vrot.lane.b32.xlu2 %v3642_v0, %s7654_s27 }
 0x3cc   : > { %v3766_v37 = vpop.permute.xlu0 %3765  ;;  %v1744_v27 = vmul.f32 %v7584_v33, %v1743_v52 }
 0x3cd   : > { %3905 = vst.msk [vmem:[#allocation3 + $0x10c] sm:$0xf] %vm2584_vm13, %v3766_v37  ;;  %v2852_v43 = vpop.permute.xlu1 %2851  ;;  %v9334_v49 = vpop.permute.xlu2 %4519  ;;  %v6966_v22 = vld [vmem:[#allocation3 + $0xe4] sm:$0xf0] }
 0x3ce   : > { %2989 = vst.msk [vmem:[#allocation3 + $0x12c] sm:$0xf] %vm2963_vm6, %v2852_v43  ;;  %v6969_v18 = vor.u32 %v7333_v62, %v6966_v22  ;;  %v1745_v0 = vadd.f32 %v7584_v33, %v1744_v27  ;;  %v9352_v62 = vpop.f32.mrf.mxu2  ;;  %v1768_v43 = vor.u32 1.1754944e-38, %v1767_v48 }
 0x3cf   : > { %v7586_v46 = vpop.eup %7585  ;;  %v6840_v41 = vmul.f32 -1.442695, %v9352_v62 }
 0x3d0   : > { %5790 = vmatmul.bf16.gmra.mxu0 %v6969_v18  ;;  %v1749_v19 = vsel %vm1748_vm15, %v7584_v33, %v1745_v0  ;;  %v1757_v2 = vmul.f32 %v7586_v46, %v1156_v36  ;;  %vm1762_vm4 = vweird.f32 %v7586_v46  ;;  %v2726_v33 = vpack.c.bf16 %v2672_v8, %v2672_v8  ;;  %v2673_v8 = vld [vmem:[#allocation2 + $0x119] sm:$0xff] }
 0x3d1   : > { %v1754_v29 = vsel %vm1751_vm1, %v1753_v50, %v1749_v19  ;;  %vm1763_vm5 = vmor %vm1761_vm2, %vm1762_vm4  ;;  %7587 = vpow2.f32 %v6840_v41 }
 0x3d2   : > { %4153 = vrot.lane.b32.xlu0 %v9052_v44, %s7654_s27  ;;  %v2019_v44 = vmul.f32 %v1754_v29, %v9274_v13  ;;  %v1758_v37 = vsub.f32 1.0, %v1757_v2  ;;  %v9382_v29 = vpop.f32.mrf.mxu0 }
 0x3d3   : > { %4531 = vrot.lane.b32.xlu2 %v9292_v54, %s7655_s28  ;;  %2490 = vrot.lane.b32.xlu1 %v2348_v35, %s7653_s26  ;;  %v1765_v54 = vand.u32 2147483647, %v1156_v36  ;;  %10971 = vst [vmem:[#allocation6_spill] sm:$0xff] %v9382_v29 }
 0x3d4   : > { %v2477_v7 = vpop.permute.xlu0 %2476  ;;  %2081 = vst.msk [vmem:[#allocation2 + $0x150] sm:$0xff] %vm382_vm0, %v2019_v44  ;;  %v1759_v60 = vmul.f32 %v7586_v46, %v1758_v37  ;;  %v2727_v37 = vpack.c.bf16 %v2673_v8, %v2673_v8 }
 0x3d5   : > { %v4518_v51 = vpop.permute.xlu1 %4517  ;;  %2612 = vst.msk [vmem:[#allocation3 + $0x144] sm:$0xf] %vm2584_vm13, %v2477_v7  ;;  %v4144_v47 = vpop.permute.xlu2 %4143  ;;  %vm1766_vm7 = vcmp.eq.f32.partialorder %v1765_v54, 8.507059e+37 }
 0x3d6   : > { %4659 = vst.msk [vmem:[#allocation3 + $0xf4] sm:$0xf] %vm3342_vm14, %v4518_v51  ;;  %v1760_v22 = vadd.f32 %v7586_v46, %v1759_v60  ;;  %v9370_v7 = vpop.f32.mrf.mxu2 }
 0x3d7   : > { %4283 = vst.msk [vmem:[#allocation3 + $0x10c] sm:$0xf] %vm2963_vm6, %v4144_v47  ;;  %v7588_v50 = vpop.eup %7587  ;;  %v9380_v47 = vpop.f32.mrf.mxu3 }
 0x3d8   : > { %v1764_v36 = vsel %vm1763_vm5, %v7586_v46, %v1760_v22  ;;  %v1157_v46 = vadd.f32 1.0, %v7588_v50  ;;  %10970 = vst [vmem:[#allocation5_spill] sm:$0xff] %v9380_v47 }
 0x3d9   : > { %v1769_v28 = vsel %vm1766_vm7, %v1768_v43, %v1764_v36  ;;  %v7304_v43 = vld [vmem:[%s7818_s25 + $0xc8] sm:$0xff] }
 0x3da   : > { %2867 = vrot.lane.b32.xlu0 %v2726_v33, %s7654_s27  ;;  %v2020_v52 = vmul.f32 %v1769_v28, %v9294_v4  ;;  %v6841_v4 = vmul.f32 -1.442695, %v9370_v7  ;;  %7589 = vrcp.f32 %v1157_v46  ;;  %vm1776_vm8 = vweird.f32 %v1157_v46  ;;  %6798 = vmatmul.msk.bf16.gmra.mxu2 %vm729_vm9, %v7304_v43  ;;  %v3971_v43 = vld [vmem:[#allocation2 + $0x147] sm:$0xff] }
 0x3db   : > { %4155 = vrot.lane.b32.xlu2 %v9146_v6, %s7654_s27  ;;  %3242 = vrot.lane.b32.xlu1 %v9146_v6, %s7655_s28  ;;  %v4727_v27 = vld [vmem:[#allocation2 + $0x149] sm:$0xff]  ;;  %v9368_v6 = vpack.c.bf16 %v2295_v17, %v2295_v17 }
 0x3dc   : > { %v3229_v13 = vpop.permute.xlu0 %3228  ;;  %v9365_v0 = vpack.c.bf16 %v4727_v27, %v4727_v27  ;;  %2082 = vst.msk [vmem:[#allocation2 + $0x158] sm:$0xff] %vm382_vm0, %v2020_v52  ;;  %7591 = vpow2.f32 %v6841_v4 }
 0x3dd   : > { %v3768_v21 = vpop.permute.xlu1 %3767  ;;  %3367 = vst.msk [vmem:[#allocation3 + $0x120] sm:$0xf] %vm3342_vm14, %v3229_v13  ;;  %v2481_v18 = vpop.permute.xlu2 %2480  ;;  %v2296_v13 = vld [vmem:[#allocation2 + $0x128] sm:$0xff]  ;;  %v7336_v52 = vld [vmem:[#allocation3 + $0xf4] sm:$0xf] }
 0x3de   : > { %3906 = vst.msk [vmem:[#allocation3 + $0x118] sm:$0xf] %vm2584_vm13, %v3768_v21  ;;  %v1780_v21 = vand.u32 2147483647, %v1157_v46  ;;  %v9413_v8 = vpop.f32.mrf.mxu2 }
 0x3df   : > { %2614 = vst.msk [vmem:[#allocation3 + $0x15c] sm:$0xf] %vm2584_vm13, %v2481_v18 }
 0x3e0   : > { %4835 = vst.msk [vmem:[#allocation3 + $0x1a0] sm:$0xf] %vm2205_vm3, %v9365_v0  ;;  %v7590_v44 = vpop.eup %7589  ;;  %vm9415_vm12 = vcmp.eq.f32.partialorder %v1780_v21, 8.507059e+37  ;;  %v3433_v21 = vld [vmem:[#allocation2 + $0x140] sm:$0xff] }
 0x3e1   : > { %v1772_v60 = vmul.f32 %v7590_v44, %v1157_v46  ;;  %vm1777_vm10 = vweird.f32 %v7590_v44 }
 0x3e2   : > { %3781 = vrot.lane.b32.xlu0 %v2726_v33, %s7653_s26  ;;  %v7592_v54 = vpop.eup %7591  ;;  %v9388_v33 = vpop.f32.mrf.mxu1  ;;  %vm9409_vm11 = vmor %vm1776_vm8, %vm1777_vm10 }
 0x3e3   : > { %4533 = vrot.lane.b32.xlu1 %v2348_v35, %s7655_s28  ;;  %2492 = vrot.lane.b32.xlu2 %v9368_v6, %s7653_s26  ;;  %v4728_v35 = vld [vmem:[#allocation2 + $0x151] sm:$0xff]  ;;  %10972 = vst [vmem:[#allocation7_spill] sm:$0xff] %v9388_v33  ;;  %v9396_v41 = vadd.f32 1.0, %v7592_v54  ;;  %v1773_v36 = vsub.f32 1.0, %v1772_v60  ;;  %v6842_v60 = vmul.f32 -1.442695, %v9413_v8 }
 0x3e4   : > { %v4142_v19 = vpop.permute.xlu0 %4141  ;;  %v4782_v48 = vpack.c.bf16 %v4728_v35, %v4728_v35  ;;  %v2350_v35 = vpack.c.bf16 %v2296_v13, %v2296_v13 }
 0x3e5   : > { %4282 = vst.msk [vmem:[#allocation3 + $0x100] sm:$0xf] %vm2963_vm6, %v4142_v19  ;;  %v2479_v2 = vpop.permute.xlu1 %2478  ;;  %v3233_v51 = vpop.permute.xlu2 %3232  ;;  %7593 = vrcp.f32 %v9396_v41  ;;  %v1774_v4 = vmul.f32 %v7590_v44, %v1773_v36  ;;  %vm1791_vm15 = vweird.f32 %v9396_v41 }
 0x3e6   : > { %4660 = vst.msk [vmem:[#allocation3 + $0x100] sm:$0xf] %vm3342_vm14, %v9334_v49  ;;  %v1782_v49 = vand.u32 2147483648, %v1157_v46  ;;  %7595 = vpow2.f32 %v6842_v60  ;;  %v1797_v60 = vand.u32 2147483648, %v9396_v41 }
 0x3e7   : > { %2613 = vst.msk [vmem:[#allocation3 + $0x150] sm:$0xf] %vm2584_vm13, %v2479_v2  ;;  %v7068_v36 = vld [vmem:[#allocation3 + $0x1a0] sm:$0xf] }
 0x3e8   : > { %3369 = vst.msk [vmem:[#allocation3 + $0x138] sm:$0xf] %vm3342_vm14, %v3233_v51  ;;  %v1783_v51 = vor.u32 1.1754944e-38, %v1782_v49  ;;  %v7000_v2 = vld [vmem:[#allocation3 + $0x120] sm:$0xf] }
 0x3e9   : > { %4836 = vst.msk [vmem:[#allocation3 + $0x1ac] sm:$0xf] %vm2205_vm3, %v4782_v48  ;;  %v1775_v48 = vadd.f32 %v7590_v44, %v1774_v4 }
 0x3ea   : > { %4157 = vrot.lane.b32.xlu0 %v9151_v59, %s7654_s27 }
 0x3eb   : > { %2869 = vrot.lane.b32.xlu1 %v2727_v37, %s7654_s27  ;;  %3244 = vrot.lane.b32.xlu2 %v9151_v59, %s7655_s28  ;;  %v5632_v59 = vpop.f32.mrf.mxu3  ;;  %v1779_v49 = vsel %vm9409_vm11, %v7590_v44, %v1775_v48 }
 0x3ec   : > { %v2856_v22 = vpop.permute.xlu0 %2855 }
 0x3ed   : > { %2991 = vst.msk [vmem:[#allocation3 + $0x144] sm:$0xf] %vm2963_vm6, %v2856_v22  ;;  %v3231_v18 = vpop.permute.xlu1 %3230  ;;  %v9400_v28 = vpop.permute.xlu2 %4523  ;;  %v6978_v17 = vld [vmem:[#allocation3 + $0xfc] sm:$0xf0] }
 0x3ee   : > { %3368 = vst.msk [vmem:[#allocation3 + $0x12c] sm:$0xf] %vm3342_vm14, %v3231_v18  ;;  %v5776_v27 = vpop.f32.mrf.mxu0  ;;  %v6981_v50 = vor.u32 %v7336_v52, %v6978_v17  ;;  %v3972_v22 = vld [vmem:[#allocation2 + $0x14f] sm:$0xff]  ;;  %v9420_v18 = vpack.c.bf16 %v3971_v43, %v3971_v43  ;;  %v7594_v17 = vpop.eup %7593 }
 0x3ef   : > { %v9405_v19 = vadd.f32 %v5776_v27, %v5632_v59  ;;  %v9425_v52 = vpack.c.bf16 %v3972_v22, %v3972_v22  ;;  %v1784_v59 = vsel %vm9415_vm12, %v1783_v51, %v1779_v49  ;;  %v3434_v27 = vld [vmem:[#allocation2 + $0x148] sm:$0xff]  ;;  %v1787_v48 = vmul.f32 %v7594_v17, %v9396_v41  ;;  %v7596_v49 = vpop.eup %7595 }
 0x3f0   : > { %5795 = vmatmul.bf16.gmra.mxu0 %v6981_v50  ;;  %v7359_v46 = vld [vmem:[#allocation3 + $0x1a8] sm:$0xf0]  ;;  %2246 = vst.msk [vmem:[#allocation3 + $0x1e0] sm:$0xf] %vm2205_vm3, %v9420_v18  ;;  %v9434_v50 = vpop.f32.mrf.mxu1  ;;  %v2021_v4 = vmul.f32 %v1784_v59, %v9352_v62  ;;  %v3487_v62 = vpack.c.bf16 %v3433_v21, %v3433_v21  ;;  %v2674_v22 = vld [vmem:[#allocation2 + $0x121] sm:$0xff]  ;;  %vm1792_vm1 = vweird.f32 %v7594_v17  ;;  %v1798_v21 = vor.u32 1.1754944e-38, %v1797_v60 }
 0x3f1   : > { %10973 = vst [vmem:[#allocation8_spill] sm:$0xff] %v9405_v19  ;;  %v7069_v13 = vor.u32 %v7359_v46, %v7068_v36  ;;  %v1788_v36 = vsub.f32 1.0, %v1787_v48  ;;  %v3488_v46 = vpack.c.bf16 %v3434_v27, %v3434_v27  ;;  %v2728_v59 = vpack.c.bf16 %v2674_v22, %v2674_v22  ;;  %vm9450_vm2 = vmor %vm1791_vm15, %vm1792_vm1 }
 0x3f2   : > { %2494 = vrot.lane.b32.xlu0 %v2350_v35, %s7653_s26  ;;  %10978 = vst [vmem:[#allocation9_spill] sm:$0xff] %v9434_v50 }
 0x3f3   : > { %3783 = vrot.lane.b32.xlu1 %v2727_v37, %s7653_s26  ;;  %4535 = vrot.lane.b32.xlu2 %v9368_v6, %s7655_s28  ;;  %v1795_v37 = vand.u32 2147483647, %v9396_v41  ;;  %2247 = vst.msk [vmem:[#allocation3 + $0x1ec] sm:$0xf] %vm2205_vm3, %v9425_v52 }
 0x3f4   : > { %v3770_v44 = vpop.permute.xlu0 %3769  ;;  %7267 = vmatmul.msk.bf16.gmra.mxu1 %vm382_vm0, %v7069_v13  ;;  %2083 = vst.msk [vmem:[#allocation2 + $0x160] sm:$0xff] %vm382_vm0, %v2021_v4  ;;  %v1789_v13 = vmul.f32 %v7594_v17, %v1788_v36 }
 0x3f5   : > { %3907 = vst.msk [vmem:[#allocation3 + $0x124] sm:$0xf] %vm2584_vm13, %v3770_v44  ;;  %v4522_v6 = vpop.permute.xlu1 %4521  ;;  %v2860_v51 = vpop.permute.xlu2 %2859  ;;  %v7343_v54 = vld [vmem:[#allocation3 + $0x128] sm:$0xf0]  ;;  %vm1796_vm4 = vcmp.eq.f32.partialorder %v1795_v37, 8.507059e+37 }
 0x3f6   : > { %4661 = vst.msk [vmem:[#allocation3 + $0x10c] sm:$0xf] %vm3342_vm14, %v4522_v6  ;;  %v7001_v43 = vor.u32 %v7343_v54, %v7000_v2  ;;  %v1159_v2 = vadd.f32 1.0, %v7596_v49  ;;  %v9454_v6 = vpop.f32.mrf.mxu2  ;;  %v1790_v27 = vadd.f32 %v7594_v17, %v1789_v13  ;;  %v2675_v13 = vld [vmem:[#allocation2 + $0x129] sm:$0xff] }
 0x3f7   : > { %2993 = vst.msk [vmem:[#allocation3 + $0x15c] sm:$0xf] %vm2963_vm6, %v2860_v51  ;;  %v6843_v4 = vmul.f32 -1.442695, %v9454_v6 }
 0x3f8   : > { %5661 = vmatmul.bf16.gmra.mxu3 %v7001_v43  ;;  %3541 = vst.msk [vmem:[#allocation3 + $0x1b4] sm:$0xf] %vm2205_vm3, %v3487_v62  ;;  %7597 = vrcp.f32 %v1159_v2  ;;  %v1794_v48 = vsel %vm9450_vm2, %v7594_v17, %v1790_v27  ;;  %v2297_v62 = vld [vmem:[#allocation2 + $0x130] sm:$0xff]  ;;  %vm1806_vm5 = vweird.f32 %v1159_v2 }
 0x3f9   : > { %3542 = vst.msk [vmem:[#allocation3 + $0x1c0] sm:$0xf] %vm2205_vm3, %v3488_v46  ;;  %7599 = vpow2.f32 %v6843_v4  ;;  %v1799_v60 = vsel %vm1796_vm4, %v1798_v21, %v1794_v48  ;;  %v2351_v22 = vpack.c.bf16 %v2297_v62, %v2297_v62  ;;  %v1810_v21 = vand.u32 2147483647, %v1159_v2  ;;  %v9488_v48 = vpop.f32.mrf.mxu0 }
 0x3fa   : > { %3246 = vrot.lane.b32.xlu0 %v9245_v16, %s7655_s28  ;;  %v2022_v37 = vmul.f32 %v1799_v60, %v9370_v7  ;;  %v1812_v7 = vand.u32 2147483648, %v1159_v2  ;;  %10982 = vst [vmem:[#allocation11_spill] sm:$0xff] %v9488_v48  ;;  %v2729_v62 = vpack.c.bf16 %v2675_v13, %v2675_v13 }
 0x3fb   : > { %4537 = vrot.lane.b32.xlu1 %v2350_v35, %s7655_s28  ;;  %2871 = vrot.lane.b32.xlu2 %v2728_v59, %s7654_s27  ;;  %v4729_v35 = vld [vmem:[#allocation2 + $0x159] sm:$0xff]  ;;  %vm1811_vm10 = vcmp.eq.f32.partialorder %v1810_v21, 8.507059e+37 }
 0x3fc   : > { %v4146_v41 = vpop.permute.xlu0 %4145  ;;  %v9470_v43 = vpack.c.bf16 %v4729_v35, %v4729_v35  ;;  %2084 = vst.msk [vmem:[#allocation2 + $0x168] sm:$0xff] %vm382_vm0, %v2022_v37 }
 0x3fd   : > { %4284 = vst.msk [vmem:[#allocation3 + $0x118] sm:$0xf] %vm2963_vm6, %v4146_v41  ;;  %v2858_v51 = vpop.permute.xlu1 %2857  ;;  %v4148_v54 = vpop.permute.xlu2 %4147 }
 0x3fe   : > { %4662 = vst.msk [vmem:[#allocation3 + $0x118] sm:$0xf] %vm3342_vm14, %v9400_v28  ;;  %v7598_v17 = vpop.eup %7597 }
 0x3ff   : > { %2992 = vst.msk [vmem:[#allocation3 + $0x150] sm:$0xf] %vm2963_vm6, %v2858_v51  ;;  %v7600_v36 = vpop.eup %7599  ;;  %v1802_v28 = vmul.f32 %v7598_v17, %v1159_v2  ;;  %vm1807_vm7 = vweird.f32 %v7598_v17  ;;  %v1813_v2 = vor.u32 1.1754944e-38, %v1812_v7 }
 0x400   : > { %4285 = vst.msk [vmem:[#allocation3 + $0x124] sm:$0xf] %vm2963_vm6, %v4148_v54  ;;  %v9480_v46 = vadd.f32 1.0, %v7600_v36  ;;  %vm9491_vm8 = vmor %vm1806_vm5, %vm1807_vm7 }
 0x401   : > { %4837 = vst.msk [vmem:[#allocation3 + $0x1b8] sm:$0xf] %vm2205_vm3, %v9470_v43  ;;  %v1803_v44 = vsub.f32 1.0, %v1802_v28  ;;  %v9495_v28 = vpop.f32.mrf.mxu1 }
 0x402   : > { %3785 = vrot.lane.b32.xlu0 %v2728_v59, %s7653_s26  ;;  %v7339_v59 = vld [vmem:[#allocation3 + $0x10c] sm:$0xf]  ;;  %7601 = vrcp.f32 %v9480_v46  ;;  %10985 = vst [vmem:[#allocation12_spill] sm:$0xff] %v9495_v28  ;;  %vm1821_vm11 = vweird.f32 %v9480_v46 }
 0x403   : > { %4159 = vrot.lane.b32.xlu2 %v9245_v16, %s7654_s27  ;;  %2496 = vrot.lane.b32.xlu1 %v2351_v22, %s7653_s26  ;;  %v9486_v16 = vpop.f32.mrf.mxu3  ;;  %v1804_v54 = vmul.f32 %v7598_v17, %v1803_v44  ;;  %v4730_v37 = vld [vmem:[#allocation2 + $0x161] sm:$0xff]  ;;  %v3973_v28 = vld [vmem:[#allocation2 + $0x157] sm:$0xff] }
 0x404   : > { %v2483_v49 = vpop.permute.xlu0 %2482  ;;  %10981 = vst [vmem:[#allocation10_spill] sm:$0xff] %v9486_v16  ;;  %v4784_v36 = vpack.c.bf16 %v4730_v37, %v4730_v37 }
 0x405   : > { %v3772_v27 = vpop.permute.xlu1 %3771  ;;  %2615 = vst.msk [vmem:[#allocation3 + $0x168] sm:$0xf] %vm2584_vm13, %v2483_v49  ;;  %v9483_v4 = vpop.permute.xlu2 %4527  ;;  %v6990_v41 = vld [vmem:[#allocation3 + $0x114] sm:$0xf0]  ;;  %v1805_v35 = vadd.f32 %v7598_v17, %v1804_v54 }
 0x406   : > { %3908 = vst.msk [vmem:[#allocation3 + $0x130] sm:$0xf] %vm2584_vm13, %v3772_v27  ;;  %v6993_v51 = vor.u32 %v7339_v59, %v6990_v41 }
 0x407   : > { %v1809_v49 = vsel %vm9491_vm8, %v7598_v17, %v1805_v35  ;;  %4838 = vst.msk [vmem:[#allocation3 + $0x1c4] sm:$0xf] %vm2205_vm3, %v4784_v36  ;;  %v1827_v17 = vand.u32 2147483648, %v9480_v46  ;;  %v9515_v35 = vpop.f32.mrf.mxu2  ;;  %v3974_v36 = vld [vmem:[#allocation2 + $0x15f] sm:$0xff] }
 0x408   : > { %5800 = vmatmul.bf16.gmra.mxu0 %v6993_v51  ;;  %v7602_v27 = vpop.eup %7601  ;;  %v1814_v7 = vsel %vm1811_vm10, %v1813_v2, %v1809_v49  ;;  %v1825_v2 = vand.u32 2147483647, %v9480_v46 }
 0x409   : > { %v2023_v44 = vmul.f32 %v1814_v7, %v9413_v8  ;;  %v1817_v21 = vmul.f32 %v7602_v27, %v9480_v46  ;;  %vm1822_vm12 = vweird.f32 %v7602_v27  ;;  %v7080_v46 = vld [vmem:[#allocation3 + $0x1b8] sm:$0xf] }
 0x40a   : > { %2873 = vrot.lane.b32.xlu0 %v2729_v62, %s7654_s27  ;;  %vm9519_vm15 = vmor %vm1821_vm11, %vm1822_vm12  ;;  %vm9528_vm1 = vcmp.eq.f32.partialorder %v1825_v2, 8.507059e+37 }
 0x40b   : > { %4539 = vrot.lane.b32.xlu2 %v2351_v22, %s7655_s28  ;;  %3248 = vrot.lane.b32.xlu1 %v9268_v53, %s7655_s28  ;;  %v5637_v51 = vpop.f32.mrf.mxu3  ;;  %v2298_v22 = vld [vmem:[#allocation2 + $0x138] sm:$0xff]  ;;  %v1818_v60 = vsub.f32 1.0, %v1817_v21  ;;  %2085 = vst.msk [vmem:[#allocation2 + $0x170] sm:$0xff] %vm382_vm0, %v2023_v44  ;;  %v6844_v21 = vmul.f32 -1.442695, %v9515_v35 }
 0x40c   : > { %v3235_v13 = vpop.permute.xlu0 %3234  ;;  %v9517_v49 = vpack.c.bf16 %v2298_v22, %v2298_v22 }
 0x40d   : > { %v4526_v59 = vpop.permute.xlu1 %4525  ;;  %3370 = vst.msk [vmem:[#allocation3 + $0x144] sm:$0xf] %vm3342_vm14, %v3235_v13  ;;  %v2487_v41 = vpop.permute.xlu2 %2486  ;;  %v1819_v37 = vmul.f32 %v7602_v27, %v1818_v60  ;;  %v1828_v13 = vor.u32 1.1754944e-38, %v1827_v17  ;;  %v3435_v60 = vld [vmem:[#allocation2 + $0x150] sm:$0xff]  ;;  %v7012_v17 = vld [vmem:[#allocation3 + $0x138] sm:$0xf]  ;;  %7603 = vpow2.f32 %v6844_v21 }
 0x40e   : > { %4663 = vst.msk [vmem:[#allocation3 + $0x124] sm:$0xf] %vm3342_vm14, %v4526_v59  ;;  %v5781_v54 = vpop.f32.mrf.mxu0  ;;  %v9524_v59 = vpack.c.bf16 %v3974_v36, %v3974_v36 }
 0x40f   : > { %2617 = vst.msk [vmem:[#allocation3 + $0x180] sm:$0xf] %vm2584_vm13, %v2487_v41  ;;  %v9512_v8 = vadd.f32 %v5781_v54, %v5637_v51  ;;  %v2139_v41 = vld [vmem:[#allocation2 + $0x157] sm:$0xff]  ;;  %v1820_v44 = vadd.f32 %v7602_v27, %v1819_v37  ;;  %v9552_v51 = vpop.f32.mrf.mxu2 }
 0x410   : > { %v7362_v54 = vld [vmem:[#allocation3 + $0x1c0] sm:$0xf0]  ;;  %v2193_v22 = vpack.c.bf16 %v2139_v41, %v2139_v41  ;;  %2249 = vst.msk [vmem:[#allocation3 + $0x204] sm:$0xf] %vm2205_vm3, %v9524_v59 }
 0x411   : > { %10986 = vst [vmem:[#allocation13_spill] sm:$0xff] %v9512_v8  ;;  %v7081_v36 = vor.u32 %v7362_v54, %v7080_v46  ;;  %v1824_v37 = vsel %vm9519_vm15, %v7602_v27, %v1820_v44  ;;  %v7305_v41 = vld [vmem:[%s7818_s25 + $0xd0] sm:$0xff]  ;;  %s6660_s25 = sshll.u32 %s11168_s12, 3  ;;  %s7656_s12 = smov 120  }
 0x412   : > { %4161 = vrot.lane.b32.xlu0 %v9268_v53, %s7654_s27  ;;  %v9537_v53 = vpop.f32.mrf.mxu1  ;;  %2248 = vst.msk [vmem:[#allocation3 + $0x1f8] sm:$0xf] %vm2205_vm3, %v2193_v22  ;;  %v1829_v21 = vsel %vm9528_vm1, %v1828_v13, %v1824_v37  ;;  %v3593_v54 = vld [vmem:[#allocation2 + $0x131] sm:$0xff]  ;;  %6799 = vmatmul.msk.bf16.gmra.mxu2 %vm729_vm9, %v7305_v41  ;;  %v4731_v7 = vld [vmem:[#allocation2 + $0x169] sm:$0xff]  ;;  %s10219_s24 = scalar_lea.vmem %s10869_s8, %s6660_s25 }
 0x413   : > { %3787 = vrot.lane.b32.xlu1 %v2729_v62, %s7653_s26  ;;  %2498 = vrot.lane.b32.xlu2 %v9517_v49, %s7653_s26  ;;  %10991 = vst [vmem:[#allocation14_spill] sm:$0xff] %v9537_v53  ;;  %v3436_v62 = vld [vmem:[#allocation2 + $0x158] sm:$0xff]  ;;  %v3489_v53 = vpack.c.bf16 %v3435_v60, %v3435_v60  ;;  %v2024_v27 = vmul.f32 %v1829_v21, %v9454_v6 }
 0x414   : > { %v3774_v2 = vpop.permute.xlu0 %3773  ;;  %v7346_v8 = vld [vmem:[#allocation3 + $0x140] sm:$0xf0]  ;;  %7268 = vmatmul.msk.bf16.gmra.mxu1 %vm382_vm0, %v7081_v36  ;;  %v3490_v44 = vpack.c.bf16 %v3436_v62, %v3436_v62  ;;  %v4785_v22 = vpack.c.bf16 %v4731_v7, %v4731_v7  ;;  %v3647_v13 = vpack.c.bf16 %v3593_v54, %v3593_v54 }
 0x415   : > { %3909 = vst.msk [vmem:[#allocation3 + $0x13c] sm:$0xf] %vm2584_vm13, %v3774_v2  ;;  %v2485_v48 = vpop.permute.xlu1 %2484  ;;  %v3239_v16 = vpop.permute.xlu2 %3238  ;;  %v7013_v46 = vor.u32 %v7346_v8, %v7012_v17 }
 0x416   : > { %2616 = vst.msk [vmem:[#allocation3 + $0x174] sm:$0xf] %vm2584_vm13, %v2485_v48  ;;  %v7604_v8 = vpop.eup %7603  ;;  %v6845_v48 = vmul.f32 -1.442695, %v9552_v51  ;;  %v9565_v2 = vpop.f32.mrf.mxu0 }
 0x417   : > { %3372 = vst.msk [vmem:[#allocation3 + $0x15c] sm:$0xf] %vm3342_vm14, %v3239_v16  ;;  %5666 = vmatmul.bf16.gmra.mxu3 %v7013_v46  ;;  %v1161_v6 = vadd.f32 1.0, %v7604_v8  ;;  %v9562_v16 = vpop.f32.mrf.mxu3 }
 0x418   : > { %2086 = vst.msk [vmem:[#allocation2 + $0x178] sm:$0xff] %vm382_vm0, %v2024_v27 }
 0x419   : > { %3543 = vst.msk [vmem:[#allocation3 + $0x1cc] sm:$0xf] %vm2205_vm3, %v3489_v53  ;;  %7605 = vrcp.f32 %v1161_v6  ;;  %v2299_v53 = vld [vmem:[#allocation2 + $0x140] sm:$0xff]  ;;  %vm1836_vm9 = vweird.f32 %v1161_v6 }
 0x41a   : > { %4839 = vst.msk [vmem:[#allocation3 + $0x1d0] sm:$0xf] %vm2205_vm3, %v4785_v22  ;;  %3789 = vrot.lane.b32.xlu0 %v3647_v13, %s7653_s26  ;;  %7607 = vpow2.f32 %v6845_v48  ;;  %v9569_v62 = vpack.c.bf16 %v2299_v53, %v2299_v53  ;;  %v9571_v46 = vpop.f32.mrf.mxu1  ;;  %v1840_v22 = vand.u32 2147483647, %v1161_v6 }
 0x41b   : > { %2875 = vrot.lane.b32.xlu1 %v3647_v13, %s7654_s27  ;;  %3250 = vrot.lane.b32.xlu2 %v9316_v55, %s7655_s28  ;;  %3544 = vst.msk [vmem:[#allocation3 + $0x1d8] sm:$0xf] %vm2205_vm3, %v3490_v44  ;;  %v1842_v13 = vand.u32 2147483648, %v1161_v6 }
 0x41c   : > { %10992 = vst [vmem:[#allocation15_spill] sm:$0xff] %v9562_v16  ;;  %v2862_v60 = vpop.permute.xlu0 %2861  ;;  %vm9596_vm5 = vcmp.eq.f32.partialorder %v1840_v22, 8.507059e+37 }
 0x41d   : > { %2994 = vst.msk [vmem:[#allocation3 + $0x168] sm:$0xf] %vm2963_vm6, %v2862_v60  ;;  %v3237_v17 = vpop.permute.xlu1 %3236  ;;  %v4152_v36 = vpop.permute.xlu2 %4151 }
 0x41e   : > { %10993 = vst [vmem:[#allocation16_spill] sm:$0xff] %v9565_v2  ;;  %v7349_v44 = vld [vmem:[#allocation3 + $0x158] sm:$0xf0] }
 0x41f   : > { %3371 = vst.msk [vmem:[#allocation3 + $0x150] sm:$0xf] %vm3342_vm14, %v3237_v17  ;;  %v4732_v37 = vld [vmem:[#allocation2 + $0x171] sm:$0xff]  ;;  %v7606_v21 = vpop.eup %7605  ;;  %v5642_v53 = vpop.f32.mrf.mxu3 }
 0x420   : > { %4287 = vst.msk [vmem:[#allocation3 + $0x13c] sm:$0xf] %vm2963_vm6, %v4152_v36  ;;  %v4786_v41 = vpack.c.bf16 %v4732_v37, %v4732_v37  ;;  %v7608_v54 = vpop.eup %7607  ;;  %v1832_v27 = vmul.f32 %v7606_v21, %v1161_v6  ;;  %vm1837_vm2 = vweird.f32 %v7606_v21  ;;  %v3594_v37 = vld [vmem:[#allocation2 + $0x139] sm:$0xff] }
 0x421   : > { %10994 = vst [vmem:[#allocation17_spill] sm:$0xff] %v9571_v46  ;;  %v9580_v8 = vadd.f32 1.0, %v7608_v54  ;;  %vm9590_vm4 = vmor %vm1836_vm9, %vm1837_vm2 }
 0x422   : > { %4840 = vst.msk [vmem:[#allocation3 + $0x1dc] sm:$0xf] %vm2205_vm3, %v4786_v41  ;;  %2500 = vrot.lane.b32.xlu0 %v9569_v62, %s7653_s26  ;;  %v1833_v36 = vsub.f32 1.0, %v1832_v27  ;;  %v1843_v27 = vor.u32 1.1754944e-38, %v1842_v13  ;;  %v3437_v13 = vld [vmem:[#allocation2 + $0x160] sm:$0xff] }
 0x423   : > { %4541 = vrot.lane.b32.xlu1 %v9517_v49, %s7655_s28  ;;  %4163 = vrot.lane.b32.xlu2 %v9316_v55, %s7654_s27  ;;  %7609 = vrcp.f32 %v9580_v8  ;;  %vm1851_vm7 = vweird.f32 %v9580_v8 }
 0x424   : > { %v4150_v7 = vpop.permute.xlu0 %4149  ;;  %v1834_v54 = vmul.f32 %v7606_v21, %v1833_v36 }
 0x425   : > { %4286 = vst.msk [vmem:[#allocation3 + $0x130] sm:$0xf] %vm2963_vm6, %v4150_v7  ;;  %v3776_v48 = vpop.permute.xlu1 %3775  ;;  %v2866_v60 = vpop.permute.xlu2 %2865  ;;  %v3975_v7 = vld [vmem:[#allocation2 + $0x167] sm:$0xff] }
 0x426   : > { %v7024_v17 = vld [vmem:[#allocation3 + $0x150] sm:$0xf]  ;;  %4664 = vst.msk [vmem:[#allocation3 + $0x130] sm:$0xf] %vm3342_vm14, %v9483_v4  ;;  %v5786_v55 = vpop.f32.mrf.mxu0  ;;  %v9594_v2 = vpack.c.bf16 %v3975_v7, %v3975_v7  ;;  %v1835_v16 = vadd.f32 %v7606_v21, %v1834_v54  ;;  %v9614_v54 = vpop.f32.mrf.mxu1 }
 0x427   : > { %v7025_v49 = vor.u32 %v7349_v44, %v7024_v17  ;;  %3910 = vst.msk [vmem:[#allocation3 + $0x148] sm:$0xf] %vm2584_vm13, %v3776_v48  ;;  %v9587_v41 = vadd.f32 %v5786_v55, %v5642_v53  ;;  %v7092_v4 = vld [vmem:[#allocation3 + $0x1d0] sm:$0xf]  ;;  %v2304_v44 = vld [vmem:[#allocation2 + $0x168] sm:$0xff]  ;;  %v3648_v17 = vpack.c.bf16 %v3594_v37, %v3594_v37 }
 0x428   : > { %2996 = vst.msk [vmem:[#allocation3 + $0x180] sm:$0xf] %vm2963_vm6, %v2866_v60  ;;  %v9600_v53 = vpack.c.bf16 %v2304_v44, %v2304_v44  ;;  %v3976_v60 = vld [vmem:[#allocation2 + $0x16f] sm:$0xff]  ;;  %v1839_v22 = vsel %vm9590_vm4, %v7606_v21, %v1835_v16  ;;  %v3491_v44 = vpack.c.bf16 %v3437_v13, %v3437_v13 }
 0x429   : > { %10995 = vst [vmem:[#allocation18_spill] sm:$0xff] %v9587_v41  ;;  %5671 = vmatmul.bf16.gmra.mxu3 %v7025_v49  ;;  %v7365_v36 = vld [vmem:[#allocation3 + $0x1d8] sm:$0xf0]  ;;  %v9604_v49 = vpack.c.bf16 %v3976_v60, %v3976_v60  ;;  %v7610_v37 = vpop.eup %7609 }
 0x42a   : > { %4165 = vrot.lane.b32.xlu0 %v9323_v3, %s7654_s27  ;;  %v7093_v55 = vor.u32 %v7365_v36, %v7092_v4  ;;  %2250 = vst.msk [vmem:[#allocation3 + $0x210] sm:$0xf] %vm2205_vm3, %v9594_v2  ;;  %v1844_v4 = vsel %vm9596_vm5, %v1843_v27, %v1839_v22  ;;  %v1847_v60 = vmul.f32 %v7610_v37, %v9580_v8  ;;  %v2300_v48 = vld [vmem:[#allocation2 + $0x148] sm:$0xff]  ;;  %vm1852_vm8 = vweird.f32 %v7610_v37 }
 0x42b   : > { %3791 = vrot.lane.b32.xlu1 %v3648_v17, %s7653_s26  ;;  %2877 = vrot.lane.b32.xlu2 %v3648_v17, %s7654_s27  ;;  %3546 = vst.msk [vmem:[#allocation3 + $0x1f0] sm:$0xf] %vm2205_vm3, %v9600_v53  ;;  %v2025_v21 = vmul.f32 %v1844_v4, %v9515_v35  ;;  %v7342_v17 = vld [vmem:[#allocation3 + $0x124] sm:$0xf]  ;;  %v1855_v22 = vand.u32 2147483647, %v9580_v8  ;;  %v2354_v35 = vpack.c.bf16 %v2300_v48, %v2300_v48  ;;  %vm1853_vm10 = vmor %vm1851_vm7, %vm1852_vm8  ;;  %v9641_v48 = vpop.f32.mrf.mxu2 }
 0x42c   : > { %11000 = vst [vmem:[#allocation19_spill] sm:$0xff] %v9614_v54  ;;  %v3778_v7 = vpop.permute.xlu0 %3777  ;;  %7269 = vmatmul.msk.bf16.gmra.mxu1 %vm382_vm0, %v7093_v55  ;;  %v1857_v55 = vand.u32 2147483648, %v9580_v8  ;;  %v1848_v13 = vsub.f32 1.0, %v1847_v60 }
 0x42d   : > { %2251 = vst.msk [vmem:[#allocation3 + $0x21c] sm:$0xf] %vm2205_vm3, %v9604_v49  ;;  %v2864_v6 = vpop.permute.xlu1 %2863  ;;  %v9622_v16 = vpop.permute.xlu2 %4531  ;;  %v7002_v36 = vld [vmem:[#allocation3 + $0x12c] sm:$0xf0]  ;;  %vm1856_vm11 = vcmp.eq.f32.partialorder %v1855_v22, 8.507059e+37 }
 0x42e   : > { %3911 = vst.msk [vmem:[#allocation3 + $0x154] sm:$0xf] %vm2584_vm13, %v3778_v7  ;;  %v7005_v27 = vor.u32 %v7342_v17, %v7002_v36  ;;  %v1849_v7 = vmul.f32 %v7610_v37, %v1848_v13  ;;  %v1858_v4 = vor.u32 1.1754944e-38, %v1857_v55  ;;  %v2678_v36 = vld [vmem:[#allocation2 + $0x141] sm:$0xff]  ;;  %v6846_v13 = vmul.f32 -1.442695, %v9641_v48 }
 0x42f   : > { %2995 = vst.msk [vmem:[#allocation3 + $0x174] sm:$0xf] %vm2963_vm6, %v2864_v6  ;;  %v2732_v55 = vpack.c.bf16 %v2678_v36, %v2678_v36 }
 0x430   : > { %2087 = vst.msk [vmem:[#allocation2 + $0x180] sm:$0xff] %vm382_vm0, %v2025_v21  ;;  %5805 = vmatmul.bf16.gmra.mxu0 %v7005_v27  ;;  %v1850_v6 = vadd.f32 %v7610_v37, %v1849_v7  ;;  %7611 = vpow2.f32 %v6846_v13 }
 0x431   : > { %3545 = vst.msk [vmem:[#allocation3 + $0x1e4] sm:$0xf] %vm2205_vm3, %v3491_v44 }
 0x432   : > { %3252 = vrot.lane.b32.xlu0 %v9323_v3, %s7655_s28  ;;  %v1854_v44 = vsel %vm1853_vm10, %v7610_v37, %v1850_v6 }
 0x433   : > { %4543 = vrot.lane.b32.xlu2 %v9569_v62, %s7655_s28  ;;  %2502 = vrot.lane.b32.xlu1 %v2354_v35, %s7653_s26  ;;  %v1859_v3 = vsel %vm1856_vm11, %v1858_v4, %v1854_v44 }
 0x434   : > { %v2489_v21 = vpop.permute.xlu0 %2488  ;;  %v2026_v62 = vmul.f32 %v1859_v3, %v9552_v51  ;;  %v9668_v3 = vpop.f32.mrf.mxu3 }
 0x435   : > { %v4530_v17 = vpop.permute.xlu1 %4529  ;;  %2618 = vst.msk [vmem:[#allocation3 + $0x18c] sm:$0xf] %vm2584_vm13, %v2489_v21  ;;  %v4156_v8 = vpop.permute.xlu2 %4155 }
 0x436   : > { %4665 = vst.msk [vmem:[#allocation3 + $0x13c] sm:$0xf] %vm3342_vm14, %v4530_v17  ;;  %v7612_v7 = vpop.eup %7611  ;;  %v9655_v21 = vpop.f32.mrf.mxu2 }
 0x437   : > { %v4733_v60 = vld [vmem:[#allocation2 + $0x179] sm:$0xff]  ;;  %4289 = vst.msk [vmem:[#allocation3 + $0x154] sm:$0xf] %vm2963_vm6, %v4156_v8  ;;  %v9653_v6 = vadd.f32 1.0, %v7612_v7  ;;  %v9657_v17 = vpop.f32.mrf.mxu1 }
 0x438   : > { %v4787_v27 = vpack.c.bf16 %v4733_v60, %v4733_v60  ;;  %2088 = vst.msk [vmem:[#allocation2 + $0x188] sm:$0xff] %vm382_vm0, %v2026_v62  ;;  %v2301_v62 = vld [vmem:[#allocation2 + $0x150] sm:$0xff] }
 0x439   : > { %11001 = vst [vmem:[#allocation20_spill] sm:$0xff] %v9657_v17  ;;  %7613 = vrcp.f32 %v9653_v6  ;;  %vm1866_vm12 = vweird.f32 %v9653_v6  ;;  %v2302_v17 = vld [vmem:[#allocation2 + $0x158] sm:$0xff] }
 0x43a   : > { %4841 = vst.msk [vmem:[#allocation3 + $0x1e8] sm:$0xf] %vm2205_vm3, %v4787_v27  ;;  %2879 = vrot.lane.b32.xlu0 %v2732_v55, %s7654_s27  ;;  %v9670_v27 = vpop.f32.mrf.mxu0 }
 0x43b   : > { %4167 = vrot.lane.b32.xlu2 %v9420_v18, %s7654_s27  ;;  %4545 = vrot.lane.b32.xlu1 %v2354_v35, %s7655_s28  ;;  %v6847_v35 = vmul.f32 -1.442695, %v9655_v21  ;;  %11002 = vst [vmem:[#allocation21_spill] sm:$0xff] %v9668_v3 }
 0x43c   : > { %v3241_v37 = vpop.permute.xlu0 %3240  ;;  %11003 = vst [vmem:[#allocation22_spill] sm:$0xff] %v9670_v27 }
 0x43d   : > { %v3780_v22 = vpop.permute.xlu1 %3779  ;;  %3373 = vst.msk [vmem:[#allocation3 + $0x168] sm:$0xf] %vm3342_vm14, %v3241_v37  ;;  %v2493_v51 = vpop.permute.xlu2 %2492  ;;  %7615 = vpow2.f32 %v6847_v35  ;;  %v2306_v37 = vld [vmem:[#allocation2 + $0x178] sm:$0xff]  ;;  %v7345_v3 = vld [vmem:[#allocation3 + $0x13c] sm:$0xf] }
 0x43e   : > { %3912 = vst.msk [vmem:[#allocation3 + $0x160] sm:$0xf] %vm2584_vm13, %v3780_v22  ;;  %v9718_v33 = vpop.f32.mrf.mxu2 }
 0x43f   : > { %2620 = vst.msk [vmem:[#allocation3 + $0x1a4] sm:$0xf] %vm2584_vm13, %v2493_v51  ;;  %v4734_v4 = vld [vmem:[#allocation2 + $0x181] sm:$0xff]  ;;  %v7614_v7 = vpop.eup %7613 }
 0x440   : > { %v4788_v8 = vpack.c.bf16 %v4734_v4, %v4734_v4  ;;  %v3978_v51 = vld [vmem:[#allocation2 + $0x17f] sm:$0xff]  ;;  %v2355_v4 = vpack.c.bf16 %v2301_v62, %v2301_v62  ;;  %vm1867_vm15 = vweird.f32 %v7614_v7 }
 0x441   : > { %v9680_v35 = vpack.c.bf16 %v3978_v51, %v3978_v51  ;;  %vm9714_vm1 = vmor %vm1866_vm12, %vm1867_vm15 }
 0x442   : > { %4169 = vrot.lane.b32.xlu0 %v9425_v52, %s7654_s27  ;;  %4842 = vst.msk [vmem:[#allocation3 + $0x1f4] sm:$0xf] %vm2205_vm3, %v4788_v8  ;;  %v7104_v8 = vld [vmem:[#allocation3 + $0x1e8] sm:$0xf] }
 0x443   : > { %3793 = vrot.lane.b32.xlu2 %v2732_v55, %s7653_s26  ;;  %3254 = vrot.lane.b32.xlu1 %v9420_v18, %s7655_s28  ;;  %v2305_v18 = vld [vmem:[#allocation2 + $0x170] sm:$0xff]  ;;  %2253 = vst.msk [vmem:[#allocation3 + $0x234] sm:$0xf] %vm2205_vm3, %v9680_v35 }
 0x444   : > { %v4154_v44 = vpop.permute.xlu0 %4153  ;;  %v3977_v55 = vld [vmem:[#allocation2 + $0x177] sm:$0xff]  ;;  %v9676_v13 = vpack.c.bf16 %v2305_v18, %v2305_v18  ;;  %v9694_v18 = vpack.c.bf16 %v2306_v37, %v2306_v37 }
 0x445   : > { %4288 = vst.msk [vmem:[#allocation3 + $0x148] sm:$0xf] %vm2963_vm6, %v4154_v44  ;;  %v2491_v36 = vpop.permute.xlu1 %2490  ;;  %v3245_v60 = vpop.permute.xlu2 %3244  ;;  %v9678_v22 = vpack.c.bf16 %v3977_v55, %v3977_v55 }
 0x446   : > { %4666 = vst.msk [vmem:[#allocation3 + $0x148] sm:$0xf] %vm3342_vm14, %v9622_v16  ;;  %v7616_v44 = vpop.eup %7615  ;;  %v1862_v16 = vmul.f32 %v7614_v7, %v9653_v6  ;;  %v9698_v55 = vpop.f32.mrf.mxu1 }
 0x447   : > { %2619 = vst.msk [vmem:[#allocation3 + $0x198] sm:$0xf] %vm2584_vm13, %v2491_v36  ;;  %v1872_v36 = vand.u32 2147483648, %v9653_v6 }
 0x448   : > { %3375 = vst.msk [vmem:[#allocation3 + $0x180] sm:$0xf] %vm3342_vm14, %v3245_v60  ;;  %v9692_v60 = vadd.f32 1.0, %v7616_v44  ;;  %v1863_v41 = vsub.f32 1.0, %v1862_v16 }
 0x449   : > { %3547 = vst.msk [vmem:[#allocation3 + $0x1fc] sm:$0xf] %vm2205_vm3, %v9676_v13  ;;  %v7368_v62 = vld [vmem:[#allocation3 + $0x1f0] sm:$0xf0] }
 0x44a   : > { %3795 = vrot.lane.b32.xlu0 %v9365_v0, %s7653_s26  ;;  %2252 = vst.msk [vmem:[#allocation3 + $0x228] sm:$0xf] %vm2205_vm3, %v9678_v22  ;;  %v7105_v27 = vor.u32 %v7368_v62, %v7104_v8  ;;  %7617 = vrcp.f32 %v9692_v60  ;;  %v1864_v19 = vmul.f32 %v7614_v7, %v1863_v41  ;;  %vm1881_vm2 = vweird.f32 %v9692_v60  ;;  %v3597_v62 = vld [vmem:[#allocation2 + $0x151] sm:$0xff] }
 0x44b   : > { %2881 = vrot.lane.b32.xlu1 %v9365_v0, %s7654_s27  ;;  %2504 = vrot.lane.b32.xlu2 %v2355_v4, %s7653_s26  ;;  %11004 = vst [vmem:[#allocation23_spill] sm:$0xff] %v9698_v55  ;;  %v1870_v0 = vand.u32 2147483647, %v9653_v6  ;;  %v5647_v55 = vpop.f32.mrf.mxu3 }
 0x44c   : > { %v2868_v51 = vpop.permute.xlu0 %2867  ;;  %7270 = vmatmul.msk.bf16.gmra.mxu1 %vm382_vm0, %v7105_v27  ;;  %3548 = vst.msk [vmem:[#allocation3 + $0x208] sm:$0xf] %vm2205_vm3, %v9694_v18  ;;  %v1865_v41 = vadd.f32 %v7614_v7, %v1864_v19  ;;  %v4027_v27 = vpack.c.bf16 %v3973_v28, %v3973_v28  ;;  %v7036_v19 = vld [vmem:[#allocation3 + $0x168] sm:$0xf] }
 0x44d   : > { %2997 = vst.msk [vmem:[#allocation3 + $0x18c] sm:$0xf] %vm2963_vm6, %v2868_v51  ;;  %v3243_v44 = vpop.permute.xlu1 %3242  ;;  %v9704_v37 = vpop.permute.xlu2 %4535  ;;  %v7014_v54 = vld [vmem:[#allocation3 + $0x144] sm:$0xf0]  ;;  %v1873_v51 = vor.u32 1.1754944e-38, %v1872_v36  ;;  %vm1871_vm9 = vcmp.eq.f32.partialorder %v1870_v0, 8.507059e+37 }
 0x44e   : > { %3374 = vst.msk [vmem:[#allocation3 + $0x174] sm:$0xf] %vm3342_vm14, %v3243_v44  ;;  %v5791_v16 = vpop.f32.mrf.mxu0  ;;  %v7017_v46 = vor.u32 %v7345_v3, %v7014_v54  ;;  %v2356_v54 = vpack.c.bf16 %v2302_v17, %v2302_v17  ;;  %v6848_v3 = vmul.f32 -1.442695, %v9718_v33  ;;  %v1869_v6 = vsel %vm9714_vm1, %v7614_v7, %v1865_v41 }
 0x44f   : > { %v9709_v8 = vadd.f32 %v5791_v16, %v5647_v55  ;;  %v1874_v36 = vsel %vm1871_vm9, %v1873_v51, %v1869_v6  ;;  %v1887_v7 = vand.u32 2147483648, %v9692_v60  ;;  %v3651_v6 = vpack.c.bf16 %v3597_v62, %v3597_v62  ;;  %v2303_v62 = vld [vmem:[#allocation2 + $0x160] sm:$0xff] }
 0x450   : > { %5810 = vmatmul.bf16.gmra.mxu0 %v7017_v46  ;;  %7619 = vpow2.f32 %v6848_v3  ;;  %v7618_v55 = vpop.eup %7617  ;;  %v2027_v46 = vmul.f32 %v1874_v36, %v9641_v48  ;;  %v1885_v48 = vand.u32 2147483647, %v9692_v60 }
 0x451   : > { %11005 = vst [vmem:[#allocation24_spill] sm:$0xff] %v9709_v8  ;;  %v1877_v17 = vmul.f32 %v7618_v55, %v9692_v60  ;;  %vm1882_vm4 = vweird.f32 %v7618_v55  ;;  %v3600_v8 = vld [vmem:[#allocation2 + $0x169] sm:$0xff] }
 0x452   : > { %2506 = vrot.lane.b32.xlu0 %v2356_v54, %s7653_s26  ;;  %2089 = vst.msk [vmem:[#allocation2 + $0x190] sm:$0xff] %vm382_vm0, %v2027_v46  ;;  %vm9737_vm5 = vmor %vm1881_vm2, %vm1882_vm4  ;;  %vm1886_vm7 = vcmp.eq.f32.partialorder %v1885_v48, 8.507059e+37  ;;  %v2357_v48 = vpack.c.bf16 %v2303_v62, %v2303_v62 }
 0x453   : > { %4547 = vrot.lane.b32.xlu2 %v2355_v4, %s7655_s28  ;;  %4171 = vrot.lane.b32.xlu1 %v4027_v27, %s7654_s27  ;;  %v1878_v51 = vsub.f32 1.0, %v1877_v17 }
 0x454   : > { %v3782_v44 = vpop.permute.xlu0 %3781 }
 0x455   : > { %3913 = vst.msk [vmem:[#allocation3 + $0x16c] sm:$0xf] %vm2584_vm13, %v3782_v44  ;;  %v4534_v28 = vpop.permute.xlu1 %4533  ;;  %v2872_v0 = vpop.permute.xlu2 %2871  ;;  %v7352_v16 = vld [vmem:[#allocation3 + $0x170] sm:$0xf0]  ;;  %v1879_v3 = vmul.f32 %v7618_v55, %v1878_v51  ;;  %v1888_v44 = vor.u32 1.1754944e-38, %v1887_v7 }
 0x456   : > { %4667 = vst.msk [vmem:[#allocation3 + $0x154] sm:$0xf] %vm3342_vm14, %v4534_v28  ;;  %v7037_v4 = vor.u32 %v7352_v16, %v7036_v19  ;;  %v7620_v41 = vpop.eup %7619  ;;  %v9741_v19 = vpop.f32.mrf.mxu2 }
 0x457   : > { %2999 = vst.msk [vmem:[#allocation3 + $0x1a4] sm:$0xf] %vm2963_vm6, %v2872_v0  ;;  %v1165_v28 = vadd.f32 1.0, %v7620_v41  ;;  %v1880_v17 = vadd.f32 %v7618_v55, %v1879_v3  ;;  %v6849_v60 = vmul.f32 -1.442695, %v9741_v19 }
 0x458   : > { %5676 = vmatmul.bf16.gmra.mxu3 %v7037_v4 }
 0x459   : > { %7621 = vrcp.f32 %v1165_v28  ;;  %v1884_v0 = vsel %vm9737_vm5, %v7618_v55, %v1880_v17  ;;  %vm1896_vm8 = vweird.f32 %v1165_v28  ;;  %v1900_v17 = vand.u32 2147483647, %v1165_v28  ;;  %v2309_v26 = vld [vmem:[#allocation2 + $0x190] sm:$0xff] }
 0x45a   : > { %4549 = vrot.lane.b32.xlu0 %v2356_v54, %s7655_s28  ;;  %7623 = vpow2.f32 %v6849_v60  ;;  %v1889_v54 = vsel %vm1886_vm7, %v1888_v44, %v1884_v0 }
 0x45b   : > { %3256 = vrot.lane.b32.xlu2 %v9425_v52, %s7655_s28  ;;  %3797 = vrot.lane.b32.xlu1 %v3651_v6, %s7653_s26  ;;  %v2028_v4 = vmul.f32 %v1889_v54, %v9655_v21  ;;  %v4735_v52 = vld [vmem:[#allocation2 + $0x189] sm:$0xff]  ;;  %v1902_v21 = vand.u32 2147483648, %v1165_v28  ;;  %vm1901_vm12 = vcmp.eq.f32.partialorder %v1900_v17, 8.507059e+37 }
 0x45c   : > { %v4158_v46 = vpop.permute.xlu0 %4157  ;;  %v9755_v51 = vpack.c.bf16 %v4735_v52, %v4735_v52 }
 0x45d   : > { %4290 = vst.msk [vmem:[#allocation3 + $0x160] sm:$0xf] %vm2963_vm6, %v4158_v46  ;;  %v2870_v16 = vpop.permute.xlu1 %2869  ;;  %v4160_v7 = vpop.permute.xlu2 %4159  ;;  %v7348_v0 = vld [vmem:[#allocation3 + $0x154] sm:$0xf] }
 0x45e   : > { %4668 = vst.msk [vmem:[#allocation3 + $0x160] sm:$0xf] %vm3342_vm14, %v9704_v37 }
 0x45f   : > { %2998 = vst.msk [vmem:[#allocation3 + $0x198] sm:$0xf] %vm2963_vm6, %v2870_v16  ;;  %v7622_v55 = vpop.eup %7621  ;;  %v9772_v16 = vpop.f32.mrf.mxu0 }
 0x460   : > { %4291 = vst.msk [vmem:[#allocation3 + $0x16c] sm:$0xf] %vm2963_vm6, %v4160_v7  ;;  %v7624_v41 = vpop.eup %7623  ;;  %v1892_v37 = vmul.f32 %v7622_v55, %v1165_v28  ;;  %vm1897_vm10 = vweird.f32 %v7622_v55 }
 0x461   : > { %2090 = vst.msk [vmem:[#allocation2 + $0x198] sm:$0xff] %vm382_vm0, %v2028_v4  ;;  %v9764_v3 = vadd.f32 1.0, %v7624_v41  ;;  %vm1898_vm11 = vmor %vm1896_vm8, %vm1897_vm10  ;;  %v1903_v4 = vor.u32 1.1754944e-38, %v1902_v21  ;;  %v9777_v41 = vpop.f32.mrf.mxu1 }
 0x462   : > { %4843 = vst.msk [vmem:[#allocation3 + $0x200] sm:$0xf] %vm2205_vm3, %v9755_v51  ;;  %3258 = vrot.lane.b32.xlu0 %v4027_v27, %s7655_s28  ;;  %v1893_v44 = vsub.f32 1.0, %v1892_v37 }
 0x463   : > { %2883 = vrot.lane.b32.xlu2 %v3651_v6, %s7654_s27  ;;  %2508 = vrot.lane.b32.xlu1 %v2357_v48, %s7653_s26  ;;  %7625 = vrcp.f32 %v9764_v3  ;;  %v9770_v6 = vpop.f32.mrf.mxu3  ;;  %11011 = vst [vmem:[#allocation26_spill] sm:$0xff] %v9772_v16  ;;  %vm1911_vm15 = vweird.f32 %v9764_v3 }
 0x464   : > { %v2495_v36 = vpop.permute.xlu0 %2494  ;;  %11010 = vst [vmem:[#allocation25_spill] sm:$0xff] %v9770_v6  ;;  %v1894_v54 = vmul.f32 %v7622_v55, %v1893_v44 }
 0x465   : > { %v3784_v60 = vpop.permute.xlu1 %3783  ;;  %2621 = vst.msk [vmem:[#allocation3 + $0x1b0] sm:$0xf] %vm2584_vm13, %v2495_v36  ;;  %v9767_v46 = vpop.permute.xlu2 %4539  ;;  %v7026_v27 = vld [vmem:[#allocation3 + $0x15c] sm:$0xf0] }
 0x466   : > { %3914 = vst.msk [vmem:[#allocation3 + $0x178] sm:$0xf] %vm2584_vm13, %v3784_v60  ;;  %v7029_v7 = vor.u32 %v7348_v0, %v7026_v27  ;;  %v1895_v62 = vadd.f32 %v7622_v55, %v1894_v54  ;;  %v3598_v54 = vld [vmem:[#allocation2 + $0x159] sm:$0xff] }
 0x467   : > { %11012 = vst [vmem:[#allocation27_spill] sm:$0xff] %v9777_v41  ;;  %v3652_v6 = vpack.c.bf16 %v3598_v54, %v3598_v54  ;;  %v3980_v54 = vld [vmem:[#allocation2 + $0x18f] sm:$0xff] }
 0x468   : > { %v4736_v28 = vld [vmem:[#allocation2 + $0x191] sm:$0xff]  ;;  %5815 = vmatmul.bf16.gmra.mxu0 %v7029_v7  ;;  %v1899_v37 = vsel %vm1898_vm11, %v7622_v55, %v1895_v62  ;;  %v1917_v55 = vand.u32 2147483648, %v9764_v3  ;;  %v3979_v62 = vld [vmem:[#allocation2 + $0x187] sm:$0xff] }
 0x469   : > { %v9775_v52 = vpack.c.bf16 %v4736_v28, %v4736_v28  ;;  %v7626_v36 = vpop.eup %7625  ;;  %v1904_v21 = vsel %vm1901_vm12, %v1903_v4, %v1899_v37  ;;  %v2307_v4 = vld [vmem:[#allocation2 + $0x180] sm:$0xff]  ;;  %v2308_v37 = vld [vmem:[#allocation2 + $0x188] sm:$0xff]  ;;  %v3981_v50 = vld [vmem:[#allocation2 + $0x197] sm:$0xff] }
 0x46a   : > { %2885 = vrot.lane.b32.xlu0 %v9470_v43, %s7654_s27  ;;  %v2029_v17 = vmul.f32 %v1904_v21, %v9718_v33  ;;  %v1907_v60 = vmul.f32 %v7626_v36, %v9764_v3  ;;  %vm1912_vm1 = vweird.f32 %v7626_v36  ;;  %v9803_v16 = vpack.c.bf16 %v2308_v37, %v2308_v37 }
 0x46b   : > { %4844 = vst.msk [vmem:[#allocation3 + $0x20c] sm:$0xf] %vm2205_vm3, %v9775_v52  ;;  %4173 = vrot.lane.b32.xlu2 %v9524_v59, %s7654_s27  ;;  %4551 = vrot.lane.b32.xlu1 %v2357_v48, %s7655_s28  ;;  %v5652_v27 = vpop.f32.mrf.mxu3  ;;  %v1915_v48 = vand.u32 2147483647, %v9764_v3  ;;  %vm9807_vm9 = vmor %vm1911_vm15, %vm1912_vm1 }
 0x46c   : > { %v3247_v44 = vpop.permute.xlu0 %3246  ;;  %v1908_v28 = vsub.f32 1.0, %v1907_v60  ;;  %2091 = vst.msk [vmem:[#allocation2 + $0x1a0] sm:$0xff] %vm382_vm0, %v2029_v17  ;;  %v9801_v60 = vpack.c.bf16 %v3979_v62, %v3979_v62  ;;  %v7116_v17 = vld [vmem:[#allocation3 + $0x200] sm:$0xf] }
 0x46d   : > { %v4538_v0 = vpop.permute.xlu1 %4537  ;;  %3376 = vst.msk [vmem:[#allocation3 + $0x18c] sm:$0xf] %vm3342_vm14, %v3247_v44  ;;  %v2499_v43 = vpop.permute.xlu2 %2498  ;;  %vm9814_vm2 = vcmp.eq.f32.partialorder %v1915_v48, 8.507059e+37 }
 0x46e   : > { %4669 = vst.msk [vmem:[#allocation3 + $0x16c] sm:$0xf] %vm3342_vm14, %v4538_v0  ;;  %v5796_v7 = vpop.f32.mrf.mxu0  ;;  %v1909_v21 = vmul.f32 %v7626_v36, %v1908_v28  ;;  %v9797_v44 = vpop.f32.mrf.mxu2  ;;  %v9799_v0 = vpack.c.bf16 %v2307_v4, %v2307_v4 }
 0x46f   : > { %2623 = vst.msk [vmem:[#allocation3 + $0x1c8] sm:$0xf] %vm2584_vm13, %v2499_v43  ;;  %v9794_v33 = vadd.f32 %v5796_v7, %v5652_v27  ;;  %v1918_v27 = vor.u32 1.1754944e-38, %v1917_v55  ;;  %v6850_v7 = vmul.f32 -1.442695, %v9797_v44  ;;  %v9825_v55 = vpop.f32.mrf.mxu1 }
 0x470   : > { %v1910_v28 = vadd.f32 %v7626_v36, %v1909_v21  ;;  %2254 = vst.msk [vmem:[#allocation3 + $0x240] sm:$0xf] %vm2205_vm3, %v9801_v60  ;;  %v7048_v21 = vld [vmem:[#allocation3 + $0x180] sm:$0xf] }
 0x471   : > { %11013 = vst [vmem:[#allocation28_spill] sm:$0xff] %v9794_v33  ;;  %7627 = vpow2.f32 %v6850_v7 }
 0x472   : > { %4175 = vrot.lane.b32.xlu0 %v9594_v2, %s7654_s27  ;;  %v7371_v62 = vld [vmem:[#allocation3 + $0x208] sm:$0xf0]  ;;  %3549 = vst.msk [vmem:[#allocation3 + $0x214] sm:$0xf] %vm2205_vm3, %v9799_v0  ;;  %v1914_v37 = vsel %vm9807_vm9, %v7626_v36, %v1910_v28 }
 0x473   : > { %3799 = vrot.lane.b32.xlu2 %v3652_v6, %s7653_s26  ;;  %3260 = vrot.lane.b32.xlu1 %v9524_v59, %s7655_s28  ;;  %v7117_v3 = vor.u32 %v7371_v62, %v7116_v17  ;;  %11018 = vst [vmem:[#allocation29_spill] sm:$0xff] %v9825_v55  ;;  %v1919_v7 = vsel %vm9814_vm2, %v1918_v27, %v1914_v37  ;;  %v3599_v62 = vld [vmem:[#allocation2 + $0x161] sm:$0xff]  ;;  %v4737_v43 = vld [vmem:[#allocation2 + $0x199] sm:$0xff] }
 0x474   : > { %v3786_v48 = vpop.permute.xlu0 %3785  ;;  %v7355_v33 = vld [vmem:[#allocation3 + $0x188] sm:$0xf0]  ;;  %3550 = vst.msk [vmem:[#allocation3 + $0x220] sm:$0xf] %vm2205_vm3, %v9803_v16  ;;  %v9835_v55 = vpack.c.bf16 %v3980_v54, %v3980_v54  ;;  %v2030_v36 = vmul.f32 %v1919_v7, %v9741_v19  ;;  %v9840_v28 = vpack.c.bf16 %v4737_v43, %v4737_v43  ;;  %v3653_v4 = vpack.c.bf16 %v3599_v62, %v3599_v62 }
 0x475   : > { %3915 = vst.msk [vmem:[#allocation3 + $0x184] sm:$0xf] %vm2584_vm13, %v3786_v48  ;;  %v2497_v6 = vpop.permute.xlu1 %2496  ;;  %v3251_v59 = vpop.permute.xlu2 %3250  ;;  %v7049_v17 = vor.u32 %v7355_v33, %v7048_v21  ;;  %7271 = vmatmul.msk.bf16.gmra.mxu1 %vm382_vm0, %v7117_v3  ;;  %v3982_v29 = vld [vmem:[#allocation2 + $0x19f] sm:$0xff] }
 0x476   : > { %2622 = vst.msk [vmem:[#allocation3 + $0x1bc] sm:$0xf] %vm2584_vm13, %v2497_v6  ;;  %v9843_v33 = vpop.f32.mrf.mxu2  ;;  %v9854_v3 = vpop.f32.mrf.mxu3  ;;  %v9892_v47 = vpack.c.bf16 %v3982_v29, %v3982_v29 }
 0x477   : > { %3378 = vst.msk [vmem:[#allocation3 + $0x1a4] sm:$0xf] %vm3342_vm14, %v3251_v59  ;;  %5681 = vmatmul.bf16.gmra.mxu3 %v7049_v17  ;;  %v7628_v27 = vpop.eup %7627  ;;  %v6851_v54 = vmul.f32 -1.442695, %v9843_v33  ;;  %v9857_v6 = vpop.f32.mrf.mxu0 }
 0x478   : > { %2092 = vst.msk [vmem:[#allocation2 + $0x1a8] sm:$0xff] %vm382_vm0, %v2030_v36  ;;  %v1167_v19 = vadd.f32 1.0, %v7628_v27  ;;  %v9863_v62 = vpop.f32.mrf.mxu1 }
 0x479   : > { %2255 = vst.msk [vmem:[#allocation3 + $0x24c] sm:$0xf] %vm2205_vm3, %v9835_v55 }
 0x47a   : > { %4845 = vst.msk [vmem:[#allocation3 + $0x218] sm:$0xf] %vm2205_vm3, %v9840_v28  ;;  %3801 = vrot.lane.b32.xlu0 %v3653_v4, %s7653_s26  ;;  %7629 = vrcp.f32 %v1167_v19  ;;  %vm1926_vm4 = vweird.f32 %v1167_v19 }
 0x47b   : > { %2887 = vrot.lane.b32.xlu1 %v3653_v4, %s7654_s27  ;;  %2510 = vrot.lane.b32.xlu2 %v9600_v53, %s7653_s26  ;;  %11019 = vst [vmem:[#allocation30_spill] sm:$0xff] %v9854_v3  ;;  %7631 = vpow2.f32 %v6851_v54  ;;  %v1930_v54 = vand.u32 2147483647, %v1167_v19 }
 0x47c   : > { %v2874_v48 = vpop.permute.xlu0 %2873  ;;  %11020 = vst [vmem:[#allocation31_spill] sm:$0xff] %v9857_v6 }
 0x47d   : > { %3000 = vst.msk [vmem:[#allocation3 + $0x1b0] sm:$0xf] %vm2963_vm6, %v2874_v48  ;;  %v3249_v37 = vpop.permute.xlu1 %3248  ;;  %v4164_v21 = vpop.permute.xlu2 %4163  ;;  %v1932_v48 = vand.u32 2147483648, %v1167_v19  ;;  %vm1931_vm8 = vcmp.eq.f32.partialorder %v1930_v54, 8.507059e+37 }
 0x47e   : > { %3377 = vst.msk [vmem:[#allocation3 + $0x198] sm:$0xf] %vm3342_vm14, %v3249_v37  ;;  %v7358_v27 = vld [vmem:[#allocation3 + $0x1a0] sm:$0xf0] }
 0x47f   : > { %v4738_v59 = vld [vmem:[#allocation2 + $0x1a1] sm:$0xff]  ;;  %4293 = vst.msk [vmem:[#allocation3 + $0x184] sm:$0xf] %vm2963_vm6, %v4164_v21 }
 0x480   : > { %v9861_v7 = vpack.c.bf16 %v4738_v59, %v4738_v59  ;;  %v7630_v17 = vpop.eup %7629  ;;  %11021 = vst [vmem:[#allocation32_spill] sm:$0xff] %v9863_v62  ;;  %v5657_v62 = vpop.f32.mrf.mxu3 }
 0x481   : > { %v7632_v36 = vpop.eup %7631  ;;  %v1922_v43 = vmul.f32 %v7630_v17, %v1167_v19  ;;  %vm1927_vm5 = vweird.f32 %v7630_v17  ;;  %2257 = vst.msk [vmem:[#allocation3 + $0x264] sm:$0xf] %vm2205_vm3, %v9892_v47 }
 0x482   : > { %4846 = vst.msk [vmem:[#allocation3 + $0x224] sm:$0xf] %vm2205_vm3, %v9861_v7  ;;  %2512 = vrot.lane.b32.xlu0 %v9676_v13, %s7653_s26  ;;  %v9873_v37 = vadd.f32 1.0, %v7632_v36  ;;  %vm9884_vm7 = vmor %vm1926_vm4, %vm1927_vm5 }
 0x483   : > { %4553 = vrot.lane.b32.xlu2 %v9600_v53, %s7655_s28  ;;  %4177 = vrot.lane.b32.xlu1 %v9604_v49, %s7654_s27  ;;  %v1923_v3 = vsub.f32 1.0, %v1922_v43 }
 0x484   : > { %v4162_v4 = vpop.permute.xlu0 %4161  ;;  %7633 = vrcp.f32 %v9873_v37  ;;  %vm1941_vm10 = vweird.f32 %v9873_v37 }
 0x485   : > { %4292 = vst.msk [vmem:[#allocation3 + $0x178] sm:$0xf] %vm2963_vm6, %v4162_v4  ;;  %v3788_v21 = vpop.permute.xlu1 %3787  ;;  %v2878_v59 = vpop.permute.xlu2 %2877  ;;  %v7060_v6 = vld [vmem:[#allocation3 + $0x198] sm:$0xf]  ;;  %v1924_v4 = vmul.f32 %v7630_v17, %v1923_v3 }
 0x486   : > { %4670 = vst.msk [vmem:[#allocation3 + $0x178] sm:$0xf] %vm3342_vm14, %v9767_v46  ;;  %v5801_v53 = vpop.f32.mrf.mxu0  ;;  %v7061_v41 = vor.u32 %v7358_v27, %v7060_v6  ;;  %v1933_v46 = vor.u32 1.1754944e-38, %v1932_v48  ;;  %v9888_v6 = vpack.c.bf16 %v2309_v26, %v2309_v26  ;;  %v9890_v27 = vpack.c.bf16 %v3981_v50, %v3981_v50  ;;  %v7128_v3 = vld [vmem:[#allocation3 + $0x218] sm:$0xf]  ;;  %v9905_v50 = vpop.f32.mrf.mxu1 }
 0x487   : > { %3916 = vst.msk [vmem:[#allocation3 + $0x190] sm:$0xf] %vm2584_vm13, %v3788_v21  ;;  %v9880_v36 = vadd.f32 %v5801_v53, %v5657_v62  ;;  %v3654_v21 = vpack.c.bf16 %v3600_v8, %v3600_v8  ;;  %v1925_v62 = vadd.f32 %v7630_v17, %v1924_v4  ;;  %v7351_v48 = vld [vmem:[#allocation3 + $0x16c] sm:$0xf] }
 0x488   : > { %3002 = vst.msk [vmem:[#allocation3 + $0x1c8] sm:$0xf] %vm2963_vm6, %v2878_v59  ;;  %5686 = vmatmul.bf16.gmra.mxu3 %v7061_v41 }
 0x489   : > { %11022 = vst [vmem:[#allocation33_spill] sm:$0xff] %v9880_v36  ;;  %v7374_v53 = vld [vmem:[#allocation3 + $0x220] sm:$0xf0]  ;;  %v2310_v36 = vld [vmem:[#allocation2 + $0x198] sm:$0xff]  ;;  %v1929_v26 = vsel %vm9884_vm7, %v7630_v17, %v1925_v62  ;;  %v1945_v62 = vand.u32 2147483647, %v9873_v37 }
 0x48a   : > { %4555 = vrot.lane.b32.xlu0 %v9676_v13, %s7655_s28  ;;  %v7129_v41 = vor.u32 %v7374_v53, %v7128_v3  ;;  %2256 = vst.msk [vmem:[#allocation3 + $0x258] sm:$0xf] %vm2205_vm3, %v9890_v27  ;;  %v7634_v29 = vpop.eup %7633  ;;  %v1934_v13 = vsel %vm1931_vm8, %v1933_v46, %v1929_v26  ;;  %v9908_v19 = vpack.c.bf16 %v2310_v36, %v2310_v36  ;;  %v1947_v46 = vand.u32 2147483648, %v9873_v37 }
 0x48b   : > { %3262 = vrot.lane.b32.xlu2 %v9594_v2, %s7655_s28  ;;  %3803 = vrot.lane.b32.xlu1 %v3654_v21, %s7653_s26  ;;  %3551 = vst.msk [vmem:[#allocation3 + $0x22c] sm:$0xf] %vm2205_vm3, %v9888_v6  ;;  %v2031_v17 = vmul.f32 %v1934_v13, %v9797_v44  ;;  %v1937_v4 = vmul.f32 %v7634_v29, %v9873_v37  ;;  %vm1942_vm11 = vweird.f32 %v7634_v29  ;;  %vm1946_vm15 = vcmp.eq.f32.partialorder %v1945_v62, 8.507059e+37  ;;  %v2684_v13 = vld [vmem:[#allocation2 + $0x171] sm:$0xff] }
 0x48c   : > { %v3790_v8 = vpop.permute.xlu0 %3789  ;;  %7272 = vmatmul.msk.bf16.gmra.mxu1 %vm382_vm0, %v7129_v41  ;;  %3552 = vst.msk [vmem:[#allocation3 + $0x238] sm:$0xf] %vm2205_vm3, %v9908_v19  ;;  %vm1943_vm12 = vmor %vm1941_vm10, %vm1942_vm11  ;;  %v1948_v3 = vor.u32 1.1754944e-38, %v1947_v46 }
 0x48d   : > { %3917 = vst.msk [vmem:[#allocation3 + $0x19c] sm:$0xf] %vm2584_vm13, %v3790_v8  ;;  %v2876_v2 = vpop.permute.xlu1 %2875  ;;  %v4544_v54 = vpop.permute.xlu2 %4543  ;;  %v7038_v59 = vld [vmem:[#allocation3 + $0x174] sm:$0xf0]  ;;  %v1938_v36 = vsub.f32 1.0, %v1937_v4 }
 0x48e   : > { %3001 = vst.msk [vmem:[#allocation3 + $0x1bc] sm:$0xf] %vm2963_vm6, %v2876_v2  ;;  %v7041_v43 = vor.u32 %v7351_v48, %v7038_v59  ;;  %v2738_v48 = vpack.c.bf16 %v2684_v13, %v2684_v13  ;;  %v9965_v13 = vpop.f32.mrf.mxu0 }
 0x48f   : > { %2093 = vst.msk [vmem:[#allocation2 + $0x1b0] sm:$0xff] %vm382_vm0, %v2031_v17  ;;  %v1939_v44 = vmul.f32 %v7634_v29, %v1938_v36 }
 0x490   : > { %5820 = vmatmul.bf16.gmra.mxu0 %v7041_v43  ;;  %11027 = vst [vmem:[#allocation36_spill] sm:$0xff] %v9965_v13 }
 0x491   : > { %v1940_v53 = vadd.f32 %v7634_v29, %v1939_v44  ;;  %v9950_v44 = vpop.f32.mrf.mxu1 }
 0x492   : > { %3264 = vrot.lane.b32.xlu0 %v9604_v49, %s7655_s28  ;;  %11025 = vst [vmem:[#allocation34_spill] sm:$0xff] %v9950_v44 }
 0x493   : > { %2889 = vrot.lane.b32.xlu2 %v3654_v21, %s7654_s27  ;;  %2514 = vrot.lane.b32.xlu1 %v9694_v18, %s7653_s26  ;;  %v1944_v8 = vsel %vm1943_vm12, %v7634_v29, %v1940_v53 }
 0x494   : > { %v2501_v41 = vpop.permute.xlu0 %2500  ;;  %v1949_v49 = vsel %vm1946_vm15, %v1948_v3, %v1944_v8  ;;  %v9963_v8 = vpop.f32.mrf.mxu3 }
 0x495   : > { %v4542_v26 = vpop.permute.xlu1 %4541  ;;  %2624 = vst.msk [vmem:[#allocation3 + $0x1d4] sm:$0xf] %vm2584_vm13, %v2501_v41  ;;  %v4168_v37 = vpop.permute.xlu2 %4167  ;;  %v2032_v21 = vmul.f32 %v1949_v49, %v9843_v33 }
 0x496   : > { %v4739_v2 = vld [vmem:[#allocation2 + $0x1a9] sm:$0xff]  ;;  %4671 = vst.msk [vmem:[#allocation3 + $0x184] sm:$0xf] %vm3342_vm14, %v4542_v26  ;;  %v9935_v59 = vpop.f32.mrf.mxu2 }
 0x497   : > { %v9929_v17 = vpack.c.bf16 %v4739_v2, %v4739_v2  ;;  %4295 = vst.msk [vmem:[#allocation3 + $0x19c] sm:$0xf] %vm2963_vm6, %v4168_v37  ;;  %v6852_v29 = vmul.f32 -1.442695, %v9935_v59  ;;  %v3602_v37 = vld [vmem:[#allocation2 + $0x179] sm:$0xff] }
 0x498   : > { %2094 = vst.msk [vmem:[#allocation2 + $0x1b8] sm:$0xff] %vm382_vm0, %v2032_v21  ;;  %v2311_v21 = vld [vmem:[#allocation2 + $0x1a0] sm:$0xff] }
 0x499   : > { %4847 = vst.msk [vmem:[#allocation3 + $0x230] sm:$0xf] %vm2205_vm3, %v9929_v17  ;;  %7635 = vpow2.f32 %v6852_v29  ;;  %v9969_v29 = vpack.c.bf16 %v2311_v21, %v2311_v21 }
 0x49a   : > { %2891 = vrot.lane.b32.xlu0 %v2738_v48, %s7654_s27  ;;  %11026 = vst [vmem:[#allocation35_spill] sm:$0xff] %v9963_v8 }
 0x49b   : > { %4179 = vrot.lane.b32.xlu2 %v9678_v22, %s7654_s27  ;;  %4557 = vrot.lane.b32.xlu1 %v9694_v18, %s7655_s28  ;;  %3553 = vst.msk [vmem:[#allocation3 + $0x244] sm:$0xf] %vm2205_vm3, %v9969_v29 }
 0x49c   : > { %v4166_v4 = vpop.permute.xlu0 %4165 }
 0x49d   : > { %v3792_v33 = vpop.permute.xlu1 %3791  ;;  %4294 = vst.msk [vmem:[#allocation3 + $0x190] sm:$0xf] %vm2963_vm6, %v4166_v4  ;;  %v3794_v43 = vpop.permute.xlu2 %3793  ;;  %v7354_v2 = vld [vmem:[#allocation3 + $0x184] sm:$0xf]  ;;  %v2312_v4 = vld [vmem:[#allocation2 + $0x1a8] sm:$0xff] }
 0x49e   : > { %3918 = vst.msk [vmem:[#allocation3 + $0x1a8] sm:$0xf] %vm2584_vm13, %v3792_v33  ;;  %v9948_v36 = vpop.f32.mrf.mxu2  ;;  %v3983_v33 = vld [vmem:[#allocation2 + $0x1a7] sm:$0xff] }
 0x49f   : > { %4672 = vst.msk [vmem:[#allocation3 + $0x190] sm:$0xf] %vm3342_vm14, %v4544_v54  ;;  %v4740_v46 = vld [vmem:[#allocation2 + $0x1b1] sm:$0xff]  ;;  %v7636_v62 = vpop.eup %7635  ;;  %v6853_v18 = vmul.f32 -1.442695, %v9948_v36 }
 0x4a0   : > { %3919 = vst.msk [vmem:[#allocation3 + $0x1b4] sm:$0xf] %vm2584_vm13, %v3794_v43  ;;  %v9952_v3 = vpack.c.bf16 %v4740_v46, %v4740_v46  ;;  %v1169_v54 = vadd.f32 1.0, %v7636_v62  ;;  %v3984_v43 = vld [vmem:[#allocation2 + $0x1af] sm:$0xff]  ;;  %v7140_v46 = vld [vmem:[#allocation3 + $0x230] sm:$0xf]  ;;  %v9971_v62 = vpack.c.bf16 %v3983_v33, %v3983_v33 }
 0x4a1   : > { %7637 = vpow2.f32 %v6853_v18  ;;  %v9973_v18 = vpack.c.bf16 %v3984_v43, %v3984_v43 }
 0x4a2   : > { %4181 = vrot.lane.b32.xlu0 %v9680_v35, %s7654_s27  ;;  %4848 = vst.msk [vmem:[#allocation3 + $0x23c] sm:$0xf] %vm2205_vm3, %v9952_v3  ;;  %7639 = vrcp.f32 %v1169_v54  ;;  %v1962_v44 = vand.u32 2147483648, %v1169_v54  ;;  %vm1956_vm1 = vweird.f32 %v1169_v54 }
 0x4a3   : > { %3805 = vrot.lane.b32.xlu2 %v2738_v48, %s7653_s26  ;;  %3266 = vrot.lane.b32.xlu1 %v9678_v22, %s7655_s28  ;;  %v3656_v48 = vpack.c.bf16 %v3602_v37, %v3602_v37  ;;  %2258 = vst.msk [vmem:[#allocation3 + $0x270] sm:$0xf] %vm2205_vm3, %v9971_v62 }
 0x4a4   : > { %v3253_v53 = vpop.permute.xlu0 %3252  ;;  %2259 = vst.msk [vmem:[#allocation3 + $0x27c] sm:$0xf] %vm2205_vm3, %v9973_v18 }
 0x4a5   : > { %3379 = vst.msk [vmem:[#allocation3 + $0x1b0] sm:$0xf] %vm3342_vm14, %v3253_v53  ;;  %v2503_v41 = vpop.permute.xlu1 %2502  ;;  %v2505_v26 = vpop.permute.xlu2 %2504 }
 0x4a6   : > { %2625 = vst.msk [vmem:[#allocation3 + $0x1e0] sm:$0xf] %vm2584_vm13, %v2503_v41  ;;  %v7050_v22 = vld [vmem:[#allocation3 + $0x18c] sm:$0xf0] }
 0x4a7   : > { %2626 = vst.msk [vmem:[#allocation3 + $0x1ec] sm:$0xf] %vm2584_vm13, %v2505_v26  ;;  %v7053_v49 = vor.u32 %v7354_v2, %v7050_v22  ;;  %v7638_v53 = vpop.eup %7637  ;;  %v9981_v2 = vpack.c.bf16 %v2312_v4, %v2312_v4  ;;  %v9985_v22 = vpop.f32.mrf.mxu1 }
 0x4a8   : > { %v7640_v41 = vpop.eup %7639  ;;  %v1170_v26 = vadd.f32 1.0, %v7638_v53  ;;  %11028 = vst [vmem:[#allocation37_spill] sm:$0xff] %v9985_v22  ;;  %v5662_v53 = vpop.f32.mrf.mxu3  ;;  %v1960_v22 = vand.u32 2147483647, %v1169_v54 }
 0x4a9   : > { %5825 = vmatmul.bf16.gmra.mxu0 %v7053_v49  ;;  %v7377_v37 = vld [vmem:[#allocation3 + $0x238] sm:$0xf0]  ;;  %v1952_v21 = vmul.f32 %v7640_v41, %v1169_v54  ;;  %vm1957_vm9 = vweird.f32 %v7640_v41  ;;  %3554 = vst.msk [vmem:[#allocation3 + $0x250] sm:$0xf] %vm2205_vm3, %v9981_v2 }
 0x4aa   : > { %3807 = vrot.lane.b32.xlu0 %v3656_v48, %s7653_s26  ;;  %v7141_v33 = vor.u32 %v7377_v37, %v7140_v46  ;;  %7641 = vrcp.f32 %v1170_v26  ;;  %vm1958_vm2 = vmor %vm1956_vm1, %vm1957_vm9  ;;  %vm1961_vm4 = vcmp.eq.f32.partialorder %v1960_v22, 8.507059e+37  ;;  %vm1971_vm5 = vweird.f32 %v1170_v26 }
 0x4ab   : > { %2893 = vrot.lane.b32.xlu1 %v3656_v48, %s7654_s27  ;;  %2516 = vrot.lane.b32.xlu2 %v9799_v0, %s7653_s26  ;;  %v1953_v13 = vsub.f32 1.0, %v1952_v21 }
 0x4ac   : > { %v2880_v49 = vpop.permute.xlu0 %2879  ;;  %7273 = vmatmul.msk.bf16.gmra.mxu1 %vm382_vm0, %v7141_v33 }
 0x4ad   : > { %3003 = vst.msk [vmem:[#allocation3 + $0x1d4] sm:$0xf] %vm2963_vm6, %v2880_v49  ;;  %v4546_v48 = vpop.permute.xlu1 %4545  ;;  %v4548_v43 = vpop.permute.xlu2 %4547  ;;  %v1954_v37 = vmul.f32 %v7640_v41, %v1953_v13  ;;  %v1963_v49 = vor.u32 1.1754944e-38, %v1962_v44 }
 0x4ae   : > { %4673 = vst.msk [vmem:[#allocation3 + $0x19c] sm:$0xf] %vm3342_vm14, %v4546_v48  ;;  %v5806_v4 = vpop.f32.mrf.mxu0 }
 0x4af   : > { %v9992_v46 = vadd.f32 %v5806_v4, %v5662_v53  ;;  %v1955_v8 = vadd.f32 %v7640_v41, %v1954_v37  ;;  %v1977_v4 = vand.u32 2147483648, %v1170_v26  ;;  %v3603_v37 = vld [vmem:[#allocation2 + $0x181] sm:$0xff] }
 0x4b0   : > { %v7642_v48 = vpop.eup %7641 }
 0x4b1   : > { %11029 = vst [vmem:[#allocation38_spill] sm:$0xff] %v9992_v46  ;;  %v1959_v21 = vsel %vm1958_vm2, %v7640_v41, %v1955_v8  ;;  %v1967_v33 = vmul.f32 %v7642_v48, %v1170_v26  ;;  %vm1972_vm7 = vweird.f32 %v7642_v48  ;;  %v3657_v41 = vpack.c.bf16 %v3603_v37, %v3603_v37 }
 0x4b2   : > { %2518 = vrot.lane.b32.xlu0 %v9803_v16, %s7653_s26  ;;  %v1964_v44 = vsel %vm1961_vm4, %v1963_v49, %v1959_v21  ;;  %vm1973_vm8 = vmor %vm1971_vm5, %vm1972_vm7  ;;  %v1978_v49 = vor.u32 1.1754944e-38, %v1977_v4 }
 0x4b3   : > { %4559 = vrot.lane.b32.xlu2 %v9799_v0, %s7655_s28  ;;  %4183 = vrot.lane.b32.xlu1 %v9801_v60, %s7654_s27  ;;  %v2033_v22 = vmul.f32 %v1964_v44, %v9935_v59  ;;  %v1968_v46 = vsub.f32 1.0, %v1967_v33  ;;  %v1975_v0 = vand.u32 2147483647, %v1170_v26  ;;  %v7072_v33 = vld [vmem:[#allocation3 + $0x1b0] sm:$0xf] }
 0x4b4   : > { %v4170_v54 = vpop.permute.xlu0 %4169 }
 0x4b5   : > { %v3255_v53 = vpop.permute.xlu1 %3254  ;;  %4296 = vst.msk [vmem:[#allocation3 + $0x1a8] sm:$0xf] %vm2963_vm6, %v4170_v54  ;;  %v3257_v13 = vpop.permute.xlu2 %3256  ;;  %v1969_v8 = vmul.f32 %v7642_v48, %v1968_v46  ;;  %vm1976_vm10 = vcmp.eq.f32.partialorder %v1975_v0, 8.507059e+37  ;;  %v7357_v44 = vld [vmem:[#allocation3 + $0x19c] sm:$0xf] }
 0x4b6   : > { %3380 = vst.msk [vmem:[#allocation3 + $0x1bc] sm:$0xf] %vm3342_vm14, %v3255_v53 }
 0x4b7   : > { %4674 = vst.msk [vmem:[#allocation3 + $0x1a8] sm:$0xf] %vm3342_vm14, %v4548_v43  ;;  %v1970_v54 = vadd.f32 %v7642_v48, %v1969_v8  ;;  %v10028_v8 = vpop.f32.mrf.mxu3 }
 0x4b8   : > { %3381 = vst.msk [vmem:[#allocation3 + $0x1c8] sm:$0xf] %vm3342_vm14, %v3257_v13 }
 0x4b9   : > { %2095 = vst.msk [vmem:[#allocation2 + $0x1c0] sm:$0xff] %vm382_vm0, %v2033_v22  ;;  %v1974_v26 = vsel %vm1973_vm8, %v7642_v48, %v1970_v54 }
 0x4ba   : > { %4561 = vrot.lane.b32.xlu0 %v9803_v16, %s7655_s28  ;;  %v1979_v21 = vsel %vm1976_vm10, %v1978_v49, %v1974_v26  ;;  %11030 = vst [vmem:[#allocation39_spill] sm:$0xff] %v10028_v8  ;;  %v10030_v49 = vpop.f32.mrf.mxu0  ;;  %v10038_v26 = vpop.f32.mrf.mxu1 }
 0x4bb   : > { %3268 = vrot.lane.b32.xlu2 %v9680_v35, %s7655_s28  ;;  %3809 = vrot.lane.b32.xlu1 %v3657_v41, %s7653_s26  ;;  %v2034_v16 = vmul.f32 %v1979_v21, %v9948_v36  ;;  %11031 = vst [vmem:[#allocation40_spill] sm:$0xff] %v10030_v49  ;;  %v10415_v49 = vld [vmem:[%s10219_s24 + $0xf0] sm:$0xff] }
 0x4bc   : > { %v3796_v59 = vpop.permute.xlu0 %3795  ;;  %11032 = vst [vmem:[#allocation41_spill] sm:$0xff] %v10038_v26  ;;  %v10440_v26 = vld [vmem:[%s10219_s24 + $0x108] sm:$0xff] }
 0x4bd   : > { %3920 = vst.msk [vmem:[#allocation3 + $0x1c0] sm:$0xf] %vm2584_vm13, %v3796_v59  ;;  %v2882_v43 = vpop.permute.xlu1 %2881  ;;  %v2884_v46 = vpop.permute.xlu2 %2883  ;;  %v7361_v53 = vld [vmem:[#allocation3 + $0x1b8] sm:$0xf0] }
 0x4be   : > { %3004 = vst.msk [vmem:[#allocation3 + $0x1e0] sm:$0xf] %vm2963_vm6, %v2882_v43  ;;  %v7073_v13 = vor.u32 %v7361_v53, %v7072_v33  ;;  %v7062_v4 = vld [vmem:[#allocation3 + $0x1a4] sm:$0xf0] }
 0x4bf   : > { %3005 = vst.msk [vmem:[#allocation3 + $0x1ec] sm:$0xf] %vm2963_vm6, %v2884_v46  ;;  %v7065_v35 = vor.u32 %v7357_v44, %v7062_v4  ;;  %v5667_v33 = vpop.f32.mrf.mxu3  ;;  %v4363_v44 = vld [vmem:[#allocation2 + $0x1b8] sm:$0xff] }
 0x4c0   : > { %v4741_v22 = vld [vmem:[#allocation2 + $0x1b9] sm:$0xff]  ;;  %2096 = vst.msk [vmem:[#allocation2 + $0x1c8] sm:$0xff] %vm382_vm0, %v2034_v16  ;;  %5691 = vmatmul.bf16.gmra.mxu3 %v7073_v13  ;;  %v3604_v16 = vld [vmem:[#allocation2 + $0x189] sm:$0xff] }
 0x4c1   : > { %v10018_v48 = vpack.c.bf16 %v4741_v22, %v4741_v22  ;;  %5830 = vmatmul.bf16.gmra.mxu0 %v7065_v35  ;;  %v2313_v13 = vld [vmem:[#allocation2 + $0x1b0] sm:$0xff]  ;;  %v10057_v35 = vpack.c.bf16 %v4363_v44, %v4363_v44  ;;  %11066 = vst [vmem:[#allocation75_spill] sm:$0xff] %v10415_v49 }
 0x4c2   : > { %3270 = vrot.lane.b32.xlu0 %v9801_v60, %s7655_s28  ;;  %v10055_v4 = vpack.c.bf16 %v2313_v13, %v2313_v13  ;;  %11070 = vst [vmem:[#allocation79_spill] sm:$0xff] %v10440_v26 }
 0x4c3   : > { %4849 = vst.msk [vmem:[#allocation3 + $0x248] sm:$0xf] %vm2205_vm3, %v10018_v48  ;;  %2895 = vrot.lane.b32.xlu2 %v3657_v41, %s7654_s27  ;;  %2520 = vrot.lane.b32.xlu1 %v9888_v6, %s7653_s26 }
 0x4c4   : > { %v2507_v36 = vpop.permute.xlu0 %2506  ;;  %3555 = vst.msk [vmem:[#allocation3 + $0x25c] sm:$0xf] %vm2205_vm3, %v10055_v4 }
 0x4c5   : > { %v4172_v37 = vpop.permute.xlu1 %4171  ;;  %2627 = vst.msk [vmem:[#allocation3 + $0x1f8] sm:$0xf] %vm2584_vm13, %v2507_v36  ;;  %v4174_v0 = vpop.permute.xlu2 %4173 }
 0x4c6   : > { %4297 = vst.msk [vmem:[#allocation3 + $0x1b4] sm:$0xf] %vm2963_vm6, %v4172_v37 }
 0x4c7   : > { %v4742_v60 = vld [vmem:[#allocation2 + $0x1c1] sm:$0xff]  ;;  %v4743_v54 = vld [vmem:[#allocation2 + $0x1c9] sm:$0xff]  ;;  %4298 = vst.msk [vmem:[#allocation3 + $0x1c0] sm:$0xf] %vm2963_vm6, %v4174_v0  ;;  %v10068_v0 = vpop.f32.mrf.mxu1 }
 0x4c8   : > { %v10034_v59 = vpack.c.bf16 %v4742_v60, %v4742_v60  ;;  %v10036_v41 = vpack.c.bf16 %v4743_v54, %v4743_v54  ;;  %3556 = vst.msk [vmem:[#allocation3 + $0x268] sm:$0xf] %vm2205_vm3, %v10057_v35 }
 0x4c9   : > { %11034 = vst [vmem:[#allocation43_spill] sm:$0xff] %v10068_v0 }
 0x4ca   : > { %4850 = vst.msk [vmem:[#allocation3 + $0x254] sm:$0xf] %vm2205_vm3, %v10034_v59  ;;  %2897 = vrot.lane.b32.xlu0 %v9755_v51, %s7654_s27  ;;  %v7152_v22 = vld [vmem:[#allocation3 + $0x248] sm:$0xf] }
 0x4cb   : > { %4851 = vst.msk [vmem:[#allocation3 + $0x260] sm:$0xf] %vm2205_vm3, %v10036_v41  ;;  %4185 = vrot.lane.b32.xlu2 %v9835_v55, %s7654_s27  ;;  %4563 = vrot.lane.b32.xlu1 %v9888_v6, %s7655_s28  ;;  %v3658_v6 = vpack.c.bf16 %v3604_v16, %v3604_v16 }
 0x4cc   : > { %v4550_v43 = vpop.permute.xlu0 %4549 }
 0x4cd   : > { %v3798_v46 = vpop.permute.xlu1 %3797  ;;  %4675 = vst.msk [vmem:[#allocation3 + $0x1b4] sm:$0xf] %vm3342_vm14, %v4550_v43  ;;  %v3800_v21 = vpop.permute.xlu2 %3799 }
 0x4ce   : > { %3921 = vst.msk [vmem:[#allocation3 + $0x1cc] sm:$0xf] %vm2584_vm13, %v3798_v46  ;;  %v5811_v53 = vpop.f32.mrf.mxu0 }
 0x4cf   : > { %3922 = vst.msk [vmem:[#allocation3 + $0x1d8] sm:$0xf] %vm2584_vm13, %v3800_v21  ;;  %v10053_v51 = vadd.f32 %v5811_v53, %v5667_v33  ;;  %v7084_v21 = vld [vmem:[#allocation3 + $0x1c8] sm:$0xf] }
 0x4d1   : > { %11033 = vst [vmem:[#allocation42_spill] sm:$0xff] %v10053_v51  ;;  %v7380_v36 = vld [vmem:[#allocation3 + $0x250] sm:$0xf0]  ;;  %v10392_v51 = vld [vmem:[%s10219_s24 + $0xd8] sm:$0xff] }
 0x4d2   : > { %4187 = vrot.lane.b32.xlu0 %v9890_v27, %s7654_s27  ;;  %v7153_v37 = vor.u32 %v7380_v36, %v7152_v22  ;;  %v10086_v22 = vpop.f32.mrf.mxu1  ;;  %11063 = vst [vmem:[#allocation72_spill] sm:$0xff] %v10392_v51 }
 0x4d3   : > { %3811 = vrot.lane.b32.xlu2 %v3658_v6, %s7653_s26  ;;  %3272 = vrot.lane.b32.xlu1 %v9835_v55, %s7655_s28  ;;  %v10080_v55 = vpop.f32.mrf.mxu3  ;;  %v4744_v6 = vld [vmem:[#allocation2 + $0x1d1] sm:$0xff]  ;;  %11037 = vst [vmem:[#allocation46_spill] sm:$0xff] %v10086_v22 }
 0x4d4   : > { %v3259_v60 = vpop.permute.xlu0 %3258  ;;  %7274 = vmatmul.msk.bf16.gmra.mxu1 %vm382_vm0, %v7153_v37  ;;  %11035 = vst [vmem:[#allocation44_spill] sm:$0xff] %v10080_v55 }
 0x4d5   : > { %3382 = vst.msk [vmem:[#allocation3 + $0x1d4] sm:$0xf] %vm3342_vm14, %v3259_v60  ;;  %v2509_v54 = vpop.permute.xlu1 %2508  ;;  %v2511_v43 = vpop.permute.xlu2 %2510 }
 0x4d6   : > { %2628 = vst.msk [vmem:[#allocation3 + $0x204] sm:$0xf] %vm2584_vm13, %v2509_v54  ;;  %v10083_v44 = vpop.f32.mrf.mxu0  ;;  %v7360_v54 = vld [vmem:[#allocation3 + $0x1b4] sm:$0xf] }
 0x4d7   : > { %2629 = vst.msk [vmem:[#allocation3 + $0x210] sm:$0xf] %vm2584_vm13, %v2511_v43 }
 0x4d8   : > { %11036 = vst [vmem:[#allocation45_spill] sm:$0xff] %v10083_v44 }
 0x4da   : > { %3813 = vrot.lane.b32.xlu0 %v9775_v52, %s7653_s26 }
 0x4db   : > { %2899 = vrot.lane.b32.xlu1 %v9775_v52, %s7654_s27  ;;  %2522 = vrot.lane.b32.xlu2 %v9908_v19, %s7653_s26  ;;  %v4798_v52 = vpack.c.bf16 %v4744_v6, %v4744_v6 }
 0x4dc   : > { %v2886_v46 = vpop.permute.xlu0 %2885  ;;  %v7364_v33 = vld [vmem:[#allocation3 + $0x1d0] sm:$0xf0] }
 0x4dd   : > { %3006 = vst.msk [vmem:[#allocation3 + $0x1f8] sm:$0xf] %vm2963_vm6, %v2886_v46  ;;  %v4552_v53 = vpop.permute.xlu1 %4551  ;;  %v4554_v16 = vpop.permute.xlu2 %4553  ;;  %v7085_v13 = vor.u32 %v7364_v33, %v7084_v21 }
 0x4de   : > { %4676 = vst.msk [vmem:[#allocation3 + $0x1c0] sm:$0xf] %vm3342_vm14, %v4552_v53  ;;  %v5672_v46 = vpop.f32.mrf.mxu3 }
 0x4df   : > { %5696 = vmatmul.bf16.gmra.mxu3 %v7085_v13  ;;  %4852 = vst.msk [vmem:[#allocation3 + $0x26c] sm:$0xf] %vm2205_vm3, %v4798_v52  ;;  %v4364_v13 = vld [vmem:[#allocation2 + $0x1c0] sm:$0xff]  ;;  %v4365_v52 = vld [vmem:[#allocation2 + $0x1c8] sm:$0xff] }
 0x4e0   : > { %v10101_v6 = vpack.c.bf16 %v4364_v13, %v4364_v13  ;;  %v10103_v0 = vpack.c.bf16 %v4365_v52, %v4365_v52 }
 0x4e2   : > { %2524 = vrot.lane.b32.xlu0 %v9969_v29, %s7653_s26  ;;  %3557 = vst.msk [vmem:[#allocation3 + $0x274] sm:$0xf] %vm2205_vm3, %v10101_v6 }
 0x4e3   : > { %4565 = vrot.lane.b32.xlu2 %v9908_v19, %s7655_s28  ;;  %4189 = vrot.lane.b32.xlu1 %v9892_v47, %s7654_s27  ;;  %v7164_v19 = vld [vmem:[#allocation3 + $0x260] sm:$0xf]  ;;  %3558 = vst.msk [vmem:[#allocation3 + $0x280] sm:$0xf] %vm2205_vm3, %v10103_v0 }
 0x4e4   : > { %v4176_v36 = vpop.permute.xlu0 %4175 }
 0x4e5   : > { %v3261_v37 = vpop.permute.xlu1 %3260  ;;  %4299 = vst.msk [vmem:[#allocation3 + $0x1cc] sm:$0xf] %vm2963_vm6, %v4176_v36  ;;  %v3263_v60 = vpop.permute.xlu2 %3262  ;;  %v7074_v43 = vld [vmem:[#allocation3 + $0x1bc] sm:$0xf0] }
 0x4e6   : > { %3383 = vst.msk [vmem:[#allocation3 + $0x1e0] sm:$0xf] %vm3342_vm14, %v3261_v37  ;;  %v5816_v21 = vpop.f32.mrf.mxu0  ;;  %v7077_v33 = vor.u32 %v7360_v54, %v7074_v43  ;;  %v7383_v36 = vld [vmem:[#allocation3 + $0x268] sm:$0xf0]  ;;  %v10145_v52 = vpop.f32.mrf.mxu3 }
 0x4e7   : > { %4677 = vst.msk [vmem:[#allocation3 + $0x1cc] sm:$0xf] %vm3342_vm14, %v4554_v16  ;;  %v10098_v53 = vadd.f32 %v5816_v21, %v5672_v46  ;;  %v7165_v37 = vor.u32 %v7383_v36, %v7164_v19  ;;  %v10115_v16 = vpop.f32.mrf.mxu1 }
 0x4e8   : > { %3384 = vst.msk [vmem:[#allocation3 + $0x1ec] sm:$0xf] %vm3342_vm14, %v3263_v60  ;;  %5835 = vmatmul.bf16.gmra.mxu0 %v7077_v33 }
 0x4e9   : > { %11038 = vst [vmem:[#allocation47_spill] sm:$0xff] %v10098_v53  ;;  %7275 = vmatmul.msk.bf16.gmra.mxu1 %vm382_vm0, %v7165_v37  ;;  %v10332_v53 = vld [vmem:[%s10219_s24 + $0x68] sm:$0xff] }
 0x4ea   : > { %4567 = vrot.lane.b32.xlu0 %v9969_v29, %s7655_s28  ;;  %11039 = vst [vmem:[#allocation48_spill] sm:$0xff] %v10115_v16 }
 0x4eb   : > { %3274 = vrot.lane.b32.xlu2 %v9890_v27, %s7655_s28  ;;  %3815 = vrot.lane.b32.xlu1 %v9840_v28, %s7653_s26  ;;  %11040 = vst [vmem:[#allocation49_spill] sm:$0xff] %v10145_v52 }
 0x4ec   : > { %v3802_v60 = vpop.permute.xlu0 %3801 }
 0x4ed   : > { %3923 = vst.msk [vmem:[#allocation3 + $0x1e4] sm:$0xf] %vm2584_vm13, %v3802_v60  ;;  %v2888_v29 = vpop.permute.xlu1 %2887  ;;  %v2890_v54 = vpop.permute.xlu2 %2889  ;;  %v7096_v43 = vld [vmem:[#allocation3 + $0x1e0] sm:$0xf] }
 0x4ee   : > { %3007 = vst.msk [vmem:[#allocation3 + $0x204] sm:$0xf] %vm2963_vm6, %v2888_v29  ;;  %v7363_v36 = vld [vmem:[#allocation3 + $0x1cc] sm:$0xf] }
 0x4ef   : > { %3008 = vst.msk [vmem:[#allocation3 + $0x210] sm:$0xf] %vm2963_vm6, %v2890_v54  ;;  %v7367_v27 = vld [vmem:[#allocation3 + $0x1e8] sm:$0xf0] }
 0x4f0   : > { %v7097_v46 = vor.u32 %v7367_v27, %v7096_v43  ;;  %v10148_v43 = vpop.f32.mrf.mxu0 }
 0x4f1   : > { %11041 = vst [vmem:[#allocation50_spill] sm:$0xff] %v10148_v43 }
 0x4f2   : > { %5701 = vmatmul.bf16.gmra.mxu3 %v7097_v46  ;;  %3276 = vrot.lane.b32.xlu0 %v9892_v47, %s7655_s28 }
 0x4f3   : > { %2901 = vrot.lane.b32.xlu2 %v9840_v28, %s7654_s27  ;;  %2526 = vrot.lane.b32.xlu1 %v9981_v2, %s7653_s26 }
 0x4f4   : > { %v2513_v21 = vpop.permute.xlu0 %2512 }
 0x4f5   : > { %v4178_v33 = vpop.permute.xlu1 %4177  ;;  %2630 = vst.msk [vmem:[#allocation3 + $0x21c] sm:$0xf] %vm2584_vm13, %v2513_v21  ;;  %v4180_v19 = vpop.permute.xlu2 %4179 }
 0x4f6   : > { %4300 = vst.msk [vmem:[#allocation3 + $0x1d8] sm:$0xf] %vm2963_vm6, %v4178_v33  ;;  %v3985_v33 = vld [vmem:[#allocation2 + $0x1b7] sm:$0xff] }
 0x4f7   : > { %4301 = vst.msk [vmem:[#allocation3 + $0x1e4] sm:$0xf] %vm2963_vm6, %v4180_v19 }
 0x4fa   : > { %2903 = vrot.lane.b32.xlu0 %v9861_v7, %s7654_s27 }
 0x4fb   : > { %4191 = vrot.lane.b32.xlu2 %v9971_v62, %s7654_s27  ;;  %4569 = vrot.lane.b32.xlu1 %v9981_v2, %s7655_s28 }
 0x4fc   : > { %v4556_v47 = vpop.permute.xlu0 %4555 }
 0x4fd   : > { %v3804_v28 = vpop.permute.xlu1 %3803  ;;  %4678 = vst.msk [vmem:[#allocation3 + $0x1d8] sm:$0xf] %vm3342_vm14, %v4556_v47  ;;  %v3806_v13 = vpop.permute.xlu2 %3805  ;;  %v4039_v47 = vpack.c.bf16 %v3985_v33, %v3985_v33 }
 0x4fe   : > { %3924 = vst.msk [vmem:[#allocation3 + $0x1f0] sm:$0xf] %vm2584_vm13, %v3804_v28 }
 0x4ff   : > { %3925 = vst.msk [vmem:[#allocation3 + $0x1fc] sm:$0xf] %vm2584_vm13, %v3806_v13 }
 0x502   : > { %4193 = vrot.lane.b32.xlu0 %v9973_v18, %s7654_s27 }
 0x503   : > { %3817 = vrot.lane.b32.xlu2 %v9861_v7, %s7653_s26  ;;  %3278 = vrot.lane.b32.xlu1 %v9971_v62, %s7655_s28  ;;  %v5677_v7 = vpop.f32.mrf.mxu3 }
 0x504   : > { %v3265_v2 = vpop.permute.xlu0 %3264  ;;  %v7086_v37 = vld [vmem:[#allocation3 + $0x1d4] sm:$0xf0] }
 0x505   : > { %3385 = vst.msk [vmem:[#allocation3 + $0x1f8] sm:$0xf] %vm3342_vm14, %v3265_v2  ;;  %v2515_v60 = vpop.permute.xlu1 %2514  ;;  %v2517_v29 = vpop.permute.xlu2 %2516  ;;  %v7089_v54 = vor.u32 %v7363_v36, %v7086_v37 }
 0x506   : > { %2631 = vst.msk [vmem:[#allocation3 + $0x228] sm:$0xf] %vm2584_vm13, %v2515_v60  ;;  %v3987_v60 = vld [vmem:[#allocation2 + $0x1c7] sm:$0xff] }
 0x507   : > { %2632 = vst.msk [vmem:[#allocation3 + $0x234] sm:$0xf] %vm2584_vm13, %v2517_v29  ;;  %5840 = vmatmul.bf16.gmra.mxu0 %v7089_v54 }
 0x50a   : > { %3819 = vrot.lane.b32.xlu0 %v9929_v17, %s7653_s26 }
 0x50b   : > { %2905 = vrot.lane.b32.xlu1 %v9929_v17, %s7654_s27  ;;  %2528 = vrot.lane.b32.xlu2 %v10055_v4, %s7653_s26  ;;  %v5679_v2 = vpop.f32.mrf.mxu3 }
 0x50c   : > { %v2892_v62 = vpop.permute.xlu0 %2891 }
 0x50d   : > { %3009 = vst.msk [vmem:[#allocation3 + $0x21c] sm:$0xf] %vm2963_vm6, %v2892_v62  ;;  %v4558_v27 = vpop.permute.xlu1 %4557  ;;  %v4560_v46 = vpop.permute.xlu2 %4559 }
 0x50e   : > { %4679 = vst.msk [vmem:[#allocation3 + $0x1e4] sm:$0xf] %vm3342_vm14, %v4558_v27  ;;  %v5821_v21 = vpop.f32.mrf.mxu0 }
 0x50f   : > { %v10160_v19 = vadd.f32 %v5821_v21, %v5677_v7  ;;  %v7108_v7 = vld [vmem:[#allocation3 + $0x1f8] sm:$0xf] }
 0x511   : > { %11042 = vst [vmem:[#allocation51_spill] sm:$0xff] %v10160_v19 }
 0x512   : > { %4573 = vrot.lane.b32.xlu0 %v10057_v35, %s7655_s28  ;;  %v10173_v35 = vpop.f32.mrf.mxu1 }
 0x513   : > { %4571 = vrot.lane.b32.xlu2 %v10055_v4, %s7655_s28  ;;  %4195 = vrot.lane.b32.xlu1 %v4039_v47, %s7654_s27  ;;  %11044 = vst [vmem:[#allocation53_spill] sm:$0xff] %v10173_v35  ;;  %v10329_v35 = vld [vmem:[%s10219_s24 + $0x90] sm:$0xff] }
 0x514   : > { %v4182_v17 = vpop.permute.xlu0 %4181 }
 0x515   : > { %v3267_v28 = vpop.permute.xlu1 %3266  ;;  %4302 = vst.msk [vmem:[#allocation3 + $0x1f0] sm:$0xf] %vm2963_vm6, %v4182_v17  ;;  %v3269_v13 = vpop.permute.xlu2 %3268 }
 0x516   : > { %3386 = vst.msk [vmem:[#allocation3 + $0x204] sm:$0xf] %vm3342_vm14, %v3267_v28  ;;  %v5823_v36 = vpop.f32.mrf.mxu0  ;;  %v5682_v17 = vpop.f32.mrf.mxu3 }
 0x517   : > { %4680 = vst.msk [vmem:[#allocation3 + $0x1f0] sm:$0xf] %vm3342_vm14, %v4560_v46  ;;  %v10170_v37 = vadd.f32 %v5823_v36, %v5679_v2  ;;  %v7366_v46 = vld [vmem:[#allocation3 + $0x1e4] sm:$0xf] }
 0x518   : > { %3387 = vst.msk [vmem:[#allocation3 + $0x210] sm:$0xf] %vm3342_vm14, %v3269_v13 }
 0x519   : > { %11043 = vst [vmem:[#allocation52_spill] sm:$0xff] %v10170_v37 }
 0x51a   : > { %3282 = vrot.lane.b32.xlu0 %v4039_v47, %s7655_s28  ;;  %v10187_v47 = vpop.f32.mrf.mxu1 }
 0x51b   : > { %3280 = vrot.lane.b32.xlu2 %v9973_v18, %s7655_s28  ;;  %3821 = vrot.lane.b32.xlu1 %v9952_v3, %s7653_s26  ;;  %v10183_v18 = vpack.c.bf16 %v3987_v60, %v3987_v60  ;;  %11045 = vst [vmem:[#allocation54_spill] sm:$0xff] %v10187_v47  ;;  %v3988_v60 = vld [vmem:[#allocation2 + $0x1cf] sm:$0xff]  ;;  %v10356_v47 = vld [vmem:[%s10219_s24 + $0x80] sm:$0xff] }
 0x51c   : > { %v3808_v4 = vpop.permute.xlu0 %3807 }
 0x51d   : > { %3926 = vst.msk [vmem:[#allocation3 + $0x208] sm:$0xf] %vm2584_vm13, %v3808_v4  ;;  %v2894_v29 = vpop.permute.xlu1 %2893  ;;  %v2896_v54 = vpop.permute.xlu2 %2895  ;;  %v7370_v62 = vld [vmem:[#allocation3 + $0x200] sm:$0xf0]  ;;  %v3986_v4 = vld [vmem:[#allocation2 + $0x1bf] sm:$0xff] }
 0x51e   : > { %3010 = vst.msk [vmem:[#allocation3 + $0x228] sm:$0xf] %vm2963_vm6, %v2894_v29  ;;  %v7109_v27 = vor.u32 %v7370_v62, %v7108_v7  ;;  %v7098_v21 = vld [vmem:[#allocation3 + $0x1ec] sm:$0xf0] }
 0x51f   : > { %3011 = vst.msk [vmem:[#allocation3 + $0x234] sm:$0xf] %vm2963_vm6, %v2896_v54  ;;  %v7101_v33 = vor.u32 %v7366_v46, %v7098_v21  ;;  %v4040_v54 = vpack.c.bf16 %v3986_v4, %v3986_v4  ;;  %v5684_v21 = vpop.f32.mrf.mxu3 }
 0x520   : > { %5706 = vmatmul.bf16.gmra.mxu3 %v7109_v27 }
 0x521   : > { %5845 = vmatmul.bf16.gmra.mxu0 %v7101_v33 }
 0x522   : > { %4199 = vrot.lane.b32.xlu0 %v10183_v18, %s7654_s27  ;;  %v10202_v7 = vpop.f32.mrf.mxu1 }
 0x523   : > { %2907 = vrot.lane.b32.xlu2 %v9952_v3, %s7654_s27  ;;  %4575 = vrot.lane.b32.xlu1 %v10101_v6, %s7655_s28  ;;  %v4042_v3 = vpack.c.bf16 %v3988_v60, %v3988_v60  ;;  %v3990_v6 = vld [vmem:[#allocation2 + $0x1df] sm:$0xff]  ;;  %11047 = vst [vmem:[#allocation56_spill] sm:$0xff] %v10202_v7 }
 0x524   : > { %v2519_v28 = vpop.permute.xlu0 %2518  ;;  %v10225_v60 = vld [vmem:[%s10219_s24] sm:$0xff] }
 0x525   : > { %v4184_v13 = vpop.permute.xlu1 %4183  ;;  %2633 = vst.msk [vmem:[#allocation3 + $0x240] sm:$0xf] %vm2584_vm13, %v2519_v28  ;;  %v4186_v2 = vpop.permute.xlu2 %4185  ;;  %v10324_v7 = vld [vmem:[%s10219_s24 + $0x120] sm:$0xff] }
 0x526   : > { %4303 = vst.msk [vmem:[#allocation3 + $0x1fc] sm:$0xf] %vm2963_vm6, %v4184_v13  ;;  %v5826_v36 = vpop.f32.mrf.mxu0  ;;  %v3989_v13 = vld [vmem:[#allocation2 + $0x1d7] sm:$0xff] }
 0x527   : > { %4304 = vst.msk [vmem:[#allocation3 + $0x208] sm:$0xf] %vm2963_vm6, %v4186_v2  ;;  %v10196_v29 = vadd.f32 %v5826_v36, %v5682_v17  ;;  %v4044_v17 = vpack.c.bf16 %v3990_v6, %v3990_v6  ;;  %v7120_v6 = vld [vmem:[#allocation3 + $0x210] sm:$0xf] }
 0x528   : > { %11056 = vst [vmem:[#allocation65_spill] sm:$0xff] %v10324_v7 }
 0x529   : > { %11046 = vst [vmem:[#allocation55_spill] sm:$0xff] %v10196_v29 }
 0x52a   : > { %3825 = vrot.lane.b32.xlu0 %v10034_v59, %s7653_s26  ;;  %v10222_v4 = vpop.f32.mrf.mxu1 }
 0x52b   : > { %4197 = vrot.lane.b32.xlu2 %v4040_v54, %s7654_s27  ;;  %4201 = vrot.lane.b32.xlu1 %v4042_v3, %s7654_s27  ;;  %11049 = vst [vmem:[#allocation58_spill] sm:$0xff] %v10222_v4 }
 0x52c   : > { %v4562_v62 = vpop.permute.xlu0 %4561 }
 0x52d   : > { %v3810_v27 = vpop.permute.xlu1 %3809  ;;  %4681 = vst.msk [vmem:[#allocation3 + $0x1fc] sm:$0xf] %vm3342_vm14, %v4562_v62  ;;  %v3812_v46 = vpop.permute.xlu2 %3811 }
 0x52e   : > { %3927 = vst.msk [vmem:[#allocation3 + $0x214] sm:$0xf] %vm2584_vm13, %v3810_v27  ;;  %v5828_v33 = vpop.f32.mrf.mxu0  ;;  %v4367_v27 = vld [vmem:[#allocation2 + $0x1d8] sm:$0xff] }
 0x52f   : > { %3928 = vst.msk [vmem:[#allocation3 + $0x220] sm:$0xf] %vm2584_vm13, %v3812_v46  ;;  %v10207_v59 = vadd.f32 %v5828_v33, %v5684_v21 }
 0x531   : > { %11048 = vst [vmem:[#allocation57_spill] sm:$0xff] %v10207_v59 }
 0x532   : > { %4205 = vrot.lane.b32.xlu0 %v4044_v17, %s7654_s27 }
 0x533   : > { %3823 = vrot.lane.b32.xlu2 %v10018_v48, %s7653_s26  ;;  %3284 = vrot.lane.b32.xlu1 %v4040_v54, %s7655_s28  ;;  %v4043_v48 = vpack.c.bf16 %v3989_v13, %v3989_v13  ;;  %v5687_v54 = vpop.f32.mrf.mxu3  ;;  %v4421_v13 = vpack.c.bf16 %v4367_v27, %v4367_v27 }
 0x534   : > { %v3271_v28 = vpop.permute.xlu0 %3270 }
 0x535   : > { %3388 = vst.msk [vmem:[#allocation3 + $0x21c] sm:$0xf] %vm3342_vm14, %v3271_v28  ;;  %v2521_v2 = vpop.permute.xlu1 %2520  ;;  %v2523_v36 = vpop.permute.xlu2 %2522 }
 0x536   : > { %2634 = vst.msk [vmem:[#allocation3 + $0x24c] sm:$0xf] %vm2584_vm13, %v2521_v2  ;;  %v10236_v2 = vpop.f32.mrf.mxu1 }
 0x537   : > { %2635 = vst.msk [vmem:[#allocation3 + $0x258] sm:$0xf] %vm2584_vm13, %v2523_v36 }
 0x538   : > { %11051 = vst [vmem:[#allocation60_spill] sm:$0xff] %v10236_v2 }
 0x53a   : > { %6187 = vrot.lane.b32.xlu0 %v10225_v60, %s7656_s12 }
 0x53b   : > { %4203 = vrot.lane.b32.xlu2 %v4043_v48, %s7654_s27  ;;  %3827 = vrot.lane.b32.xlu1 %v10036_v41, %s7653_s26  ;;  %v10239_v41 = vld [vmem:[%s10219_s24 + $0x18] sm:$0xff] }
 0x53c   : > { %v2898_v3 = vpop.permute.xlu0 %2897  ;;  %v7373_v62 = vld [vmem:[#allocation3 + $0x218] sm:$0xf0] }
 0x53d   : > { %3012 = vst.msk [vmem:[#allocation3 + $0x240] sm:$0xf] %vm2963_vm6, %v2898_v3  ;;  %v4564_v46 = vpop.permute.xlu1 %4563  ;;  %v4566_v21 = vpop.permute.xlu2 %4565  ;;  %v7121_v33 = vor.u32 %v7373_v62, %v7120_v6  ;;  %v7369_v3 = vld [vmem:[#allocation3 + $0x1fc] sm:$0xf] }
 0x53e   : > { %4682 = vst.msk [vmem:[#allocation3 + $0x208] sm:$0xf] %vm3342_vm14, %v4564_v46  ;;  %v5831_v17 = vpop.f32.mrf.mxu0  ;;  %v5689_v62 = vpop.f32.mrf.mxu3 }
 0x53f   : > { %v10234_v28 = vadd.f32 %v5831_v17, %v5687_v54  ;;  %5711 = vmatmul.bf16.gmra.mxu3 %v7121_v33  ;;  %v10255_v17 = vpop.f32.mrf.mxu1 }
 0x540   : > { %11053 = vst [vmem:[#allocation62_spill] sm:$0xff] %v10255_v17  ;;  %v10314_v17 = vld [vmem:[%s10219_s24 + $0x28] sm:$0xff] }
 0x541   : > { %11050 = vst [vmem:[#allocation59_spill] sm:$0xff] %v10234_v28  ;;  %v10275_v28 = vld [vmem:[%s10219_s24 + $0x20] sm:$0xff] }
 0x542   : > { %6193 = vrot.lane.b32.xlu0 %v10239_v41, %s7656_s12 }
 0x543   : > { %4577 = vrot.lane.b32.xlu2 %v10103_v0, %s7655_s28  ;;  %4581 = vrot.lane.b32.xlu1 %v4421_v13, %s7655_s28  ;;  %v10253_v0 = vld [vmem:[%s10219_s24 + $0x30] sm:$0xff]  ;;  %v10258_v13 = vld [vmem:[%s10219_s24 + $0x8] sm:$0xff] }
 0x544   : > { %v4188_v36 = vpop.permute.xlu0 %4187 }
 0x545   : > { %v3273_v48 = vpop.permute.xlu1 %3272  ;;  %4305 = vst.msk [vmem:[#allocation3 + $0x214] sm:$0xf] %vm2963_vm6, %v4188_v36  ;;  %v3275_v54 = vpop.permute.xlu2 %3274  ;;  %v7110_v6 = vld [vmem:[#allocation3 + $0x204] sm:$0xf0]  ;;  %v4368_v36 = vld [vmem:[#allocation2 + $0x1e0] sm:$0xff] }
 0x546   : > { %3389 = vst.msk [vmem:[#allocation3 + $0x228] sm:$0xf] %vm3342_vm14, %v3273_v48  ;;  %v5833_v27 = vpop.f32.mrf.mxu0  ;;  %v7113_v46 = vor.u32 %v7369_v3, %v7110_v6 }
 0x547   : > { %4683 = vst.msk [vmem:[#allocation3 + $0x214] sm:$0xf] %vm3342_vm14, %v4566_v21  ;;  %v10249_v33 = vadd.f32 %v5833_v27, %v5689_v62  ;;  %v4422_v62 = vpack.c.bf16 %v4368_v36, %v4368_v36 }
 0x548   : > { %3390 = vst.msk [vmem:[#allocation3 + $0x234] sm:$0xf] %vm3342_vm14, %v3275_v54  ;;  %5850 = vmatmul.bf16.gmra.mxu0 %v7113_v46  ;;  %v10270_v46 = vld [vmem:[%s10219_s24 + $0x48] sm:$0xff] }
 0x549   : > { %11052 = vst [vmem:[#allocation61_spill] sm:$0xff] %v10249_v33  ;;  %v10309_v33 = vld [vmem:[%s10219_s24 + $0x50] sm:$0xff] }
 0x54a   : > { %6199 = vrot.lane.b32.xlu0 %v10253_v0, %s7656_s12 }
 0x54b   : > { %6189 = vrot.lane.b32.xlu1 %v10258_v13, %s7656_s12  ;;  %3286 = vrot.lane.b32.xlu2 %v10183_v18, %s7655_s28  ;;  %v10272_v18 = vpop.f32.mrf.mxu1 }
 0x54c   : > { %v3814_v21 = vpop.permute.xlu0 %3813  ;;  %11054 = vst [vmem:[#allocation63_spill] sm:$0xff] %v10272_v18  ;;  %v5692_v18 = vpop.f32.mrf.mxu3 }
 0x54d   : > { %3929 = vst.msk [vmem:[#allocation3 + $0x22c] sm:$0xf] %vm2584_vm13, %v3814_v21  ;;  %v2900_v48 = vpop.permute.xlu1 %2899  ;;  %v2902_v54 = vpop.permute.xlu2 %2901  ;;  %v7132_v3 = vld [vmem:[#allocation3 + $0x228] sm:$0xf] }
 0x54e   : > { %3013 = vst.msk [vmem:[#allocation3 + $0x24c] sm:$0xf] %vm2963_vm6, %v2900_v48 }
 0x54f   : > { %3014 = vst.msk [vmem:[#allocation3 + $0x258] sm:$0xf] %vm2963_vm6, %v2902_v54  ;;  %v7376_v6 = vld [vmem:[#allocation3 + $0x230] sm:$0xf0] }
 0x550   : > { %v7133_v27 = vor.u32 %v7376_v6, %v7132_v3  ;;  %v10286_v54 = vld [vmem:[%s10219_s24 + $0x60] sm:$0xff]  ;;  %v10289_v3 = vld [vmem:[%s10219_s24 + $0x38] sm:$0xff]  ;;  %v10294_v6 = vld [vmem:[%s10219_s24 + $0x10] sm:$0xff] }
 0x552   : > { %5716 = vmatmul.bf16.gmra.mxu3 %v7133_v27  ;;  %6205 = vrot.lane.b32.xlu0 %v10270_v46, %s7656_s12 }
 0x553   : > { %6195 = vrot.lane.b32.xlu1 %v10275_v28, %s7656_s12  ;;  %4583 = vrot.lane.b32.xlu2 %v4422_v62, %s7655_s28  ;;  %v10300_v62 = vpop.f32.mrf.mxu1  ;;  %s371_s28 = scalar_lea.vmem %s10870_s9, %s6658_s20 }
 0x554   : > { %v2525_v21 = vpop.permute.xlu0 %2524  ;;  %11055 = vst [vmem:[#allocation64_spill] sm:$0xff] %v10300_v62 }
 0x555   : > { %v4190_v36 = vpop.permute.xlu1 %4189  ;;  %2636 = vst.msk [vmem:[#allocation3 + $0x264] sm:$0xf] %vm2584_vm13, %v2525_v21  ;;  %v4192_v48 = vpop.permute.xlu2 %4191 }
 0x556   : > { %4306 = vst.msk [vmem:[#allocation3 + $0x220] sm:$0xf] %vm2963_vm6, %v4190_v36 }
 0x557   : > { %4307 = vst.msk [vmem:[#allocation3 + $0x22c] sm:$0xf] %vm2963_vm6, %v4192_v48  ;;  %v10306_v48 = vld [vmem:[%s10219_s24 + $0x78] sm:$0xff] }
 0x55a   : > { %6211 = vrot.lane.b32.xlu0 %v10286_v54, %s7656_s12 }
 0x55b   : > { %6201 = vrot.lane.b32.xlu1 %v10289_v3, %s7656_s12  ;;  %6191 = vrot.lane.b32.xlu2 %v10294_v6, %s7656_s12 }
 0x55c   : > { %v4568_v27 = vpop.permute.xlu0 %4567 }
 0x55d   : > { %v3816_v21 = vpop.permute.xlu1 %3815  ;;  %4684 = vst.msk [vmem:[#allocation3 + $0x220] sm:$0xf] %vm3342_vm14, %v4568_v27  ;;  %v3818_v36 = vpop.permute.xlu2 %3817 }
 0x55e   : > { %3930 = vst.msk [vmem:[#allocation3 + $0x238] sm:$0xf] %vm2584_vm13, %v3816_v21  ;;  %v5980_v27 = vpop.f32.mrf.mxu1 }
 0x55f   : > { %3931 = vst.msk [vmem:[#allocation3 + $0x244] sm:$0xf] %vm2584_vm13, %v3818_v36  ;;  %v7372_v36 = vld [vmem:[#allocation3 + $0x214] sm:$0xf] }
 0x562   : > { %6217 = vrot.lane.b32.xlu0 %v10306_v48, %s7656_s12 }
 0x563   : > { %6207 = vrot.lane.b32.xlu1 %v10309_v33, %s7656_s12  ;;  %6197 = vrot.lane.b32.xlu2 %v10314_v17, %s7656_s12 }
 0x564   : > { %v3277_v21 = vpop.permute.xlu0 %3276  ;;  %v7122_v62 = vld [vmem:[#allocation3 + $0x21c] sm:$0xf0] }
 0x565   : > { %v5836_v59 = vpop.f32.mrf.mxu0  ;;  %3391 = vst.msk [vmem:[#allocation3 + $0x240] sm:$0xf] %vm3342_vm14, %v3277_v21  ;;  %v2527_v4 = vpop.permute.xlu1 %2526  ;;  %v7125_v37 = vor.u32 %v7372_v36, %v7122_v62  ;;  %v10348_v36 = vld [vmem:[%s10219_s24 + $0x128] sm:$0xff] }
 0x566   : > { %v5837_v2 = vadd.f32 %v5836_v59, %v5692_v18  ;;  %2637 = vst.msk [vmem:[#allocation3 + $0x270] sm:$0xf] %vm2584_vm13, %v2527_v4  ;;  %v2529_v29 = vpop.permute.xlu2 %2528  ;;  %v10337_v59 = vld [vmem:[%s10219_s24 + $0x40] sm:$0xff]  ;;  %v5982_v21 = vpop.f32.mrf.mxu1 }
 0x567   : > { %2638 = vst.msk [vmem:[#allocation3 + $0x27c] sm:$0xf] %vm2584_vm13, %v2529_v29  ;;  %5855 = vmatmul.bf16.gmra.mxu0 %v7125_v37  ;;  %v5694_v37 = vpop.f32.mrf.mxu3 }
 0x568   : > { %v10326_v19 = vadd.f32 %v5980_v27, %v5837_v2  ;;  %11058 = vst [vmem:[#allocation67_spill] sm:$0xff] %v10348_v36 }
 0x56a   : > { %11057 = vst [vmem:[#allocation66_spill] sm:$0xff] %v10326_v19  ;;  %6223 = vrot.lane.b32.xlu0 %v10329_v35, %s7656_s12  ;;  %v10353_v19 = vld [vmem:[%s10219_s24 + $0xa8] sm:$0xff] }
 0x56b   : > { %6213 = vrot.lane.b32.xlu1 %v10332_v53, %s7656_s12  ;;  %6203 = vrot.lane.b32.xlu2 %v10337_v59, %s7656_s12  ;;  %11060 = vst [vmem:[#allocation69_spill] sm:$0xff] %v10353_v19 }
 0x56c   : > { %v2904_v4 = vpop.permute.xlu0 %2903 }
 0x56d   : > { %v5838_v2 = vpop.f32.mrf.mxu0  ;;  %3015 = vst.msk [vmem:[#allocation3 + $0x264] sm:$0xf] %vm2963_vm6, %v2904_v4  ;;  %v4570_v18 = vpop.permute.xlu1 %4569  ;;  %v10361_v4 = vld [vmem:[%s10219_s24 + $0x58] sm:$0xff] }
 0x56e   : > { %v5839_v62 = vadd.f32 %v5838_v2, %v5694_v37  ;;  %4685 = vst.msk [vmem:[#allocation3 + $0x22c] sm:$0xf] %vm3342_vm14, %v4570_v18  ;;  %v4572_v27 = vpop.permute.xlu2 %4571  ;;  %v10377_v37 = vld [vmem:[%s10219_s24 + $0x98] sm:$0xff] }
 0x56f   : > { %11062 = vst [vmem:[#allocation71_spill] sm:$0xff] %v10377_v37  ;;  %v5697_v22 = vpop.f32.mrf.mxu3 }
 0x570   : > { %v10350_v29 = vadd.f32 %v5982_v21, %v5839_v62  ;;  %v10374_v21 = vld [vmem:[%s10219_s24 + $0xc0] sm:$0xff] }
 0x571   : > { %11061 = vst [vmem:[#allocation70_spill] sm:$0xff] %v10374_v21 }
 0x572   : > { %11059 = vst [vmem:[#allocation68_spill] sm:$0xff] %v10350_v29  ;;  %6229 = vrot.lane.b32.xlu0 %v10353_v19, %s7656_s12  ;;  %v10382_v29 = vld [vmem:[%s10219_s24 + $0x70] sm:$0xff] }
 0x573   : > { %6219 = vrot.lane.b32.xlu1 %v10356_v47, %s7656_s12  ;;  %6209 = vrot.lane.b32.xlu2 %v10361_v4, %s7656_s12 }
 0x574   : > { %v4194_v2 = vpop.permute.xlu0 %4193 }
 0x575   : > { %v3279_v18 = vpop.permute.xlu1 %3278  ;;  %4308 = vst.msk [vmem:[#allocation3 + $0x238] sm:$0xf] %vm2963_vm6, %v4194_v2  ;;  %v7375_v16 = vld [vmem:[#allocation3 + $0x22c] sm:$0xf] }
 0x576   : > { %3392 = vst.msk [vmem:[#allocation3 + $0x24c] sm:$0xf] %vm3342_vm14, %v3279_v18  ;;  %v3281_v62 = vpop.permute.xlu2 %3280  ;;  %v7144_v18 = vld [vmem:[#allocation3 + $0x240] sm:$0xf] }
 0x577   : > { %4686 = vst.msk [vmem:[#allocation3 + $0x238] sm:$0xf] %vm3342_vm14, %v4572_v27 }
 0x578   : > { %3393 = vst.msk [vmem:[#allocation3 + $0x258] sm:$0xf] %vm3342_vm14, %v3281_v62 }
 0x57a   : > { %6235 = vrot.lane.b32.xlu0 %v10374_v21, %s7656_s12  ;;  %v4746_v21 = vld [vmem:[#allocation2 + $0x1e1] sm:$0xff] }
 0x57b   : > { %6225 = vrot.lane.b32.xlu1 %v10377_v37, %s7656_s12  ;;  %6215 = vrot.lane.b32.xlu2 %v10382_v29, %s7656_s12 }
 0x57c   : > { %v3820_v2 = vpop.permute.xlu0 %3819 }
 0x57d   : > { %3932 = vst.msk [vmem:[#allocation3 + $0x250] sm:$0xf] %vm2584_vm13, %v3820_v2  ;;  %v2906_v27 = vpop.permute.xlu1 %2905  ;;  %v7379_v62 = vld [vmem:[#allocation3 + $0x248] sm:$0xf0]  ;;  %v10395_v2 = vld [vmem:[%s10219_s24 + $0xb0] sm:$0xff] }
 0x57e   : > { %3016 = vst.msk [vmem:[#allocation3 + $0x270] sm:$0xf] %vm2963_vm6, %v2906_v27  ;;  %v2908_v43 = vpop.permute.xlu2 %2907  ;;  %v7145_v52 = vor.u32 %v7379_v62, %v7144_v18  ;;  %v7134_v44 = vld [vmem:[#allocation3 + $0x234] sm:$0xf0]  ;;  %v5985_v18 = vpop.f32.mrf.mxu1  ;;  %v10408_v62 = vld [vmem:[%s10219_s24 + $0x130] sm:$0xff] }
 0x57f   : > { %3017 = vst.msk [vmem:[#allocation3 + $0x27c] sm:$0xf] %vm2963_vm6, %v2908_v43  ;;  %v7137_v55 = vor.u32 %v7375_v16, %v7134_v44  ;;  %v10400_v27 = vld [vmem:[%s10219_s24 + $0x88] sm:$0xff] }
 0x580   : > { %5721 = vmatmul.bf16.gmra.mxu3 %v7145_v52  ;;  %11064 = vst [vmem:[#allocation73_spill] sm:$0xff] %v10395_v2 }
 0x581   : > { %5860 = vmatmul.bf16.gmra.mxu0 %v7137_v55 }
 0x582   : > { %6241 = vrot.lane.b32.xlu0 %v10392_v51, %s7656_s12 }
 0x583   : > { %6231 = vrot.lane.b32.xlu1 %v10395_v2, %s7656_s12  ;;  %6221 = vrot.lane.b32.xlu2 %v10400_v27, %s7656_s12  ;;  %v10420_v2 = vld [vmem:[%s10219_s24 + $0xc8] sm:$0xff] }
 0x584   : > { %v5841_v55 = vpop.f32.mrf.mxu0  ;;  %v4574_v44 = vpop.permute.xlu0 %4573  ;;  %11067 = vst [vmem:[#allocation76_spill] sm:$0xff] %v10420_v2 }
 0x585   : > { %v5842_v16 = vadd.f32 %v5841_v55, %v5697_v22  ;;  %v4196_v52 = vpop.permute.xlu1 %4195  ;;  %v10425_v22 = vld [vmem:[%s10219_s24 + $0xa0] sm:$0xff]  ;;  %v5699_v55 = vpop.f32.mrf.mxu3 }
 0x586   : > { %4309 = vst.msk [vmem:[#allocation3 + $0x244] sm:$0xf] %vm2963_vm6, %v4196_v52  ;;  %v4198_v43 = vpop.permute.xlu2 %4197 }
 0x587   : > { %v10410_v51 = vadd.f32 %v5985_v18, %v5842_v16  ;;  %4687 = vst.msk [vmem:[#allocation3 + $0x244] sm:$0xf] %vm3342_vm14, %v4574_v44 }
 0x588   : > { %4310 = vst.msk [vmem:[#allocation3 + $0x250] sm:$0xf] %vm2963_vm6, %v4198_v43  ;;  %v5987_v43 = vpop.f32.mrf.mxu1 }
 0x589   : > { %11065 = vst [vmem:[#allocation74_spill] sm:$0xff] %v10410_v51  ;;  %v10434_v51 = vld [vmem:[%s10219_s24 + $0x138] sm:$0xff] }
 0x58a   : > { %6247 = vrot.lane.b32.xlu0 %v10415_v49, %s7656_s12  ;;  %11068 = vst [vmem:[#allocation77_spill] sm:$0xff] %v10434_v51 }
 0x58b   : > { %6237 = vrot.lane.b32.xlu1 %v10420_v2, %s7656_s12  ;;  %6227 = vrot.lane.b32.xlu2 %v10425_v22, %s7656_s12  ;;  %v4745_v2 = vld [vmem:[#allocation2 + $0x1d9] sm:$0xff] }
 0x58c   : > { %v5843_v18 = vpop.f32.mrf.mxu0  ;;  %v3283_v44 = vpop.permute.xlu0 %3282  ;;  %v4799_v19 = vpack.c.bf16 %v4745_v2, %v4745_v2 }
 0x58d   : > { %v5844_v16 = vadd.f32 %v5843_v18, %v5699_v55  ;;  %v3822_v52 = vpop.permute.xlu1 %3821  ;;  %3394 = vst.msk [vmem:[#allocation3 + $0x264] sm:$0xf] %vm3342_vm14, %v3283_v44  ;;  %v4800_v55 = vpack.c.bf16 %v4746_v21, %v4746_v21  ;;  %v10445_v44 = vld [vmem:[%s10219_s24 + $0xe0] sm:$0xff]  ;;  %v7156_v21 = vld [vmem:[#allocation3 + $0x258] sm:$0xf] }
 0x58e   : > { %3933 = vst.msk [vmem:[#allocation3 + $0x25c] sm:$0xf] %vm2584_vm13, %v3822_v52  ;;  %v3824_v8 = vpop.permute.xlu2 %3823  ;;  %v10450_v52 = vld [vmem:[%s10219_s24 + $0xb8] sm:$0xff] }
 0x58f   : > { %v10436_v49 = vadd.f32 %v5987_v43, %v5844_v16  ;;  %3934 = vst.msk [vmem:[#allocation3 + $0x268] sm:$0xf] %vm2584_vm13, %v3824_v8 }
 0x590   : > { %11071 = vst [vmem:[#allocation80_spill] sm:$0xff] %v10445_v44 }
 0x591   : > { %11069 = vst [vmem:[#allocation78_spill] sm:$0xff] %v10436_v49  ;;  %v10461_v49 = vld [vmem:[%s10219_s24 + $0xf8] sm:$0xff] }
 0x592   : > { %6253 = vrot.lane.b32.xlu0 %v10440_v26, %s7656_s12  ;;  %11072 = vst [vmem:[#allocation81_spill] sm:$0xff] %v10450_v52  ;;  %v10466_v26 = vld [vmem:[%s10219_s24 + $0xd0] sm:$0xff] }
 0x593   : > { %6243 = vrot.lane.b32.xlu1 %v10445_v44, %s7656_s12  ;;  %6233 = vrot.lane.b32.xlu2 %v10450_v52, %s7656_s12  ;;  %4853 = vst.msk [vmem:[#allocation3 + $0x278] sm:$0xf] %vm2205_vm3, %v4799_v19  ;;  %v5702_v44 = vpop.f32.mrf.mxu3 }
 0x594   : > { %v4200_v8 = vpop.permute.xlu0 %4199  ;;  %v7382_v2 = vld [vmem:[#allocation3 + $0x260] sm:$0xf0]  ;;  %4854 = vst.msk [vmem:[#allocation3 + $0x284] sm:$0xf] %vm2205_vm3, %v4800_v55 }
 0x595   : > { %v4576_v16 = vpop.permute.xlu1 %4575  ;;  %4311 = vst.msk [vmem:[#allocation3 + $0x25c] sm:$0xf] %vm2963_vm6, %v4200_v8  ;;  %v7157_v43 = vor.u32 %v7382_v2, %v7156_v21  ;;  %v5990_v2 = vpop.f32.mrf.mxu1 }
 0x596   : > { %4688 = vst.msk [vmem:[#allocation3 + $0x250] sm:$0xf] %vm3342_vm14, %v4576_v16  ;;  %v4204_v18 = vpop.permute.xlu2 %4203 }
 0x597   : > { %5726 = vmatmul.bf16.gmra.mxu3 %v7157_v43  ;;  %11073 = vst [vmem:[#allocation82_spill] sm:$0xff] %v10461_v49  ;;  %v7378_v43 = vld [vmem:[#allocation3 + $0x244] sm:$0xf] }
 0x598   : > { %11074 = vst [vmem:[#allocation83_spill] sm:$0xff] %v10466_v26 }
 0x59a   : > { %6259 = vrot.lane.b32.xlu0 %v10324_v7, %s7656_s12  ;;  %v7176_v19 = vld [vmem:[#allocation3 + $0x278] sm:$0xf] }
 0x59b   : > { %6249 = vrot.lane.b32.xlu1 %v10461_v49, %s7656_s12  ;;  %6239 = vrot.lane.b32.xlu2 %v10466_v26, %s7656_s12  ;;  %v7386_v55 = vld [vmem:[#allocation3 + $0x280] sm:$0xf0] }
 0x59c   : > { %v3826_v8 = vpop.permute.xlu0 %3825  ;;  %v7177_v21 = vor.u32 %v7386_v55, %v7176_v19  ;;  %v10479_v19 = vld [vmem:[%s10219_s24 + $0x140] sm:$0xff] }
 0x59d   : > { %v4202_v16 = vpop.permute.xlu1 %4201  ;;  %3935 = vst.msk [vmem:[#allocation3 + $0x274] sm:$0xf] %vm2584_vm13, %v3826_v8  ;;  %v7146_v7 = vld [vmem:[#allocation3 + $0x24c] sm:$0xf0]  ;;  %v10485_v8 = vld [vmem:[%s10219_s24 + $0x110] sm:$0xff] }
 0x59e   : > { %v4578_v52 = vpop.permute.xlu2 %4577  ;;  %4312 = vst.msk [vmem:[#allocation3 + $0x268] sm:$0xf] %vm2963_vm6, %v4202_v16  ;;  %v5846_v37 = vpop.f32.mrf.mxu0  ;;  %v7149_v49 = vor.u32 %v7378_v43, %v7146_v7  ;;  %7276 = vmatmul.msk.bf16.gmra.mxu1 %vm382_vm0, %v7177_v21  ;;  %v10490_v7 = vld [vmem:[%s10219_s24 + $0xe8] sm:$0xff]  ;;  %v10501_v21 = vld [vmem:[%s10219_s24 + $0x150] sm:$0xff]  ;;  %vm6457_vm0 = vcmask 64512  }
 0x59f   : > { %4689 = vst.msk [vmem:[#allocation3 + $0x25c] sm:$0xf] %vm3342_vm14, %v4578_v52  ;;  %v5847_v26 = vadd.f32 %v5846_v37, %v5702_v44  ;;  %v10504_v16 = vld [vmem:[%s10219_s24 + $0x148] sm:$0xff] }
 0x5a0   : > { %4690 = vst.msk [vmem:[#allocation3 + $0x268] sm:$0xf] %vm3342_vm14, %v8338_v24  ;;  %5865 = vmatmul.bf16.gmra.mxu0 %v7149_v49  ;;  %v10511_v24 = vld [vmem:[%s10219_s24 + $0x100] sm:$0xff] }
 0x5a1   : > { %4313 = vst.msk [vmem:[#allocation3 + $0x274] sm:$0xf] %vm2963_vm6, %v4204_v18  ;;  %v10482_v55 = vadd.f32 %v5990_v2, %v5847_v26  ;;  %v5704_v26 = vpop.f32.mrf.mxu3  ;;  %v5992_v2 = vpop.f32.mrf.mxu1 }
 0x5a2   : > { %11076 = vst [vmem:[#allocation85_spill] sm:$0xff] %v10485_v8  ;;  %6265 = vrot.lane.b32.xlu0 %v10434_v51, %s7656_s12 }
 0x5a3   : > { %11075 = vst [vmem:[#allocation84_spill] sm:$0xff] %v10482_v55  ;;  %6255 = vrot.lane.b32.xlu1 %v10485_v8, %s7656_s12  ;;  %6245 = vrot.lane.b32.xlu2 %v10490_v7, %s7656_s12 }
 0x5a4   : > { %11077 = vst [vmem:[#allocation86_spill] sm:$0xff] %v10490_v7  ;;  %v4206_v49 = vpop.permute.xlu0 %4205  ;;  %v10522_v7 = vld [vmem:[%s10219_s24 + $0x168] sm:$0xff] }
 0x5a5   : > { %v3285_v37 = vpop.permute.xlu1 %3284 }
 0x5a6   : > { %3395 = vst.msk [vmem:[#allocation3 + $0x270] sm:$0xf] %vm3342_vm14, %v3285_v37  ;;  %v3287_v18 = vpop.permute.xlu2 %3286  ;;  %v5848_v44 = vpop.f32.mrf.mxu0 }
 0x5a7   : > { %3396 = vst.msk [vmem:[#allocation3 + $0x27c] sm:$0xf] %vm3342_vm14, %v3287_v18  ;;  %v5849_v52 = vadd.f32 %v5848_v44, %v5704_v26  ;;  %v7381_v26 = vld [vmem:[#allocation3 + $0x25c] sm:$0xf]  ;;  %v7158_v37 = vld [vmem:[#allocation3 + $0x264] sm:$0xf0] }
 0x5a8   : > { %v7161_v8 = vor.u32 %v7381_v26, %v7158_v37  ;;  %v10528_v18 = vld [vmem:[%s10219_s24 + $0x118] sm:$0xff]  ;;  %v5896_v26 = vadd.f32 %v9025_v58, %v8964_v38 }
 0x5a9   : > { %v10506_v43 = vadd.f32 %v5992_v2, %v5849_v52 }
 0x5aa   : > { %6271 = vrot.lane.b32.xlu0 %v10501_v21, %s7656_s12 }
 0x5ab   : > { %6261 = vrot.lane.b32.xlu1 %v10348_v36, %s7656_s12  ;;  %6251 = vrot.lane.b32.xlu2 %v10511_v24, %s7656_s12 }
 0x5ac   : > { %v6188_v44 = vpop.permute.xlu0 %6187 }
 0x5ad   : > { %v3828_v52 = vpop.permute.xlu1 %3827  ;;  %v7168_v2 = vld [vmem:[#allocation3 + $0x270] sm:$0xf] }
 0x5ae   : > { %3936 = vst.msk [vmem:[#allocation3 + $0x280] sm:$0xf] %vm2584_vm13, %v3828_v52  ;;  %v4584_v55 = vpop.permute.xlu2 %4583  ;;  %v7385_v51 = vld [vmem:[#allocation3 + $0x278] sm:$0xf0]  ;;  %v10544_v52 = vld [vmem:[%s10219_s24 + $0x180] sm:$0xff] }
 0x5af   : > { %4314 = vst.msk [vmem:[#allocation3 + $0x280] sm:$0xf] %vm2963_vm6, %v4206_v49  ;;  %v7169_v36 = vor.u32 %v7385_v51, %v7168_v2  ;;  %v5891_v51 = vadd.f32 %v8948_v31, %v8865_v40  ;;  %v10549_v31 = vld [vmem:[%s10219_s24 + $0x158] sm:$0xff] }
 0x5b0   : > { %4692 = vst.msk [vmem:[#allocation3 + $0x280] sm:$0xf] %vm3342_vm14, %v4584_v55  ;;  %5870 = vmatmul.bf16.gmra.mxu0 %v7161_v8  ;;  %v5749_v55 = vadd.f32 %v8945_v14, %v8943_v20  ;;  %v5759_v14 = vadd.f32 %v9108_v39, %v9106_v1 }
 0x5b1   : > { %5731 = vmatmul.bf16.gmra.mxu3 %v7169_v36  ;;  %v5754_v36 = vadd.f32 %v9017_v30, %v9014_v42  ;;  %v6079_v40 = vsub.f32 %v5891_v51, %v10225_v60  ;;  %v6081_v30 = vsub.f32 %v5896_v26, %v10294_v6  ;;  %v10567_v26 = vld [vmem:[%s10219_s24 + $0x198] sm:$0xff] }
 0x5b2   : > { %6277 = vrot.lane.b32.xlu0 %v10522_v7, %s7656_s12  ;;  %v5893_v2 = vadd.f32 %v8987_v11, %v5749_v55  ;;  %v5903_v6 = vadd.f32 %v9160_v25, %v5759_v14 }
 0x5b3   : > { %6267 = vrot.lane.b32.xlu1 %v10479_v19, %s7656_s12  ;;  %6257 = vrot.lane.b32.xlu2 %v10528_v18, %s7656_s12  ;;  %v5898_v20 = vadd.f32 %v9056_v32, %v5754_v36  ;;  %v6349_v42 = vmul.f32 %v6188_v44, %v6079_v40  ;;  %v10572_v40 = vld [vmem:[%s10219_s24 + $0x170] sm:$0xff] }
 0x5b4   : > { %v6194_v8 = vpop.permute.xlu0 %6193  ;;  %v6080_v58 = vsub.f32 %v5893_v2, %v10258_v13  ;;  %v5906_v13 = vadd.f32 %v9218_v15, %v9131_v57  ;;  %v6084_v14 = vsub.f32 %v5903_v6, %v10314_v17  ;;  %v5707_v15 = vpop.f32.mrf.mxu3 }
 0x5b5   : > { %v4582_v49 = vpop.permute.xlu1 %4581  ;;  %v6082_v1 = vsub.f32 %v5898_v20, %v10239_v41  ;;  %v6403_v44 = vmul.f32 %v6349_v42, %v6349_v42 }
 0x5b6   : > { %4691 = vst.msk [vmem:[#allocation3 + $0x274] sm:$0xf] %vm3342_vm14, %v4582_v49  ;;  %v6192_v37 = vpop.permute.xlu2 %6191  ;;  %v5901_v49 = vadd.f32 %v9114_v34, %v9042_v61  ;;  %v5764_v61 = vadd.f32 %v9211_v5, %v9209_v56  ;;  %v6085_v17 = vsub.f32 %v5906_v13, %v10253_v0  ;;  %v5911_v56 = vadd.f32 %v9296_v12, %v9235_v9  ;;  %v5995_v0 = vpop.f32.mrf.mxu1  ;;  %v10597_v12 = vld [vmem:[%s10219_s24 + $0x188] sm:$0xff]  ;;  %v11078_v13 = vld [vmem:[#allocation5_spill] sm:$0xff] }
 0x5b7   : > { %v7170_v38 = vld [vmem:[#allocation3 + $0x27c] sm:$0xf0]  ;;  %v6351_v11 = vmul.f32 %v6192_v37, %v6081_v30  ;;  %v6352_v37 = vmul.f32 %v6194_v8, %v6082_v1  ;;  %v6458_v25 = vsel %vm6457_vm0, %v6403_v44, 0.0  ;;  %v5769_v5 = vadd.f32 %v9288_v63, %v9285_v23 }
 0x5b8   : > { %v6083_v57 = vsub.f32 %v5901_v49, %v10275_v28  ;;  %v5908_v44 = vadd.f32 %v9258_v10, %v5764_v61  ;;  %v10600_v49 = vld [vmem:[%s10219_s24 + $0x160] sm:$0xff] }
 0x5b9   : > { %v6405_v41 = vmul.f32 %v6351_v11, %v6351_v11  ;;  %v6406_v8 = vmul.f32 %v6352_v37, %v6352_v37  ;;  %v5913_v23 = vadd.f32 %v9327_v45, %v5769_v5  ;;  %v11079_v37 = vld [vmem:[#allocation6_spill] sm:$0xff]  ;;  %v11081_v5 = vld [vmem:[#allocation4_spill] sm:$0xff] }
 0x5ba   : > { %6283 = vrot.lane.b32.xlu0 %v10544_v52, %s7656_s12 }
 0x5bb   : > { %6273 = vrot.lane.b32.xlu1 %v10549_v31, %s7656_s12  ;;  %6263 = vrot.lane.b32.xlu2 %v10408_v62, %s7656_s12  ;;  %v6461_v42 = vsel %vm6457_vm0, %v6405_v41, 0.0  ;;  %v5774_v41 = vadd.f32 %v11079_v37, %v11078_v13 }
 0x5bc   : > { %v6200_v32 = vpop.permute.xlu0 %6199 }
 0x5bd   : > { %v6190_v39 = vpop.permute.xlu1 %6189  ;;  %v7384_v60 = vld [vmem:[#allocation3 + $0x274] sm:$0xf]  ;;  %v6355_v28 = vmul.f32 %v6200_v32, %v6085_v17  ;;  %v6087_v32 = vsub.f32 %v5911_v56, %v10337_v59  ;;  %v6086_v59 = vsub.f32 %v5908_v44, %v10289_v3  ;;  %v6088_v17 = vsub.f32 %v5913_v23, %v10270_v46 }
 0x5be   : > { %v6350_v51 = vmul.f32 %v6190_v39, %v6080_v58  ;;  %v6198_v55 = vpop.permute.xlu2 %6197  ;;  %v7173_v36 = vor.u32 %v7384_v60, %v7170_v38 }
 0x5bf   : > { %v6354_v30 = vmul.f32 %v6198_v55, %v6084_v14  ;;  %v6409_v10 = vmul.f32 %v6355_v28, %v6355_v28  ;;  %v11084_v28 = vld [vmem:[#allocation12_spill] sm:$0xff] }
 0x5c0   : > { %v6404_v2 = vmul.f32 %v6350_v51, %v6350_v51  ;;  %5875 = vmatmul.bf16.gmra.mxu0 %v7173_v36  ;;  %v6463_v51 = vsel %vm6457_vm0, %v6406_v8, 0.0 }
 0x5c1   : > { %v6408_v55 = vmul.f32 %v6354_v30, %v6354_v30 }
 0x5c2   : > { %v6459_v20 = vsel %vm6457_vm0, %v6404_v2, 0.0  ;;  %6289 = vrot.lane.b32.xlu0 %v10567_v26, %s7656_s12 }
 0x5c3   : > { %v6460_v34 = vadd.f32 %v6459_v20, %v6458_v25  ;;  %6279 = vrot.lane.b32.xlu1 %v10572_v40, %s7656_s12  ;;  %6269 = vrot.lane.b32.xlu2 %v10504_v16, %s7656_s12  ;;  %v6467_v45 = vsel %vm6457_vm0, %v6408_v55, 0.0 }
 0x5c4   : > { %v6206_v38 = vpop.permute.xlu0 %6205 }
 0x5c5   : > { %v6462_v11 = vadd.f32 %v6461_v42, %v6460_v34  ;;  %v5851_v58 = vpop.f32.mrf.mxu0  ;;  %v6196_v1 = vpop.permute.xlu1 %6195  ;;  %v6469_v42 = vsel %vm6457_vm0, %v6409_v10, 0.0  ;;  %v6358_v3 = vmul.f32 %v6206_v38, %v6088_v17 }
 0x5c6   : > { %v5852_v39 = vadd.f32 %v5851_v58, %v5707_v15  ;;  %v6353_v60 = vmul.f32 %v6196_v1, %v6083_v57  ;;  %v6204_v6 = vpop.permute.xlu2 %6203  ;;  %v11080_v15 = vld [vmem:[#allocation9_spill] sm:$0xff]  ;;  %v11083_v1 = vld [vmem:[#allocation8_spill] sm:$0xff] }
 0x5c7   : > { %v6464_v63 = vadd.f32 %v6463_v51, %v6462_v11  ;;  %v6357_v14 = vmul.f32 %v6204_v6, %v6087_v32  ;;  %v5918_v8 = vadd.f32 %v11080_v15, %v5774_v41  ;;  %v11082_v11 = vld [vmem:[#allocation7_spill] sm:$0xff]  ;;  %v10626_v51 = vld [vmem:[%s10219_s24 + $0x178] sm:$0xff]  ;;  %v6412_v37 = vmul.f32 %v6358_v3, %v6358_v3  ;;  %v11094_v3 = vld [vmem:[#allocation22_spill] sm:$0xff] }
 0x5c8   : > { %v10594_v36 = vadd.f32 %v5995_v0, %v5852_v39  ;;  %v6407_v9 = vmul.f32 %v6353_v60, %v6353_v60  ;;  %v5916_v58 = vadd.f32 %v11082_v11, %v11081_v5  ;;  %v5921_v39 = vadd.f32 %v11084_v28, %v11083_v1  ;;  %v10623_v0 = vld [vmem:[%s10219_s24 + $0x1a0] sm:$0xff]  ;;  %v11086_v32 = vld [vmem:[#allocation11_spill] sm:$0xff] }
 0x5c9   : > { %v6411_v6 = vmul.f32 %v6357_v14, %v6357_v14  ;;  %v6090_v46 = vsub.f32 %v5918_v8, %v10361_v4  ;;  %v11092_v28 = vld [vmem:[#allocation19_spill] sm:$0xff] }
 0x5ca   : > { %v6465_v2 = vsel %vm6457_vm0, %v6407_v9, 0.0  ;;  %v6121_v25 = vsub.f32 %v10594_v36, %v10501_v21  ;;  %v6091_v23 = vsub.f32 %v5921_v39, %v10286_v54  ;;  %v6089_v38 = vsub.f32 %v5916_v58, %v10309_v33  ;;  %v10646_v58 = vld [vmem:[%s10219_s24 + $0x190] sm:$0xff] }
 0x5cb   : > { %v6466_v20 = vadd.f32 %v6465_v2, %v6464_v63  ;;  %6285 = vrot.lane.b32.xlu1 %v10597_v12, %s7656_s12  ;;  %6275 = vrot.lane.b32.xlu2 %v10600_v49, %s7656_s12  ;;  %v11085_v63 = vld [vmem:[#allocation10_spill] sm:$0xff]  ;;  %v6473_v41 = vsel %vm6457_vm0, %v6411_v6, 0.0  ;;  %v11087_v2 = vld [vmem:[#allocation13_spill] sm:$0xff] }
 0x5cc   : > { %v6212_v61 = vpop.permute.xlu0 %6211  ;;  %v5779_v13 = vadd.f32 %v11086_v32, %v11085_v63  ;;  %v11095_v32 = vld [vmem:[#allocation23_spill] sm:$0xff] }
 0x5cd   : > { %v6468_v34 = vadd.f32 %v6467_v45, %v6466_v20  ;;  %v6202_v57 = vpop.permute.xlu1 %6201  ;;  %v11088_v20 = vld [vmem:[#allocation17_spill] sm:$0xff]  ;;  %v6361_v15 = vmul.f32 %v6212_v61, %v6091_v23 }
 0x5ce   : > { %v6356_v30 = vmul.f32 %v6202_v57, %v6086_v59  ;;  %v6210_v56 = vpop.permute.xlu2 %6209  ;;  %v5926_v54 = vadd.f32 %v11088_v20, %v11087_v2  ;;  %v11089_v59 = vld [vmem:[#allocation15_spill] sm:$0xff]  ;;  %v11096_v20 = vld [vmem:[#allocation18_spill] sm:$0xff] }
 0x5cf   : > { %v6470_v60 = vadd.f32 %v6469_v42, %v6468_v34  ;;  %v6360_v10 = vmul.f32 %v6210_v56, %v6090_v46  ;;  %v11090_v34 = vld [vmem:[#allocation16_spill] sm:$0xff]  ;;  %v11091_v42 = vld [vmem:[#allocation14_spill] sm:$0xff] }
 0x5d0   : > { %v6410_v44 = vmul.f32 %v6356_v30, %v6356_v30  ;;  %v5784_v57 = vadd.f32 %v11090_v34, %v11089_v59  ;;  %v5923_v17 = vadd.f32 %v11091_v42, %v5779_v13  ;;  %v6475_v30 = vsel %vm6457_vm0, %v6412_v37, 0.0  ;;  %v11099_v59 = vld [vmem:[#allocation27_spill] sm:$0xff] }
 0x5d1   : > { %v6414_v5 = vmul.f32 %v6360_v10, %v6360_v10  ;;  %v6093_v1 = vsub.f32 %v5926_v54, %v10382_v29  ;;  %v11097_v54 = vld [vmem:[#allocation20_spill] sm:$0xff] }
 0x5d2   : > { %v6471_v55 = vsel %vm6457_vm0, %v6410_v44, 0.0  ;;  %v5928_v39 = vadd.f32 %v11092_v28, %v5784_v57  ;;  %v6415_v44 = vmul.f32 %v6361_v15, %v6361_v15  ;;  %v6092_v23 = vsub.f32 %v5923_v17, %v10332_v53 }
 0x5d3   : > { %v6472_v9 = vadd.f32 %v6471_v55, %v6470_v60  ;;  %6291 = vrot.lane.b32.xlu1 %v10623_v0, %s7656_s12  ;;  %6281 = vrot.lane.b32.xlu2 %v10626_v51, %s7656_s12  ;;  %v11093_v60 = vld [vmem:[#allocation21_spill] sm:$0xff]  ;;  %v6479_v46 = vsel %vm6457_vm0, %v6414_v5, 0.0 }
 0x5d4   : > { %v6218_v4 = vpop.permute.xlu0 %6217  ;;  %v5789_v6 = vadd.f32 %v11094_v3, %v11093_v60  ;;  %v6481_v37 = vsel %vm6457_vm0, %v6415_v44, 0.0  ;;  %v11102_v3 = vld [vmem:[#allocation28_spill] sm:$0xff] }
 0x5d5   : > { %v6474_v45 = vadd.f32 %v6473_v41, %v6472_v9  ;;  %v6208_v14 = vpop.permute.xlu1 %6207  ;;  %v6094_v41 = vsub.f32 %v5928_v39, %v10306_v48 }
 0x5d6   : > { %v6359_v8 = vmul.f32 %v6208_v14, %v6089_v38  ;;  %v6216_v33 = vpop.permute.xlu2 %6215  ;;  %v5933_v13 = vadd.f32 %v11095_v32, %v5789_v6  ;;  %v11098_v14 = vld [vmem:[#allocation24_spill] sm:$0xff]  ;;  %v10681_v32 = vpop.f32.mrf.mxu3 }
 0x5d7   : > { %v6476_v56 = vadd.f32 %v6475_v30, %v6474_v45  ;;  %v6363_v9 = vmul.f32 %v6216_v33, %v6093_v1  ;;  %v5931_v45 = vadd.f32 %v11097_v54, %v11096_v20  ;;  %v5936_v34 = vadd.f32 %v11099_v59, %v11098_v14  ;;  %v10665_v33 = vld [vmem:[%s10219_s24 + $0x1a8] sm:$0xff]  ;;  %v11103_v6 = vld [vmem:[#allocation32_spill] sm:$0xff]  ;;  %v11107_v54 = vld [vmem:[#allocation35_spill] sm:$0xff] }
 0x5d8   : > { %v6413_v11 = vmul.f32 %v6359_v8, %v6359_v8  ;;  %v6364_v15 = vmul.f32 %v6218_v4, %v6094_v41  ;;  %v6096_v17 = vsub.f32 %v5933_v13, %v10400_v27  ;;  %v5941_v44 = vadd.f32 %v11103_v6, %v11102_v3  ;;  %v11114_v6 = vld [vmem:[#allocation38_spill] sm:$0xff] }
 0x5d9   : > { %v6417_v53 = vmul.f32 %v6363_v9, %v6363_v9  ;;  %v6097_v48 = vsub.f32 %v5936_v34, %v10329_v35  ;;  %v6095_v5 = vsub.f32 %v5931_v45, %v10356_v47  ;;  %v11105_v35 = vld [vmem:[#allocation31_spill] sm:$0xff]  ;;  %v11108_v45 = vld [vmem:[#allocation36_spill] sm:$0xff] }
 0x5da   : > { %v6477_v61 = vsel %vm6457_vm0, %v6413_v11, 0.0  ;;  %v11100_v11 = vld [vmem:[#allocation25_spill] sm:$0xff]  ;;  %v6418_v4 = vmul.f32 %v6364_v15, %v6364_v15  ;;  %v5804_v14 = vadd.f32 %v11108_v45, %v11107_v54  ;;  %v11120_v54 = vld [vmem:[#allocation40_spill] sm:$0xff] }
 0x5db   : > { %v6478_v55 = vadd.f32 %v6477_v61, %v6476_v56  ;;  %6287 = vrot.lane.b32.xlu2 %v10646_v58, %s7656_s12  ;;  %v11101_v56 = vld [vmem:[#allocation26_spill] sm:$0xff]  ;;  %v6485_v28 = vsel %vm6457_vm0, %v6417_v53, 0.0 }
 0x5dc   : > { %v6224_v38 = vpop.permute.xlu0 %6223  ;;  %v5794_v1 = vadd.f32 %v11101_v56, %v11100_v11  ;;  %v6487_v13 = vsel %vm6457_vm0, %v6418_v4, 0.0  ;;  %v11111_v11 = vld [vmem:[#allocation69_spill] sm:$0xff] }
 0x5dd   : > { %v6480_v29 = vadd.f32 %v6479_v46, %v6478_v55  ;;  %v6214_v63 = vpop.permute.xlu1 %6213  ;;  %v11104_v55 = vld [vmem:[#allocation30_spill] sm:$0xff]  ;;  %v6367_v47 = vmul.f32 %v6224_v38, %v6097_v48 }
 0x5de   : > { %v6362_v10 = vmul.f32 %v6214_v63, %v6092_v23  ;;  %v6222_v2 = vpop.permute.xlu2 %6221  ;;  %v5799_v46 = vadd.f32 %v11105_v35, %v11104_v55  ;;  %v10700_v55 = vpop.f32.mrf.mxu3 }
 0x5df   : > { %v6482_v57 = vadd.f32 %v6481_v37, %v6480_v29  ;;  %v6366_v39 = vmul.f32 %v6222_v2, %v6096_v17  ;;  %v11106_v29 = vld [vmem:[#allocation29_spill] sm:$0xff]  ;;  %v6099_v2 = vsub.f32 %v5941_v44, %v10425_v22  ;;  %v6421_v59 = vmul.f32 %v6367_v47, %v6367_v47 }
 0x5e0   : > { %v6416_v8 = vmul.f32 %v6362_v10, %v6362_v10  ;;  %v5938_v63 = vadd.f32 %v11106_v29, %v5794_v1  ;;  %v5943_v20 = vadd.f32 %v9905_v50, %v5799_v46  ;;  %v11110_v22 = vld [vmem:[#allocation37_spill] sm:$0xff] }
 0x5e1   : > { %v6420_v37 = vmul.f32 %v6366_v39, %v6366_v39  ;;  %v6493_v50 = vsel %vm6457_vm0, %v6421_v59, 0.0  ;;  %v11113_v39 = vld [vmem:[#allocation34_spill] sm:$0xff]  ;;  %v11115_v44 = vld [vmem:[#allocation41_spill] sm:$0xff] }
 0x5e2   : > { %v6483_v42 = vsel %vm6457_vm0, %v6416_v8, 0.0  ;;  %v11109_v8 = vld [vmem:[#allocation71_spill] sm:$0xff]  ;;  %v6100_v56 = vsub.f32 %v5943_v20, %v11111_v11  ;;  %v11116_v29 = vld [vmem:[#allocation81_spill] sm:$0xff] }
 0x5e3   : > { %v6484_v30 = vadd.f32 %v6483_v42, %v6482_v57  ;;  %6293 = vrot.lane.b32.xlu2 %v10665_v33, %s7656_s12  ;;  %v10689_v57 = vpop.f32.mrf.mxu1  ;;  %v6491_v15 = vsel %vm6457_vm0, %v6420_v37, 0.0  ;;  %v6098_v42 = vsub.f32 %v5938_v63, %v11109_v8  ;;  %v11117_v37 = vld [vmem:[#allocation70_spill] sm:$0xff]  ;;  %v11119_v20 = vld [vmem:[#allocation39_spill] sm:$0xff] }
 0x5e4   : > { %v6230_v60 = vpop.permute.xlu0 %6229  ;;  %v5809_v45 = vadd.f32 %v11120_v54, %v11119_v20 }
 0x5e5   : > { %v6486_v27 = vadd.f32 %v6485_v28, %v6484_v30  ;;  %v6220_v61 = vpop.permute.xlu1 %6219  ;;  %v11112_v28 = vld [vmem:[#allocation33_spill] sm:$0xff]  ;;  %v6370_v35 = vmul.f32 %v6230_v60, %v6100_v56 }
 0x5e6   : > { %v6365_v9 = vmul.f32 %v6220_v61, %v6095_v5  ;;  %v6228_v23 = vpop.permute.xlu2 %6227  ;;  %v5948_v5 = vadd.f32 %v11110_v22, %v5804_v14  ;;  %v5946_v3 = vadd.f32 %v11113_v39, %v11112_v28  ;;  %v11124_v22 = vld [vmem:[#allocation45_spill] sm:$0xff] }
 0x5e7   : > { %v6488_v10 = vadd.f32 %v6487_v13, %v6486_v27  ;;  %v6369_v53 = vmul.f32 %v6228_v23, %v6099_v2  ;;  %v5951_v27 = vadd.f32 %v11115_v44, %v11114_v6  ;;  %v6424_v59 = vmul.f32 %v6370_v35, %v6370_v35  ;;  %v11127_v35 = vld [vmem:[#allocation48_spill] sm:$0xff] }
 0x5e8   : > { %v6419_v41 = vmul.f32 %v6365_v9, %v6365_v9  ;;  %v10702_v9 = vpop.f32.mrf.mxu0  ;;  %v6102_v63 = vsub.f32 %v5948_v5, %v11116_v29 }
 0x5e9   : > { %v6423_v46 = vmul.f32 %v6369_v53, %v6369_v53  ;;  %v11122_v53 = vld [vmem:[#allocation46_spill] sm:$0xff]  ;;  %v6499_v39 = vsel %vm6457_vm0, %v6424_v59, 0.0 }
 0x5ea   : > { %v6489_v38 = vsel %vm6457_vm0, %v6419_v41, 0.0  ;;  %v6103_v41 = vsub.f32 %v5951_v27, %v11117_v37  ;;  %v11126_v27 = vld [vmem:[#allocation83_spill] sm:$0xff] }
 0x5eb   : > { %v6490_v34 = vadd.f32 %v6489_v38, %v6488_v10  ;;  %v11118_v10 = vld [vmem:[#allocation73_spill] sm:$0xff]  ;;  %v10710_v14 = vpop.f32.mrf.mxu1  ;;  %v6497_v60 = vsel %vm6457_vm0, %v6423_v46, 0.0 }
 0x5ec   : > { %v6236_v17 = vpop.permute.xlu0 %6235  ;;  %v6101_v2 = vsub.f32 %v5946_v3, %v11118_v10 }
 0x5ed   : > { %v6492_v30 = vadd.f32 %v6491_v15, %v6490_v34  ;;  %v6226_v48 = vpop.permute.xlu1 %6225  ;;  %v11121_v15 = vld [vmem:[#allocation42_spill] sm:$0xff] }
 0x5ee   : > { %v6368_v1 = vmul.f32 %v6226_v48, %v6098_v42  ;;  %v6234_v4 = vpop.permute.xlu2 %6233  ;;  %v5956_v8 = vadd.f32 %v11122_v53, %v11121_v15  ;;  %v11123_v48 = vld [vmem:[#allocation44_spill] sm:$0xff] }
 0x5ef   : > { %v6494_v61 = vadd.f32 %v6493_v50, %v6492_v30  ;;  %v6372_v38 = vmul.f32 %v6234_v4, %v6102_v63  ;;  %v5814_v5 = vadd.f32 %v11124_v22, %v11123_v48  ;;  %v6373_v50 = vmul.f32 %v6236_v17, %v6103_v41  ;;  %v10725_v63 = vpop.f32.mrf.mxu3  ;;  %v11133_v22 = vld [vmem:[#allocation47_spill] sm:$0xff] }
 0x5f0   : > { %v6422_v47 = vmul.f32 %v6368_v1, %v6368_v1  ;;  %v11125_v1 = vld [vmem:[#allocation43_spill] sm:$0xff]  ;;  %v10719_v44 = vpop.f32.mrf.mxu0 }
 0x5f1   : > { %v5953_v28 = vadd.f32 %v11125_v1, %v5809_v45  ;;  %v6426_v3 = vmul.f32 %v6372_v38, %v6372_v38  ;;  %v5958_v46 = vadd.f32 %v11127_v35, %v5814_v5  ;;  %v6427_v17 = vmul.f32 %v6373_v50, %v6373_v50  ;;  %v11134_v5 = vld [vmem:[#allocation53_spill] sm:$0xff]  ;;  %v11136_v1 = vld [vmem:[#allocation56_spill] sm:$0xff] }
 0x5f2   : > { %v6495_v23 = vsel %vm6457_vm0, %v6422_v47, 0.0  ;;  %v11128_v47 = vld [vmem:[#allocation49_spill] sm:$0xff]  ;;  %v5961_v50 = vadd.f32 %v11134_v5, %v11133_v22  ;;  %v11143_v22 = vld [vmem:[#allocation58_spill] sm:$0xff] }
 0x5f3   : > { %v6496_v13 = vadd.f32 %v6495_v23, %v6494_v61  ;;  %v6105_v61 = vsub.f32 %v5956_v8, %v11126_v27  ;;  %v11129_v23 = vld [vmem:[#allocation50_spill] sm:$0xff]  ;;  %v6503_v41 = vsel %vm6457_vm0, %v6426_v3, 0.0  ;;  %v10731_v15 = vpop.f32.mrf.mxu1  ;;  %v6505_v53 = vsel %vm6457_vm0, %v6427_v17, 0.0  ;;  %v11132_v8 = vld [vmem:[#allocation72_spill] sm:$0xff] }
 0x5f4   : > { %v6242_v34 = vpop.permute.xlu0 %6241  ;;  %v5819_v29 = vadd.f32 %v11129_v23, %v11128_v47  ;;  %v11137_v27 = vld [vmem:[#allocation86_spill] sm:$0xff] }
 0x5f5   : > { %v6498_v42 = vadd.f32 %v6497_v60, %v6496_v13  ;;  %v6232_v30 = vpop.permute.xlu1 %6231  ;;  %v11131_v60 = vld [vmem:[#allocation54_spill] sm:$0xff] }
 0x5f6   : > { %v6371_v11 = vmul.f32 %v6232_v30, %v6101_v2  ;;  %v6240_v56 = vpop.permute.xlu2 %6239  ;;  %v11130_v2 = vld [vmem:[#allocation76_spill] sm:$0xff]  ;;  %v5963_v38 = vadd.f32 %v11131_v60, %v5819_v29 }
 0x5f7   : > { %v6500_v4 = vadd.f32 %v6499_v39, %v6498_v42  ;;  %v6375_v10 = vmul.f32 %v6240_v56, %v6105_v61  ;;  %v6104_v20 = vsub.f32 %v5953_v28, %v11130_v2  ;;  %v6106_v42 = vsub.f32 %v5958_v46, %v11132_v8  ;;  %v11135_v56 = vld [vmem:[#allocation51_spill] sm:$0xff]  ;;  %v11138_v46 = vld [vmem:[#allocation80_spill] sm:$0xff]  ;;  %v10744_v29 = vpop.f32.mrf.mxu3 }
 0x5f8   : > { %v6425_v6 = vmul.f32 %v6371_v11, %v6371_v11  ;;  %v5966_v28 = vadd.f32 %v11136_v1, %v11135_v56  ;;  %v6108_v61 = vsub.f32 %v5963_v38, %v11137_v27  ;;  %v10741_v35 = vpop.f32.mrf.mxu0  ;;  %v6107_v23 = vsub.f32 %v5961_v50, %v11138_v46  ;;  %v11144_v50 = vld [vmem:[#allocation57_spill] sm:$0xff] }
 0x5f9   : > { %v6376_v39 = vmul.f32 %v6242_v34, %v6106_v42  ;;  %v6429_v3 = vmul.f32 %v6375_v10, %v6375_v10 }
 0x5fa   : > { %v6501_v13 = vsel %vm6457_vm0, %v6425_v6, 0.0 }
 0x5fb   : > { %v6502_v37 = vadd.f32 %v6501_v13, %v6500_v4  ;;  %v6430_v17 = vmul.f32 %v6376_v39, %v6376_v39  ;;  %v6509_v13 = vsel %vm6457_vm0, %v6429_v3, 0.0  ;;  %v10750_v38 = vpop.f32.mrf.mxu1 }
 0x5fc   : > { %v6248_v54 = vpop.permute.xlu0 %6247 }
 0x5fd   : > { %v6504_v45 = vadd.f32 %v6503_v41, %v6502_v37  ;;  %v6238_v59 = vpop.permute.xlu1 %6237  ;;  %v11139_v37 = vld [vmem:[#allocation75_spill] sm:$0xff]  ;;  %v6511_v1 = vsel %vm6457_vm0, %v6430_v17, 0.0 }
 0x5fe   : > { %v6374_v30 = vmul.f32 %v6238_v59, %v6104_v20  ;;  %v6246_v48 = vpop.permute.xlu2 %6245  ;;  %v6109_v41 = vsub.f32 %v5966_v28, %v11139_v37  ;;  %v11141_v59 = vld [vmem:[#allocation60_spill] sm:$0xff] }
 0x5ff   : > { %v6506_v11 = vadd.f32 %v6505_v53, %v6504_v45  ;;  %v6378_v2 = vmul.f32 %v6246_v48, %v6108_v61  ;;  %v11140_v45 = vld [vmem:[#allocation55_spill] sm:$0xff] }
 0x600   : > { %v6428_v6 = vmul.f32 %v6374_v30, %v6374_v30  ;;  %v5971_v60 = vadd.f32 %v11141_v59, %v11140_v45  ;;  %v6379_v53 = vmul.f32 %v6248_v54, %v6109_v41  ;;  %v11142_v30 = vld [vmem:[#allocation52_spill] sm:$0xff]  ;;  %v10759_v27 = vpop.f32.mrf.mxu0  ;;  %v10766_v59 = vpop.f32.mrf.mxu3 }
 0x601   : > { %v5968_v5 = vadd.f32 %v11143_v22, %v11142_v30  ;;  %v6432_v48 = vmul.f32 %v6378_v2, %v6378_v2  ;;  %v11150_v22 = vld [vmem:[#allocation59_spill] sm:$0xff] }
 0x602   : > { %v6507_v4 = vsel %vm6457_vm0, %v6428_v6, 0.0  ;;  %v6433_v3 = vmul.f32 %v6379_v53, %v6379_v53 }
 0x603   : > { %v6508_v47 = vadd.f32 %v6507_v4, %v6506_v11  ;;  %v11145_v11 = vld [vmem:[#allocation62_spill] sm:$0xff]  ;;  %v6111_v4 = vsub.f32 %v5971_v60, %v10511_v24  ;;  %v6515_v61 = vsel %vm6457_vm0, %v6432_v48, 0.0 }
 0x604   : > { %v6254_v34 = vpop.permute.xlu0 %6253  ;;  %v5973_v56 = vadd.f32 %v11145_v11, %v11144_v50  ;;  %v6517_v24 = vsel %vm6457_vm0, %v6433_v3, 0.0  ;;  %v11151_v50 = vld [vmem:[#allocation63_spill] sm:$0xff] }
 0x605   : > { %v6510_v10 = vadd.f32 %v6509_v13, %v6508_v47  ;;  %v6244_v20 = vpop.permute.xlu1 %6243  ;;  %v11146_v47 = vld [vmem:[#allocation79_spill] sm:$0xff]  ;;  %v11147_v13 = vld [vmem:[#allocation82_spill] sm:$0xff]  ;;  %v5976_v11 = vadd.f32 %v11151_v50, %v11150_v22 }
 0x606   : > { %v6377_v8 = vmul.f32 %v6244_v20, %v6107_v23  ;;  %v6252_v42 = vpop.permute.xlu2 %6251  ;;  %v6112_v46 = vsub.f32 %v5973_v56, %v11146_v47  ;;  %v6110_v37 = vsub.f32 %v5968_v5, %v11147_v13  ;;  %v11148_v20 = vld [vmem:[#allocation61_spill] sm:$0xff] }
 0x607   : > { %v6512_v39 = vadd.f32 %v6511_v1, %v6510_v10  ;;  %v6381_v23 = vmul.f32 %v6252_v42, %v6111_v4  ;;  %v11149_v10 = vld [vmem:[#allocation64_spill] sm:$0xff]  ;;  %v10771_v42 = vpop.f32.mrf.mxu1 }
 0x608   : > { %v6431_v28 = vmul.f32 %v6377_v8, %v6377_v8  ;;  %v5978_v45 = vadd.f32 %v11149_v10, %v11148_v20  ;;  %v6382_v60 = vmul.f32 %v6254_v34, %v6112_v46  ;;  %v11152_v34 = vld [vmem:[#allocation85_spill] sm:$0xff]  ;;  %v10777_v46 = vpop.f32.mrf.mxu3 }
 0x609   : > { %v6435_v5 = vmul.f32 %v6381_v23, %v6381_v23  ;;  %v6113_v4 = vsub.f32 %v5976_v11, %v11152_v34  ;;  %v11153_v23 = vld [vmem:[#allocation66_spill] sm:$0xff] }
 0x60a   : > { %v6513_v6 = vsel %vm6457_vm0, %v6431_v28, 0.0  ;;  %v6436_v1 = vmul.f32 %v6382_v60, %v6382_v60  ;;  %v6114_v28 = vsub.f32 %v5978_v45, %v10528_v18  ;;  %v11156_v11 = vld [vmem:[#allocation74_spill] sm:$0xff] }
 0x60b   : > { %v6514_v54 = vadd.f32 %v6513_v6, %v6512_v39  ;;  %v6521_v6 = vsel %vm6457_vm0, %v6435_v5, 0.0  ;;  %v11157_v5 = vsub.f32 %v11156_v11, %v10408_v62 }
 0x60c   : > { %v6260_v2 = vpop.permute.xlu0 %6259  ;;  %v6523_v13 = vsel %vm6457_vm0, %v6436_v1, 0.0 }
 0x60d   : > { %v6516_v41 = vadd.f32 %v6515_v61, %v6514_v54  ;;  %v6250_v17 = vpop.permute.xlu1 %6249  ;;  %v5863_v54 = vpop.f32.mrf.mxu0 }
 0x60e   : > { %v6380_v53 = vmul.f32 %v6250_v17, %v6110_v37  ;;  %v6258_v8 = vpop.permute.xlu2 %6257  ;;  %v11154_v37 = vld [vmem:[#allocation65_spill] sm:$0xff] }
 0x60f   : > { %v6518_v30 = vadd.f32 %v6517_v24, %v6516_v41  ;;  %v6384_v3 = vmul.f32 %v6258_v8, %v6114_v28  ;;  %v11155_v41 = vsub.f32 %v11153_v23, %v11154_v37  ;;  %v10783_v24 = vpop.f32.mrf.mxu1 }
 0x610   : > { %v6434_v56 = vmul.f32 %v6380_v53, %v6380_v53 }
 0x611   : > { %v6385_v17 = vmul.f32 %v6260_v2, %v11155_v41  ;;  %v6438_v60 = vmul.f32 %v6384_v3, %v6384_v3  ;;  %v5724_v41 = vpop.f32.mrf.mxu3 }
 0x612   : > { %v6519_v48 = vsel %vm6457_vm0, %v6434_v56, 0.0 }
 0x613   : > { %v6520_v39 = vadd.f32 %v6519_v48, %v6518_v30  ;;  %v6439_v8 = vmul.f32 %v6385_v17, %v6385_v17  ;;  %v6527_v50 = vsel %vm6457_vm0, %v6438_v60, 0.0 }
 0x614   : > { %v6266_v45 = vpop.permute.xlu0 %6265 }
 0x615   : > { %v6522_v61 = vadd.f32 %v6521_v6, %v6520_v39  ;;  %v6256_v47 = vpop.permute.xlu1 %6255  ;;  %v6529_v28 = vsel %vm6457_vm0, %v6439_v8, 0.0  ;;  %v11158_v39 = vld [vmem:[#allocation78_spill] sm:$0xff]  ;;  %v11159_v6 = vld [vmem:[#allocation77_spill] sm:$0xff] }
 0x616   : > { %v6383_v20 = vmul.f32 %v6256_v47, %v6113_v4  ;;  %v6264_v10 = vpop.permute.xlu2 %6263  ;;  %v11160_v34 = vsub.f32 %v11158_v39, %v11159_v6  ;;  %v11161_v4 = vld [vmem:[#allocation68_spill] sm:$0xff] }
 0x617   : > { %v6524_v18 = vadd.f32 %v6523_v13, %v6522_v61  ;;  %v6387_v56 = vmul.f32 %v6264_v10, %v11157_v5  ;;  %v11162_v61 = vld [vmem:[#allocation67_spill] sm:$0xff]  ;;  %v10797_v10 = vpop.f32.mrf.mxu1 }
 0x618   : > { %v6437_v53 = vmul.f32 %v6383_v20, %v6383_v20  ;;  %v6388_v3 = vmul.f32 %v6266_v45, %v11160_v34  ;;  %v11163_v47 = vsub.f32 %v11161_v4, %v11162_v61  ;;  %v5854_v45 = vadd.f32 %v10702_v9, %v10681_v32  ;;  %v11165_v9 = vld [vmem:[#allocation84_spill] sm:$0xff] }
 0x619   : > { %v6441_v17 = vmul.f32 %v6387_v56, %v6387_v56 }
 0x61a   : > { %v6525_v30 = vsel %vm6457_vm0, %v6437_v53, 0.0  ;;  %v6442_v60 = vmul.f32 %v6388_v3, %v6388_v3  ;;  %v5727_v39 = vpop.f32.mrf.mxu3  ;;  %v5864_v3 = vadd.f32 %v5863_v54, %v10766_v59 }
 0x61b   : > { %v6526_v22 = vadd.f32 %v6525_v30, %v6524_v18  ;;  %v5857_v18 = vadd.f32 %v10719_v44, %v10700_v55  ;;  %v5859_v30 = vadd.f32 %v10741_v35, %v10725_v63  ;;  %v11166_v63 = vsub.f32 %v11165_v9, %v10479_v19 }
 0x61c   : > { %v6272_v62 = vpop.permute.xlu0 %6271  ;;  %v6535_v44 = vsel %vm6457_vm0, %v6442_v60, 0.0  ;;  %v6008_v54 = vadd.f32 %v10771_v42, %v5864_v3 }
 0x61d   : > { %v6528_v1 = vadd.f32 %v6527_v50, %v6526_v22  ;;  %v5866_v2 = vpop.f32.mrf.mxu0  ;;  %v6262_v48 = vpop.permute.xlu1 %6261  ;;  %v6533_v22 = vsel %vm6457_vm0, %v6441_v17, 0.0  ;;  %v11164_v50 = vsub.f32 %v10506_v43, %v10504_v16  ;;  %v6001_v55 = vadd.f32 %v10710_v14, %v5857_v18 }
 0x61e   : > { %v6386_v13 = vmul.f32 %v6262_v48, %v11163_v47  ;;  %v6270_v23 = vpop.permute.xlu2 %6269  ;;  %v6391_v32 = vmul.f32 %v6272_v62, %v6121_v25  ;;  %v5998_v48 = vadd.f32 %v10689_v57, %v5854_v45  ;;  %v6003_v43 = vadd.f32 %v10731_v15, %v5859_v30 }
 0x61f   : > { %v6530_v37 = vadd.f32 %v6529_v28, %v6528_v1  ;;  %v6390_v11 = vmul.f32 %v6270_v23, %v11164_v50  ;;  %v6015_v14 = vpop.f32.mrf.mxu1  ;;  %v6123_v36 = vsub.f32 %v6001_v55, %v10600_v49  ;;  %v5862_v57 = vadd.f32 %v10759_v27, %v10744_v29 }
 0x620   : > { %v6440_v20 = vmul.f32 %v6386_v13, %v6386_v13  ;;  %v6445_v4 = vmul.f32 %v6391_v32, %v6391_v32  ;;  %v6122_v61 = vsub.f32 %v5998_v48, %v10549_v31  ;;  %v6124_v47 = vsub.f32 %v6003_v43, %v10522_v7 }
 0x621   : > { %v6444_v6 = vmul.f32 %v6390_v11, %v6390_v11  ;;  %v5867_v62 = vadd.f32 %v5866_v2, %v10777_v46  ;;  %v6006_v18 = vadd.f32 %v10750_v38, %v5862_v57 }
 0x622   : > { %v6531_v53 = vsel %vm6457_vm0, %v6440_v20, 0.0  ;;  %v6541_v17 = vsel %vm6457_vm0, %v6445_v4, 0.0 }
 0x623   : > { %v6532_v8 = vadd.f32 %v6531_v53, %v6530_v37  ;;  %v6539_v15 = vsel %vm6457_vm0, %v6444_v6, 0.0  ;;  %v5729_v53 = vpop.f32.mrf.mxu3  ;;  %v6011_v42 = vadd.f32 %v10783_v24, %v5867_v62  ;;  %v6125_v2 = vsub.f32 %v6006_v18, %v10572_v40 }
 0x624   : > { %v6278_v19 = vpop.permute.xlu0 %6277 }
 0x625   : > { %v6534_v5 = vadd.f32 %v6533_v22, %v6532_v8  ;;  %v5868_v56 = vpop.f32.mrf.mxu0  ;;  %v6268_v1 = vpop.permute.xlu1 %6267  ;;  %v6394_v49 = vmul.f32 %v6278_v19, %v6124_v47  ;;  %v6126_v8 = vsub.f32 %v6008_v54, %v10626_v51  ;;  %v6127_v9 = vsub.f32 %v6011_v42, %v10544_v52 }
 0x626   : > { %v6389_v35 = vmul.f32 %v6268_v1, %v11166_v63  ;;  %v6276_v16 = vpop.permute.xlu2 %6275  ;;  %v5869_v50 = vadd.f32 %v5868_v56, %v5724_v41 }
 0x627   : > { %v6536_v28 = vadd.f32 %v6535_v44, %v6534_v5  ;;  %v6393_v13 = vmul.f32 %v6276_v16, %v6123_v36  ;;  %v6448_v7 = vmul.f32 %v6394_v49, %v6394_v49  ;;  %v6017_v22 = vpop.f32.mrf.mxu1 }
 0x628   : > { %v6443_v34 = vmul.f32 %v6389_v35, %v6389_v35  ;;  %v6013_v24 = vadd.f32 %v10797_v10, %v5869_v50 }
 0x629   : > { %v6447_v29 = vmul.f32 %v6393_v13, %v6393_v13  ;;  %v6547_v55 = vsel %vm6457_vm0, %v6448_v7, 0.0 }
 0x62a   : > { %v6537_v21 = vsel %vm6457_vm0, %v6443_v34, 0.0  ;;  %v6128_v52 = vsub.f32 %v6013_v24, %v10597_v12 }
 0x62b   : > { %v6538_v25 = vadd.f32 %v6537_v21, %v6536_v28  ;;  %v6545_v11 = vsel %vm6457_vm0, %v6447_v29, 0.0 }
 0x62c   : > { %v6284_v51 = vpop.permute.xlu0 %6283 }
 0x62d   : > { %v6540_v23 = vadd.f32 %v6539_v15, %v6538_v25  ;;  %v5871_v37 = vpop.f32.mrf.mxu0  ;;  %v6274_v59 = vpop.permute.xlu1 %6273  ;;  %v6397_v28 = vmul.f32 %v6284_v51, %v6127_v9 }
 0x62e   : > { %v6392_v20 = vmul.f32 %v6274_v59, %v6122_v61  ;;  %v6282_v60 = vpop.permute.xlu2 %6281  ;;  %v5872_v44 = vadd.f32 %v5871_v37, %v5727_v39 }
 0x62f   : > { %v6542_v31 = vadd.f32 %v6541_v17, %v6540_v23  ;;  %v6396_v46 = vmul.f32 %v6282_v60, %v6126_v8  ;;  %v6020_v3 = vpop.f32.mrf.mxu1  ;;  %v6451_v10 = vmul.f32 %v6397_v28, %v6397_v28 }
 0x630   : > { %v6446_v27 = vmul.f32 %v6392_v20, %v6392_v20  ;;  %v6016_v48 = vadd.f32 %v6015_v14, %v5872_v44 }
 0x631   : > { %v6450_v35 = vmul.f32 %v6396_v46, %v6396_v46  ;;  %v6553_v23 = vsel %vm6457_vm0, %v6451_v10, 0.0 }
 0x632   : > { %v6543_v45 = vsel %vm6457_vm0, %v6446_v27, 0.0  ;;  %v6129_v25 = vsub.f32 %v6016_v48, %v10646_v58 }
 0x633   : > { %v6544_v30 = vadd.f32 %v6543_v45, %v6542_v31  ;;  %v6551_v6 = vsel %vm6457_vm0, %v6450_v35, 0.0 }
 0x634   : > { %v5732_v16 = vpop.f32.mrf.mxu3  ;;  %v6290_v13 = vpop.permute.xlu0 %6289 }
 0x635   : > { %v6546_v38 = vadd.f32 %v6545_v11, %v6544_v30  ;;  %v5873_v5 = vpop.f32.mrf.mxu0  ;;  %v6280_v1 = vpop.permute.xlu1 %6279 }
 0x636   : > { %v6395_v32 = vmul.f32 %v6280_v1, %v6125_v2  ;;  %v5874_v41 = vadd.f32 %v5873_v5, %v5729_v53  ;;  %v6288_v39 = vpop.permute.xlu2 %6287 }
 0x637   : > { %v6548_v63 = vadd.f32 %v6547_v55, %v6546_v38  ;;  %v6399_v61 = vmul.f32 %v6288_v39, %v6129_v25  ;;  %v6022_v29 = vpop.f32.mrf.mxu1 }
 0x638   : > { %v6449_v56 = vmul.f32 %v6395_v32, %v6395_v32  ;;  %v6018_v34 = vadd.f32 %v6017_v22, %v5874_v41 }
 0x639   : > { %v6453_v12 = vmul.f32 %v6399_v61, %v6399_v61 }
 0x63a   : > { %v6549_v40 = vsel %vm6457_vm0, %v6449_v56, 0.0  ;;  %v6130_v57 = vsub.f32 %v6018_v34, %v10567_v26 }
 0x63b   : > { %v6550_v43 = vadd.f32 %v6549_v40, %v6548_v63  ;;  %v6557_v26 = vsel %vm6457_vm0, %v6453_v12, 0.0 }
 0x63c   : > { %v6400_v54 = vmul.f32 %v6290_v13, %v6130_v57  ;;  %v5734_v17 = vpop.f32.mrf.mxu3 }
 0x63d   : > { %v6552_v4 = vadd.f32 %v6551_v6, %v6550_v43  ;;  %v6286_v21 = vpop.permute.xlu1 %6285  ;;  %v5876_v36 = vpop.f32.mrf.mxu0 }
 0x63e   : > { %v6398_v19 = vmul.f32 %v6286_v21, %v6128_v52  ;;  %v5877_v14 = vadd.f32 %v5876_v36, %v5732_v16  ;;  %v6454_v27 = vmul.f32 %v6400_v54, %v6400_v54  ;;  %v6294_v45 = vpop.permute.xlu2 %6293 }
 0x63f   : > { %v6554_v59 = vadd.f32 %v6553_v23, %v6552_v4 }
 0x640   : > { %v6452_v15 = vmul.f32 %v6398_v19, %v6398_v19  ;;  %v6021_v47 = vadd.f32 %v6020_v3, %v5877_v14  ;;  %v6559_v42 = vsel %vm6457_vm0, %v6454_v27, 0.0 }
 0x642   : > { %v6555_v37 = vsel %vm6457_vm0, %v6452_v15, 0.0  ;;  %v6131_v49 = vsub.f32 %v6021_v47, %v10623_v0 }
 0x643   : > { %v6556_v20 = vadd.f32 %v6555_v37, %v6554_v59 }
 0x645   : > { %v6292_v58 = vpop.permute.xlu1 %6291  ;;  %v5878_v62 = vpop.f32.mrf.mxu0  ;;  %v6558_v7 = vadd.f32 %v6557_v26, %v6556_v20 }
 0x646   : > { %v6401_v31 = vmul.f32 %v6292_v58, %v6131_v49  ;;  %v5879_v18 = vadd.f32 %v5878_v62, %v5734_v17 }
 0x647   : > { %v6560_v22 = vadd.f32 %v6559_v42, %v6558_v7 }
 0x648   : > { %v6455_v60 = vmul.f32 %v6401_v31, %v6401_v31  ;;  %v6023_v53 = vadd.f32 %v6022_v29, %v5879_v18 }
 0x64a   : > { %v6132_v8 = vsub.f32 %v6023_v53, %v10665_v33  ;;  %v6561_v30 = vsel %vm6457_vm0, %v6455_v60, 0.0 }
 0x64b   : > { %v6562_v11 = vadd.f32 %v6561_v30, %v6560_v22 }
 0x64c   : > { %v6402_v0 = vmul.f32 %v6294_v45, %v6132_v8 }
 0x64e   : > { %v6456_v50 = vmul.f32 %v6402_v0, %v6402_v0 }
 0x650   : > { %v6563_v46 = vsel %vm6457_vm0, %v6456_v50, 0.0 }
 0x651   : > { %v6564_v2 = vadd.f32 %v6563_v46, %v6562_v11 }
 0x653   : > { %6565 = vadd.xlane.f32.xlu0 %v6564_v2 }
 0x6c6   : > { %v6566_v38 = vpop.xlane.xlu0 %6565 }
 0x6c7   : > { %v6567_v5 = vrot.slane %v6566_v38, 4 }
 0x6c9   : > { %v6568_v1 = vadd.f32 %v6567_v5, %v6566_v38 }
 0x6cb   : > { %v6569_v55 = vrot.slane %v6568_v1, 2 }
 0x6cd   : > { %v6570_v44 = vadd.f32 %v6569_v55, %v6568_v1 }
 0x6cf   : > { %v6571_v32 = vrot.slane %v6570_v44, 1 }
 0x6d1   : > { %v6572_v33 = vadd.f32 %v6571_v32, %v6570_v44 }
 0x6d3   : > { %7405 = vpush %v6572_v33 }
 0x704   : > { %s7406_s29 = spop %7405 }
 0x705   : > { %v6574_v9 = vstv %s7406_s29 }
 0x706   : > { %6575 = vst [vmem:[%s371_s28] sm:$0xff] %v6574_v9 }
 0x707 PF: > { %s19_s30 = sadd.s32 1, %s7649_s30  }
 0x708   : > { %p16_p5 = scmp.ge.s32.totalorder %s19_s30, 4  }
 0x70a   :  { %18 = sbr.rel (!%p16_p5) target bundleno = 1 (0x1), region = 92 }

</bundles_post_ra>
